<compile_context>
chip_gen: v7x
topology: tpu7x:2x2x1
jax: 0.10.0
libtpu: 0.0.40
codegen_flags: <defaults>
</compile_context>

<pallas_src>
import functools

import jax
import jax.numpy as jnp
from jax.experimental import pallas as pl
from jax.experimental.pallas import tpu as pltpu


def _round_up(x, m):
    return (x + m - 1) // m * m


# ----------------------------------------------------------------------------
# Pallas kernels
# ----------------------------------------------------------------------------
def _matmul_relu_kernel(a_ref, b_ref, o_ref, *, apply_relu):
    """Single-K-block GEMM: o = [relu](a @ b).  bf16 operands, f32 accumulate."""
    r = jnp.dot(a_ref[...], b_ref[...], preferred_element_type=jnp.float32)
    if apply_relu:
        r = jnp.maximum(r, 0.0)
    o_ref[...] = r.astype(o_ref.dtype)


def _maxpool9_kernel(x_ref, o_ref):
    """x_ref: (9, TL) stacked shifted windows; o_ref: (1, TL) = max over the 9."""
    o_ref[...] = jnp.max(x_ref[...].astype(jnp.float32), axis=0,
                         keepdims=True).astype(o_ref.dtype)


def _fc3_relu_kernel(x_ref, w1_ref, w2_ref, w3_ref, o_ref):
    """Fused relu(l1) -> relu(l2) -> l3, all operands resident in VMEM."""
    h = jnp.dot(x_ref[...], w1_ref[...], preferred_element_type=jnp.float32)
    h = jnp.maximum(h, 0.0).astype(jnp.bfloat16)
    h = jnp.dot(h, w2_ref[...], preferred_element_type=jnp.float32)
    h = jnp.maximum(h, 0.0).astype(jnp.bfloat16)
    o_ref[...] = jnp.dot(h, w3_ref[...], preferred_element_type=jnp.float32)


# ----------------------------------------------------------------------------
# Wrappers
# ----------------------------------------------------------------------------
def matmul_lane_dense_pallas(a, b, *, relu, out_dtype=jnp.bfloat16):
    """a: (M, K) bf16 (small M = OC, resident); b: (K, Np) bf16 (lane-dense Np).

    K is one resident block (already a multiple of 128); the grid runs only over
    Np tiles, so the weight `a` is DMA'd once and stays in VMEM.
    """
    M, K = a.shape
    K2, Np = b.shape
    assert K == K2 and K % 128 == 0 and M % 8 == 0

    if _round_up(Np, 128) <= 2048:
        tn = _round_up(Np, 128)          # one lane-dense tile
    else:
        tn = 512
    Np_pad = _round_up(Np, tn)
    if Np_pad != Np:
        b = jnp.pad(b, ((0, 0), (0, Np_pad - Np)))

    out = pl.pallas_call(
        functools.partial(_matmul_relu_kernel, apply_relu=relu),
        out_shape=jax.ShapeDtypeStruct((M, Np_pad), out_dtype),
        grid_spec=pltpu.PrefetchScalarGridSpec(
            num_scalar_prefetch=0,
            grid=(Np_pad // tn,),
            in_specs=[
                pl.BlockSpec((M, K), lambda j: (0, 0)),    # weights: resident
                pl.BlockSpec((K, tn), lambda j: (0, j)),   # patches: streamed
            ],
            out_specs=pl.BlockSpec((M, tn), lambda j: (0, j)),
        ),
        compiler_params=pltpu.CompilerParams(
            dimension_semantics=("parallel",)),
    )(a, b)
    if Np_pad != Np:
        out = out[:, :Np]
    return out


def _im2col_T(x, kh, kw, stride):
    """x: (C, N, H, W) -> patches^T (C*kh*kw, N*OH*OW), rows ordered (c, i, j)."""
    C, N, H, W = x.shape
    OH = (H - kh) // stride + 1
    OW = (W - kw) // stride + 1
    cols = [x[:, :, i:i + stride * OH:stride, j:j + stride * OW:stride]
            for i in range(kh) for j in range(kw)]
    p = jnp.stack(cols, axis=1)                       # (C, kh*kw, N, OH, OW)
    return p.reshape(C * kh * kw, N * OH * OW), OH, OW


def conv2d_relu_pallas(x, w_mat, kh, kw, stride=1):
    """VALID conv, no bias, fused ReLU, transposed-GEMM formulation.

    x: (C, N, H, W) bf16; w_mat: (OC, Kp) bf16, Kp = round_up(C*kh*kw, 128).
    Returns (OC, N, OH, OW) bf16.
    """
    # TODO(synk): fuse patch extraction into the Pallas pipeline (read an input
    # slab per grid step) instead of materializing patches^T in HBM.
    C, N, H, W = x.shape
    OC, Kp = w_mat.shape
    patches, OH, OW = _im2col_T(x, kh, kw, stride)
    K = patches.shape[0]
    if Kp != K:
        patches = jnp.pad(patches, ((0, Kp - K), (0, 0)))
    out_t = matmul_lane_dense_pallas(w_mat, patches, relu=True)  # (OC, N*OH*OW)
    return out_t.reshape(OC, N, OH, OW)


def maxpool3x3s2_pallas(x):
    """nn.MaxPool2d(kernel_size=3, stride=2) on a channel-major (C, N, H, W) tensor."""
    C, N, H, W = x.shape
    k, s = 3, 2
    OH = (H - k) // s + 1
    OW = (W - k) // s + 1
    wins = [x[:, :, i:i + s * OH:s, j:j + s * OW:s]
            for i in range(k) for j in range(k)]
    L = C * N * OH * OW
    stacked = jnp.stack(wins, axis=0).reshape(k * k, L)
    tl = 1024 if L >= 2048 else _round_up(L, 128)
    Lp = _round_up(L, tl)
    if Lp != L:
        stacked = jnp.pad(stacked, ((0, 0), (0, Lp - L)))
    out = pl.pallas_call(
        _maxpool9_kernel,
        out_shape=jax.ShapeDtypeStruct((1, Lp), x.dtype),
        grid_spec=pltpu.PrefetchScalarGridSpec(
            num_scalar_prefetch=0,
            grid=(Lp // tl,),
            in_specs=[pl.BlockSpec((k * k, tl), lambda i: (0, i))],
            out_specs=pl.BlockSpec((1, tl), lambda i: (0, i)),
        ),
        compiler_params=pltpu.CompilerParams(
            dimension_semantics=("parallel",)),
    )(stacked)
    return out[0, :L].reshape(C, N, OH, OW)


def fc3_pallas(x, w1t, w2t, w3t):
    """Fused relu(l1) -> relu(l2) -> l3.  x: (B, K) bf16; w*t: (in, out) bf16."""
    B = x.shape[0]
    return pl.pallas_call(
        _fc3_relu_kernel,
        out_shape=jax.ShapeDtypeStruct((B, w3t.shape[1]), jnp.float32),
        in_specs=[pl.BlockSpec(memory_space=pltpu.MemorySpace.VMEM)] * 4,
        out_specs=pl.BlockSpec(memory_space=pltpu.MemorySpace.VMEM),
    )(x, w1t, w2t, w3t)


# ----------------------------------------------------------------------------
# Parameter prep (done once): bf16, pre-packed / pre-padded weights
# ----------------------------------------------------------------------------
def prepare_params(p):
    prep = {}
    for name in ("c1", "c2", "c3", "c4", "c5"):
        w = p[name]
        OC, C, KH, KW = w.shape
        K = C * KH * KW
        Kp = _round_up(K, 128)
        wm = w.reshape(OC, K).astype(jnp.bfloat16)
        if Kp != K:
            wm = jnp.pad(wm, ((0, 0), (0, Kp - K)))
        prep[name] = (wm, KH, KW)
    for name in ("l1", "l2", "l3"):
        prep[name] = p[name].T.astype(jnp.bfloat16)   # (in, out)
    return prep


# ----------------------------------------------------------------------------
# AlexNet forward (Pallas)
# ----------------------------------------------------------------------------
def alexnet_forward(x, p):
    """x: (N, C, H, W) float32; p: raw params (PyTorch layout). Returns (N, 10) f32."""
    prm = prepare_params(p)
    # Activations stay channel-major (C, N, H, W) bf16 between layers.
    h = x.transpose(1, 0, 2, 3).astype(jnp.bfloat16)
    h = conv2d_relu_pallas(h, *prm["c1"])          # relu(c1(x))
    h = maxpool3x3s2_pallas(h)                     # mp1
    h = conv2d_relu_pallas(h, *prm["c2"])          # relu(c2(.))
    h = maxpool3x3s2_pallas(h)                     # mp2
    h = conv2d_relu_pallas(h, *prm["c3"])          # relu(c3(.))
    h = conv2d_relu_pallas(h, *prm["c4"])          # relu(c4(.))
    h = conv2d_relu_pallas(h, *prm["c5"])          # relu(c5(.))
    h = maxpool3x3s2_pallas(h)                     # mp3
    n = h.shape[1]
    resized = h.transpose(1, 0, 2, 3).reshape(n, -1)     # == .view(N, -1) order
    return fc3_pallas(resized, prm["l1"], prm["l2"], prm["l3"])  # relu(l1), relu(l2), l3


# ----------------------------------------------------------------------------
# Pure-JAX reference (bf16 matmul inputs, f32 accumulate — matches kernel math)
# ----------------------------------------------------------------------------
def reference_forward(x, p):
    dn = ("NCHW", "OIHW", "NCHW")

    def conv(h, w):
        out = jax.lax.conv_general_dilated(
            h.astype(jnp.bfloat16), w.astype(jnp.bfloat16), (1, 1), "VALID",
            dimension_numbers=dn, preferred_element_type=jnp.float32)
        return jnp.maximum(out, 0.0)

    def pool(h):
        return jax.lax.reduce_window(h, -jnp.inf, jax.lax.max,
                                     (1, 1, 3, 3), (1, 1, 2, 2), "VALID")

    def fc(a, w):
        return jnp.dot(a.astype(jnp.bfloat16), w.T.astype(jnp.bfloat16),
                       preferred_element_type=jnp.float32)

    h = pool(conv(x, p["c1"]))
    h = pool(conv(h, p["c2"]))
    h = conv(h, p["c3"])
    h = conv(h, p["c4"])
    h = conv(h, p["c5"])
    h = pool(h)
    r = h.reshape(h.shape[0], -1)
    h6 = jnp.maximum(fc(r, p["l1"]), 0.0)
    h7 = jnp.maximum(fc(h6, p["l2"]), 0.0)
    return fc(h7, p["l3"])


# ----------------------------------------------------------------------------
# Deterministic parameter init (scaled-down AlexNet; no bias anywhere)
# ----------------------------------------------------------------------------
def init_params(key):
    ks = jax.random.split(key, 8)
    s = 0.05
    return {
        "c1": s * jax.random.normal(ks[0], (16, 3, 11, 11), jnp.float32),
        "c2": s * jax.random.normal(ks[1], (32, 16, 5, 5), jnp.float32),
        "c3": s * jax.random.normal(ks[2], (48, 32, 3, 3), jnp.float32),
        "c4": s * jax.random.normal(ks[3], (32, 48, 3, 3), jnp.float32),
        "c5": s * jax.random.normal(ks[4], (32, 32, 3, 3), jnp.float32),
        "l1": s * jax.random.normal(ks[5], (128, 32 * 2 * 2), jnp.float32),
        "l2": s * jax.random.normal(ks[6], (128, 128), jnp.float32),
        "l3": s * jax.random.normal(ks[7], (10, 128), jnp.float32),
    }


if __name__ == "__main__":
    key = jax.random.PRNGKey(0)
    k_x, k_p = jax.random.split(key)
    # Input: batch=2, channels=3, spatial 67x67 (smallest size giving a clean
    # 2x2 feature map after mp3, analogous to the 21x21 / 256*441 original).
    x = jax.random.normal(k_x, (2, 3, 67, 67), jnp.float32)
    params = init_params(k_p)

    fwd = jax.jit(alexnet_forward)
    y = jax.block_until_ready(fwd(x, params))
    assert y.shape == (2, 10), y.shape

    y_ref = jax.block_until_ready(reference_forward(x, params))
    assert bool(jnp.allclose(y, y_ref, rtol=2e-2, atol=2e-2)), (
        "Pallas output does not match JAX reference")

    print("KERNEL_OK")
</pallas_src>

<mosaic_0001>
module attributes {stable_mosaic.version = 11 : i64} {
  func.func @_matmul_relu_kernel(%arg0: i32, %arg1: memref<16x384xbf16, #tpu.memory_space<vmem>>, %arg2: memref<384x512xbf16, #tpu.memory_space<vmem>>, %arg3: memref<16x512xbf16, #tpu.memory_space<vmem>>) attributes {dimension_semantics = [#tpu.dimension_semantics<parallel>], iteration_bounds = array<i64: 13>, scalar_prefetch = 0 : i64, scratch_operands = 0 : i64, tpu.core_type = #tpu.core_type<tc>, window_params = [{pipeline_mode = #tpu.pipeline_mode<synchronous>, transform_indices = @transform_0, window_bounds = array<i64: 16, 384>}, {transform_indices = @transform_1, window_bounds = array<i64: 384, 512>}, {transform_indices = @transform_2, window_bounds = array<i64: 16, 512>}]} {
    %c0 = arith.constant 0 : index
    %c0_0 = arith.constant 0 : index
    %0 = vector.load %arg1[%c0, %c0_0] : memref<16x384xbf16, #tpu.memory_space<vmem>>, vector<16x384xbf16>
    %c0_1 = arith.constant 0 : index
    %c0_2 = arith.constant 0 : index
    %1 = vector.load %arg2[%c0_1, %c0_2] : memref<384x512xbf16, #tpu.memory_space<vmem>>, vector<384x512xbf16>
    %cst = arith.constant dense<0.000000e+00> : vector<16x512xf32>
    %2 = tpu.matmul %0, %1, %cst {dimension_numbers = #tpu.dot_dimension_numbers<[1], [0], [0], [1], [0, 0, 1, 1], [], []>} : vector<16x384xbf16>, vector<384x512xbf16>, vector<16x512xf32> -> vector<16x512xf32>
    %cst_3 = arith.constant 0.000000e+00 : f32
    %3 = vector.broadcast %cst_3 : f32 to vector<16x512xf32>
    %4 = arith.maximumf %2, %3 : vector<16x512xf32>
    %5 = arith.truncf %4 : vector<16x512xf32> to vector<16x512xbf16>
    %c0_4 = arith.constant 0 : index
    %c0_5 = arith.constant 0 : index
    %6 = vector.load %arg3[%c0_4, %c0_5] : memref<16x512xbf16, #tpu.memory_space<vmem>>, vector<16x512xbf16>
    tpu.vector_store %arg3[%c0_4, %c0_5], %5 {strides = array<i32>} : memref<16x512xbf16, #tpu.memory_space<vmem>>, vector<16x512xbf16>,
    return
  }
  func.func @transform_0(%arg0: i32) -> (i32, i32) {
    %c0_i32 = arith.constant 0 : i32
    %c0_i32_0 = arith.constant 0 : i32
    %c0_i32_1 = arith.constant 0 : i32
    return %c0_i32, %c0_i32_0 : i32, i32
  }
  func.func @transform_1(%arg0: i32) -> (i32, i32) {
    %c0_i32 = arith.constant 0 : i32
    %c0_i32_0 = arith.constant 0 : i32
    return %c0_i32, %arg0 : i32, i32
  }
  func.func @transform_2(%arg0: i32) -> (i32, i32) {
    %c0_i32 = arith.constant 0 : i32
    %c0_i32_0 = arith.constant 0 : i32
    return %c0_i32, %arg0 : i32, i32
  }
}

module attributes {stable_mosaic.version = 11 : i64} {
  func.func @_maxpool9_kernel(%arg0: i32, %arg1: memref<9x1024xbf16, #tpu.memory_space<vmem>>, %arg2: memref<1x1024xbf16, #tpu.memory_space<vmem>>) attributes {dimension_semantics = [#tpu.dimension_semantics<parallel>], iteration_bounds = array<i64: 25>, scalar_prefetch = 0 : i64, scratch_operands = 0 : i64, tpu.core_type = #tpu.core_type<tc>, window_params = [{transform_indices = @transform_0, window_bounds = array<i64: 9, 1024>}, {transform_indices = @transform_1, window_bounds = array<i64: 1, 1024>}]} {
    %c0 = arith.constant 0 : index
    %c0_0 = arith.constant 0 : index
    %0 = vector.load %arg1[%c0, %c0_0] : memref<9x1024xbf16, #tpu.memory_space<vmem>>, vector<9x1024xbf16>
    %1 = arith.extf %0 : vector<9x1024xbf16> to vector<9x1024xf32>
    %cst = arith.constant dense<0xFF800000> : vector<1024xf32>
    %2 = vector.multi_reduction <maximumf>, %1, %cst [0] : vector<9x1024xf32> to vector<1024xf32>
    %3 = vector.shape_cast %2 : vector<1024xf32> to vector<1x1024xf32>
    %4 = arith.truncf %3 : vector<1x1024xf32> to vector<1x1024xbf16>
    %c0_1 = arith.constant 0 : index
    %c0_2 = arith.constant 0 : index
    %5 = vector.load %arg2[%c0_1, %c0_2] : memref<1x1024xbf16, #tpu.memory_space<vmem>>, vector<1x1024xbf16>
    tpu.vector_store %arg2[%c0_1, %c0_2], %4 {strides = array<i32>} : memref<1x1024xbf16, #tpu.memory_space<vmem>>, vector<1x1024xbf16>,
    return
  }
  func.func @transform_0(%arg0: i32) -> (i32, i32) {
    %c0_i32 = arith.constant 0 : i32
    %c0_i32_0 = arith.constant 0 : i32
    return %c0_i32, %arg0 : i32, i32
  }
  func.func @transform_1(%arg0: i32) -> (i32, i32) {
    %c0_i32 = arith.constant 0 : i32
    %c0_i32_0 = arith.constant 0 : i32
    return %c0_i32, %arg0 : i32, i32
  }
}

module attributes {stable_mosaic.version = 11 : i64} {
  func.func @_matmul_relu_kernel(%arg0: i32, %arg1: memref<32x512xbf16, #tpu.memory_space<vmem>>, %arg2: memref<512x1152xbf16, #tpu.memory_space<vmem>>, %arg3: memref<32x1152xbf16, #tpu.memory_space<vmem>>) attributes {dimension_semantics = [#tpu.dimension_semantics<parallel>], iteration_bounds = array<i64: 1>, scalar_prefetch = 0 : i64, scratch_operands = 0 : i64, tpu.core_type = #tpu.core_type<tc>, window_params = [{pipeline_mode = #tpu.pipeline_mode<synchronous>, transform_indices = @transform_0, window_bounds = array<i64: 32, 512>}, {transform_indices = @transform_1, window_bounds = array<i64: 512, 1152>}, {transform_indices = @transform_2, window_bounds = array<i64: 32, 1152>}]} {
    %c0 = arith.constant 0 : index
    %c0_0 = arith.constant 0 : index
    %0 = vector.load %arg1[%c0, %c0_0] : memref<32x512xbf16, #tpu.memory_space<vmem>>, vector<32x512xbf16>
    %c0_1 = arith.constant 0 : index
    %c0_2 = arith.constant 0 : index
    %1 = vector.load %arg2[%c0_1, %c0_2] : memref<512x1152xbf16, #tpu.memory_space<vmem>>, vector<512x1152xbf16>
    %cst = arith.constant dense<0.000000e+00> : vector<32x1152xf32>
    %2 = tpu.matmul %0, %1, %cst {dimension_numbers = #tpu.dot_dimension_numbers<[1], [0], [0], [1], [0, 0, 1, 1], [], []>} : vector<32x512xbf16>, vector<512x1152xbf16>, vector<32x1152xf32> -> vector<32x1152xf32>
    %cst_3 = arith.constant 0.000000e+00 : f32
    %3 = vector.broadcast %cst_3 : f32 to vector<32x1152xf32>
    %4 = arith.maximumf %2, %3 : vector<32x1152xf32>
    %5 = arith.truncf %4 : vector<32x1152xf32> to vector<32x1152xbf16>
    %c0_4 = arith.constant 0 : index
    %c0_5 = arith.constant 0 : index
    %6 = vector.load %arg3[%c0_4, %c0_5] : memref<32x1152xbf16, #tpu.memory_space<vmem>>, vector<32x1152xbf16>
    tpu.vector_store %arg3[%c0_4, %c0_5], %5 {strides = array<i32>} : memref<32x1152xbf16, #tpu.memory_space<vmem>>, vector<32x1152xbf16>,
    return
  }
  func.func @transform_0(%arg0: i32) -> (i32, i32) {
    %c0_i32 = arith.constant 0 : i32
    %c0_i32_0 = arith.constant 0 : i32
    %c0_i32_1 = arith.constant 0 : i32
    return %c0_i32, %c0_i32_0 : i32, i32
  }
  func.func @transform_1(%arg0: i32) -> (i32, i32) {
    %c0_i32 = arith.constant 0 : i32
    %c0_i32_0 = arith.constant 0 : i32
    return %c0_i32, %arg0 : i32, i32
  }
  func.func @transform_2(%arg0: i32) -> (i32, i32) {
    %c0_i32 = arith.constant 0 : i32
    %c0_i32_0 = arith.constant 0 : i32
    return %c0_i32, %arg0 : i32, i32
  }
}

module attributes {stable_mosaic.version = 11 : i64} {
  func.func @_maxpool9_kernel(%arg0: i32, %arg1: memref<9x1024xbf16, #tpu.memory_space<vmem>>, %arg2: memref<1x1024xbf16, #tpu.memory_space<vmem>>) attributes {dimension_semantics = [#tpu.dimension_semantics<parallel>], iteration_bounds = array<i64: 8>, scalar_prefetch = 0 : i64, scratch_operands = 0 : i64, tpu.core_type = #tpu.core_type<tc>, window_params = [{transform_indices = @transform_0, window_bounds = array<i64: 9, 1024>}, {transform_indices = @transform_1, window_bounds = array<i64: 1, 1024>}]} {
    %c0 = arith.constant 0 : index
    %c0_0 = arith.constant 0 : index
    %0 = vector.load %arg1[%c0, %c0_0] : memref<9x1024xbf16, #tpu.memory_space<vmem>>, vector<9x1024xbf16>
    %1 = arith.extf %0 : vector<9x1024xbf16> to vector<9x1024xf32>
    %cst = arith.constant dense<0xFF800000> : vector<1024xf32>
    %2 = vector.multi_reduction <maximumf>, %1, %cst [0] : vector<9x1024xf32> to vector<1024xf32>
    %3 = vector.shape_cast %2 : vector<1024xf32> to vector<1x1024xf32>
    %4 = arith.truncf %3 : vector<1x1024xf32> to vector<1x1024xbf16>
    %c0_1 = arith.constant 0 : index
    %c0_2 = arith.constant 0 : index
    %5 = vector.load %arg2[%c0_1, %c0_2] : memref<1x1024xbf16, #tpu.memory_space<vmem>>, vector<1x1024xbf16>
    tpu.vector_store %arg2[%c0_1, %c0_2], %4 {strides = array<i32>} : memref<1x1024xbf16, #tpu.memory_space<vmem>>, vector<1x1024xbf16>,
    return
  }
  func.func @transform_0(%arg0: i32) -> (i32, i32) {
    %c0_i32 = arith.constant 0 : i32
    %c0_i32_0 = arith.constant 0 : i32
    return %c0_i32, %arg0 : i32, i32
  }
  func.func @transform_1(%arg0: i32) -> (i32, i32) {
    %c0_i32 = arith.constant 0 : i32
    %c0_i32_0 = arith.constant 0 : i32
    return %c0_i32, %arg0 : i32, i32
  }
}

module attributes {stable_mosaic.version = 11 : i64} {
  func.func @_matmul_relu_kernel(%arg0: i32, %arg1: memref<48x384xbf16, #tpu.memory_space<vmem>>, %arg2: memref<384x256xbf16, #tpu.memory_space<vmem>>, %arg3: memref<48x256xbf16, #tpu.memory_space<vmem>>) attributes {dimension_semantics = [#tpu.dimension_semantics<parallel>], iteration_bounds = array<i64: 1>, scalar_prefetch = 0 : i64, scratch_operands = 0 : i64, tpu.core_type = #tpu.core_type<tc>, window_params = [{pipeline_mode = #tpu.pipeline_mode<synchronous>, transform_indices = @transform_0, window_bounds = array<i64: 48, 384>}, {transform_indices = @transform_1, window_bounds = array<i64: 384, 256>}, {transform_indices = @transform_2, window_bounds = array<i64: 48, 256>}]} {
    %c0 = arith.constant 0 : index
    %c0_0 = arith.constant 0 : index
    %0 = vector.load %arg1[%c0, %c0_0] : memref<48x384xbf16, #tpu.memory_space<vmem>>, vector<48x384xbf16>
    %c0_1 = arith.constant 0 : index
    %c0_2 = arith.constant 0 : index
    %1 = vector.load %arg2[%c0_1, %c0_2] : memref<384x256xbf16, #tpu.memory_space<vmem>>, vector<384x256xbf16>
    %cst = arith.constant dense<0.000000e+00> : vector<48x256xf32>
    %2 = tpu.matmul %0, %1, %cst {dimension_numbers = #tpu.dot_dimension_numbers<[1], [0], [0], [1], [0, 0, 1, 1], [], []>} : vector<48x384xbf16>, vector<384x256xbf16>, vector<48x256xf32> -> vector<48x256xf32>
    %cst_3 = arith.constant 0.000000e+00 : f32
    %3 = vector.broadcast %cst_3 : f32 to vector<48x256xf32>
    %4 = arith.maximumf %2, %3 : vector<48x256xf32>
    %5 = arith.truncf %4 : vector<48x256xf32> to vector<48x256xbf16>
    %c0_4 = arith.constant 0 : index
    %c0_5 = arith.constant 0 : index
    %6 = vector.load %arg3[%c0_4, %c0_5] : memref<48x256xbf16, #tpu.memory_space<vmem>>, vector<48x256xbf16>
    tpu.vector_store %arg3[%c0_4, %c0_5], %5 {strides = array<i32>} : memref<48x256xbf16, #tpu.memory_space<vmem>>, vector<48x256xbf16>,
    return
  }
  func.func @transform_0(%arg0: i32) -> (i32, i32) {
    %c0_i32 = arith.constant 0 : i32
    %c0_i32_0 = arith.constant 0 : i32
    %c0_i32_1 = arith.constant 0 : i32
    return %c0_i32, %c0_i32_0 : i32, i32
  }
  func.func @transform_1(%arg0: i32) -> (i32, i32) {
    %c0_i32 = arith.constant 0 : i32
    %c0_i32_0 = arith.constant 0 : i32
    return %c0_i32, %arg0 : i32, i32
  }
  func.func @transform_2(%arg0: i32) -> (i32, i32) {
    %c0_i32 = arith.constant 0 : i32
    %c0_i32_0 = arith.constant 0 : i32
    return %c0_i32, %arg0 : i32, i32
  }
}

module attributes {stable_mosaic.version = 11 : i64} {
  func.func @_matmul_relu_kernel(%arg0: i32, %arg1: memref<32x512xbf16, #tpu.memory_space<vmem>>, %arg2: memref<512x128xbf16, #tpu.memory_space<vmem>>, %arg3: memref<32x128xbf16, #tpu.memory_space<vmem>>) attributes {dimension_semantics = [#tpu.dimension_semantics<parallel>], iteration_bounds = array<i64: 1>, scalar_prefetch = 0 : i64, scratch_operands = 0 : i64, tpu.core_type = #tpu.core_type<tc>, window_params = [{pipeline_mode = #tpu.pipeline_mode<synchronous>, transform_indices = @transform_0, window_bounds = array<i64: 32, 512>}, {transform_indices = @transform_1, window_bounds = array<i64: 512, 128>}, {transform_indices = @transform_2, window_bounds = array<i64: 32, 128>}]} {
    %c0 = arith.constant 0 : index
    %c0_0 = arith.constant 0 : index
    %0 = vector.load %arg1[%c0, %c0_0] : memref<32x512xbf16, #tpu.memory_space<vmem>>, vector<32x512xbf16>
    %c0_1 = arith.constant 0 : index
    %c0_2 = arith.constant 0 : index
    %1 = vector.load %arg2[%c0_1, %c0_2] : memref<512x128xbf16, #tpu.memory_space<vmem>>, vector<512x128xbf16>
    %cst = arith.constant dense<0.000000e+00> : vector<32x128xf32>
    %2 = tpu.matmul %0, %1, %cst {dimension_numbers = #tpu.dot_dimension_numbers<[1], [0], [0], [1], [0, 0, 1, 1], [], []>} : vector<32x512xbf16>, vector<512x128xbf16>, vector<32x128xf32> -> vector<32x128xf32>
    %cst_3 = arith.constant 0.000000e+00 : f32
    %3 = vector.broadcast %cst_3 : f32 to vector<32x128xf32>
    %4 = arith.maximumf %2, %3 : vector<32x128xf32>
    %5 = arith.truncf %4 : vector<32x128xf32> to vector<32x128xbf16>
    %c0_4 = arith.constant 0 : index
    %c0_5 = arith.constant 0 : index
    %6 = vector.load %arg3[%c0_4, %c0_5] : memref<32x128xbf16, #tpu.memory_space<vmem>>, vector<32x128xbf16>
    tpu.vector_store %arg3[%c0_4, %c0_5], %5 {strides = array<i32>} : memref<32x128xbf16, #tpu.memory_space<vmem>>, vector<32x128xbf16>,
    return
  }
  func.func @transform_0(%arg0: i32) -> (i32, i32) {
    %c0_i32 = arith.constant 0 : i32
    %c0_i32_0 = arith.constant 0 : i32
    %c0_i32_1 = arith.constant 0 : i32
    return %c0_i32, %c0_i32_0 : i32, i32
  }
  func.func @transform_1(%arg0: i32) -> (i32, i32) {
    %c0_i32 = arith.constant 0 : i32
    %c0_i32_0 = arith.constant 0 : i32
    return %c0_i32, %arg0 : i32, i32
  }
  func.func @transform_2(%arg0: i32) -> (i32, i32) {
    %c0_i32 = arith.constant 0 : i32
    %c0_i32_0 = arith.constant 0 : i32
    return %c0_i32, %arg0 : i32, i32
  }
}

module attributes {stable_mosaic.version = 11 : i64} {
  func.func @_matmul_relu_kernel(%arg0: i32, %arg1: memref<32x384xbf16, #tpu.memory_space<vmem>>, %arg2: memref<384x128xbf16, #tpu.memory_space<vmem>>, %arg3: memref<32x128xbf16, #tpu.memory_space<vmem>>) attributes {dimension_semantics = [#tpu.dimension_semantics<parallel>], iteration_bounds = array<i64: 1>, scalar_prefetch = 0 : i64, scratch_operands = 0 : i64, tpu.core_type = #tpu.core_type<tc>, window_params = [{pipeline_mode = #tpu.pipeline_mode<synchronous>, transform_indices = @transform_0, window_bounds = array<i64: 32, 384>}, {transform_indices = @transform_1, window_bounds = array<i64: 384, 128>}, {transform_indices = @transform_2, window_bounds = array<i64: 32, 128>}]} {
    %c0 = arith.constant 0 : index
    %c0_0 = arith.constant 0 : index
    %0 = vector.load %arg1[%c0, %c0_0] : memref<32x384xbf16, #tpu.memory_space<vmem>>, vector<32x384xbf16>
    %c0_1 = arith.constant 0 : index
    %c0_2 = arith.constant 0 : index
    %1 = vector.load %arg2[%c0_1, %c0_2] : memref<384x128xbf16, #tpu.memory_space<vmem>>, vector<384x128xbf16>
    %cst = arith.constant dense<0.000000e+00> : vector<32x128xf32>
    %2 = tpu.matmul %0, %1, %cst {dimension_numbers = #tpu.dot_dimension_numbers<[1], [0], [0], [1], [0, 0, 1, 1], [], []>} : vector<32x384xbf16>, vector<384x128xbf16>, vector<32x128xf32> -> vector<32x128xf32>
    %cst_3 = arith.constant 0.000000e+00 : f32
    %3 = vector.broadcast %cst_3 : f32 to vector<32x128xf32>
    %4 = arith.maximumf %2, %3 : vector<32x128xf32>
    %5 = arith.truncf %4 : vector<32x128xf32> to vector<32x128xbf16>
    %c0_4 = arith.constant 0 : index
    %c0_5 = arith.constant 0 : index
    %6 = vector.load %arg3[%c0_4, %c0_5] : memref<32x128xbf16, #tpu.memory_space<vmem>>, vector<32x128xbf16>
    tpu.vector_store %arg3[%c0_4, %c0_5], %5 {strides = array<i32>} : memref<32x128xbf16, #tpu.memory_space<vmem>>, vector<32x128xbf16>,
    return
  }
  func.func @transform_0(%arg0: i32) -> (i32, i32) {
    %c0_i32 = arith.constant 0 : i32
    %c0_i32_0 = arith.constant 0 : i32
    %c0_i32_1 = arith.constant 0 : i32
    return %c0_i32, %c0_i32_0 : i32, i32
  }
  func.func @transform_1(%arg0: i32) -> (i32, i32) {
    %c0_i32 = arith.constant 0 : i32
    %c0_i32_0 = arith.constant 0 : i32
    return %c0_i32, %arg0 : i32, i32
  }
  func.func @transform_2(%arg0: i32) -> (i32, i32) {
    %c0_i32 = arith.constant 0 : i32
    %c0_i32_0 = arith.constant 0 : i32
    return %c0_i32, %arg0 : i32, i32
  }
}

module attributes {stable_mosaic.version = 11 : i64} {
  func.func @_maxpool9_kernel(%arg0: i32, %arg1: memref<9x256xbf16, #tpu.memory_space<vmem>>, %arg2: memref<1x256xbf16, #tpu.memory_space<vmem>>) attributes {dimension_semantics = [#tpu.dimension_semantics<parallel>], iteration_bounds = array<i64: 1>, scalar_prefetch = 0 : i64, scratch_operands = 0 : i64, tpu.core_type = #tpu.core_type<tc>, window_params = [{transform_indices = @transform_0, window_bounds = array<i64: 9, 256>}, {transform_indices = @transform_1, window_bounds = array<i64: 1, 256>}]} {
    %c0 = arith.constant 0 : index
    %c0_0 = arith.constant 0 : index
    %0 = vector.load %arg1[%c0, %c0_0] : memref<9x256xbf16, #tpu.memory_space<vmem>>, vector<9x256xbf16>
    %1 = arith.extf %0 : vector<9x256xbf16> to vector<9x256xf32>
    %cst = arith.constant dense<0xFF800000> : vector<256xf32>
    %2 = vector.multi_reduction <maximumf>, %1, %cst [0] : vector<9x256xf32> to vector<256xf32>
    %3 = vector.shape_cast %2 : vector<256xf32> to vector<1x256xf32>
    %4 = arith.truncf %3 : vector<1x256xf32> to vector<1x256xbf16>
    %c0_1 = arith.constant 0 : index
    %c0_2 = arith.constant 0 : index
    %5 = vector.load %arg2[%c0_1, %c0_2] : memref<1x256xbf16, #tpu.memory_space<vmem>>, vector<1x256xbf16>
    tpu.vector_store %arg2[%c0_1, %c0_2], %4 {strides = array<i32>} : memref<1x256xbf16, #tpu.memory_space<vmem>>, vector<1x256xbf16>,
    return
  }
  func.func @transform_0(%arg0: i32) -> (i32, i32) {
    %c0_i32 = arith.constant 0 : i32
    %c0_i32_0 = arith.constant 0 : i32
    return %c0_i32, %arg0 : i32, i32
  }
  func.func @transform_1(%arg0: i32) -> (i32, i32) {
    %c0_i32 = arith.constant 0 : i32
    %c0_i32_0 = arith.constant 0 : i32
    return %c0_i32, %arg0 : i32, i32
  }
}

module attributes {stable_mosaic.version = 11 : i64} {
  func.func @_fc3_relu_kernel(%arg0: memref<2x128xbf16, #tpu.memory_space<vmem>>, %arg1: memref<128x128xbf16, #tpu.memory_space<vmem>>, %arg2: memref<128x128xbf16, #tpu.memory_space<vmem>>, %arg3: memref<128x10xbf16, #tpu.memory_space<vmem>>, %arg4: memref<2x10xf32, #tpu.memory_space<vmem>>) attributes {dimension_semantics = [], scalar_prefetch = 0 : i64, scratch_operands = 0 : i64, tpu.core_type = #tpu.core_type<tc>} {
    %c0 = arith.constant 0 : index
    %c0_0 = arith.constant 0 : index
    %0 = vector.load %arg0[%c0, %c0_0] : memref<2x128xbf16, #tpu.memory_space<vmem>>, vector<2x128xbf16>
    %c0_1 = arith.constant 0 : index
    %c0_2 = arith.constant 0 : index
    %1 = vector.load %arg1[%c0_1, %c0_2] : memref<128x128xbf16, #tpu.memory_space<vmem>>, vector<128x128xbf16>
    %cst = arith.constant dense<0.000000e+00> : vector<2x128xf32>
    %2 = tpu.matmul %0, %1, %cst {dimension_numbers = #tpu.dot_dimension_numbers<[1], [0], [0], [1], [0, 0, 1, 1], [], []>} : vector<2x128xbf16>, vector<128x128xbf16>, vector<2x128xf32> -> vector<2x128xf32>
    %cst_3 = arith.constant 0.000000e+00 : f32
    %3 = vector.broadcast %cst_3 : f32 to vector<2x128xf32>
    %4 = arith.maximumf %2, %3 : vector<2x128xf32>
    %5 = arith.truncf %4 : vector<2x128xf32> to vector<2x128xbf16>
    %c0_4 = arith.constant 0 : index
    %c0_5 = arith.constant 0 : index
    %6 = vector.load %arg2[%c0_4, %c0_5] : memref<128x128xbf16, #tpu.memory_space<vmem>>, vector<128x128xbf16>
    %cst_6 = arith.constant dense<0.000000e+00> : vector<2x128xf32>
    %7 = tpu.matmul %5, %6, %cst_6 {dimension_numbers = #tpu.dot_dimension_numbers<[1], [0], [0], [1], [0, 0, 1, 1], [], []>} : vector<2x128xbf16>, vector<128x128xbf16>, vector<2x128xf32> -> vector<2x128xf32>
    %cst_7 = arith.constant 0.000000e+00 : f32
    %8 = vector.broadcast %cst_7 : f32 to vector<2x128xf32>
    %9 = arith.maximumf %7, %8 : vector<2x128xf32>
    %10 = arith.truncf %9 : vector<2x128xf32> to vector<2x128xbf16>
    %c0_8 = arith.constant 0 : index
    %c0_9 = arith.constant 0 : index
    %11 = vector.load %arg3[%c0_8, %c0_9] : memref<128x10xbf16, #tpu.memory_space<vmem>>, vector<128x10xbf16>
    %cst_10 = arith.constant dense<0.000000e+00> : vector<2x10xf32>
    %12 = tpu.matmul %10, %11, %cst_10 {dimension_numbers = #tpu.dot_dimension_numbers<[1], [0], [0], [1], [0, 0, 1, 1], [], []>} : vector<2x128xbf16>, vector<128x10xbf16>, vector<2x10xf32> -> vector<2x10xf32>
    %c0_11 = arith.constant 0 : index
    %c0_12 = arith.constant 0 : index
    %13 = vector.load %arg4[%c0_11, %c0_12] : memref<2x10xf32, #tpu.memory_space<vmem>>, vector<2x10xf32>
    tpu.vector_store %arg4[%c0_11, %c0_12], %12 {strides = array<i32>} : memref<2x10xf32, #tpu.memory_space<vmem>>, vector<2x10xf32>,
    return
  }
}

</mosaic_0001>

<bundles_post_ra>
// kernel: alexnet_forward.9
= control target key start
LH: loop header
LB: loop body
LE: loop exit
PB: predicated region body
PF: predicated region fallthrough
CT: control target
= control target key end

     0   :  { %s1589_s9 = smov 0   ;;  %s1591_s10 = smov 0   ;;  %s1956_s0 = inlined_call_operand.vmem [shape: bf16[16,384], index: 0, kind: input, shape index: {}]   ;;  %s1957_s1 = inlined_call_operand.vmem [shape: bf16[384,6656], index: 1, kind: input, shape index: {}]   ;;  %s1958_s2 = inlined_call_operand.vmem [shape: bf16[16,6656], index: 2, kind: output, shape index: {}]  }
   0x1   :  { %s1593_s11 = smov 0  }
   0x2 LB: > { %s1244_s12 = sadd.s32 4294967295, %s1571_s11   ;;  %s1606_s13 = sadd.s32 1, %s1571_s11   ;;  %s1571_s11 = sphi %s1593_s11, %s1962_s11   ;;  %s1567_s10 = sphi %s1591_s10, %s1961_s10   ;;  %s1563_s9 = sphi %s1589_s9, %s1960_s9  }
   0x3   : > { %s37_s14 = ssub.s32 %s1571_s11, %s1606_s13  ;;  %s40_s15 = sadd.s32 1, %s1567_s10 }
   0x4   : > { %p38_p0 = scmp.eq.s32.totalorder %s37_s14, 0  ;;  %p47_p1 = scmp.ne.s32.totalorder %s1567_s10, %s1563_s9 }
   0x5   : > { %p48_p2 = scmp.eq.s32.totalorder %s1571_s11, 0  ;;  %p77_p3 = scmp.eq.s32.totalorder %s1244_s12, 12 }
   0x6   : > { %s1617_s16 = scalar_select %p38_p0, %s1567_s10, %s40_s15  }
   0x7   : > { %p49_p4 = por %p48_p2, %p47_p1  ;;  %p1619_p5 = por %p77_p3, %p47_p1 }
   0x8   : > { %p1247_p6 = scmp.ge.s32.totalorder %s1571_s11, 13 }
   0xa   : > { %102 = sbr.rel (%p1247_p6) target bundleno = 70 (0x46), region = 20 }
  0x11   : > { %105 = sbr.rel (!%p49_p4) target bundleno = 70 (0x46), region = 24  ;;  %s107_s18 = sand.u32 (%p49_p4), 1, %s1567_s10  }
  0x12   : > { %s1360_s19 = sshll.u32 (%p49_p4), %s1571_s11, 4  ;;  %s1374_s20 = smul.u32 (%p49_p4), 768, %s107_s18 }
  0x13   : > { %s1629_s23 = scalar_lea.vmem (%p49_p4), %s1957_s1, %s1360_s19 }
  0x14   : > { %v125_v0 = vld [vmem:[%s1629_s23] sm:$0xff] (%p49_p4)  ;;  %v127_v1 = vld [vmem:[%s1629_s23 + $0x8] sm:$0xff] (%p49_p4)  ;;  %v129_v2 = vld [vmem:[%s1629_s23 + $0xd0] sm:$0xff] (%p49_p4)  ;;  %s1637_s24 = scalar_lea.vmem (%p49_p4), [#allocation2], %s1374_s20 }
  0x15   : > { %v131_v3 = vld [vmem:[%s1629_s23 + $0xd8] sm:$0xff] (%p49_p4)  ;;  %v133_v4 = vld [vmem:[%s1629_s23 + $0x1a0] sm:$0xff] (%p49_p4)  ;;  %v135_v5 = vld [vmem:[%s1629_s23 + $0x1a8] sm:$0xff] (%p49_p4)  ;;  %126 = vst [vmem:[%s1637_s24] sm:$0xff] (%p49_p4), %v125_v0 }
  0x16   : > { %128 = vst [vmem:[%s1637_s24 + $0x8] sm:$0xff] (%p49_p4), %v127_v1  ;;  %130 = vst [vmem:[%s1637_s24 + $0x10] sm:$0xff] (%p49_p4), %v129_v2  ;;  %v137_v6 = vld [vmem:[%s1629_s23 + $0x270] sm:$0xff] (%p49_p4)  ;;  %v139_v7 = vld [vmem:[%s1629_s23 + $0x278] sm:$0xff] (%p49_p4) }
  0x17   : > { %132 = vst [vmem:[%s1637_s24 + $0x18] sm:$0xff] (%p49_p4), %v131_v3  ;;  %134 = vst [vmem:[%s1637_s24 + $0x20] sm:$0xff] (%p49_p4), %v133_v4  ;;  %v141_v8 = vld [vmem:[%s1629_s23 + $0x340] sm:$0xff] (%p49_p4)  ;;  %v143_v9 = vld [vmem:[%s1629_s23 + $0x348] sm:$0xff] (%p49_p4) }
  0x18   : > { %136 = vst [vmem:[%s1637_s24 + $0x28] sm:$0xff] %v135_v5  ;;  %138 = vst [vmem:[%s1637_s24 + $0x30] sm:$0xff] %v137_v6  ;;  %v145_v10 = vld [vmem:[%s1629_s23 + $0x410] sm:$0xff]  ;;  %v147_v11 = vld [vmem:[%s1629_s23 + $0x418] sm:$0xff] }
  0x19   : > { %140 = vst [vmem:[%s1637_s24 + $0x38] sm:$0xff] %v139_v7  ;;  %142 = vst [vmem:[%s1637_s24 + $0x40] sm:$0xff] %v141_v8  ;;  %v149_v12 = vld [vmem:[%s1629_s23 + $0x4e0] sm:$0xff]  ;;  %v151_v13 = vld [vmem:[%s1629_s23 + $0x4e8] sm:$0xff] }
  0x1a   : > { %144 = vst [vmem:[%s1637_s24 + $0x48] sm:$0xff] %v143_v9  ;;  %146 = vst [vmem:[%s1637_s24 + $0x50] sm:$0xff] %v145_v10  ;;  %v153_v14 = vld [vmem:[%s1629_s23 + $0x5b0] sm:$0xff]  ;;  %v155_v15 = vld [vmem:[%s1629_s23 + $0x5b8] sm:$0xff] }
  0x1b   : > { %148 = vst [vmem:[%s1637_s24 + $0x58] sm:$0xff] %v147_v11  ;;  %150 = vst [vmem:[%s1637_s24 + $0x60] sm:$0xff] %v149_v12  ;;  %v157_v16 = vld [vmem:[%s1629_s23 + $0x680] sm:$0xff]  ;;  %v159_v17 = vld [vmem:[%s1629_s23 + $0x688] sm:$0xff] }
  0x1c   : > { %152 = vst [vmem:[%s1637_s24 + $0x68] sm:$0xff] %v151_v13  ;;  %154 = vst [vmem:[%s1637_s24 + $0x70] sm:$0xff] %v153_v14  ;;  %v161_v18 = vld [vmem:[%s1629_s23 + $0x750] sm:$0xff]  ;;  %v163_v19 = vld [vmem:[%s1629_s23 + $0x758] sm:$0xff] }
  0x1d   : > { %156 = vst [vmem:[%s1637_s24 + $0x78] sm:$0xff] %v155_v15  ;;  %158 = vst [vmem:[%s1637_s24 + $0x80] sm:$0xff] %v157_v16  ;;  %v165_v20 = vld [vmem:[%s1629_s23 + $0x820] sm:$0xff]  ;;  %v167_v21 = vld [vmem:[%s1629_s23 + $0x828] sm:$0xff] }
  0x1e   : > { %160 = vst [vmem:[%s1637_s24 + $0x88] sm:$0xff] %v159_v17  ;;  %162 = vst [vmem:[%s1637_s24 + $0x90] sm:$0xff] %v161_v18  ;;  %v169_v22 = vld [vmem:[%s1629_s23 + $0x8f0] sm:$0xff]  ;;  %v171_v23 = vld [vmem:[%s1629_s23 + $0x8f8] sm:$0xff] }
  0x1f   : > { %164 = vst [vmem:[%s1637_s24 + $0x98] sm:$0xff] %v163_v19  ;;  %166 = vst [vmem:[%s1637_s24 + $0xa0] sm:$0xff] %v165_v20  ;;  %v173_v24 = vld [vmem:[%s1629_s23 + $0x9c0] sm:$0xff]  ;;  %v175_v25 = vld [vmem:[%s1629_s23 + $0x9c8] sm:$0xff] }
  0x20   : > { %168 = vst [vmem:[%s1637_s24 + $0xa8] sm:$0xff] %v167_v21  ;;  %170 = vst [vmem:[%s1637_s24 + $0xb0] sm:$0xff] %v169_v22  ;;  %v177_v26 = vld [vmem:[%s1629_s23 + $0xa90] sm:$0xff]  ;;  %v179_v27 = vld [vmem:[%s1629_s23 + $0xa98] sm:$0xff] }
  0x21   : > { %172 = vst [vmem:[%s1637_s24 + $0xb8] sm:$0xff] %v171_v23  ;;  %174 = vst [vmem:[%s1637_s24 + $0xc0] sm:$0xff] %v173_v24  ;;  %v181_v28 = vld [vmem:[%s1629_s23 + $0xb60] sm:$0xff]  ;;  %v183_v29 = vld [vmem:[%s1629_s23 + $0xb68] sm:$0xff] }
  0x22   : > { %176 = vst [vmem:[%s1637_s24 + $0xc8] sm:$0xff] %v175_v25  ;;  %178 = vst [vmem:[%s1637_s24 + $0xd0] sm:$0xff] %v177_v26  ;;  %v185_v30 = vld [vmem:[%s1629_s23 + $0xc30] sm:$0xff]  ;;  %v187_v31 = vld [vmem:[%s1629_s23 + $0xc38] sm:$0xff] }
  0x23   : > { %180 = vst [vmem:[%s1637_s24 + $0xd8] sm:$0xff] %v179_v27  ;;  %182 = vst [vmem:[%s1637_s24 + $0xe0] sm:$0xff] %v181_v28  ;;  %v189_v32 = vld [vmem:[%s1629_s23 + $0xd00] sm:$0xff]  ;;  %v191_v33 = vld [vmem:[%s1629_s23 + $0xd08] sm:$0xff] }
  0x24   : > { %184 = vst [vmem:[%s1637_s24 + $0xe8] sm:$0xff] %v183_v29  ;;  %186 = vst [vmem:[%s1637_s24 + $0xf0] sm:$0xff] %v185_v30  ;;  %v193_v34 = vld [vmem:[%s1629_s23 + $0xdd0] sm:$0xff]  ;;  %v195_v35 = vld [vmem:[%s1629_s23 + $0xdd8] sm:$0xff] }
  0x25   : > { %188 = vst [vmem:[%s1637_s24 + $0xf8] sm:$0xff] %v187_v31  ;;  %190 = vst [vmem:[%s1637_s24 + $0x100] sm:$0xff] %v189_v32  ;;  %v197_v36 = vld [vmem:[%s1629_s23 + $0xea0] sm:$0xff]  ;;  %v199_v37 = vld [vmem:[%s1629_s23 + $0xea8] sm:$0xff] }
  0x26   : > { %192 = vst [vmem:[%s1637_s24 + $0x108] sm:$0xff] %v191_v33  ;;  %194 = vst [vmem:[%s1637_s24 + $0x110] sm:$0xff] %v193_v34  ;;  %v201_v38 = vld [vmem:[%s1629_s23 + $0xf70] sm:$0xff]  ;;  %v203_v39 = vld [vmem:[%s1629_s23 + $0xf78] sm:$0xff] }
  0x27   : > { %196 = vst [vmem:[%s1637_s24 + $0x118] sm:$0xff] %v195_v35  ;;  %198 = vst [vmem:[%s1637_s24 + $0x120] sm:$0xff] %v197_v36  ;;  %v205_v40 = vld [vmem:[%s1629_s23 + $0x1040] sm:$0xff]  ;;  %v207_v41 = vld [vmem:[%s1629_s23 + $0x1048] sm:$0xff] }
  0x28   : > { %200 = vst [vmem:[%s1637_s24 + $0x128] sm:$0xff] %v199_v37  ;;  %202 = vst [vmem:[%s1637_s24 + $0x130] sm:$0xff] %v201_v38  ;;  %v209_v42 = vld [vmem:[%s1629_s23 + $0x1110] sm:$0xff]  ;;  %v211_v43 = vld [vmem:[%s1629_s23 + $0x1118] sm:$0xff] }
  0x29   : > { %204 = vst [vmem:[%s1637_s24 + $0x138] sm:$0xff] %v203_v39  ;;  %206 = vst [vmem:[%s1637_s24 + $0x140] sm:$0xff] %v205_v40  ;;  %v213_v44 = vld [vmem:[%s1629_s23 + $0x11e0] sm:$0xff]  ;;  %v215_v45 = vld [vmem:[%s1629_s23 + $0x11e8] sm:$0xff] }
  0x2a   : > { %208 = vst [vmem:[%s1637_s24 + $0x148] sm:$0xff] %v207_v41  ;;  %210 = vst [vmem:[%s1637_s24 + $0x150] sm:$0xff] %v209_v42  ;;  %v217_v46 = vld [vmem:[%s1629_s23 + $0x12b0] sm:$0xff]  ;;  %v219_v47 = vld [vmem:[%s1629_s23 + $0x12b8] sm:$0xff] }
  0x2b   : > { %212 = vst [vmem:[%s1637_s24 + $0x158] sm:$0xff] %v211_v43  ;;  %214 = vst [vmem:[%s1637_s24 + $0x160] sm:$0xff] %v213_v44  ;;  %v221_v48 = vld [vmem:[%s1629_s23 + $0x1380] sm:$0xff]  ;;  %v223_v49 = vld [vmem:[%s1629_s23 + $0x1388] sm:$0xff] }
  0x2c   : > { %216 = vst [vmem:[%s1637_s24 + $0x168] sm:$0xff] %v215_v45  ;;  %218 = vst [vmem:[%s1637_s24 + $0x170] sm:$0xff] %v217_v46  ;;  %v225_v50 = vld [vmem:[%s1629_s23 + $0x1450] sm:$0xff]  ;;  %v227_v51 = vld [vmem:[%s1629_s23 + $0x1458] sm:$0xff] }
  0x2d   : > { %220 = vst [vmem:[%s1637_s24 + $0x178] sm:$0xff] %v219_v47  ;;  %222 = vst [vmem:[%s1637_s24 + $0x180] sm:$0xff] %v221_v48  ;;  %v229_v52 = vld [vmem:[%s1629_s23 + $0x1520] sm:$0xff]  ;;  %v231_v53 = vld [vmem:[%s1629_s23 + $0x1528] sm:$0xff] }
  0x2e   : > { %224 = vst [vmem:[%s1637_s24 + $0x188] sm:$0xff] %v223_v49  ;;  %226 = vst [vmem:[%s1637_s24 + $0x190] sm:$0xff] %v225_v50  ;;  %v233_v54 = vld [vmem:[%s1629_s23 + $0x15f0] sm:$0xff]  ;;  %v235_v55 = vld [vmem:[%s1629_s23 + $0x15f8] sm:$0xff] }
  0x2f   : > { %228 = vst [vmem:[%s1637_s24 + $0x198] sm:$0xff] %v227_v51  ;;  %230 = vst [vmem:[%s1637_s24 + $0x1a0] sm:$0xff] %v229_v52  ;;  %v237_v56 = vld [vmem:[%s1629_s23 + $0x16c0] sm:$0xff]  ;;  %v239_v57 = vld [vmem:[%s1629_s23 + $0x16c8] sm:$0xff] }
  0x30   : > { %232 = vst [vmem:[%s1637_s24 + $0x1a8] sm:$0xff] %v231_v53  ;;  %234 = vst [vmem:[%s1637_s24 + $0x1b0] sm:$0xff] %v233_v54  ;;  %v241_v58 = vld [vmem:[%s1629_s23 + $0x1790] sm:$0xff]  ;;  %v243_v59 = vld [vmem:[%s1629_s23 + $0x1798] sm:$0xff] }
  0x31   : > { %236 = vst [vmem:[%s1637_s24 + $0x1b8] sm:$0xff] %v235_v55  ;;  %238 = vst [vmem:[%s1637_s24 + $0x1c0] sm:$0xff] %v237_v56  ;;  %v245_v60 = vld [vmem:[%s1629_s23 + $0x1860] sm:$0xff]  ;;  %v247_v61 = vld [vmem:[%s1629_s23 + $0x1868] sm:$0xff] }
  0x32   : > { %240 = vst [vmem:[%s1637_s24 + $0x1c8] sm:$0xff] %v239_v57  ;;  %242 = vst [vmem:[%s1637_s24 + $0x1d0] sm:$0xff] %v241_v58  ;;  %v249_v62 = vld [vmem:[%s1629_s23 + $0x1930] sm:$0xff]  ;;  %v251_v63 = vld [vmem:[%s1629_s23 + $0x1938] sm:$0xff] }
  0x33   : > { %244 = vst [vmem:[%s1637_s24 + $0x1d8] sm:$0xff] %v243_v59  ;;  %246 = vst [vmem:[%s1637_s24 + $0x1e0] sm:$0xff] %v245_v60  ;;  %v253_v0 = vld [vmem:[%s1629_s23 + $0x1a00] sm:$0xff]  ;;  %v255_v1 = vld [vmem:[%s1629_s23 + $0x1a08] sm:$0xff] }
  0x34   : > { %248 = vst [vmem:[%s1637_s24 + $0x1e8] sm:$0xff] %v247_v61  ;;  %250 = vst [vmem:[%s1637_s24 + $0x1f0] sm:$0xff] %v249_v62  ;;  %v257_v2 = vld [vmem:[%s1629_s23 + $0x1ad0] sm:$0xff]  ;;  %v259_v3 = vld [vmem:[%s1629_s23 + $0x1ad8] sm:$0xff] }
  0x35   : > { %252 = vst [vmem:[%s1637_s24 + $0x1f8] sm:$0xff] %v251_v63  ;;  %254 = vst [vmem:[%s1637_s24 + $0x200] sm:$0xff] %v253_v0  ;;  %v261_v4 = vld [vmem:[%s1629_s23 + $0x1ba0] sm:$0xff]  ;;  %v263_v5 = vld [vmem:[%s1629_s23 + $0x1ba8] sm:$0xff] }
  0x36   : > { %256 = vst [vmem:[%s1637_s24 + $0x208] sm:$0xff] %v255_v1  ;;  %258 = vst [vmem:[%s1637_s24 + $0x210] sm:$0xff] %v257_v2  ;;  %v265_v6 = vld [vmem:[%s1629_s23 + $0x1c70] sm:$0xff]  ;;  %v267_v7 = vld [vmem:[%s1629_s23 + $0x1c78] sm:$0xff] }
  0x37   : > { %260 = vst [vmem:[%s1637_s24 + $0x218] sm:$0xff] %v259_v3  ;;  %262 = vst [vmem:[%s1637_s24 + $0x220] sm:$0xff] %v261_v4  ;;  %v269_v8 = vld [vmem:[%s1629_s23 + $0x1d40] sm:$0xff]  ;;  %v271_v9 = vld [vmem:[%s1629_s23 + $0x1d48] sm:$0xff] }
  0x38   : > { %264 = vst [vmem:[%s1637_s24 + $0x228] sm:$0xff] %v263_v5  ;;  %266 = vst [vmem:[%s1637_s24 + $0x230] sm:$0xff] %v265_v6  ;;  %v273_v10 = vld [vmem:[%s1629_s23 + $0x1e10] sm:$0xff]  ;;  %v275_v11 = vld [vmem:[%s1629_s23 + $0x1e18] sm:$0xff] }
  0x39   : > { %268 = vst [vmem:[%s1637_s24 + $0x238] sm:$0xff] %v267_v7  ;;  %270 = vst [vmem:[%s1637_s24 + $0x240] sm:$0xff] %v269_v8  ;;  %v277_v12 = vld [vmem:[%s1629_s23 + $0x1ee0] sm:$0xff]  ;;  %v279_v13 = vld [vmem:[%s1629_s23 + $0x1ee8] sm:$0xff] }
  0x3a   : > { %272 = vst [vmem:[%s1637_s24 + $0x248] sm:$0xff] %v271_v9  ;;  %274 = vst [vmem:[%s1637_s24 + $0x250] sm:$0xff] %v273_v10  ;;  %v281_v14 = vld [vmem:[%s1629_s23 + $0x1fb0] sm:$0xff]  ;;  %v283_v15 = vld [vmem:[%s1629_s23 + $0x1fb8] sm:$0xff] }
  0x3b   : > { %276 = vst [vmem:[%s1637_s24 + $0x258] sm:$0xff] %v275_v11  ;;  %278 = vst [vmem:[%s1637_s24 + $0x260] sm:$0xff] %v277_v12  ;;  %v285_v16 = vld [vmem:[%s1629_s23 + $0x2080] sm:$0xff]  ;;  %v287_v17 = vld [vmem:[%s1629_s23 + $0x2088] sm:$0xff] }
  0x3c   : > { %280 = vst [vmem:[%s1637_s24 + $0x268] sm:$0xff] %v279_v13  ;;  %282 = vst [vmem:[%s1637_s24 + $0x270] sm:$0xff] %v281_v14  ;;  %v289_v18 = vld [vmem:[%s1629_s23 + $0x2150] sm:$0xff]  ;;  %v291_v19 = vld [vmem:[%s1629_s23 + $0x2158] sm:$0xff] }
  0x3d   : > { %284 = vst [vmem:[%s1637_s24 + $0x278] sm:$0xff] %v283_v15  ;;  %286 = vst [vmem:[%s1637_s24 + $0x280] sm:$0xff] %v285_v16  ;;  %v293_v20 = vld [vmem:[%s1629_s23 + $0x2220] sm:$0xff]  ;;  %v295_v21 = vld [vmem:[%s1629_s23 + $0x2228] sm:$0xff] }
  0x3e   : > { %288 = vst [vmem:[%s1637_s24 + $0x288] sm:$0xff] %v287_v17  ;;  %290 = vst [vmem:[%s1637_s24 + $0x290] sm:$0xff] %v289_v18  ;;  %v297_v22 = vld [vmem:[%s1629_s23 + $0x22f0] sm:$0xff]  ;;  %v299_v23 = vld [vmem:[%s1629_s23 + $0x22f8] sm:$0xff] }
  0x3f   : > { %292 = vst [vmem:[%s1637_s24 + $0x298] sm:$0xff] %v291_v19  ;;  %294 = vst [vmem:[%s1637_s24 + $0x2a0] sm:$0xff] %v293_v20  ;;  %v301_v24 = vld [vmem:[%s1629_s23 + $0x23c0] sm:$0xff]  ;;  %v303_v25 = vld [vmem:[%s1629_s23 + $0x23c8] sm:$0xff] }
  0x40   : > { %296 = vst [vmem:[%s1637_s24 + $0x2a8] sm:$0xff] %v295_v21  ;;  %298 = vst [vmem:[%s1637_s24 + $0x2b0] sm:$0xff] %v297_v22  ;;  %v305_v26 = vld [vmem:[%s1629_s23 + $0x2490] sm:$0xff]  ;;  %v307_v27 = vld [vmem:[%s1629_s23 + $0x2498] sm:$0xff] }
  0x41   : > { %300 = vst [vmem:[%s1637_s24 + $0x2b8] sm:$0xff] %v299_v23  ;;  %302 = vst [vmem:[%s1637_s24 + $0x2c0] sm:$0xff] %v301_v24  ;;  %v309_v28 = vld [vmem:[%s1629_s23 + $0x2560] sm:$0xff]  ;;  %v311_v29 = vld [vmem:[%s1629_s23 + $0x2568] sm:$0xff] }
  0x42   : > { %304 = vst [vmem:[%s1637_s24 + $0x2c8] sm:$0xff] %v303_v25  ;;  %306 = vst [vmem:[%s1637_s24 + $0x2d0] sm:$0xff] %v305_v26  ;;  %v313_v30 = vld [vmem:[%s1629_s23 + $0x2630] sm:$0xff]  ;;  %v315_v31 = vld [vmem:[%s1629_s23 + $0x2638] sm:$0xff] }
  0x43   : > { %308 = vst [vmem:[%s1637_s24 + $0x2d8] sm:$0xff] %v307_v27  ;;  %310 = vst [vmem:[%s1637_s24 + $0x2e0] sm:$0xff] %v309_v28 }
  0x44   : > { %312 = vst [vmem:[%s1637_s24 + $0x2e8] sm:$0xff] %v311_v29  ;;  %314 = vst [vmem:[%s1637_s24 + $0x2f0] sm:$0xff] %v313_v30 }
  0x45   : > { %316 = vst [vmem:[%s1637_s24 + $0x2f8] sm:$0xff] %v315_v31 }
  0x46 PF: > { %p1250_p7 = scmp.ge.s32.totalorder %s1571_s11, 1  ;;  %p321_p8 = scmp.lt.s32.totalorder %s1571_s11, 14 }
  0x48   : > { %p322_p9 = pnand %p1250_p7, %p321_p8 }
  0x49   : > { %s328_s25 = sand.u32 (!%p322_p9), 1, %s1563_s9   ;;  %v1499_v32 = vld [vmem:[%s1956_s0 + $0x4] ss:$12 sps:$4 sm:$0xff] (!%p322_p9)  }
  0x4a   : > { %325 = sbr.rel (%p322_p9) target bundleno = 403 (0x193), region = 47  ;;  %979 = vmatprep.mubr.bf16.mxu0 (!%p322_p9), %v1499_v32  ;;  %1065 = vmatprep.mubr.bf16.mxu1 (!%p322_p9), %v1499_v32  ;;  %s1251_s6 = sshll.u32 (!%p322_p9), %s328_s25, 5 }
  0x4b   : > { %s1375_s26 = smul.u32 (!%p322_p9), 768, %s328_s25  ;;  %s347_s7 = scalar_lea.vmem (!%p322_p9), [#allocation3], %s1251_s6 }
  0x4d   : > { %s1833_s29 = scalar_lea.vmem (!%p322_p9), [#allocation2], %s1375_s26 }
  0x4e   : > { %v1401_v33 = vld [vmem:[%s1833_s29 + $0x4] ss:$16 sps:$4 sm:$0xff] (!%p322_p9)   ;;  %v1403_v34 = vld [vmem:[%s1833_s29 + $0xc] ss:$16 sps:$4 sm:$0xff] (!%p322_p9)   ;;  %v1405_v35 = vld [vmem:[%s1833_s29] ss:$16 sps:$4 sm:$0xff] (!%p322_p9)  }
  0x4f   : > { %947 = vmatprep.subr.bf16.mxu0 (!%p322_p9), %v1401_v33  ;;  %v1406_v36 = vld [vmem:[%s1833_s29 + $0x8] ss:$16 sps:$4 sm:$0xff] (!%p322_p9)   ;;  %1033 = vmatprep.subr.bf16.mxu1 (!%p322_p9), %v1403_v34  ;;  %v1407_v37 = vld [vmem:[%s1833_s29 + $0x24] ss:$16 sps:$4 sm:$0xff] (!%p322_p9)   ;;  %v1409_v38 = vld [vmem:[%s1833_s29 + $0x2c] ss:$16 sps:$4 sm:$0xff] (!%p322_p9)  }
  0x50   : > { %948 = vmatpush1.bf16.msra.mxu0 (!%p322_p9), %v1405_v35  ;;  %1034 = vmatpush1.bf16.msra.mxu1 (!%p322_p9), %v1406_v36  ;;  %v1411_v39 = vld [vmem:[%s1833_s29 + $0x20] ss:$16 sps:$4 sm:$0xff] (!%p322_p9)   ;;  %v1412_v40 = vld [vmem:[%s1833_s29 + $0x28] ss:$16 sps:$4 sm:$0xff] (!%p322_p9)   ;;  %v1413_v41 = vld [vmem:[%s1833_s29 + $0x44] ss:$16 sps:$4 sm:$0xff] (!%p322_p9)  }
  0x51   : > { %949 = vmatprep.subr.bf16.mxu0 %v1407_v37  ;;  %1035 = vmatprep.subr.bf16.mxu1 %v1409_v38  ;;  %v1415_v42 = vld [vmem:[%s1833_s29 + $0x4c] ss:$16 sps:$4 sm:$0xff]   ;;  %v1417_v43 = vld [vmem:[%s1833_s29 + $0x40] ss:$16 sps:$4 sm:$0xff]   ;;  %v1418_v44 = vld [vmem:[%s1833_s29 + $0x48] ss:$16 sps:$4 sm:$0xff]  }
  0x52   : > { %v1419_v45 = vld [vmem:[%s1833_s29 + $0x64] ss:$16 sps:$4 sm:$0xff]   ;;  %v1421_v46 = vld [vmem:[%s1833_s29 + $0x6c] ss:$16 sps:$4 sm:$0xff]   ;;  %v1423_v47 = vld [vmem:[%s1833_s29 + $0x60] ss:$16 sps:$4 sm:$0xff]  }
  0x53   : > { %v1424_v48 = vld [vmem:[%s1833_s29 + $0x68] ss:$16 sps:$4 sm:$0xff]   ;;  %v1425_v49 = vld [vmem:[%s1833_s29 + $0x84] ss:$16 sps:$4 sm:$0xff]   ;;  %v1427_v50 = vld [vmem:[%s1833_s29 + $0x8c] ss:$16 sps:$4 sm:$0xff]  }
  0x54   : > { %950 = vmatpush1.bf16.msra.mxu0 %v1411_v39  ;;  %1036 = vmatpush1.bf16.msra.mxu1 %v1412_v40  ;;  %v1429_v51 = vld [vmem:[%s1833_s29 + $0x80] ss:$16 sps:$4 sm:$0xff]   ;;  %v1430_v52 = vld [vmem:[%s1833_s29 + $0x88] ss:$16 sps:$4 sm:$0xff]   ;;  %v1431_v53 = vld [vmem:[%s1833_s29 + $0xa4] ss:$16 sps:$4 sm:$0xff]  }
  0x55   : > { %951 = vmatprep.subr.bf16.mxu0 %v1413_v41  ;;  %1037 = vmatprep.subr.bf16.mxu1 %v1415_v42  ;;  %v1433_v54 = vld [vmem:[%s1833_s29 + $0xac] ss:$16 sps:$4 sm:$0xff]   ;;  %v1435_v55 = vld [vmem:[%s1833_s29 + $0xa0] ss:$16 sps:$4 sm:$0xff]   ;;  %v1436_v56 = vld [vmem:[%s1833_s29 + $0xa8] ss:$16 sps:$4 sm:$0xff]  }
  0x56   : > { %v1437_v57 = vld [vmem:[%s1833_s29 + $0xc4] ss:$16 sps:$4 sm:$0xff]   ;;  %v1439_v58 = vld [vmem:[%s1833_s29 + $0xcc] ss:$16 sps:$4 sm:$0xff]   ;;  %v1441_v59 = vld [vmem:[%s1833_s29 + $0xc0] ss:$16 sps:$4 sm:$0xff]  }
  0x57   : > { %v1442_v60 = vld [vmem:[%s1833_s29 + $0xc8] ss:$16 sps:$4 sm:$0xff]   ;;  %v1443_v61 = vld [vmem:[%s1833_s29 + $0xe4] ss:$16 sps:$4 sm:$0xff]   ;;  %v1445_v62 = vld [vmem:[%s1833_s29 + $0xec] ss:$16 sps:$4 sm:$0xff]  }
  0x58   : > { %952 = vmatpush1.bf16.msra.mxu0 %v1417_v43  ;;  %1038 = vmatpush1.bf16.msra.mxu1 %v1418_v44  ;;  %v1447_v63 = vld [vmem:[%s1833_s29 + $0xe0] ss:$16 sps:$4 sm:$0xff]   ;;  %v1448_v0 = vld [vmem:[%s1833_s29 + $0xe8] ss:$16 sps:$4 sm:$0xff]   ;;  %v1449_v1 = vld [vmem:[%s1833_s29 + $0x104] ss:$16 sps:$4 sm:$0xff]  }
  0x59   : > { %953 = vmatprep.subr.bf16.mxu0 %v1419_v45  ;;  %1039 = vmatprep.subr.bf16.mxu1 %v1421_v46  ;;  %v1451_v2 = vld [vmem:[%s1833_s29 + $0x10c] ss:$16 sps:$4 sm:$0xff]   ;;  %v1453_v3 = vld [vmem:[%s1833_s29 + $0x100] ss:$16 sps:$4 sm:$0xff]   ;;  %v1454_v4 = vld [vmem:[%s1833_s29 + $0x108] ss:$16 sps:$4 sm:$0xff]  }
  0x5a   : > { %v1455_v5 = vld [vmem:[%s1833_s29 + $0x124] ss:$16 sps:$4 sm:$0xff]   ;;  %v1457_v6 = vld [vmem:[%s1833_s29 + $0x12c] ss:$16 sps:$4 sm:$0xff]   ;;  %v1459_v7 = vld [vmem:[%s1833_s29 + $0x120] ss:$16 sps:$4 sm:$0xff]  }
  0x5b   : > { %v1460_v8 = vld [vmem:[%s1833_s29 + $0x128] ss:$16 sps:$4 sm:$0xff]   ;;  %v1461_v9 = vld [vmem:[%s1833_s29 + $0x144] ss:$16 sps:$4 sm:$0xff]   ;;  %v1463_v10 = vld [vmem:[%s1833_s29 + $0x14c] ss:$16 sps:$4 sm:$0xff]  }
  0x5c   : > { %954 = vmatpush1.bf16.msra.mxu0 %v1423_v47  ;;  %1040 = vmatpush1.bf16.msra.mxu1 %v1424_v48  ;;  %v1465_v11 = vld [vmem:[%s1833_s29 + $0x140] ss:$16 sps:$4 sm:$0xff]   ;;  %v1466_v12 = vld [vmem:[%s1833_s29 + $0x148] ss:$16 sps:$4 sm:$0xff]   ;;  %v1467_v13 = vld [vmem:[%s1833_s29 + $0x164] ss:$16 sps:$4 sm:$0xff]  }
  0x5d   : > { %955 = vmatprep.subr.bf16.mxu0 %v1425_v49  ;;  %1041 = vmatprep.subr.bf16.mxu1 %v1427_v50  ;;  %v1469_v14 = vld [vmem:[%s1833_s29 + $0x16c] ss:$16 sps:$4 sm:$0xff]   ;;  %v1471_v15 = vld [vmem:[%s1833_s29 + $0x160] ss:$16 sps:$4 sm:$0xff]   ;;  %v1472_v16 = vld [vmem:[%s1833_s29 + $0x168] ss:$16 sps:$4 sm:$0xff]  }
  0x5e   : > { %v1473_v17 = vld [vmem:[%s1833_s29 + $0x184] ss:$16 sps:$4 sm:$0xff]   ;;  %v1475_v18 = vld [vmem:[%s1833_s29 + $0x18c] ss:$16 sps:$4 sm:$0xff]   ;;  %v1477_v19 = vld [vmem:[%s1833_s29 + $0x180] ss:$16 sps:$4 sm:$0xff]  }
  0x5f   : > { %v1478_v20 = vld [vmem:[%s1833_s29 + $0x188] ss:$16 sps:$4 sm:$0xff]   ;;  %v1479_v21 = vld [vmem:[%s1833_s29 + $0x1a4] ss:$16 sps:$4 sm:$0xff]   ;;  %v1481_v22 = vld [vmem:[%s1833_s29 + $0x1ac] ss:$16 sps:$4 sm:$0xff]  }
  0x60   : > { %956 = vmatpush1.bf16.msra.mxu0 %v1429_v51  ;;  %1042 = vmatpush1.bf16.msra.mxu1 %v1430_v52  ;;  %v1483_v23 = vld [vmem:[%s1833_s29 + $0x1a0] ss:$16 sps:$4 sm:$0xff]   ;;  %v1484_v24 = vld [vmem:[%s1833_s29 + $0x1a8] ss:$16 sps:$4 sm:$0xff]   ;;  %v1485_v25 = vld [vmem:[%s1833_s29 + $0x1c4] ss:$16 sps:$4 sm:$0xff]  }
  0x61   : > { %957 = vmatprep.subr.bf16.mxu0 %v1431_v53  ;;  %1043 = vmatprep.subr.bf16.mxu1 %v1433_v54  ;;  %v1487_v26 = vld [vmem:[%s1833_s29 + $0x1cc] ss:$16 sps:$4 sm:$0xff]   ;;  %v1489_v27 = vld [vmem:[%s1833_s29 + $0x1c0] ss:$16 sps:$4 sm:$0xff]   ;;  %v1490_v28 = vld [vmem:[%s1833_s29 + $0x1c8] ss:$16 sps:$4 sm:$0xff]  }
  0x62   : > { %v1491_v29 = vld [vmem:[%s1833_s29 + $0x1e4] ss:$16 sps:$4 sm:$0xff]   ;;  %v1493_v30 = vld [vmem:[%s1833_s29 + $0x1ec] ss:$16 sps:$4 sm:$0xff]   ;;  %v1495_v31 = vld [vmem:[%s1833_s29 + $0x1e0] ss:$16 sps:$4 sm:$0xff]  }
  0x63   : > { %v1496_v32 = vld [vmem:[%s1833_s29 + $0x1e8] ss:$16 sps:$4 sm:$0xff]   ;;  %v1502_v33 = vld [vmem:[%s1833_s29 + $0x204] ss:$16 sps:$4 sm:$0xff]   ;;  %v1505_v34 = vld [vmem:[%s1833_s29 + $0x20c] ss:$16 sps:$4 sm:$0xff]  }
  0x64   : > { %958 = vmatpush1.bf16.msra.mxu0 %v1435_v55  ;;  %1044 = vmatpush1.bf16.msra.mxu1 %v1436_v56  ;;  %v1497_v35 = vld [vmem:[%s1956_s0] ss:$12 sps:$4 sm:$0xff]   ;;  %v1503_v37 = vld [vmem:[%s1833_s29 + $0x208] ss:$16 sps:$4 sm:$0xff]   ;;  %v1508_v38 = vld [vmem:[%s1833_s29 + $0x224] ss:$16 sps:$4 sm:$0xff]  }
  0x65   : > { %959 = vmatprep.subr.bf16.mxu0 %v1437_v57  ;;  %1045 = vmatprep.subr.bf16.mxu1 %v1439_v58  ;;  %v1500_v36 = vld [vmem:[%s1833_s29 + $0x200] ss:$16 sps:$4 sm:$0xff]   ;;  %v1511_v39 = vld [vmem:[%s1833_s29 + $0x22c] ss:$16 sps:$4 sm:$0xff]   ;;  %v1509_v41 = vld [vmem:[%s1833_s29 + $0x228] ss:$16 sps:$4 sm:$0xff]  }
  0x66   : > { %v1506_v40 = vld [vmem:[%s1833_s29 + $0x220] ss:$16 sps:$4 sm:$0xff]   ;;  %v1514_v42 = vld [vmem:[%s1833_s29 + $0x244] ss:$16 sps:$4 sm:$0xff]   ;;  %v1517_v43 = vld [vmem:[%s1833_s29 + $0x24c] ss:$16 sps:$4 sm:$0xff]  }
  0x67   : > { %v1573_v44 = vmov 0   ;;  %v1512_v45 = vld [vmem:[%s1833_s29 + $0x240] ss:$16 sps:$4 sm:$0xff]   ;;  %v1515_v46 = vld [vmem:[%s1833_s29 + $0x248] ss:$16 sps:$4 sm:$0xff]   ;;  %s1365_s8 = sshll.u32 (%p1619_p5), %s1244_s12, 4 }
  0x68   : > { %960 = vmatpush1.bf16.msra.mxu0 %v1441_v59  ;;  %1046 = vmatpush1.bf16.msra.mxu1 %v1442_v60  ;;  %v1520_v47 = vld [vmem:[%s1833_s29 + $0x264] ss:$16 sps:$4 sm:$0xff]   ;;  %v1523_v48 = vld [vmem:[%s1833_s29 + $0x26c] ss:$16 sps:$4 sm:$0xff]   ;;  %v1518_v49 = vld [vmem:[%s1833_s29 + $0x260] ss:$16 sps:$4 sm:$0xff]   ;;  %s1164_s15 = scalar_lea.vmem (%p1619_p5), %s1958_s2, %s1365_s8 }
  0x69   : > { %961 = vmatprep.subr.bf16.mxu0 %v1443_v61  ;;  %1047 = vmatprep.subr.bf16.mxu1 %v1445_v62  ;;  %v1521_v50 = vld [vmem:[%s1833_s29 + $0x268] ss:$16 sps:$4 sm:$0xff]   ;;  %v1526_v51 = vld [vmem:[%s1833_s29 + $0x284] ss:$16 sps:$4 sm:$0xff]   ;;  %v1529_v52 = vld [vmem:[%s1833_s29 + $0x28c] ss:$16 sps:$4 sm:$0xff]  }
  0x6a   : > { %v1524_v53 = vld [vmem:[%s1833_s29 + $0x280] ss:$16 sps:$4 sm:$0xff]   ;;  %v1527_v54 = vld [vmem:[%s1833_s29 + $0x288] ss:$16 sps:$4 sm:$0xff]   ;;  %v1532_v55 = vld [vmem:[%s1833_s29 + $0x2a4] ss:$16 sps:$4 sm:$0xff]  }
  0x6b   : > { %v1535_v56 = vld [vmem:[%s1833_s29 + $0x2ac] ss:$16 sps:$4 sm:$0xff]   ;;  %v1530_v57 = vld [vmem:[%s1833_s29 + $0x2a0] ss:$16 sps:$4 sm:$0xff]   ;;  %v1533_v58 = vld [vmem:[%s1833_s29 + $0x2a8] ss:$16 sps:$4 sm:$0xff]  }
  0x6c   : > { %962 = vmatpush1.bf16.msra.mxu0 %v1447_v63  ;;  %1048 = vmatpush1.bf16.msra.mxu1 %v1448_v0  ;;  %v1538_v59 = vld [vmem:[%s1833_s29 + $0x2c4] ss:$16 sps:$4 sm:$0xff]   ;;  %v1541_v60 = vld [vmem:[%s1833_s29 + $0x2cc] ss:$16 sps:$4 sm:$0xff]   ;;  %v1536_v61 = vld [vmem:[%s1833_s29 + $0x2c0] ss:$16 sps:$4 sm:$0xff]  }
  0x6d   : > { %963 = vmatprep.subr.bf16.mxu0 %v1449_v1  ;;  %1049 = vmatprep.subr.bf16.mxu1 %v1451_v2  ;;  %v1539_v62 = vld [vmem:[%s1833_s29 + $0x2c8] ss:$16 sps:$4 sm:$0xff]   ;;  %v1544_v63 = vld [vmem:[%s1833_s29 + $0x2e4] ss:$16 sps:$4 sm:$0xff]   ;;  %v1547_v0 = vld [vmem:[%s1833_s29 + $0x2ec] ss:$16 sps:$4 sm:$0xff]  }
  0x6e   : > { %v1542_v1 = vld [vmem:[%s1833_s29 + $0x2e0] ss:$16 sps:$4 sm:$0xff]   ;;  %v1545_v2 = vld [vmem:[%s1833_s29 + $0x2e8] ss:$16 sps:$4 sm:$0xff]  }
  0x70   : > { %964 = vmatpush1.bf16.msra.mxu0 %v1453_v3  ;;  %1050 = vmatpush1.bf16.msra.mxu1 %v1454_v4  ;;  %v1548_v3 = vld [vmem:[%s1956_s0 + $0x8] ss:$12 sps:$4 sm:$0xff]  }
  0x71   : > { %965 = vmatprep.subr.bf16.mxu0 %v1455_v5  ;;  %1051 = vmatprep.subr.bf16.mxu1 %v1457_v6 }
  0x74   : > { %966 = vmatpush1.bf16.msra.mxu0 %v1459_v7  ;;  %1052 = vmatpush1.bf16.msra.mxu1 %v1460_v8 }
  0x75   : > { %967 = vmatprep.subr.bf16.mxu0 %v1461_v9  ;;  %1053 = vmatprep.subr.bf16.mxu1 %v1463_v10 }
  0x78   : > { %968 = vmatpush1.bf16.msra.mxu0 %v1465_v11  ;;  %1054 = vmatpush1.bf16.msra.mxu1 %v1466_v12 }
  0x79   : > { %969 = vmatprep.subr.bf16.mxu0 %v1467_v13  ;;  %1055 = vmatprep.subr.bf16.mxu1 %v1469_v14 }
  0x7c   : > { %970 = vmatpush1.bf16.msra.mxu0 %v1471_v15  ;;  %1056 = vmatpush1.bf16.msra.mxu1 %v1472_v16 }
  0x7d   : > { %971 = vmatprep.subr.bf16.mxu0 %v1473_v17  ;;  %1057 = vmatprep.subr.bf16.mxu1 %v1475_v18 }
  0x80   : > { %972 = vmatpush1.bf16.msra.mxu0 %v1477_v19  ;;  %1058 = vmatpush1.bf16.msra.mxu1 %v1478_v20 }
  0x81   : > { %973 = vmatprep.subr.bf16.mxu0 %v1479_v21  ;;  %1059 = vmatprep.subr.bf16.mxu1 %v1481_v22 }
  0x84   : > { %974 = vmatpush1.bf16.msra.mxu0 %v1483_v23  ;;  %1060 = vmatpush1.bf16.msra.mxu1 %v1484_v24 }
  0x85   : > { %975 = vmatprep.subr.bf16.mxu0 %v1485_v25  ;;  %1061 = vmatprep.subr.bf16.mxu1 %v1487_v26 }
  0x88   : > { %976 = vmatpush1.bf16.msra.mxu0 %v1489_v27  ;;  %1062 = vmatpush1.bf16.msra.mxu1 %v1490_v28 }
  0x89   : > { %977 = vmatprep.subr.bf16.mxu0 %v1491_v29  ;;  %1063 = vmatprep.subr.bf16.mxu1 %v1493_v30 }
  0x8c   : > { %978 = vmatpush1.bf16.msra.mxu0 %v1495_v31  ;;  %1064 = vmatpush1.bf16.msra.mxu1 %v1496_v32 }
  0x8d   : > { %990 = vmatprep.subr.bf16.mxu0 %v1502_v33  ;;  %1076 = vmatprep.subr.bf16.mxu1 %v1505_v34 }
  0x8f   : > { %980 = vmatmul.mubr.bf16.vlgmr.msra.gmra.mrb[0].mxu0 %v1497_v35  ;;  %1066 = vmatmul.mubr.bf16.vlgmr.msra.gmra.mrb[0].mxu1 %v1497_v35 }
  0x90   : > { %991 = vmatpush1.bf16.msra.mxu0 %v1500_v36  ;;  %1077 = vmatpush1.bf16.msra.mxu1 %v1503_v37 }
  0x91   : > { %992 = vmatprep.subr.bf16.mxu0 %v1508_v38  ;;  %1078 = vmatprep.subr.bf16.mxu1 %v1511_v39 }
  0x92   : > { %1022 = vmatprep.mubr.bf16.mxu0 %v1573_v44  ;;  %1108 = vmatprep.mubr.bf16.mxu1 %v1573_v44 }
  0x94   : > { %993 = vmatpush1.bf16.msra.mxu0 %v1506_v40  ;;  %1079 = vmatpush1.bf16.msra.mxu1 %v1509_v41 }
  0x95   : > { %994 = vmatprep.subr.bf16.mxu0 %v1514_v42  ;;  %1080 = vmatprep.subr.bf16.mxu1 %v1517_v43 }
  0x98   : > { %995 = vmatpush1.bf16.msra.mxu0 %v1512_v45  ;;  %1081 = vmatpush1.bf16.msra.mxu1 %v1515_v46 }
  0x99   : > { %996 = vmatprep.subr.bf16.mxu0 %v1520_v47  ;;  %1082 = vmatprep.subr.bf16.mxu1 %v1523_v48 }
  0x9c   : > { %997 = vmatpush1.bf16.msra.mxu0 %v1518_v49  ;;  %1083 = vmatpush1.bf16.msra.mxu1 %v1521_v50 }
  0x9d   : > { %998 = vmatprep.subr.bf16.mxu0 %v1526_v51  ;;  %1084 = vmatprep.subr.bf16.mxu1 %v1529_v52 }
  0xa0   : > { %999 = vmatpush1.bf16.msra.mxu0 %v1524_v53  ;;  %1085 = vmatpush1.bf16.msra.mxu1 %v1527_v54 }
  0xa1   : > { %1000 = vmatprep.subr.bf16.mxu0 %v1532_v55  ;;  %1086 = vmatprep.subr.bf16.mxu1 %v1535_v56 }
  0xa4   : > { %1001 = vmatpush1.bf16.msra.mxu0 %v1530_v57  ;;  %1087 = vmatpush1.bf16.msra.mxu1 %v1533_v58 }
  0xa5   : > { %1002 = vmatprep.subr.bf16.mxu0 %v1538_v59  ;;  %1088 = vmatprep.subr.bf16.mxu1 %v1541_v60 }
  0xa8   : > { %1003 = vmatpush1.bf16.msra.mxu0 %v1536_v61  ;;  %1089 = vmatpush1.bf16.msra.mxu1 %v1539_v62 }
  0xa9   : > { %1004 = vmatprep.subr.bf16.mxu0 %v1544_v63  ;;  %1090 = vmatprep.subr.bf16.mxu1 %v1547_v0 }
  0xac   : > { %1005 = vmatpush1.bf16.msra.mxu0 %v1542_v1  ;;  %1091 = vmatpush1.bf16.msra.mxu1 %v1545_v2 }
  0xaf   : > { %1023 = vmatmul.mubr.bf16.vlgmr.msra.gmra.mrb[0].mxu0 %v1548_v3  ;;  %1109 = vmatmul.mubr.bf16.vlgmr.msra.gmra.mrb[0].mxu1 %v1548_v3 }
 0x182   : > { %v1024_v4 = vpop.f32.mrb[0].mxu0  ;;  %v1110_v5 = vpop.f32.mrb[0].mxu1 }
 0x183   : > { %v1119_v6 = vmax.f32 %v1024_v4, 0.0  ;;  %v1121_v7 = vmax.f32 %v1110_v5, 0.0  ;;  %v1026_v8 = vpop.f32.mrb[1].mxu0  ;;  %v1112_v9 = vpop.f32.mrb[1].mxu1 }
 0x184   : > { %v1120_v10 = vmax.f32 %v1026_v8, 0.0  ;;  %v1122_v11 = vmax.f32 %v1112_v9, 0.0  ;;  %v1028_v12 = vpop.f32.mrb[2].mxu0  ;;  %v1114_v13 = vpop.f32.mrb[2].mxu1  ;;  %1161 = sbr.rel (!%p1619_p5) target bundleno = 403 (0x193), region = 55 }
 0x185   : > { %v1123_v14 = vmax.f32 %v1028_v12, 0.0  ;;  %v1125_v15 = vmax.f32 %v1114_v13, 0.0  ;;  %v1030_v16 = vpop.f32.mrb[3].mxu0  ;;  %v1116_v17 = vpop.f32.mrb[3].mxu1 }
 0x186   : > { %v1361_v18 = vpack.c.bf16 %v1120_v10, %v1119_v6  ;;  %v1362_v19 = vpack.c.bf16 %v1122_v11, %v1121_v7  ;;  %v1124_v20 = vmax.f32 %v1030_v16, 0.0  ;;  %v1126_v21 = vmax.f32 %v1116_v17, 0.0 }
 0x188   : > { %1151 = vst [vmem:[%s347_s7] sm:$0xff] %v1361_v18  ;;  %1152 = vst [vmem:[%s347_s7 + $0x8] sm:$0xff] %v1362_v19  ;;  %v1363_v22 = vpack.c.bf16 %v1124_v20, %v1123_v14  ;;  %v1364_v23 = vpack.c.bf16 %v1126_v21, %v1125_v15 }
 0x18a   : > { %1153 = vst [vmem:[%s347_s7 + $0x10] sm:$0xff] %v1363_v22  ;;  %1154 = vst [vmem:[%s347_s7 + $0x18] sm:$0xff] %v1364_v23 }
 0x18f   : > { %v1177_v24 = vld [vmem:[%s347_s7] sm:$0xff]  ;;  %v1179_v25 = vld [vmem:[%s347_s7 + $0x8] sm:$0xff] }
 0x190   : > { %1178 = vst [vmem:[%s1164_s15] sm:$0xff] %v1177_v24  ;;  %1180 = vst [vmem:[%s1164_s15 + $0x8] sm:$0xff] %v1179_v25 }
 0x191   : > { %v1181_v26 = vld [vmem:[%s347_s7 + $0x10] sm:$0xff]  ;;  %v1183_v27 = vld [vmem:[%s347_s7 + $0x18] sm:$0xff] }
 0x192   : > { %1182 = vst [vmem:[%s1164_s15 + $0xd0] sm:$0xff] %v1181_v26  ;;  %1184 = vst [vmem:[%s1164_s15 + $0xd8] sm:$0xff] %v1183_v27 }
 0x193 PF: > { %p9_p10 = scmp.ge.s32.totalorder %s1606_s13, 15   ;;  %s1960_s9 = smov %s1567_s10 }
 0x194   : > { %s1961_s10 = smov %s1617_s16  ;;  %s1962_s11 = smov %s1606_s13 }
 0x195   :  { %11 = sbr.rel (!%p9_p10) target bundleno = 2 (0x2), region = 109 }

// kernel: alexnet_forward.10
= control target key start
LH: loop header
LB: loop body
LE: loop exit
PB: predicated region body
PF: predicated region fallthrough
CT: control target
= control target key end

     0   :  { %s473_s6 = smov 0   ;;  %s475_s7 = smov 0   ;;  %s584_s0 = inlined_call_operand.vmem [shape: bf16[9,25600], index: 0, kind: input, shape index: {}]   ;;  %s585_s1 = inlined_call_operand.vmem [shape: bf16[1,25600], index: 1, kind: output, shape index: {}]  }
   0x1   :  { %s477_s8 = smov 0  }
   0x2 LB: > { %s396_s9 = sadd.s32 4294967295, %s460_s8   ;;  %s490_s10 = sadd.s32 1, %s460_s8   ;;  %s460_s8 = sphi %s477_s8, %s596_s8   ;;  %s456_s7 = sphi %s475_s7, %s595_s7   ;;  %s452_s6 = sphi %s473_s6, %s594_s6  }
   0x3   : > { %s15_s11 = ssub.s32 %s460_s8, %s490_s10  ;;  %s18_s12 = sadd.s32 1, %s456_s7 }
   0x4   : > { %p16_p0 = scmp.eq.s32.totalorder %s15_s11, 0  ;;  %p25_p1 = scmp.ne.s32.totalorder %s456_s7, %s452_s6 }
   0x5   : > { %p26_p2 = scmp.eq.s32.totalorder %s460_s8, 0  ;;  %p399_p4 = scmp.ge.s32.totalorder %s460_s8, 25 }
   0x6   : > { %s499_s13 = scalar_select %p16_p0, %s456_s7, %s18_s12  }
   0x7   : > { %p27_p3 = por %p26_p2, %p25_p1  ;;  %77 = sbr.rel (%p399_p4) target bundleno = 22 (0x16), region = 16 }
   0xe   : > { %80 = sbr.rel (!%p27_p3) target bundleno = 22 (0x16), region = 20  ;;  %s82_s14 = sand.u32 (%p27_p3), 1, %s456_s7  }
   0xf   : > { %s412_s15 = sshll.u32 (%p27_p3), %s460_s8, 5  ;;  %s400_s16 = sshll.u32 (%p27_p3), %s82_s14, 6 }
  0x10   : > { %s87_s19 = scalar_lea.vmem (%p27_p3), %s584_s0, %s412_s15  ;;  %s84_s20 = scalar_lea.vmem (%p27_p3), [#allocation2], %s400_s16 }
  0x11   : > { %v100_v0 = vld [vmem:[%s87_s19] sm:$0xff] (%p27_p3)  ;;  %v102_v1 = vld [vmem:[%s87_s19 + $0x8] sm:$0xff] (%p27_p3)  ;;  %v104_v2 = vld [vmem:[%s87_s19 + $0x10] sm:$0xff] (%p27_p3) }
  0x12   : > { %101 = vst [vmem:[%s84_s20] sm:$0xff] (%p27_p3), %v100_v0  ;;  %103 = vst [vmem:[%s84_s20 + $0x8] sm:$0xff] (%p27_p3), %v102_v1  ;;  %v106_v3 = vld [vmem:[%s87_s19 + $0x18] sm:$0xff] (%p27_p3)  ;;  %v108_v4 = vld [vmem:[%s87_s19 + $0x320] sm:$0xff] (%p27_p3) }
  0x13   : > { %105 = vst [vmem:[%s84_s20 + $0x10] sm:$0xff] (%p27_p3), %v104_v2  ;;  %v110_v5 = vld [vmem:[%s87_s19 + $0x328] sm:$0xff] (%p27_p3)  ;;  %107 = vst [vmem:[%s84_s20 + $0x18] sm:$0xff] (%p27_p3), %v106_v3  ;;  %v112_v6 = vld [vmem:[%s87_s19 + $0x330] sm:$0xff] (%p27_p3) }
  0x14   : > { %109 = vst [vmem:[%s84_s20 + $0x20] sm:$0xff] (%p27_p3), %v108_v4  ;;  %111 = vst [vmem:[%s84_s20 + $0x28] sm:$0xff] (%p27_p3), %v110_v5  ;;  %v114_v7 = vld [vmem:[%s87_s19 + $0x338] sm:$0xff] (%p27_p3) }
  0x15   : > { %113 = vst [vmem:[%s84_s20 + $0x30] sm:$0xff] %v112_v6  ;;  %115 = vst [vmem:[%s84_s20 + $0x38] sm:$0xff] %v114_v7 }
  0x16 PF: > { %p403_p5 = scmp.ge.s32.totalorder %s460_s8, 1  ;;  %p120_p6 = scmp.lt.s32.totalorder %s460_s8, 26 }
  0x18   : > { %p121_p7 = pnand %p403_p5, %p120_p6 }
  0x19   : > { %s127_s21 = sand.u32 (!%p121_p7), 1, %s452_s6   ;;  %v263_v8 = vlaneseq (!%p121_p7)  ;;  %v462_v9 = vmov (!%p121_p7), 1966171168   ;;  %vm175_vm0 = vcmask (!%p121_p7), 1040384   ;;  %vm307_vm1 = vsmask.f32 (!%p121_p7), 256 }
  0x1a   : > { %124 = sbr.rel (%p121_p7) target bundleno = 63 (0x3f), region = 43  ;;  %s404_s22 = sshll.u32 (!%p121_p7), %s127_s21, 6  ;;  %v510_v10 = vunpack.c.l.s4 (!%p121_p7), %v462_v9  ;;  %vm309_vm2 = vcmask (!%p121_p7), 1041409   ;;  %vm310_vm3 = vsmask.f32 (!%p121_p7), 1280  ;;  %vm313_vm4 = vcmask (!%p121_p7), 1042434   ;;  %vm525_vm8 = vmand (!%p121_p7), %vm175_vm0, %vm307_vm1 }
  0x1b   : > { %s129_s23 = scalar_lea.vmem (!%p121_p7), [#allocation2], %s404_s22  ;;  %v513_v15 = vshrl.u32 (!%p121_p7), %v263_v8, 7  ;;  %vm314_vm5 = vsmask.f32 (!%p121_p7), 2304  ;;  %vm317_vm6 = vcmask (!%p121_p7), 1043459   ;;  %vm531_vm9 = vmand (!%p121_p7), %vm309_vm2, %vm310_vm3  ;;  %s543_s24 = sshll.u32 (!%p121_p7), %s396_s9, 3 }
  0x1c   : > { %v151_v11 = vld [vmem:[%s129_s23] sm:$0xff] (!%p121_p7)  ;;  %v152_v12 = vld [vmem:[%s129_s23 + $0x8] sm:$0xff] (!%p121_p7)  ;;  %v153_v13 = vld [vmem:[%s129_s23 + $0x10] sm:$0xff] (!%p121_p7)  ;;  %v262_v14 = vunpack.c.0.s8 (!%p121_p7), %v510_v10  ;;  %vm318_vm7 = vsmask.f32 (!%p121_p7), 3328  ;;  %p147_p8 = scmp.lt.s32.totalorder (!%p121_p7), %s543_s24, 199 }
  0x1d   : > { %v154_v16 = vld [vmem:[%s129_s23 + $0x18] sm:$0xff] (!%p121_p7)  ;;  %v155_v17 = vld [vmem:[%s129_s23 + $0x20] sm:$0x11] (!%p121_p7)  ;;  %v156_v18 = vld [vmem:[%s129_s23 + $0x28] sm:$0x11] (!%p121_p7)  ;;  %v159_v19 = vunpack.c.l.bf16 (!%p121_p7), %v151_v11  ;;  %v160_v20 = vunpack.c.h.bf16 (!%p121_p7), %v151_v11  ;;  %v161_v21 = vunpack.c.l.bf16 (!%p121_p7), %v152_v12  ;;  %v162_v22 = vunpack.c.h.bf16 (!%p121_p7), %v152_v12 }
  0x1e   : > { %v157_v23 = vld [vmem:[%s129_s23 + $0x30] sm:$0x11] (!%p121_p7)  ;;  %v158_v24 = vld [vmem:[%s129_s23 + $0x38] sm:$0x11] (!%p121_p7)  ;;  %v163_v25 = vunpack.c.l.bf16 (!%p121_p7), %v153_v13  ;;  %v164_v26 = vunpack.c.h.bf16 (!%p121_p7), %v153_v13  ;;  %v165_v27 = vunpack.c.l.bf16 (!%p121_p7), %v154_v16  ;;  %v166_v28 = vunpack.c.h.bf16 (!%p121_p7), %v154_v16  ;;  %vm312_vm10 = vmor (!%p121_p7), %vm531_vm9, %vm525_vm8 }
  0x1f   : > { %v167_v29 = vunpack.c.l.bf16 (!%p121_p7), %v155_v17  ;;  %v168_v30 = vunpack.c.h.bf16 (!%p121_p7), %v155_v17  ;;  %v169_v31 = vunpack.c.l.bf16 (!%p121_p7), %v156_v18  ;;  %v170_v32 = vunpack.c.h.bf16 (!%p121_p7), %v156_v18  ;;  %vm315_vm11 = vmand (!%p121_p7), %vm313_vm4, %vm314_vm5 }
  0x20   : > { %v171_v33 = vunpack.c.l.bf16 (!%p121_p7), %v157_v23  ;;  %v172_v34 = vunpack.c.h.bf16 (!%p121_p7), %v157_v23  ;;  %v173_v35 = vunpack.c.l.bf16 (!%p121_p7), %v158_v24  ;;  %v174_v36 = vunpack.c.h.bf16 (!%p121_p7), %v158_v24  ;;  %vm550_vm12 = vmor (!%p121_p7), %vm315_vm11, %vm312_vm10 }
  0x21   : > { %v176_v37 = vsel %vm175_vm0, %v167_v29, -inf  ;;  %v184_v38 = vsel %vm175_vm0, %v168_v30, -inf  ;;  %v192_v39 = vsel %vm175_vm0, %v169_v31, -inf  ;;  %v200_v40 = vsel %vm175_vm0, %v170_v32, -inf  ;;  %vm556_vm13 = vmand %vm317_vm6, %vm318_vm7  ;;  %s598_s24 = smov (!%p147_p8, %s543_s24), 199 }
  0x22   : > { %v177_v41 = vmax.f32 %v159_v19, %v176_v37  ;;  %v185_v42 = vmax.f32 %v160_v20, %v184_v38  ;;  %v193_v43 = vmax.f32 %v161_v21, %v192_v39  ;;  %v201_v44 = vmax.f32 %v162_v22, %v200_v40  ;;  %vm320_vm15 = vmor %vm556_vm13, %vm550_vm12  ;;  %s149_s27 = scalar_lea.vmem %s585_s1, %s598_s24 }
  0x23   : > { %v208_v45 = vsel %vm175_vm0, %v171_v33, -inf  ;;  %v216_v46 = vsel %vm175_vm0, %v172_v34, -inf  ;;  %v224_v47 = vsel %vm175_vm0, %v173_v35, -inf  ;;  %v232_v48 = vsel %vm175_vm0, %v174_v36, -inf }
  0x24   : > { %v178_v49 = vrot.slane %v177_v41, 4  ;;  %v186_v50 = vrot.slane %v185_v42, 4  ;;  %v194_v51 = vrot.slane %v193_v43, 4  ;;  %v202_v52 = vrot.slane %v201_v44, 4 }
  0x25   : > { %v209_v53 = vmax.f32 %v163_v25, %v208_v45  ;;  %v217_v54 = vmax.f32 %v164_v26, %v216_v46  ;;  %v225_v55 = vmax.f32 %v165_v27, %v224_v47  ;;  %v233_v56 = vmax.f32 %v166_v28, %v232_v48 }
  0x26   : > { %v179_v58 = vmax.f32 %v177_v41, %v178_v49  ;;  %v187_v59 = vmax.f32 %v185_v42, %v186_v50  ;;  %v195_v60 = vmax.f32 %v193_v43, %v194_v51  ;;  %v203_v61 = vmax.f32 %v201_v44, %v202_v52 }
  0x27   : > { %v210_v63 = vrot.slane %v209_v53, 4  ;;  %v218_v0 = vrot.slane %v217_v54, 4  ;;  %v226_v1 = vrot.slane %v225_v55, 4  ;;  %v234_v2 = vrot.slane %v233_v56, 4 }
  0x28   : > { %v180_v3 = vrot.slane %v179_v58, 2  ;;  %v188_v4 = vrot.slane %v187_v59, 2  ;;  %v196_v5 = vrot.slane %v195_v60, 2  ;;  %v204_v6 = vrot.slane %v203_v61, 2 }
  0x29   : > { %v211_v7 = vmax.f32 %v209_v53, %v210_v63  ;;  %v219_v8 = vmax.f32 %v217_v54, %v218_v0  ;;  %v227_v9 = vmax.f32 %v225_v55, %v226_v1  ;;  %v235_v11 = vmax.f32 %v233_v56, %v234_v2  ;;  %v337_v54 = vld [vmem:[%s149_s27] sm:$0xff] }
  0x2a   : > { %v181_v12 = vmax.f32 %v179_v58, %v180_v3  ;;  %v189_v13 = vmax.f32 %v187_v59, %v188_v4  ;;  %v197_v16 = vmax.f32 %v195_v60, %v196_v5  ;;  %v205_v17 = vmax.f32 %v203_v61, %v204_v6 }
  0x2b   : > { %v212_v18 = vrot.slane %v211_v7, 2  ;;  %v220_v19 = vrot.slane %v219_v8, 2  ;;  %v228_v20 = vrot.slane %v227_v9, 2  ;;  %v236_v21 = vrot.slane %v235_v11, 2 }
  0x2c   : > { %v182_v22 = vrot.slane %v181_v12, 1  ;;  %v190_v23 = vrot.slane %v189_v13, 1  ;;  %v198_v24 = vrot.slane %v197_v16, 1  ;;  %v206_v25 = vrot.slane %v205_v17, 1 }
  0x2d   : > { %v213_v26 = vmax.f32 %v211_v7, %v212_v18  ;;  %v221_v27 = vmax.f32 %v219_v8, %v220_v19  ;;  %v229_v28 = vmax.f32 %v227_v9, %v228_v20  ;;  %v237_v29 = vmax.f32 %v235_v11, %v236_v21 }
  0x2e   : > { %v183_v31 = vmax.f32 %v181_v12, %v182_v22  ;;  %v191_v32 = vmax.f32 %v189_v13, %v190_v23  ;;  %v199_v33 = vmax.f32 %v197_v16, %v198_v24  ;;  %v207_v34 = vmax.f32 %v205_v17, %v206_v25 }
  0x2f   : > { %v214_v36 = vrot.slane %v213_v26, 1  ;;  %v222_v37 = vrot.slane %v221_v27, 1  ;;  %v230_v38 = vrot.slane %v229_v28, 1  ;;  %v238_v39 = vrot.slane %v237_v29, 1 }
  0x30   : > { %v406_v40 = vpack.c.bf16 %v191_v32, %v183_v31  ;;  %v407_v41 = vpack.c.bf16 %v207_v34, %v199_v33  ;;  %v265_v42 = vsub.s32 %v262_v14, %v513_v15  ;;  %vm321_vm14 = vcmask 1044484  }
  0x31   : > { %v215_v43 = vmax.f32 %v213_v26, %v214_v36  ;;  %v223_v44 = vmax.f32 %v221_v27, %v222_v37  ;;  %v231_v45 = vmax.f32 %v229_v28, %v230_v38  ;;  %v239_v46 = vmax.f32 %v237_v29, %v238_v39 }
  0x32   : > { %v266_v47 = vrot.slane %v406_v40, %v265_v42  ;;  %v273_v48 = vrot.slane %v407_v41, %v265_v42  ;;  %vm322_vm0 = vsmask.f32 4352  ;;  %vm325_vm1 = vcmask 1045509  }
  0x33   : > { %v408_v49 = vpack.c.bf16 %v223_v44, %v215_v43  ;;  %v409_v50 = vpack.c.bf16 %v239_v46, %v231_v45  ;;  %vm323_vm2 = vmand %vm321_vm14, %vm322_vm0  ;;  %vm326_vm3 = vsmask.f32 5376  ;;  %vm329_vm5 = vcmask 1046534  }
  0x34   : > { %v288_v10 = vcombine.low %v266_v47, %v273_v48  ;;  %vm324_vm4 = vmor %vm323_vm2, %vm320_vm15  ;;  %vm330_vm6 = vsmask.f32 6400  ;;  %vm333_vm9 = vcmask 1047559   ;;  %vm334_vm10 = vsmask.f32 7424 }
  0x35   : > { %v280_v14 = vrot.slane %v408_v49, %v265_v42  ;;  %v287_v15 = vrot.slane %v409_v50, %v265_v42  ;;  %vm327_vm7 = vmand %vm325_vm1, %vm326_vm3 }
  0x36   : > { %vm328_vm8 = vmor %vm327_vm7, %vm324_vm4  ;;  %v296_v52 = vrot.slane %v288_v10, %v265_v42 }
  0x37   : > { %v289_v51 = vcombine.low %v280_v14, %v287_v15  ;;  %vm331_vm11 = vmand %vm329_vm5, %vm330_vm6 }
  0x38   : > { %vm332_vm12 = vmor %vm331_vm11, %vm328_vm8 }
  0x39   : > { %v303_v53 = vrot.slane %v289_v51, %v265_v42  ;;  %vm335_vm13 = vmand %vm333_vm9, %vm334_vm10 }
  0x3a   : > { %vm336_vm14 = vmor %vm335_vm13, %vm332_vm12 }
  0x3b   : > { %v304_v55 = vcombine.low %v296_v52, %v303_v53 }
  0x3d   : > { %v338_v56 = vsel %vm336_vm14, %v304_v55, %v337_v54 }
  0x3e   : > { %339 = vst [vmem:[%s149_s27] sm:$0xff] %v338_v56 }
  0x3f PF: > { %p8_p9 = scmp.ge.s32.totalorder %s490_s10, 27   ;;  %s594_s6 = smov %s456_s7 }
  0x40   : > { %s595_s7 = smov %s499_s13  ;;  %s596_s8 = smov %s490_s10 }
  0x41   :  { %10 = sbr.rel (!%p8_p9) target bundleno = 2 (0x2), region = 82 }

// kernel: squeeze.3
= control target key start
LH: loop header
LB: loop body
LE: loop exit
PB: predicated region body
PF: predicated region fallthrough
CT: control target
= control target key end

     0   :  { %s4800_s28 = smov 3  ;;  %s4805_s2 = smov 12  ;;  %vm499_vm0 = vcmask 1043458   ;;  %vm430_vm1 = vcmask 1046533   ;;  %vm434_vm2 = vcmask 1047559   ;;  %vm477_vm3 = vcmask 1045508   ;;  %s5858_s0 = inlined_call_operand.vmem [shape: bf16[25088], index: 0, kind: input, shape index: {}]   ;;  %s5859_s1 = inlined_call_operand.vmem [shape: bf16[16,2,28,28], index: 1, kind: output, shape index: {}]  }
   0x1   :  { %v4507_v0 = vld [vmem:[%s5858_s0 + $0x50] sm:$0xff]   ;;  %v4508_v1 = vld [vmem:[%s5858_s0 + $0x48] sm:$0xff]   ;;  %v3987_v2 = vld [vmem:[%s5858_s0 + $0x60] sm:$0xf]  ;;  %s4807_s3 = smov 96  ;;  %s4814_s6 = smov 192 }
   0x2   :  { %v4144_v3 = vunpack.c.l.bf16 %v4507_v0  ;;  %v4145_v4 = vunpack.c.h.bf16 %v4507_v0  ;;  %v4148_v5 = vunpack.c.l.bf16 %v4508_v1  ;;  %v4149_v6 = vunpack.c.h.bf16 %v4508_v1  ;;  %v4506_v7 = vld [vmem:[%s5858_s0 + $0x58] sm:$0xff]   ;;  %v4509_v8 = vld [vmem:[%s5858_s0 + $0x40] sm:$0xff]   ;;  %v4515_v14 = vld [vmem:[%s5858_s0 + $0x10] sm:$0xff]   ;;  %s4816_s7 = smov 3  ;;  %s4818_s8 = smov 192 }
   0x3   :  { %v4513_v9 = vld [vmem:[%s5858_s0 + $0x20] sm:$0xff]   ;;  %v17_v10 = vunpack.c.l.bf16 %v3987_v2  ;;  %v4140_v11 = vunpack.c.l.bf16 %v4506_v7  ;;  %v4141_v12 = vunpack.c.h.bf16 %v4506_v7  ;;  %v4153_v13 = vunpack.c.h.bf16 %v4509_v8  ;;  %v4516_v15 = vld [vmem:[%s5858_s0 + $0x8] sm:$0xff]   ;;  %v4510_v20 = vld [vmem:[%s5858_s0 + $0x38] sm:$0xff]   ;;  %s4820_s9 = smov 3  ;;  %s4822_s10 = smov 3 }
   0x4   :  { %v4183_v16 = vld [vmem:[%s5858_s0] sm:$0xff]   ;;  %68 = vst [vmem:[#allocation1 + $0xa8] sm:$0xff] %v4145_v4  ;;  %84 = vst [vmem:[#allocation1 + $0xa0] sm:$0xff] %v4144_v3  ;;  %v4168_v17 = vunpack.c.l.bf16 %v4513_v9  ;;  %v4169_v18 = vunpack.c.h.bf16 %v4513_v9  ;;  %v4176_v19 = vunpack.c.l.bf16 %v4515_v14  ;;  %v4511_v21 = vld [vmem:[%s5858_s0 + $0x30] sm:$0xff]   ;;  %v4177_v22 = vunpack.c.h.bf16 %v4515_v14  ;;  %s4824_s11 = smov 96  ;;  %s4826_s12 = smov 3 }
   0x5   :  { %100 = vst [vmem:[#allocation1 + $0x98] sm:$0xff] %v4149_v6  ;;  %116 = vst [vmem:[#allocation1 + $0x90] sm:$0xff] %v4148_v5  ;;  %v4180_v23 = vunpack.c.l.bf16 %v4516_v15  ;;  %v4181_v24 = vunpack.c.h.bf16 %v4516_v15  ;;  %v4184_v25 = vunpack.c.l.bf16 %v4183_v16  ;;  %v4512_v26 = vld [vmem:[%s5858_s0 + $0x28] sm:$0xff]   ;;  %v4185_v27 = vunpack.c.h.bf16 %v4183_v16  ;;  %v4514_v29 = vld [vmem:[%s5858_s0 + $0x18] sm:$0xff]   ;;  %s4812_s0 = smov 48  ;;  %s4828_s13 = smov 12 }
   0x6   :  { %20 = vst [vmem:[#allocation1 + $0xc0] sm:$0xff] %v17_v10  ;;  %36 = vst [vmem:[#allocation1 + $0xb8] sm:$0xff] %v4141_v12  ;;  %v4152_v28 = vunpack.c.l.bf16 %v4509_v8  ;;  %v4156_v30 = vunpack.c.l.bf16 %v4510_v20  ;;  %v4157_v31 = vunpack.c.h.bf16 %v4510_v20  ;;  %v4160_v32 = vunpack.c.l.bf16 %v4511_v21  ;;  %s4726_s14 = smov 120   ;;  %s4833_s15 = smov 3 }
   0x7   :  { %52 = vst [vmem:[#allocation1 + $0xb0] sm:$0xff] %v4140_v11  ;;  %132 = vst [vmem:[#allocation1 + $0x88] sm:$0xff] %v4153_v13  ;;  %v4161_v33 = vunpack.c.h.bf16 %v4511_v21  ;;  %v4164_v34 = vunpack.c.l.bf16 %v4512_v26  ;;  %v4165_v35 = vunpack.c.h.bf16 %v4512_v26  ;;  %v4172_v36 = vunpack.c.l.bf16 %v4514_v29  ;;  %s4836_s16 = smov 192  ;;  %s4727_s17 = smov 124  }
   0x8   :  { %276 = vst [vmem:[#allocation1 + $0x40] sm:$0xff] %v4168_v17  ;;  %340 = vst [vmem:[#allocation1 + $0x20] sm:$0xff] %v4176_v19  ;;  %v4173_v37 = vunpack.c.h.bf16 %v4514_v29  ;;  %vm482_vm4 = vcmask 1047558   ;;  %vm512_vm5 = vcmask 1046531   ;;  %vm559_vm6 = vcmask 1045506   ;;  %s675_s18 = smov 192 }
   0x9   :  { %260 = vst [vmem:[#allocation1 + $0x48] sm:$0xff] %v4169_v18  ;;  %324 = vst [vmem:[#allocation1 + $0x28] sm:$0xff] %v4177_v22  ;;  %vm587_vm7 = vcmask 1046530   ;;  %vm450_vm8 = vcmask 1044482   ;;  %vm537_vm9 = vcmask 1046532   ;;  %s4728_s19 = smov 116  }
   0xa   :  { %356 = vst [vmem:[#allocation1 + $0x18] sm:$0xff] %v4181_v24  ;;  %372 = vst [vmem:[#allocation1 + $0x10] sm:$0xff] %v4180_v23  ;;  %s653_s20 = smov 3  ;;  %vm743_vm10 = vcmask 1045507   ;;  %s746_s21 = smov 192  ;;  %vm949_vm11 = vcmask 1043459  }
   0xb   :  { %400 = vst [vmem:[#allocation1] sm:$0xff] %v4184_v25  ;;  %387 = vst [vmem:[#allocation1 + $0x8] sm:$0xff] %v4185_v27  ;;  %v458_v3 = vld [vmem:[#allocation1 + $0x9f] sm:$0x80]   ;;  %s713_s22 = smov 3  ;;  %s716_s23 = smov 12 }
   0xc   :  { %148 = vst [vmem:[#allocation1 + $0x80] sm:$0xff] %v4152_v28  ;;  %164 = vst [vmem:[#allocation1 + $0x78] sm:$0xff] %v4157_v31  ;;  %v576_v38 = vld [vmem:[#allocation1 + $0x96] ss:$7 sm:$0xf]   ;;  %s775_s24 = smov 3 }
   0xd   :  { %180 = vst [vmem:[#allocation1 + $0x70] sm:$0xff] %v4156_v30  ;;  %196 = vst [vmem:[#allocation1 + $0x68] sm:$0xff] %v4161_v33  ;;  %577 = vrot.lane.b32.xlu0 %v576_v38, %s4726_s14  ;;  %v495_v39 = vld [vmem:[#allocation1 + $0xbb] ss:$7 sm:%s4800_s28]   ;;  %s4729_s25 = smov 112   ;;  %s760_s26 = smov 3 }
   0xe   :  { %212 = vst [vmem:[#allocation1 + $0x60] sm:$0xff] %v4160_v32  ;;  %228 = vst [vmem:[#allocation1 + $0x58] sm:$0xff] %v4165_v35  ;;  %v498_v40 = vld [vmem:[#allocation1 + $0x8a] ss:$7 sm:%s4805_s2]   ;;  %v556_v45 = vld [vmem:[#allocation1 + $0x88] ss:$7 sm:%s4816_s7]  }
   0xf   :  { %244 = vst [vmem:[#allocation1 + $0x50] sm:$0xff] %v4164_v34  ;;  %308 = vst [vmem:[#allocation1 + $0x30] sm:$0xff] %v4172_v36  ;;  %v500_v41 = vsel %vm499_vm0, %v498_v40, %v495_v39  ;;  %v433_v42 = vld [vmem:[#allocation1 + $0x3d] sm:$0x80]   ;;  %v540_v14 = vld [vmem:[#allocation1 + $0xab] sm:$0x80]  }
  0x10   :  { %292 = vst [vmem:[#allocation1 + $0x38] sm:$0xff] %v4173_v37  ;;  %501 = vrot.lane.b32.xlu1 %v500_v41, %s4727_s17  ;;  %v563_v48 = vld [vmem:[#allocation1 + $0x8f] ss:$7 sm:%s4818_s8]   ;;  %v610_v21 = vld [vmem:[#allocation1 + $0xb7] sm:$0x80]   ;;  %s763_s27 = smov 12 }
  0x11   :  { %v426_v43 = vld [vmem:[#allocation1 + $0x13] ss:$7 sm:$0x1f]   ;;  %v509_v44 = vld [vmem:[#allocation1 + $0x1f] ss:$7 sm:$0x7]  }
  0x12   :  { %v429_v46 = vld [vmem:[#allocation1 - $0x1e] ss:$7 sm:%s4807_s3]   ;;  %v511_v52 = vld [vmem:[#allocation1 - $0x12] ss:$7 sm:$0x78]   ;;  %s814_s28 = smov 3 }
  0x13   :  { %v481_v47 = vld [vmem:[#allocation1 + $0x83] ss:$7 sm:%s4814_s6]   ;;  %v431_v50 = vsel %vm430_vm1, %v429_v46, %v426_v43  ;;  %v513_v55 = vsel %vm512_vm5, %v511_v52, %v509_v44  ;;  %v586_v61 = vld [vmem:[#allocation1 - $0x6] ss:$7 sm:$0x7c]   ;;  %s821_s29 = smov 192 }
  0x14   :  { %v584_v49 = vld [vmem:[#allocation1 + $0x2b] ss:$-42 sm:%s4820_s9]   ;;  %v435_v53 = vsel %vm434_vm2, %v433_v42, %v431_v50  ;;  %v700_v37 = vld [vmem:[#allocation1 + $0x43] sm:$0x80]   ;;  %s872_s30 = smov 192  ;;  %s4730_s2 = smov 108  }
  0x15   :  { %v473_v51 = vld [vmem:[#allocation1 + $0x7c] ss:$7 sm:$0xf]   ;;  %436 = vrot.lane.b32.xlu0 %v435_v53, %s4727_s17  ;;  %v558_v60 = vld [vmem:[#allocation1 + $0x57] ss:$7 sm:$0x3c]   ;;  %v588_v0 = vsel %vm587_vm7, %v586_v61, %v584_v49 }
  0x16   :  { %v476_v54 = vld [vmem:[#allocation1 + $0x4b] ss:$7 sm:%s4812_s0]   ;;  %v515_v56 = vld [vmem:[#allocation1 + $0x49] sm:$0x80]   ;;  %v560_v63 = vsel %vm559_vm6, %v558_v60, %v556_v45  ;;  %v626_v19 = vld [vmem:[#allocation1 + $0x6a] ss:$7 sm:%s4836_s16]  }
  0x17   :  { %v590_v57 = vld [vmem:[#allocation1 + $0x55] sm:$0x80]   ;;  %v478_v58 = vsel %vm477_vm3, %v476_v54, %v473_v51  ;;  %v517_v59 = vsel %vm434_vm2, %v515_v56, %v513_v55  ;;  %v447_v1 = vld [vmem:[#allocation1 + $0x75] ss:$-42 sm:%s4822_s10]   ;;  %v565_v4 = vsel %vm482_vm4, %v563_v48, %v560_v63  ;;  %v532_v8 = vld [vmem:[#allocation1 + $0xb2] ss:$-42 sm:%s4828_s13]  }
  0x18   :  { %v483_v62 = vsel %vm482_vm4, %v481_v47, %v478_v58  ;;  %v449_v2 = vld [vmem:[#allocation1 + $0x44] ss:$7 sm:$0x1c]   ;;  %v454_v6 = vld [vmem:[#allocation1 + $0x13] ss:$7 sm:%s4824_s11]   ;;  %v4611_v9 = vpack.i.bf16 %v565_v4, %v517_v59  ;;  %v592_v10 = vsel %vm434_vm2, %v590_v57, %v588_v0  ;;  %s850_s3 = smov 3 }
  0x19   :  { %484 = vrot.lane.b32.xlu1 %v483_v62, %s4727_s17  ;;  %v451_v5 = vsel %vm450_vm8, %v449_v2, %v447_v1  ;;  %v529_v7 = vld [vmem:[#allocation1 + $0x81] ss:$-42 sm:%s4826_s12]   ;;  %v654_v29 = vld [vmem:[#allocation1 + $0x68] ss:$-42 sm:%s653_s20]   ;;  %v801_v63 = vld [vmem:[#allocation1 + $0xb1] sm:$0x80]  }
  0x1a   :  { %v456_v11 = vsel %vm430_vm1, %v454_v6, %v451_v5  ;;  %v534_v12 = vsel %vm499_vm0, %v532_v8, %v529_v7  ;;  %v536_v13 = vld [vmem:[#allocation1 + $0x1f] ss:$7 sm:$0x70]   ;;  %v604_v16 = vld [vmem:[#allocation1 + $0x8d] ss:$-91 sm:%s4833_s15]   ;;  %4612 = vrot.lane.b32.xlu0 %v4611_v9, %s4726_s14  ;;  %s4731_s4 = smov 104  }
  0x1b   :  { %v538_v15 = vsel %vm537_vm9, %v536_v13, %v534_v12  ;;  %v606_v17 = vld [vmem:[#allocation1 + $0x2b] ss:$7 sm:$0x7c]   ;;  %v623_v18 = vld [vmem:[#allocation1 + $0x63] ss:$7 sm:$0x3f]   ;;  %v460_v20 = vsel %vm434_vm2, %v458_v3, %v456_v11 }
  0x1c   :  { %v637_v22 = vld [vmem:[#allocation1 + $0xa2] ss:$7 sm:$0xf]   ;;  %v542_v23 = vsel %vm434_vm2, %v540_v14, %v538_v15  ;;  %v608_v24 = vsel %vm587_vm7, %v606_v17, %v604_v16  ;;  %v628_v25 = vsel %vm482_vm4, %v626_v19, %v623_v18  ;;  %v673_v26 = vld [vmem:[#allocation1 + $0x6f] ss:$7 sm:$0x3f]  }
  0x1d   :  { %593 = vrot.lane.b32.xlu1 %v592_v10, %s4728_s19  ;;  %v676_v27 = vld [vmem:[#allocation1 + $0x76] ss:$7 sm:%s675_s18]   ;;  %v644_v28 = vld [vmem:[#allocation1 + $0x6] ss:$7 sm:$0xff]   ;;  %v612_v31 = vsel %vm434_vm2, %v610_v21, %v608_v24  ;;  %v4616_v32 = vpack.i.bf16 %v637_v22, %v628_v25  ;;  %v725_v59 = vld [vmem:[#allocation1 + $0xa5] sm:$0x80]  }
  0x1e   :  { %461 = vrot.lane.b32.xlu0 %v460_v20, %s4727_s17  ;;  %v656_v30 = vld [vmem:[#allocation1 + $0x37] ss:$7 sm:$0x7c]   ;;  %v678_v33 = vsel %vm482_vm4, %v676_v27, %v673_v26  ;;  %v660_v34 = vld [vmem:[#allocation1 + $0x92] sm:$0x80]   ;;  %s893_s5 = smov 192 }
  0x1f   :  { %v694_v35 = vld [vmem:[#allocation1 + $0x19] ss:$7 sm:$0xf]   ;;  %v696_v36 = vld [vmem:[#allocation1 - $0x18] ss:$7 sm:$0x70]   ;;  %v658_v39 = vsel %vm587_vm7, %v656_v30, %v654_v29  ;;  %v4621_v43 = vpack.i.bf16 %v678_v33, %v644_v28 }
  0x20   :  { %v740_v38 = vld [vmem:[#allocation1 + $0x82] ss:$7 sm:$0x7]   ;;  %v698_v40 = vsel %vm537_vm9, %v696_v36, %v694_v35  ;;  %v742_v41 = vld [vmem:[#allocation1 + $0x51] ss:$7 sm:$0x38]   ;;  %v662_v47 = vsel %vm434_vm2, %v660_v34, %v658_v39 }
  0x21   :  { %543 = vrot.lane.b32.xlu1 %v542_v23, %s4726_s14  ;;  %v747_v42 = vld [vmem:[#allocation1 + $0x89] ss:$7 sm:%s746_s21]   ;;  %v744_v44 = vsel %vm743_vm10, %v742_v41, %v740_v38  ;;  %v717_v46 = vld [vmem:[#allocation1 + $0x4a] ss:$7 sm:%s716_s23]   ;;  %v702_v48 = vsel %vm434_vm2, %v700_v37, %v698_v40  ;;  %v782_v61 = vld [vmem:[#allocation1 + $0x4f] sm:$0x80]  }
  0x22   :  { %613 = vrot.lane.b32.xlu0 %v612_v31, %s4728_s19  ;;  %v714_v45 = vld [vmem:[#allocation1 + $0x7b] ss:$-42 sm:%s713_s22]   ;;  %v749_v49 = vsel %vm482_vm4, %v747_v42, %v744_v44  ;;  %v797_v55 = vld [vmem:[#allocation1 + $0x25] ss:$7 sm:$0x78]   ;;  %s905_s0 = smov 3 }
  0x23   :  { %v721_v50 = vld [vmem:[#allocation1 + $0x19] ss:$7 sm:$0x70]   ;;  %v776_v51 = vld [vmem:[#allocation1 + $0x25] ss:$7 sm:%s775_s24]   ;;  %v719_v52 = vsel %vm499_vm0, %v717_v46, %v714_v45  ;;  %v4626_v57 = vpack.i.bf16 %v749_v49, %v702_v48  ;;  %s912_s6 = smov 192 }
  0x24   :  { %v778_v53 = vld [vmem:[#allocation1 - $0xc] ss:$7 sm:$0x7c]   ;;  %v795_v54 = vld [vmem:[#allocation1 + $0x87] ss:$-42 sm:$0x7]   ;;  %v723_v58 = vsel %vm537_vm9, %v721_v50, %v719_v52 }
  0x25   :  { %4617 = vrot.lane.b32.xlu1 %v4616_v32, %s4728_s19  ;;  %v687_v56 = vld [vmem:[#allocation1 + $0xae] ss:$7 sm:$0xf]   ;;  %v780_v60 = vsel %vm587_vm7, %v778_v53, %v776_v51  ;;  %v799_v62 = vsel %vm512_vm5, %v797_v55, %v795_v54  ;;  %v764_v1 = vld [vmem:[#allocation1 + $0x90] ss:$7 sm:%s763_s27]   ;;  %v727_v4 = vsel %vm434_vm2, %v725_v59, %v723_v58  ;;  %s928_s7 = smov 96 }
  0x26   :  { %4622 = vrot.lane.b32.xlu0 %v4621_v43, %s4729_s25  ;;  %v761_v0 = vld [vmem:[#allocation1 + $0xc1] ss:$-42 sm:%s760_s26]   ;;  %v815_v2 = vld [vmem:[#allocation1 + $0x8e] ss:$-42 sm:%s814_s28]   ;;  %v784_v5 = vsel %vm434_vm2, %v782_v61, %v780_v60  ;;  %v803_v6 = vsel %vm434_vm2, %v801_v63, %v799_v62  ;;  %v857_v21 = vld [vmem:[#allocation1 + $0x8c] sm:$0x80]  }
  0x27   :  { %v817_v3 = vld [vmem:[#allocation1 + $0x5d] ss:$7 sm:$0x3c]   ;;  %v766_v7 = vsel %vm499_vm0, %v764_v1, %v761_v0  ;;  %v822_v8 = vld [vmem:[#allocation1 + $0x1bb] ss:$-42 sm:%s821_s29]   ;;  %v4631_v12 = vpack.i.bf16 %v803_v6, %v784_v5  ;;  %s1005_s8 = smov 3 }
  0x28   :  { %v819_v9 = vsel %vm559_vm6, %v817_v3, %v815_v2  ;;  %v870_v10 = vld [vmem:[#allocation1 + $0x69] ss:$7 sm:$0x3f]   ;;  %v841_v14 = vld [vmem:[#allocation1] ss:$7 sm:$0xff]   ;;  %s4732_s9 = smov 100  }
  0x29   :  { %663 = vrot.lane.b32.xlu1 %v662_v47, %s4729_s25  ;;  %v873_v11 = vld [vmem:[#allocation1 + $0x70] ss:$7 sm:%s872_s30]   ;;  %v824_v13 = vsel %vm482_vm4, %v822_v8, %v819_v9  ;;  %v853_v17 = vld [vmem:[#allocation1 + $0x31] ss:$7 sm:$0x7c]   ;;  %s978_s10 = smov 3 }
  0x2a   :  { %688 = vrot.lane.b32.xlu0 %v687_v56, %s4729_s25  ;;  %v875_v15 = vsel %vm482_vm4, %v873_v11, %v870_v10  ;;  %v851_v16 = vld [vmem:[#allocation1 + $0x62] ss:$-42 sm:%s850_s3]   ;;  %v884_v22 = vld [vmem:[#allocation1 + $0xa8] ss:$7 sm:$0xf]   ;;  %s981_s11 = smov 12 }
  0x2b   :  { %v835_v18 = vld [vmem:[#allocation1 + $0x9c] ss:$7 sm:$0xf]   ;;  %v4636_v19 = vpack.i.bf16 %v875_v15, %v841_v14  ;;  %v855_v20 = vsel %vm587_vm7, %v853_v17, %v851_v16  ;;  %v891_v23 = vld [vmem:[#allocation1 + $0xc] ss:$7 sm:$0x3f]  }
  0x2c   :  { %v894_v24 = vld [vmem:[#allocation1 - $0x14b] ss:$56 sm:%s893_s5]   ;;  %v906_v25 = vld [vmem:[#allocation1 + $0x6e] ss:$-42 sm:%s905_s0]   ;;  %v859_v27 = vsel %vm434_vm2, %v857_v21, %v855_v20  ;;  %s1012_s12 = smov 192  ;;  %s4733_s13 = smov 96  }
  0x2d   :  { %4627 = vrot.lane.b32.xlu1 %v4626_v57, %s4730_s2  ;;  %v908_v26 = vld [vmem:[#allocation1 + $0x3d] ss:$7 sm:$0x3c]   ;;  %v926_v29 = vld [vmem:[#allocation1 + $0x75] ss:$7 sm:$0x1f]   ;;  %v896_v36 = vsel %vm482_vm4, %v894_v24, %v891_v23 }
  0x2e   :  { %728 = vrot.lane.b32.xlu0 %v727_v4, %s4730_s2  ;;  %v913_v28 = vld [vmem:[#allocation1 - $0x240] ss:$105 sm:%s912_s6]   ;;  %v961_v32 = vld [vmem:[#allocation1 - $0x12] ss:$7 sm:$0x78]   ;;  %v910_v33 = vsel %vm559_vm6, %v908_v26, %v906_v25  ;;  %s1033_s14 = smov 3 }
  0x2f   :  { %v929_v30 = vld [vmem:[#allocation1 - $0xd4] ss:$63 sm:%s928_s7]   ;;  %v915_v39 = vsel %vm482_vm4, %v913_v28, %v910_v33  ;;  %v933_v41 = vld [vmem:[#allocation1 + $0xa6] sm:$0x80]   ;;  %v965_v43 = vld [vmem:[#allocation1 + $0x49] sm:$0x80]  }
  0x30   :  { %v959_v31 = vld [vmem:[#allocation1 + $0x1f] ss:$7 sm:$0x7]   ;;  %v1006_v34 = vld [vmem:[#allocation1 + $0x88] ss:$7 sm:%s1005_s8]   ;;  %v931_v40 = vsel %vm430_vm1, %v929_v30, %v926_v29  ;;  %s1053_s15 = smov 3 }
  0x31   :  { %767 = vrot.lane.b32.xlu1 %v766_v7, %s4730_s2  ;;  %v1008_v35 = vld [vmem:[#allocation1 + $0x57] ss:$7 sm:$0x3c]   ;;  %v963_v42 = vsel %vm512_vm5, %v961_v32, %v959_v31  ;;  %v1013_v45 = vld [vmem:[#allocation1 + $0x8f] ss:$7 sm:%s1012_s12]   ;;  %v935_v50 = vsel %vm434_vm2, %v933_v41, %v931_v40  ;;  %s1075_s16 = smov 192 }
  0x32   :  { %4632 = vrot.lane.b32.xlu0 %v4631_v12, %s4731_s4  ;;  %v979_v37 = vld [vmem:[#allocation1 + $0x81] ss:$-42 sm:%s978_s10]   ;;  %v982_v38 = vld [vmem:[#allocation1 + $0xb2] ss:$-42 sm:%s981_s11]   ;;  %v1010_v44 = vsel %vm559_vm6, %v1008_v35, %v1006_v34  ;;  %v948_v47 = vld [vmem:[#allocation1 + $0x95] sm:$0x8]   ;;  %v967_v51 = vsel %vm434_vm2, %v965_v43, %v963_v42 }
  0x33   :  { %v946_v46 = vld [vmem:[#allocation1 + $0xb4] ss:$7 sm:$0x7]   ;;  %v984_v48 = vsel %vm499_vm0, %v982_v38, %v979_v37  ;;  %v1015_v52 = vsel %vm482_vm4, %v1013_v45, %v1010_v44  ;;  %v990_v55 = vld [vmem:[#allocation1 + $0xab] sm:$0x80]   ;;  %s1125_s17 = smov 192 }
  0x34   :  { %v986_v49 = vld [vmem:[#allocation1 + $0x1f] ss:$7 sm:$0x70]   ;;  %v950_v53 = vsel %vm949_vm11, %v948_v47, %v946_v46  ;;  %v4641_v56 = vpack.i.bf16 %v1015_v52, %v967_v51  ;;  %v1034_v57 = vld [vmem:[#allocation1 + $0x2b] ss:$-42 sm:%s1033_s14]   ;;  %s4734_s18 = smov 92  }
  0x35   :  { %825 = vrot.lane.b32.xlu1 %v824_v13, %s4731_s4  ;;  %v988_v54 = vsel %vm537_vm9, %v986_v49, %v984_v48  ;;  %v1036_v58 = vld [vmem:[#allocation1 - $0x6] ss:$7 sm:$0x7c]   ;;  %v1040_v59 = vld [vmem:[#allocation1 + $0x55] sm:$0x80]   ;;  %s1103_s19 = smov 3 }
  0x36   :  { %836 = vrot.lane.b32.xlu0 %v835_v18, %s4731_s4  ;;  %v992_v60 = vsel %vm434_vm2, %v990_v55, %v988_v54  ;;  %v1054_v61 = vld [vmem:[#allocation1 + $0x8d] ss:$-91 sm:%s1053_s15]   ;;  %v1056_v62 = vld [vmem:[#allocation1 + $0x2b] ss:$7 sm:$0x7c]   ;;  %v1038_v63 = vsel %vm587_vm7, %v1036_v58, %v1034_v57  ;;  %s1146_s20 = smov 96 }
  0x37   :  { %v1073_v0 = vld [vmem:[#allocation1 + $0x63] ss:$7 sm:$0x3f]   ;;  %v1026_v2 = vld [vmem:[#allocation1 + $0x96] ss:$7 sm:$0xf]   ;;  %v1042_v5 = vsel %vm434_vm2, %v1040_v59, %v1038_v63  ;;  %v1058_v6 = vsel %vm587_vm7, %v1056_v62, %v1054_v61 }
  0x38   :  { %v1076_v1 = vld [vmem:[#allocation1 + $0x6a] ss:$7 sm:%s1075_s16]   ;;  %v1060_v3 = vld [vmem:[#allocation1 + $0xb7] sm:$0x80]   ;;  %v1126_v9 = vld [vmem:[#allocation1 + $0x76] ss:$7 sm:%s1125_s17]  }
  0x39   :  { %4637 = vrot.lane.b32.xlu1 %v4636_v19, %s4732_s9  ;;  %v1087_v4 = vld [vmem:[#allocation1 + $0xa2] ss:$7 sm:$0xf]   ;;  %v1078_v7 = vsel %vm482_vm4, %v1076_v1, %v1073_v0  ;;  %v1123_v8 = vld [vmem:[#allocation1 + $0x6f] ss:$7 sm:$0x3f]   ;;  %v1062_v12 = vsel %vm434_vm2, %v1060_v3, %v1058_v6 }
  0x3a   :  { %860 = vrot.lane.b32.xlu0 %v859_v27, %s4732_s9  ;;  %v1104_v10 = vld [vmem:[#allocation1 + $0x68] ss:$-42 sm:%s1103_s19]   ;;  %s4735_s21 = smov 88   ;;  %v4646_v13 = vpack.i.bf16 %v1087_v4, %v1078_v7  ;;  %v1128_v15 = vsel %vm482_vm4, %v1126_v9, %v1123_v8  ;;  %s1164_s22 = smov 3  ;;  %v1110_v16 = vld [vmem:[#allocation1 + $0x92] sm:$0x80]  }
  0x3b   :  { %v1106_v11 = vld [vmem:[#allocation1 + $0x37] ss:$7 sm:$0x7c]   ;;  %v1094_v14 = vld [vmem:[#allocation1 + $0x6] ss:$7 sm:$0xff]   ;;  %s1171_s23 = smov 96 }
  0x3c   :  { %v1108_v17 = vsel %vm587_vm7, %v1106_v11, %v1104_v10  ;;  %v1144_v18 = vld [vmem:[#allocation1 + $0x12] ss:$7 sm:$0x1f]   ;;  %s1193_s24 = smov 48  ;;  %v4651_v20 = vpack.i.bf16 %v1128_v15, %v1094_v14  ;;  %s1227_s25 = smov 3  ;;  %vm402_vm12 = vcmask 228352  }
  0x3d   :  { %885 = vrot.lane.b32.xlu1 %v884_v22, %s4732_s9  ;;  %v1147_v19 = vld [vmem:[#allocation1 - $0x1f] ss:$7 sm:%s1146_s20]   ;;  %v1167_v22 = vld [vmem:[#allocation1 + $0x43] ss:$7 sm:$0x1c]   ;;  %v1112_v25 = vsel %vm434_vm2, %v1110_v16, %v1108_v17  ;;  %s1198_s26 = smov 192 }
  0x3e   :  { %897 = vrot.lane.b32.xlu0 %v896_v36, %s4733_s13  ;;  %v1165_v21 = vld [vmem:[#allocation1 + $0x74] ss:$-42 sm:%s1164_s22]   ;;  %v1151_v23 = vld [vmem:[#allocation1 + $0x3c] sm:$0x80]   ;;  %v1149_v28 = vsel %vm430_vm1, %v1147_v19, %v1144_v18  ;;  %s4736_s27 = smov 84   ;;  %s1212_s28 = smov 3 }
  0x3f   :  { %v1172_v24 = vld [vmem:[#allocation1 + $0x12] ss:$7 sm:%s1171_s23]   ;;  %v1191_v26 = vld [vmem:[#allocation1 + $0x7b] ss:$7 sm:$0xf]   ;;  %v1169_v29 = vsel %vm450_vm8, %v1167_v22, %v1165_v21  ;;  %v1153_v35 = vsel %vm434_vm2, %v1151_v23, %v1149_v28  ;;  %s1215_s29 = smov 12 }
  0x40   :  { %v1194_v27 = vld [vmem:[#allocation1 + $0x4a] ss:$7 sm:%s1193_s24]   ;;  %v1228_v30 = vld [vmem:[#allocation1 + $0x25] ss:$7 sm:%s1227_s25]   ;;  %v1174_v36 = vsel %vm430_vm1, %v1172_v24, %v1169_v29  ;;  %s1266_s30 = smov 3  ;;  %s4737_s2 = smov 80  }
  0x41   :  { %916 = vrot.lane.b32.xlu1 %v915_v39, %s4733_s13  ;;  %v1230_v31 = vld [vmem:[#allocation1 - $0xc] ss:$7 sm:$0x7c]   ;;  %v1247_v32 = vld [vmem:[#allocation1 + $0x87] ss:$-42 sm:$0x7]   ;;  %v1196_v39 = vsel %vm477_vm3, %v1194_v27, %v1191_v26 }
  0x42   :  { %936 = vrot.lane.b32.xlu0 %v935_v50, %s4733_s13  ;;  %v1249_v33 = vld [vmem:[#allocation1 + $0x25] ss:$7 sm:$0x78]   ;;  %v1137_v34 = vld [vmem:[#allocation1 + $0xae] ss:$7 sm:$0xf]   ;;  %v1232_v40 = vsel %vm587_vm7, %v1230_v31, %v1228_v30 }
  0x43   :  { %v1176_v37 = vld [vmem:[#allocation1 + $0x9e] sm:$0x80]   ;;  %v1234_v41 = vld [vmem:[#allocation1 + $0x4f] sm:$0x80]   ;;  %v1251_v42 = vsel %vm512_vm5, %v1249_v33, %v1247_v32  ;;  %v1253_v43 = vld [vmem:[#allocation1 + $0xb1] sm:$0x80]  }
  0x44   :  { %v1199_v38 = vld [vmem:[#allocation1 + $0x82] ss:$7 sm:%s1198_s26]   ;;  %v1178_v44 = vsel %vm434_vm2, %v1176_v37, %v1174_v36  ;;  %v1213_v46 = vld [vmem:[#allocation1 + $0xba] ss:$7 sm:%s1212_s28]   ;;  %v1236_v48 = vsel %vm434_vm2, %v1234_v41, %v1232_v40  ;;  %v1255_v49 = vsel %vm434_vm2, %v1253_v43, %v1251_v42  ;;  %s1273_s3 = smov 192  ;;  %s1324_s4 = smov 192 }
  0x45   :  { %951 = vrot.lane.b32.xlu1 %v950_v53, %s4733_s13  ;;  %v1201_v45 = vsel %vm482_vm4, %v1199_v38, %v1196_v39  ;;  %v1216_v47 = vld [vmem:[#allocation1 + $0x89] ss:$7 sm:%s1215_s29]   ;;  %v1269_v51 = vld [vmem:[#allocation1 + $0x5d] ss:$7 sm:$0x3c]   ;;  %v4656_v53 = vpack.i.bf16 %v1255_v49, %v1236_v48  ;;  %s1302_s5 = smov 3 }
  0x46   :  { %4642 = vrot.lane.b32.xlu0 %v4641_v56, %s4734_s18  ;;  %v1267_v50 = vld [vmem:[#allocation1 + $0x8e] ss:$-42 sm:%s1266_s30]   ;;  %v1218_v52 = vsel %vm499_vm0, %v1216_v47, %v1213_v46  ;;  %v1274_v54 = vld [vmem:[#allocation1 + $0x1bb] ss:$-42 sm:%s1273_s3]   ;;  %s4738_s0 = smov 76   ;;  %s1345_s6 = smov 192 }
  0x47   :  { %v1271_v55 = vsel %vm559_vm6, %v1269_v51, %v1267_v50  ;;  %v1322_v56 = vld [vmem:[#allocation1 + $0x69] ss:$7 sm:$0x3f]   ;;  %v1305_v59 = vld [vmem:[#allocation1 + $0x31] ss:$7 sm:$0x7c]  }
  0x48   :  { %v1325_v57 = vld [vmem:[#allocation1 + $0x70] ss:$7 sm:%s1324_s4]   ;;  %v1293_v61 = vld [vmem:[#allocation1] ss:$7 sm:$0xff]   ;;  %s1357_s7 = smov 3  ;;  %s1380_s8 = smov 96 }
  0x49   :  { %993 = vrot.lane.b32.xlu1 %v992_v60, %s4734_s18  ;;  %v1303_v58 = vld [vmem:[#allocation1 + $0x62] ss:$-42 sm:%s1302_s5]   ;;  %v1276_v60 = vsel %vm482_vm4, %v1274_v54, %v1271_v55  ;;  %v1327_v62 = vsel %vm482_vm4, %v1325_v57, %v1322_v56  ;;  %v1309_v1 = vld [vmem:[#allocation1 + $0x8c] sm:$0x80]   ;;  %v1346_v4 = vld [vmem:[#allocation1 - $0x14b] ss:$56 sm:%s1345_s6]  }
  0x4a   :  { %1027 = vrot.lane.b32.xlu0 %v1026_v2, %s4734_s18  ;;  %v1287_v63 = vld [vmem:[#allocation1 + $0x9c] ss:$7 sm:$0xf]   ;;  %v1307_v0 = vsel %vm587_vm7, %v1305_v59, %v1303_v58  ;;  %v4661_v2 = vpack.i.bf16 %v1327_v62, %v1293_v61  ;;  %v1343_v3 = vld [vmem:[#allocation1 + $0xc] ss:$7 sm:$0x3f]  }
  0x4b   :  { %v1360_v6 = vld [vmem:[#allocation1 + $0x3d] ss:$7 sm:$0x3c]   ;;  %s1364_s9 = smov 192  ;;  %v1311_v7 = vsel %vm434_vm2, %v1309_v1, %v1307_v0  ;;  %s1463_s10 = smov 192  ;;  %v1348_v15 = vsel %vm482_vm4, %v1346_v4, %v1343_v3  ;;  %vm2096_vm13 = vcmask 850944  }
  0x4c   :  { %v1378_v8 = vld [vmem:[#allocation1 + $0x75] ss:$7 sm:$0x1f]   ;;  %v1411_v10 = vld [vmem:[#allocation1 + $0x18] ss:$7 sm:$0xf]  }
  0x4d   :  { %1043 = vrot.lane.b32.xlu1 %v1042_v5, %s4735_s21  ;;  %v1358_v5 = vld [vmem:[#allocation1 + $0x6e] ss:$-42 sm:%s1357_s7]   ;;  %v1413_v11 = vld [vmem:[#allocation1 - $0x19] ss:$7 sm:$0x70]   ;;  %s4739_s11 = smov 72  }
  0x4e   :  { %1063 = vrot.lane.b32.xlu0 %v1062_v12, %s4735_s21  ;;  %v1381_v9 = vld [vmem:[#allocation1 - $0xd4] ss:$63 sm:%s1380_s8]   ;;  %s1430_s12 = smov 3  ;;  %s1433_s13 = smov 12  ;;  %v1362_v16 = vsel %vm559_vm6, %v1360_v6, %v1358_v5  ;;  %v1385_v19 = vld [vmem:[#allocation1 + $0xa6] sm:$0x80]  }
  0x4f   :  { %v1457_v12 = vld [vmem:[#allocation1 + $0x81] ss:$7 sm:$0x7]   ;;  %v1365_v17 = vld [vmem:[#allocation1 - $0x240] ss:$105 sm:%s1364_s9]   ;;  %v1383_v18 = vsel %vm430_vm1, %v1381_v9, %v1378_v8  ;;  %s4740_s14 = smov 68  }
  0x50   :  { %v1336_v14 = vld [vmem:[#allocation1 + $0xa8] ss:$7 sm:$0xf]   ;;  %v1417_v21 = vld [vmem:[#allocation1 + $0x42] sm:$0x80]   ;;  %v1367_v26 = vsel %vm482_vm4, %v1365_v17, %v1362_v16  ;;  %v1387_v27 = vsel %vm434_vm2, %v1385_v19, %v1383_v18  ;;  %s1477_s15 = smov 3 }
  0x51   :  { %4647 = vrot.lane.b32.xlu1 %v4646_v13, %s4735_s21  ;;  %v1459_v13 = vld [vmem:[#allocation1 + $0x50] ss:$7 sm:$0x38]   ;;  %v1464_v23 = vld [vmem:[#allocation1 + $0x88] ss:$7 sm:%s1463_s10]   ;;  %s1480_s16 = smov 12 }
  0x52   :  { %4652 = vrot.lane.b32.xlu0 %v4651_v20, %s4736_s27  ;;  %v1415_v20 = vsel %vm537_vm9, %v1413_v11, %v1411_v10  ;;  %v1461_v22 = vsel %vm743_vm10, %v1459_v13, %v1457_v12  ;;  %v1431_v24 = vld [vmem:[#allocation1 + $0x7a] ss:$-42 sm:%s1430_s12]   ;;  %v1400_v29 = vld [vmem:[#allocation1 + $0x95] sm:$0x8]   ;;  %s1492_s17 = smov 3  ;;  %s1512_s18 = smov 3 }
  0x53   :  { %v1398_v28 = vld [vmem:[#allocation1 + $0xb4] ss:$7 sm:$0x7]   ;;  %v1419_v30 = vsel %vm434_vm2, %v1417_v21, %v1415_v20  ;;  %v1466_v31 = vsel %vm482_vm4, %v1464_v23, %v1461_v22  ;;  %v1442_v37 = vld [vmem:[#allocation1 + $0xa4] sm:$0x80]   ;;  %s1534_s19 = smov 192 }
  0x54   :  { %v1438_v33 = vld [vmem:[#allocation1 + $0x18] ss:$7 sm:$0x70]   ;;  %v1481_v39 = vld [vmem:[#allocation1 + $0x8f] ss:$7 sm:%s1480_s16]   ;;  %s1584_s20 = smov 192 }
  0x55   :  { %1113 = vrot.lane.b32.xlu1 %v1112_v25, %s4736_s27  ;;  %v1434_v25 = vld [vmem:[#allocation1 + $0x49] ss:$7 sm:%s1433_s13]   ;;  %v1495_v41 = vld [vmem:[#allocation1 - $0x6] ss:$7 sm:$0x7c]   ;;  %s4741_s21 = smov 64  }
  0x56   :  { %1138 = vrot.lane.b32.xlu0 %v1137_v34, %s4736_s27  ;;  %v1436_v32 = vsel %vm499_vm0, %v1434_v25, %v1431_v24  ;;  %v1402_v34 = vsel %vm949_vm11, %v1400_v29, %v1398_v28  ;;  %v1478_v38 = vld [vmem:[#allocation1 + $0xc0] ss:$-42 sm:%s1477_s15]   ;;  %v1493_v40 = vld [vmem:[#allocation1 + $0x2b] ss:$-42 sm:%s1492_s17]   ;;  %v1519_v46 = vld [vmem:[#allocation1 + $0xb7] sm:$0x80]  }
  0x57   :  { %v1440_v36 = vsel %vm537_vm9, %v1438_v33, %v1436_v32  ;;  %v1513_v42 = vld [vmem:[#allocation1 + $0x8d] ss:$-91 sm:%s1512_s18]   ;;  %v1515_v43 = vld [vmem:[#allocation1 + $0x2b] ss:$7 sm:$0x7c]   ;;  %v1483_v47 = vsel %vm499_vm0, %v1481_v39, %v1478_v38  ;;  %v1497_v48 = vsel %vm587_vm7, %v1495_v41, %v1493_v40  ;;  %s1562_s22 = smov 3 }
  0x58   :  { %v1532_v49 = vld [vmem:[#allocation1 + $0x63] ss:$7 sm:$0x3f]   ;;  %v1517_v51 = vsel %vm587_vm7, %v1515_v43, %v1513_v42  ;;  %v1546_v56 = vld [vmem:[#allocation1 + $0xa2] ss:$7 sm:$0xf]  }
  0x59   :  { %1154 = vrot.lane.b32.xlu1 %v1153_v35, %s4737_s2  ;;  %v4666_v35 = vpack.i.bf16 %v1466_v31, %v1419_v30  ;;  %v1535_v50 = vld [vmem:[#allocation1 + $0x6a] ss:$7 sm:%s1534_s19]   ;;  %v414_v57 = vld [vmem:[#allocation1 + $0x70] ss:$7 sm:$0xff]   ;;  %v1521_v58 = vsel %vm434_vm2, %v1519_v46, %v1517_v51  ;;  %s1623_s23 = smov 3  ;;  %s4742_s24 = smov 60  }
  0x5a   :  { %1179 = vrot.lane.b32.xlu0 %v1178_v44, %s4737_s2  ;;  %v1444_v44 = vsel %vm434_vm2, %v1442_v37, %v1440_v36  ;;  %v1537_v55 = vsel %vm482_vm4, %v1535_v50, %v1532_v49  ;;  %v1553_v59 = vld [vmem:[#allocation1 + $0x6] ss:$7 sm:$0xff]   ;;  %417 = vst.msk [vmem:[#allocation0 + $0x248] ss:$36 sm:$0x1f] %vm402_vm12, %v414_v57   ;;  %s1605_s25 = smov 96 }
  0x5b   :  { %419 = vst.msk [vmem:[#allocation0 + $0x24c] ss:$36 sm:$0xe0] %vm402_vm12, %v414_v57   ;;  %v1563_v61 = vld [vmem:[#allocation1 + $0x68] ss:$-42 sm:%s1562_s22]   ;;  %s1630_s26 = smov 96 }
  0x5c   :  { %v1565_v62 = vld [vmem:[#allocation1 + $0x37] ss:$7 sm:$0x7c]   ;;  %v1569_v4 = vld [vmem:[#allocation1 + $0x92] sm:$0x80]   ;;  %s1652_s27 = smov 48 }
  0x5d   :  { %1202 = vrot.lane.b32.xlu1 %v1201_v45, %s4737_s2  ;;  %v1499_v45 = vld [vmem:[#allocation1 + $0x55] sm:$0x80]   ;;  %v1624_v1 = vld [vmem:[#allocation1 + $0x74] ss:$-42 sm:%s1623_s23]   ;;  %v1567_v3 = vsel %vm587_vm7, %v1565_v62, %v1563_v61  ;;  %v1610_v8 = vld [vmem:[#allocation1 + $0x3c] sm:$0x80]  }
  0x5e   :  { %1219 = vrot.lane.b32.xlu0 %v1218_v52, %s4737_s2  ;;  %v1582_v52 = vld [vmem:[#allocation1 + $0x6f] ss:$7 sm:$0x3f]   ;;  %v1501_v54 = vsel %vm434_vm2, %v1499_v45, %v1497_v48  ;;  %s1732_s28 = smov 3  ;;  %s4743_s29 = smov 56   ;;  %v1571_v11 = vsel %vm434_vm2, %v1569_v4, %v1567_v3  ;;  %vm2260_vm14 = vcmask 883712  }
  0x5f   :  { %v1603_v5 = vld [vmem:[#allocation1 + $0x12] ss:$7 sm:$0x1f]   ;;  %v1635_v12 = vld [vmem:[#allocation1 + $0x9e] sm:$0x80]   ;;  %s1657_s30 = smov 192 }
  0x60   :  { %v1606_v6 = vld [vmem:[#allocation1 - $0x1f] ss:$7 sm:%s1605_s25]   ;;  %v1650_v13 = vld [vmem:[#allocation1 + $0x7b] ss:$7 sm:$0xf]   ;;  %s1705_s2 = smov 3 }
  0x61   :  { %4657 = vrot.lane.b32.xlu1 %v4656_v53, %s4738_s0  ;;  %v1585_v53 = vld [vmem:[#allocation1 + $0x76] ss:$7 sm:%s1584_s20]   ;;  %v1608_v16 = vsel %vm430_vm1, %v1606_v6, %v1603_v5  ;;  %v1688_v17 = vld [vmem:[#allocation1 - $0x13] ss:$7 sm:$0x78]   ;;  %s1708_s3 = smov 12 }
  0x62   :  { %1277 = vrot.lane.b32.xlu0 %v1276_v60, %s4738_s0  ;;  %v1587_v60 = vsel %vm482_vm4, %v1585_v53, %v1582_v52  ;;  %v1631_v10 = vld [vmem:[#allocation1 + $0x12] ss:$7 sm:%s1630_s26]   ;;  %s1739_s4 = smov 192  ;;  %s1671_s5 = smov 3  ;;  %v1612_v23 = vsel %vm434_vm2, %v1610_v8, %v1608_v16  ;;  %v1658_v28 = vld [vmem:[#allocation1 + $0x82] ss:$7 sm:%s1657_s30]  }
  0x63   :  { %v4676_v0 = vpack.i.bf16 %v1587_v60, %v1553_v59  ;;  %v1733_v20 = vld [vmem:[#allocation1 + $0x87] ss:$7 sm:%s1732_s28]   ;;  %v1735_v21 = vld [vmem:[#allocation1 + $0x56] ss:$7 sm:$0x3c]   ;;  %s4744_s6 = smov 52  }
  0x64   :  { %v1706_v24 = vld [vmem:[#allocation1 + $0x80] ss:$-42 sm:%s1705_s2]   ;;  %v1709_v25 = vld [vmem:[#allocation1 + $0xb1] ss:$-42 sm:%s1708_s3]   ;;  %v1692_v30 = vld [vmem:[#allocation1 + $0x48] sm:$0x80]   ;;  %v1737_v31 = vsel %vm559_vm6, %v1735_v21, %v1733_v20 }
  0x65   :  { %1288 = vrot.lane.b32.xlu1 %v1287_v63, %s4738_s0  ;;  %v4671_v63 = vpack.i.bf16 %v1546_v56, %v1537_v55  ;;  %s1674_s0 = smov 12  ;;  %v1740_v32 = vld [vmem:[#allocation1 + $0x8e] ss:$7 sm:%s1739_s4]   ;;  %v1672_v33 = vld [vmem:[#allocation1 + $0xba] ss:$7 sm:%s1671_s5]   ;;  %s1790_s7 = smov 192 }
  0x66   :  { %4662 = vrot.lane.b32.xlu0 %v4661_v2, %s4739_s11  ;;  %v1626_v2 = vld [vmem:[#allocation1 + $0x43] ss:$7 sm:$0x1c]   ;;  %v1713_v36 = vld [vmem:[#allocation1 + $0x1e] ss:$7 sm:$0x70]   ;;  %v1742_v40 = vsel %vm482_vm4, %v1740_v32, %v1737_v31 }
  0x67   :  { %v1628_v9 = vsel %vm450_vm8, %v1626_v2, %v1624_v1  ;;  %v1717_v42 = vld [vmem:[#allocation1 + $0xaa] sm:$0x80]   ;;  %v1788_v45 = vld [vmem:[#allocation1 + $0x69] ss:$7 sm:$0x3f]   ;;  %s1768_s8 = smov 3 }
  0x68   :  { %v1633_v19 = vsel %vm430_vm1, %v1631_v10, %v1628_v9  ;;  %v1791_v46 = vld [vmem:[#allocation1 + $0x70] ss:$7 sm:%s1790_s7]   ;;  %v1759_v50 = vld [vmem:[#allocation1] ss:$7 sm:$0xff]   ;;  %s4745_s9 = smov 48   ;;  %s1811_s10 = smov 192 }
  0x69   :  { %1312 = vrot.lane.b32.xlu1 %v1311_v7, %s4739_s11  ;;  %v1596_v7 = vld [vmem:[#allocation1 + $0xae] ss:$7 sm:$0xf]   ;;  %v1793_v51 = vsel %vm482_vm4, %v1791_v46, %v1788_v45  ;;  %v1771_v56 = vld [vmem:[#allocation1 + $0x31] ss:$7 sm:$0x7c]  }
  0x6a   :  { %1337 = vrot.lane.b32.xlu0 %v1336_v14, %s4739_s11  ;;  %v1653_v14 = vld [vmem:[#allocation1 + $0x4a] ss:$7 sm:%s1652_s27]   ;;  %s1823_s11 = smov 3  ;;  %v1775_v61 = vld [vmem:[#allocation1 + $0x8c] sm:$0x80]   ;;  %s1830_s12 = smov 192 }
  0x6b   :  { %v1769_v55 = vld [vmem:[#allocation1 + $0x62] ss:$-42 sm:%s1768_s8]   ;;  %s1846_s13 = smov 96  ;;  %v1812_v2 = vld [vmem:[#allocation1 - $0x14b] ss:$56 sm:%s1811_s10]   ;;  %s1896_s15 = smov 3 }
  0x6c   :  { %v1753_v57 = vld [vmem:[#allocation1 + $0x95] ss:$7 sm:$0xf]   ;;  %v1773_v60 = vsel %vm587_vm7, %v1771_v56, %v1769_v55  ;;  %v1809_v1 = vld [vmem:[#allocation1 + $0xc] ss:$7 sm:$0x3f]  }
  0x6d   :  { %1349 = vrot.lane.b32.xlu1 %v1348_v15, %s4740_s14  ;;  %v1686_v15 = vld [vmem:[#allocation1 + $0x1e] ss:$7 sm:$0x7]   ;;  %v1824_v3 = vld [vmem:[#allocation1 + $0x6e] ss:$-42 sm:%s1823_s11]   ;;  %s1899_s16 = smov 12  ;;  %v1777_v4 = vsel %vm434_vm2, %v1775_v61, %v1773_v60 }
  0x6e   :  { %1368 = vrot.lane.b32.xlu0 %v1367_v26, %s4740_s14  ;;  %v1637_v26 = vsel %vm434_vm2, %v1635_v12, %v1633_v19  ;;  %v1690_v29 = vsel %vm512_vm5, %v1688_v17, %v1686_v15  ;;  %s4746_s17 = smov 44   ;;  %v1831_v5 = vld [vmem:[#allocation1 - $0x240] ss:$105 sm:%s1830_s12]   ;;  %v1844_v6 = vld [vmem:[#allocation1 + $0x75] ss:$7 sm:$0x1f]  }
  0x6f   :  { %v1694_v39 = vsel %vm434_vm2, %v1692_v30, %v1690_v29  ;;  %v1877_v8 = vld [vmem:[#allocation1 + $0x18] ss:$7 sm:$0xf]   ;;  %v1879_v9 = vld [vmem:[#allocation1 - $0x19] ss:$7 sm:$0x70]  }
  0x70   :  { %v1923_v10 = vld [vmem:[#allocation1 + $0x81] ss:$7 sm:$0x7]   ;;  %s2115_s18 = smov 3  ;;  %s2131_s19 = smov 3  ;;  %vm2410_vm15 = vcmask 916480  }
  0x71   :  { %1388 = vrot.lane.b32.xlu1 %v1387_v27, %s4740_s14  ;;  %v1655_v27 = vsel %vm477_vm3, %v1653_v14, %v1650_v13  ;;  %s2077_s20 = smov 96  ;;  %v2118_v13 = vld [vmem:[#allocation1 + $0x43] ss:$7 sm:$0x1c]   ;;  %v1897_v16 = vld [vmem:[#allocation1 + $0x7a] ss:$-42 sm:%s1896_s15]  }
  0x72   :  { %1403 = vrot.lane.b32.xlu0 %v1402_v34, %s4740_s14  ;;  %v1675_v34 = vld [vmem:[#allocation1 + $0x89] ss:$7 sm:%s1674_s0]   ;;  %v1660_v38 = vsel %vm482_vm4, %v1658_v28, %v1655_v27  ;;  %s4999_s14 = smov 192  ;;  %s5011_s22 = smov 96  ;;  %v1851_v21 = vld [vmem:[#allocation1 + $0xa6] sm:$0x80]   ;;  %v1814_v28 = vsel %vm482_vm4, %v1812_v2, %v1809_v1 }
  0x73   :  { %v1677_v41 = vsel %vm499_vm0, %v1675_v34, %v1672_v33  ;;  %v1900_v17 = vld [vmem:[#allocation1 + $0x49] ss:$7 sm:%s1899_s16]   ;;  %s5013_s23 = smov 96  ;;  %s5019_s25 = smov 192  ;;  %v2078_v30 = vld [vmem:[#allocation1 - $0x1f] ss:$7 sm:%s2077_s20]  }
  0x74   :  { %v2132_v27 = vld [vmem:[#allocation1 + $0x75] ss:$-42 sm:%s2131_s19]   ;;  %s5023_s26 = smov 48  ;;  %s5025_s27 = smov 192  ;;  %v1902_v46 = vsel %vm499_vm0, %v1900_v17, %v1897_v16 }
  0x75   :  { %4667 = vrot.lane.b32.xlu1 %v4666_v35, %s4741_s21  ;;  %v1711_v35 = vsel %vm499_vm0, %v1709_v25, %v1706_v24  ;;  %v1883_v24 = vld [vmem:[#allocation1 + $0x42] sm:$0x80]   ;;  %v1930_v25 = vld [vmem:[#allocation1 + $0x88] ss:$7 sm:%s4999_s14]   ;;  %s5034_s28 = smov 3  ;;  %s5042_s30 = smov 3 }
  0x76   :  { %1445 = vrot.lane.b32.xlu0 %v1444_v44, %s4741_s21  ;;  %v1715_v44 = vsel %vm537_vm9, %v1713_v36, %v1711_v35  ;;  %v2075_v29 = vld [vmem:[#allocation1 + $0x12] ss:$7 sm:$0x1f]   ;;  %v1881_v35 = vsel %vm537_vm9, %v1879_v9, %v1877_v8  ;;  %v2139_v45 = vld [vmem:[#allocation1 + $0x13] ss:$7 sm:%s5013_s23]   ;;  %s5044_s2 = smov 3 }
  0x77   :  { %v1719_v49 = vsel %vm434_vm2, %v1717_v42, %v1715_v44  ;;  %s4747_s3 = smov 40   ;;  %s5051_s4 = smov 12  ;;  %v1908_v55 = vld [vmem:[#allocation1 + $0xa4] sm:$0x80]   ;;  %v2080_v60 = vsel %vm430_vm1, %v2078_v30, %v2075_v29  ;;  %v2220_v17 = vld [vmem:[#allocation1 + $0xbb] ss:$7 sm:%s5042_s30]  }
  0x78   :  { %s5053_s5 = smov 3  ;;  %v2169_v56 = vld [vmem:[#allocation1 + $0x7b] ss:$7 sm:$0xf]   ;;  %s5069_s0 = smov 3 }
  0x79   :  { %1484 = vrot.lane.b32.xlu1 %v1483_v47, %s4741_s21  ;;  %v4681_v47 = vpack.i.bf16 %v1742_v40, %v1694_v39  ;;  %s2088_s21 = smov 96  ;;  %v2241_v1 = vld [vmem:[#allocation1 + $0x1e] ss:$7 sm:$0x7]   ;;  %s2295_s7 = smov 3 }
  0x7a   :  { %1502 = vrot.lane.b32.xlu0 %v1501_v54, %s4742_s24  ;;  %v2089_v31 = vld [vmem:[#allocation1 - $0x1e] ss:$7 sm:%s2088_s21]   ;;  %s2298_s8 = smov 12  ;;  %v2336_v8 = vld [vmem:[#allocation1 + $0x56] ss:$7 sm:$0x3c]  }
  0x7b   :  { %v2243_v2 = vld [vmem:[#allocation1 - $0x13] ss:$7 sm:$0x78]   ;;  %v2346_v9 = vld [vmem:[#allocation1 + $0x88] ss:$7 sm:%s5053_s5]   ;;  %s5093_s10 = smov 192 }
  0x7c   :  { %s4748_s11 = smov 36   ;;  %s2389_s12 = smov 3 }
  0x7d   :  { %1522 = vrot.lane.b32.xlu1 %v1521_v58, %s4742_s24  ;;  %v4686_v58 = vpack.i.bf16 %v1793_v51, %v1759_v50  ;;  %v2143_v50 = vld [vmem:[#allocation1 + $0x9f] sm:$0x80]   ;;  %s2429_s14 = smov 3  ;;  %s4749_s15 = smov 24  }
  0x7e   :  { %4672 = vrot.lane.b32.xlu0 %v4671_v63, %s4742_s24  ;;  %v1826_v63 = vld [vmem:[#allocation1 + $0x3d] ss:$7 sm:$0x3c]   ;;  %s5017_s24 = smov 48  ;;  %s2440_s16 = smov 3 }
  0x7f   :  { %v578_v18 = vpop.permute.xlu0 %577   ;;  %v1828_v15 = vsel %vm559_vm6, %v1826_v63, %v1824_v3  ;;  %v2251_v3 = vld [vmem:[#allocation1 + $0x1f] ss:$7 sm:$0x7]   ;;  %s2539_s19 = smov 3  ;;  %s5163_s20 = smov 192 }
  0x80   :  { %581 = vst.msk [vmem:[#allocation0 + $0x30e] ss:$36 sm:$0xf] %vm402_vm12, %v578_v18   ;;  %v2134_v18 = vld [vmem:[#allocation1 + $0x44] ss:$7 sm:$0x1c]   ;;  %v1833_v33 = vsel %vm482_vm4, %v1831_v5, %v1828_v15 }
  0x81   :  { %4677 = vrot.lane.b32.xlu1 %v4676_v0, %s4743_s29  ;;  %v1802_v0 = vld [vmem:[#allocation1 + $0xa8] ss:$7 sm:$0xf]   ;;  %v2136_v44 = vsel %vm450_vm8, %v2134_v18, %v2132_v27  ;;  %v2334_v5 = vld [vmem:[#allocation1 + $0x87] ss:$7 sm:%s5044_s2]   ;;  %s5168_s21 = smov 192 }
  0x82   :  { %1572 = vrot.lane.b32.xlu0 %v1571_v11, %s4743_s29  ;;  %v502_v22 = vpop.permute.xlu1 %501   ;;  %v1925_v11 = vld [vmem:[#allocation1 + $0x50] ss:$7 sm:$0x38]   ;;  %v2141_v63 = vsel %vm430_vm1, %v2139_v45, %v2136_v44  ;;  %v2212_v15 = vld [vmem:[#allocation1 + $0xba] ss:$7 sm:%s5034_s28]   ;;  %s2546_s23 = smov 192 }
  0x83   :  { %505 = vst.msk [vmem:[#allocation0 + $0x3cf] ss:$36 sm:$0x3] %vm402_vm12, %v502_v22   ;;  %507 = vst.msk [vmem:[#allocation0 + $0x2cf] ss:$36 sm:$0xc] %vm402_vm12, %v502_v22   ;;  %v1927_v36 = vsel %vm743_vm10, %v1925_v11, %v1923_v10 }
  0x84   :  { %v1864_v22 = vld [vmem:[#allocation1 + $0xb4] ss:$7 sm:$0x7]   ;;  %s5192_s28 = smov 192  ;;  %s5201_s30 = smov 3 }
  0x85   :  { %1597 = vrot.lane.b32.xlu1 %v1596_v7, %s4743_s29  ;;  %v1847_v7 = vld [vmem:[#allocation1 - $0xd4] ss:$63 sm:%s1846_s13]   ;;  %s5036_s29 = smov 12  ;;  %s2400_s13 = smov 3 }
  0x86   :  { %1613 = vrot.lane.b32.xlu0 %v1612_v23, %s4744_s6  ;;  %v1866_v23 = vld [vmem:[#allocation1 + $0x95] sm:$0x8]   ;;  %v1849_v34 = vsel %vm430_vm1, %v1847_v7, %v1844_v6  ;;  %v2215_v16 = vld [vmem:[#allocation1 + $0x89] ss:$7 sm:%s5036_s29]   ;;  %s5194_s29 = smov 192  ;;  %s5203_s2 = smov 12 }
  0x87   :  { %v437_v37 = vpop.permute.xlu0 %436   ;;  %v1853_v51 = vsel %vm434_vm2, %v1851_v21, %v1849_v34  ;;  %v2223_v18 = vld [vmem:[#allocation1 + $0x8a] ss:$7 sm:%s5051_s4]   ;;  %s5215_s4 = smov 12  ;;  %s2809_s5 = smov 3 }
  0x88   :  { %440 = vst.msk [vmem:[#allocation0 + $0x63] ss:$36 sm:$0x1f] %vm402_vm12, %v437_v37   ;;  %442 = vst.msk [vmem:[#allocation0 - $0x9d] ss:$36 sm:$0x60] %vm402_vm12, %v437_v37  }
  0x89   :  { %1638 = vrot.lane.b32.xlu1 %v1637_v26, %s4744_s6  ;;  %444 = vst.msk [vmem:[#allocation0 + $0x15c] sm:$0x80] %vm402_vm12, %v437_v37   ;;  %v2116_v26 = vld [vmem:[#allocation1 + $0x74] ss:$-42 sm:%s2115_s18]   ;;  %s2478_s18 = smov 192 }
  0x8a   :  { %1661 = vrot.lane.b32.xlu0 %v1660_v38, %s4744_s6  ;;  %v1904_v37 = vld [vmem:[#allocation1 + $0x18] ss:$7 sm:$0x70]   ;;  %v2086_v38 = vld [vmem:[#allocation1 + $0x13] ss:$7 sm:$0x1f]   ;;  %v2120_v42 = vsel %vm450_vm8, %v2118_v13, %v2116_v26 }
  0x8b   :  { %v485_v43 = vpop.permute.xlu1 %484   ;;  %v2091_v61 = vsel %vm430_vm1, %v2089_v31, %v2086_v38  ;;  %v1906_v7 = vsel %vm537_vm9, %v1904_v37, %v1902_v46  ;;  %v2177_v13 = vld [vmem:[#allocation1 + $0x82] ss:$7 sm:%s5019_s25]   ;;  %v2338_v38 = vsel %vm559_vm6, %v2336_v8, %v2334_v5  ;;  %v2432_v8 = vld [vmem:[#allocation1 + $0x2a] ss:$7 sm:$0x7c]   ;;  %s2583_s25 = smov 96 }
  0x8c   :  { %488 = vst.msk [vmem:[#allocation0 + $0x287] ss:$36 sm:$0xf] %vm402_vm12, %v485_v43   ;;  %490 = vst.msk [vmem:[#allocation0 + $0x187] ss:$36 sm:$0x30] %vm402_vm12, %v485_v43   ;;  %v4613_v48 = vpop.permute.xlu0 %4612  ;;  %v1910_v29 = vsel %vm434_vm2, %v1908_v55, %v1906_v7 }
  0x8d   :  { %492 = vst.msk [vmem:[#allocation0 + $0x2af] ss:$36 sm:$0xc0] %vm402_vm12, %v485_v43   ;;  %1678 = vrot.lane.b32.xlu1 %v1677_v41, %s4744_s6  ;;  %v4615_v52 = vunpack.i.h.bf16 %v4613_v48  ;;  %v4614_v53 = vunpack.i.l.bf16 %v4613_v48  ;;  %v2123_v43 = vld [vmem:[#allocation1 + $0x12] ss:$7 sm:%s5011_s22]   ;;  %s5071_s6 = smov 12 }
  0x8e   :  { %4682 = vrot.lane.b32.xlu0 %v4681_v47, %s4745_s9  ;;  %v2082_v47 = vld [vmem:[#allocation1 + $0x3c] sm:$0x80]   ;;  %v2093_v48 = vld [vmem:[#allocation1 + $0x3d] sm:$0x80]   ;;  %v2299_v27 = vld [vmem:[#allocation1 + $0xb2] ss:$-42 sm:%s2298_s8]  }
  0x8f   :  { %v594_v54 = vpop.permute.xlu1 %593   ;;  %570 = vst.msk [vmem:[#allocation0 + $0x2c6] ss:$36 sm:$0x3] %vm402_vm12, %v4615_v52   ;;  %572 = vst.msk [vmem:[#allocation0 + $0x1c6] ss:$36 sm:$0x3c] %vm402_vm12, %v4615_v52   ;;  %v2084_v21 = vsel %vm434_vm2, %v2082_v47, %v2080_v60 }
  0x90   :  { %597 = vst.msk [vmem:[#allocation0 + $0xe1] ss:$-220 sm:$0x3] %vm402_vm12, %v594_v54   ;;  %599 = vst.msk [vmem:[#allocation0 - $0x1f] ss:$36 sm:$0x7c] %vm402_vm12, %v594_v54   ;;  %v462_v59 = vpop.permute.xlu0 %461  }
  0x91   :  { %601 = vst.msk [vmem:[#allocation0 + $0x1da] sm:$0x80] %vm402_vm12, %v594_v54   ;;  %574 = vst.msk [vmem:[#allocation0 + $0x2ee] ss:$36 sm:$0xc0] %vm402_vm12, %v4615_v52   ;;  %1720 = vrot.lane.b32.xlu1 %v1719_v49, %s4745_s9  ;;  %v1868_v52 = vsel %vm949_vm11, %v1866_v23, %v1864_v22  ;;  %v5066_v54 = vsel %vm482_vm4, %v1930_v25, %v1927_v36  ;;  %v2095_v22 = vsel %vm434_vm2, %v2093_v48, %v2091_v61  ;;  %s5170_s22 = smov 3 }
  0x92   :  { %522 = vst.msk [vmem:[#allocation0 + $0xa2] ss:$36 sm:$0x7] %vm402_vm12, %v4614_v53   ;;  %524 = vst.msk [vmem:[#allocation0 - $0x5e] ss:$36 sm:$0x78] %vm402_vm12, %v4614_v53   ;;  %1754 = vrot.lane.b32.xlu0 %v1753_v57, %s4745_s9  ;;  %v2245_v36 = vsel %vm512_vm5, %v2243_v2, %v2241_v1 }
  0x93   :  { %526 = vst.msk [vmem:[#allocation0 + $0x19b] sm:$0x80] %vm402_vm12, %v4614_v53   ;;  %465 = vst.msk [vmem:[#allocation0 + $0x263] ss:$-220 sm:$0x3] %vm402_vm12, %v462_v59   ;;  %v544_v62 = vpop.permute.xlu1 %543   ;;  %v5063_v53 = vsel %vm434_vm2, %v1883_v24, %v1881_v35  ;;  %s5081_s9 = smov 192  ;;  %v2145_v24 = vsel %vm434_vm2, %v2143_v50, %v2141_v63  ;;  %v2225_v50 = vsel %vm499_vm0, %v2223_v18, %v2220_v17 }
  0x94   :  { %467 = vst.msk [vmem:[#allocation0 + $0x163] ss:$36 sm:$0x1c] %vm402_vm12, %v462_v59   ;;  %469 = vst.msk [vmem:[#allocation0 + $0x63] ss:$36 sm:$0x60] %vm402_vm12, %v462_v59   ;;  %v614_v12 = vpop.permute.xlu0 %613  }
  0x95   :  { %471 = vst.msk [vmem:[#allocation0 + $0x35c] sm:$0x80] %vm402_vm12, %v462_v59   ;;  %547 = vst.msk [vmem:[#allocation0 + $0x2a2] ss:$-220 sm:$0x3] %vm402_vm12, %v544_v62   ;;  %4687 = vrot.lane.b32.xlu1 %v4686_v58, %s4746_s17  ;;  %vm2666_vm8 = vcmask 982016  }
  0x96   :  { %549 = vst.msk [vmem:[#allocation0 + $0x3a2] ss:$-220 sm:$0xc] %vm402_vm12, %v544_v62   ;;  %551 = vst.msk [vmem:[#allocation0 + $0xa2] ss:$36 sm:$0x70] %vm402_vm12, %v544_v62   ;;  %1778 = vrot.lane.b32.xlu0 %v1777_v4, %s4746_s17 }
  0x97   :  { %553 = vst.msk [vmem:[#allocation0 + $0x39b] sm:$0x80] %vm402_vm12, %v544_v62   ;;  %617 = vst.msk [vmem:[#allocation0 + $0x2e1] ss:$-476 sm:$0x3] %vm402_vm12, %v614_v12   ;;  %v4618_v14 = vpop.permute.xlu1 %4617  ;;  %v2125_v62 = vsel %vm430_vm1, %v2123_v43, %v2120_v42  ;;  %v2097_v42 = vsel %vm2096_vm13, %v2095_v22, %v2084_v21  ;;  %s5264_s8 = smov 12 }
  0x98   :  { %619 = vst.msk [vmem:[#allocation0 + $0xe1] ss:$36 sm:$0x7c] %vm402_vm12, %v614_v12   ;;  %621 = vst.msk [vmem:[#allocation0 + $0x3da] sm:$0x80] %vm402_vm12, %v614_v12   ;;  %v4620_v19 = vunpack.i.h.bf16 %v4618_v14  ;;  %v4619_v20 = vunpack.i.l.bf16 %v4618_v14  ;;  %v4623_v32 = vpop.permute.xlu0 %4622  ;;  %v4691_v12 = vpack.i.bf16 %v5066_v54, %v5063_v53 }
  0x99   :  { %1803 = vrot.lane.b32.xlu1 %v1802_v0, %s4746_s17  ;;  %v4625_v39 = vunpack.i.h.bf16 %v4623_v32  ;;  %v4624_v40 = vunpack.i.l.bf16 %v4623_v32  ;;  %v2127_v49 = vld [vmem:[#allocation1 + $0x9e] sm:$0x80]   ;;  %v2172_v57 = vld [vmem:[#allocation1 + $0x4a] ss:$7 sm:%s5017_s24]   ;;  %v2184_v0 = vld [vmem:[#allocation1 + $0x4b] ss:$7 sm:%s5023_s26]  }
  0x9a   :  { %642 = vst.msk [vmem:[#allocation0 + $0x34d] ss:$36 sm:$0xf] %vm402_vm12, %v4620_v19   ;;  %633 = vst.msk [vmem:[#allocation0 + $0x205] ss:$36 sm:$0x3f] %vm402_vm12, %v4619_v20   ;;  %1815 = vrot.lane.b32.xlu0 %v1814_v28, %s4747_s3  ;;  %v2129_v23 = vsel %vm434_vm2, %v2127_v49, %v2125_v62  ;;  %v2174_v30 = vsel %vm477_vm3, %v2172_v57, %v2169_v56  ;;  %v2217_v49 = vsel %vm499_vm0, %v2215_v16, %v2212_v15 }
  0x9b   :  { %635 = vst.msk [vmem:[#allocation0 + $0x22d] ss:$36 sm:$0xc0] %vm402_vm12, %v4619_v20   ;;  %v664_v41 = vpop.permute.xlu1 %663   ;;  %683 = vst.msk [vmem:[#allocation0 + $0x244] ss:$36 sm:$0x3f] %vm402_vm12, %v4625_v39   ;;  %v2147_v43 = vsel %vm2096_vm13, %v2145_v24, %v2129_v23  ;;  %v2179_v47 = vsel %vm482_vm4, %v2177_v13, %v2174_v30 }
  0x9c   :  { %667 = vst.msk [vmem:[#allocation0 + $0x220] ss:$-220 sm:$0x3] %vm402_vm12, %v664_v41   ;;  %669 = vst.msk [vmem:[#allocation0 + $0x120] ss:$36 sm:$0x7c] %vm402_vm12, %v664_v41   ;;  %v689_v59 = vpop.permute.xlu0 %688  }
  0x9d   :  { %671 = vst.msk [vmem:[#allocation0 + $0x319] sm:$0x80] %vm402_vm12, %v664_v41   ;;  %685 = vst.msk [vmem:[#allocation0 + $0x26c] ss:$36 sm:$0xc0] %vm402_vm12, %v4625_v39   ;;  %1834 = vrot.lane.b32.xlu1 %v1833_v33, %s4747_s3  ;;  %s2471_s17 = smov 192 }
  0x9e   :  { %649 = vst.msk [vmem:[#allocation0 + $0x20] ss:$36 sm:$0x7f] %vm402_vm12, %v4624_v40   ;;  %651 = vst.msk [vmem:[#allocation0 + $0x119] sm:$0x80] %vm402_vm12, %v4624_v40   ;;  %1854 = vrot.lane.b32.xlu0 %v1853_v51, %s4747_s3  ;;  %s2558_s24 = smov 192 }
  0x9f   :  { %v2181_v58 = vld [vmem:[#allocation1 + $0x7c] ss:$7 sm:$0xf]   ;;  %692 = vst.msk [vmem:[#allocation0 + $0x38c] ss:$36 sm:$0xf] %vm402_vm12, %v689_v59   ;;  %v4628_v6 = vpop.permute.xlu1 %4627 }
  0xa0   :  { %v2253_v4 = vld [vmem:[#allocation1 - $0x12] ss:$7 sm:$0x78]   ;;  %v4630_v10 = vunpack.i.h.bf16 %v4628_v6  ;;  %v4629_v11 = vunpack.i.l.bf16 %v4628_v6  ;;  %v2348_v19 = vld [vmem:[#allocation1 + $0x57] ss:$7 sm:$0x3c]   ;;  %v729_v28 = vpop.permute.xlu0 %728   ;;  %v2186_v31 = vsel %vm477_vm3, %v2184_v0, %v2181_v58 }
  0xa1   :  { %v2189_v14 = vld [vmem:[#allocation1 + $0x83] ss:$7 sm:%s5025_s27]   ;;  %1869 = vrot.lane.b32.xlu1 %v1868_v52, %s4747_s3  ;;  %v2247_v32 = vld [vmem:[#allocation1 + $0x48] sm:$0x80]   ;;  %v2257_v33 = vld [vmem:[#allocation1 + $0x49] sm:$0x80]   ;;  %v2255_v37 = vsel %vm512_vm5, %v2253_v4, %v2251_v3  ;;  %v2350_v39 = vsel %vm559_vm6, %v2348_v19, %v2346_v9 }
  0xa2   :  { %v2280_v20 = vld [vmem:[#allocation1 + $0x80] ss:$-42 sm:%s5069_s0]   ;;  %v2283_v25 = vld [vmem:[#allocation1 + $0xb1] ss:$-42 sm:%s5071_s6]   ;;  %v2296_v26 = vld [vmem:[#allocation1 + $0x81] ss:$-42 sm:%s2295_s7]   ;;  %4692 = vrot.lane.b32.xlu0 %v4691_v12, %s4748_s11  ;;  %v2191_v48 = vsel %vm482_vm4, %v2189_v14, %v2186_v31  ;;  %v2249_v52 = vsel %vm434_vm2, %v2247_v32, %v2245_v36  ;;  %v2259_v53 = vsel %vm434_vm2, %v2257_v33, %v2255_v37 }
  0xa3   :  { %754 = vst.msk [vmem:[#allocation0 + $0x2a7] ss:$36 sm:$0x7] %vm402_vm12, %v4630_v10   ;;  %756 = vst.msk [vmem:[#allocation0 + $0x1a7] ss:$36 sm:$0x38] %vm402_vm12, %v4630_v10   ;;  %v768_v35 = vpop.permute.xlu1 %767   ;;  %v2285_v44 = vsel %vm499_vm0, %v2283_v25, %v2280_v20  ;;  %v2301_v45 = vsel %vm499_vm0, %v2299_v27, %v2296_v26  ;;  %v2193_v3 = vsel %vm2096_vm13, %v2191_v48, %v2179_v47 }
  0xa4   :  { %758 = vst.msk [vmem:[#allocation0 + $0x2cf] ss:$36 sm:$0xc0] %vm402_vm12, %v4630_v10   ;;  %707 = vst.msk [vmem:[#allocation0 + $0x83] ss:$36 sm:$0xf] %vm402_vm12, %v4629_v11   ;;  %v4633_v51 = vpop.permute.xlu0 %4632  ;;  %v5152_v4 = vsel %vm2260_vm14, %v2259_v53, %v2249_v52 }
  0xa5   :  { %709 = vst.msk [vmem:[#allocation0 - $0x7d] ss:$36 sm:$0x70] %vm402_vm12, %v4629_v11   ;;  %711 = vst.msk [vmem:[#allocation0 + $0x17c] sm:$0x80] %vm402_vm12, %v4629_v11   ;;  %1911 = vrot.lane.b32.xlu1 %v1910_v29, %s4748_s11  ;;  %v4635_v58 = vunpack.i.h.bf16 %v4633_v51  ;;  %v4634_v59 = vunpack.i.l.bf16 %v4633_v51  ;;  %v2227_v11 = vsel %vm2096_vm13, %v2225_v50, %v2217_v49  ;;  %vm2524_vm3 = vcmask 949248  }
  0xa6   :  { %v2341_v34 = vld [vmem:[#allocation1 + $0x8e] ss:$7 sm:%s5081_s9]   ;;  %732 = vst.msk [vmem:[#allocation0 + $0x283] ss:$-220 sm:$0x3] %vm402_vm12, %v729_v28   ;;  %2098 = vrot.lane.b32.xlu0 %v2097_v42, %s4749_s15  ;;  %s2594_s26 = smov 96 }
  0xa7   :  { %734 = vst.msk [vmem:[#allocation0 + $0x183] ss:$36 sm:$0xc] %vm402_vm12, %v729_v28   ;;  %736 = vst.msk [vmem:[#allocation0 + $0x83] ss:$36 sm:$0x70] %vm402_vm12, %v729_v28   ;;  %v2343_v54 = vsel %vm482_vm4, %v2341_v34, %v2338_v38  ;;  %v826_v60 = vpop.permute.xlu1 %825  }
  0xa8   :  { %738 = vst.msk [vmem:[#allocation0 + $0x37c] sm:$0x80] %vm402_vm12, %v729_v28   ;;  %v2353_v40 = vld [vmem:[#allocation1 + $0x8f] ss:$7 sm:%s5093_s10]   ;;  %v2291_v56 = vld [vmem:[#allocation1 + $0xaa] sm:$0x80]   ;;  %v837_v10 = vpop.permute.xlu0 %836  }
  0xa9   :  { %v2287_v41 = vld [vmem:[#allocation1 + $0x1e] ss:$7 sm:$0x70]   ;;  %771 = vst.msk [vmem:[#allocation0 + $0x3ef] ss:$-220 sm:$0x3] %vm402_vm12, %v768_v35   ;;  %v2355_v55 = vsel %vm482_vm4, %v2353_v40, %v2350_v39  ;;  %2148 = vrot.lane.b32.xlu1 %v2147_v43, %s4749_s15 }
  0xaa   :  { %773 = vst.msk [vmem:[#allocation0 + $0x2ef] ss:$36 sm:$0xc] %vm402_vm12, %v768_v35   ;;  %v2303_v46 = vld [vmem:[#allocation1 + $0x1f] ss:$7 sm:$0x70]   ;;  %v2289_v61 = vsel %vm537_vm9, %v2287_v41, %v2285_v44  ;;  %v5155_v5 = vsel %vm2260_vm14, %v2355_v55, %v2343_v54  ;;  %2194 = vrot.lane.b32.xlu0 %v2193_v3, %s4749_s15 }
  0xab   :  { %v2307_v57 = vld [vmem:[#allocation1 + $0xab] sm:$0x80]   ;;  %v2305_v62 = vsel %vm537_vm9, %v2303_v46, %v2301_v45  ;;  %v2390_v63 = vld [vmem:[#allocation1 + $0x2a] ss:$-42 sm:%s2389_s12]   ;;  %v2401_v1 = vld [vmem:[#allocation1 + $0x2b] ss:$-42 sm:%s2400_s13]   ;;  %v2293_v12 = vsel %vm434_vm2, %v2291_v56, %v2289_v61  ;;  %v4638_v16 = vpop.permute.xlu1 %4637  ;;  %v4696_v23 = vpack.i.bf16 %v5155_v5, %v5152_v4 }
  0xac   :  { %v2392_v0 = vld [vmem:[#allocation1 - $0x7] ss:$7 sm:$0x7c]   ;;  %829 = vst.msk [vmem:[#allocation0 + $0x2e6] ss:$-220 sm:$0x3] %vm402_vm12, %v826_v60   ;;  %v2309_v13 = vsel %vm434_vm2, %v2307_v57, %v2305_v62  ;;  %v4640_v21 = vunpack.i.h.bf16 %v4638_v16  ;;  %v4639_v22 = vunpack.i.l.bf16 %v4638_v16  ;;  %v861_v34 = vpop.permute.xlu0 %860  }
  0xad   :  { %831 = vst.msk [vmem:[#allocation0 + $0x1e6] ss:$36 sm:$0x3c] %vm402_vm12, %v826_v60   ;;  %833 = vst.msk [vmem:[#allocation0 + $0x90e] ss:$-220 sm:$0xc0] %vm402_vm12, %v826_v60   ;;  %v2394_v17 = vsel %vm587_vm7, %v2392_v0, %v2390_v63  ;;  %2228 = vrot.lane.b32.xlu1 %v2227_v11, %s4749_s15  ;;  %v2311_v29 = vsel %vm2260_vm14, %v2309_v13, %v2293_v12 }
  0xae   :  { %v2403_v2 = vld [vmem:[#allocation1 - $0x6] ss:$7 sm:$0x7c]   ;;  %808 = vst.msk [vmem:[#allocation0 + $0x2c2] ss:$-220 sm:$0x7] %vm402_vm12, %v4635_v58  }
  0xaf   :  { %810 = vst.msk [vmem:[#allocation0 + $0xc2] ss:$36 sm:$0x78] %vm402_vm12, %v4635_v58   ;;  %812 = vst.msk [vmem:[#allocation0 + $0x3bb] sm:$0x80] %vm402_vm12, %v4635_v58   ;;  %v2405_v18 = vsel %vm587_vm7, %v2403_v2, %v2401_v1  ;;  %v886_v40 = vpop.permute.xlu1 %885   ;;  %s4750_s27 = smov 20  }
  0xb0   :  { %789 = vst.msk [vmem:[#allocation0 + $0xc2] ss:$36 sm:$0x3] %vm402_vm12, %v4634_v59   ;;  %791 = vst.msk [vmem:[#allocation0 - $0x3e] ss:$36 sm:$0x7c] %vm402_vm12, %v4634_v59   ;;  %4697 = vrot.lane.b32.xlu0 %v4696_v23, %s4750_s27 }
  0xb1   :  { %793 = vst.msk [vmem:[#allocation0 + $0x1bb] sm:$0x80] %vm402_vm12, %v4634_v59   ;;  %v2396_v6 = vld [vmem:[#allocation1 + $0x54] sm:$0x80]   ;;  %v2407_v7 = vld [vmem:[#allocation1 + $0x55] sm:$0x80]   ;;  %2312 = vrot.lane.b32.xlu1 %v2311_v29, %s4750_s27  ;;  %v898_v59 = vpop.permute.xlu0 %897  }
  0xb2   :  { %v2443_v9 = vld [vmem:[#allocation1 + $0x2b] ss:$7 sm:$0x7c]   ;;  %v2469_v15 = vld [vmem:[#allocation1 + $0x62] ss:$7 sm:$0x3f]   ;;  %v2398_v35 = vsel %vm434_vm2, %v2396_v6, %v2394_v17  ;;  %v2409_v36 = vsel %vm434_vm2, %v2407_v7, %v2405_v18 }
  0xb3   :  { %v2430_v14 = vld [vmem:[#allocation1 + $0x8c] ss:$-91 sm:%s2429_s14]   ;;  %840 = vst.msk [vmem:[#allocation0 + $0x32e] ss:$36 sm:$0xf] %vm402_vm12, %v837_v10   ;;  %v2411_v52 = vsel %vm2410_vm15, %v2409_v36, %v2398_v35  ;;  %s5213_s3 = smov 3  ;;  %v917_v6 = vpop.permute.xlu1 %916  }
  0xb4   :  { %v2441_v19 = vld [vmem:[#allocation1 + $0x8d] ss:$-91 sm:%s2440_s16]   ;;  %v2436_v26 = vld [vmem:[#allocation1 + $0xb6] sm:$0x80]   ;;  %v2447_v30 = vld [vmem:[#allocation1 + $0xb7] sm:$0x80]   ;;  %v2434_v37 = vsel %vm587_vm7, %v2432_v8, %v2430_v14 }
  0xb5   :  { %v2476_v20 = vld [vmem:[#allocation1 + $0x63] ss:$7 sm:$0x3f]   ;;  %v2377_v25 = vld [vmem:[#allocation1 + $0x96] ss:$7 sm:$0xf]   ;;  %v2445_v38 = vsel %vm587_vm7, %v2443_v9, %v2441_v19  ;;  %v2438_v53 = vsel %vm434_vm2, %v2436_v26, %v2434_v37  ;;  %v937_v29 = vpop.permute.xlu0 %936  }
  0xb6   :  { %v2375_v24 = vld [vmem:[#allocation1 + $0x95] ss:$7 sm:$0xf]   ;;  %v2472_v27 = vld [vmem:[#allocation1 + $0x69] ss:$7 sm:%s2471_s17]   ;;  %v2449_v54 = vsel %vm434_vm2, %v2447_v30, %v2445_v38  ;;  %s2820_s0 = smov 3 }
  0xb7   :  { %v2479_v28 = vld [vmem:[#allocation1 + $0x6a] ss:$7 sm:%s2478_s18]   ;;  %v2497_v31 = vld [vmem:[#allocation1 + $0xa1] ss:$7 sm:$0xf]   ;;  %v2474_v41 = vsel %vm482_vm4, %v2472_v27, %v2469_v15  ;;  %v2379_v51 = vsel %vm2260_vm14, %v2377_v25, %v2375_v24  ;;  %v2451_v9 = vsel %vm2410_vm15, %v2449_v54, %v2438_v53  ;;  %s4751_s6 = smov 16  }
  0xb8   :  { %v2499_v32 = vld [vmem:[#allocation1 + $0xa2] ss:$7 sm:$0xf]   ;;  %880 = vst.msk [vmem:[#allocation0 + $0x225] ss:$36 sm:$0x3f] %vm402_vm12, %v4640_v21   ;;  %v2481_v42 = vsel %vm482_vm4, %v2479_v28, %v2476_v20  ;;  %2380 = vrot.lane.b32.xlu0 %v2379_v51, %s4750_s27  ;;  %2412 = vrot.lane.b32.xlu1 %v2411_v52, %s4751_s6 }
  0xb9   :  { %v2540_v33 = vld [vmem:[#allocation1 + $0x6e] ss:$-42 sm:%s2539_s19]   ;;  %882 = vst.msk [vmem:[#allocation0 + $0x24d] ss:$36 sm:$0xc0] %vm402_vm12, %v4640_v21   ;;  %v5206_v60 = vsel %vm2410_vm15, %v2481_v42, %v2474_v41  ;;  %v5209_v61 = vsel %vm2410_vm15, %v2499_v32, %v2497_v31  ;;  %s5262_s7 = smov 3 }
  0xba   :  { %846 = vst.msk [vmem:[#allocation0 + $0x1] ss:$36 sm:$0x7f] %vm402_vm12, %v4639_v22   ;;  %848 = vst.msk [vmem:[#allocation0 + $0xfa] sm:$0x80] %vm402_vm12, %v4639_v22   ;;  %v4701_v18 = vpack.i.bf16 %v5209_v61, %v5206_v60  ;;  %s5268_s9 = smov 3 }
  0xbb   :  { %v2542_v39 = vld [vmem:[#allocation1 + $0x3d] ss:$7 sm:$0x3c]   ;;  %864 = vst.msk [vmem:[#allocation0 + $0x201] ss:$-220 sm:$0x3] %vm402_vm12, %v861_v34  }
  0xbc   :  { %866 = vst.msk [vmem:[#allocation0 + $0x101] ss:$36 sm:$0x7c] %vm402_vm12, %v861_v34   ;;  %868 = vst.msk [vmem:[#allocation0 + $0x2fa] sm:$0x80] %vm402_vm12, %v861_v34   ;;  %v2544_v62 = vsel %vm559_vm6, %v2542_v39, %v2540_v33  ;;  %v952_v34 = vpop.permute.xlu1 %951   ;;  %2452 = vrot.lane.b32.xlu0 %v2451_v9, %s4751_s6  ;;  %4702 = vrot.lane.b32.xlu1 %v4701_v18, %s4751_s6  ;;  %s5270_s10 = smov 12 }
  0xbd   :  { %v2511_v43 = vld [vmem:[#allocation1 + $0xc] ss:$7 sm:$0x3f]   ;;  %v2514_v44 = vld [vmem:[#allocation1 - $0x14b] ss:$56 sm:%s5163_s20]   ;;  %s4752_s12 = smov 12  }
  0xbe   :  { %v2552_v45 = vld [vmem:[#allocation1 + $0x6f] ss:$-42 sm:%s5170_s22]   ;;  %889 = vst.msk [vmem:[#allocation0 + $0x36d] ss:$36 sm:$0xf] %vm402_vm12, %v886_v40   ;;  %v2516_v10 = vsel %vm482_vm4, %v2514_v44, %v2511_v43  ;;  %s2887_s13 = smov 3 }
  0xbf   :  { %v2554_v46 = vld [vmem:[#allocation1 + $0x3e] ss:$7 sm:$0x3c]   ;;  %v2518_v47 = vld [vmem:[#allocation1 + $0xd] ss:$7 sm:$0x3f]  }
  0xc0   :  { %v2521_v48 = vld [vmem:[#allocation1 - $0x14a] ss:$56 sm:%s5168_s21]   ;;  %v2581_v55 = vld [vmem:[#allocation1 + $0x75] ss:$7 sm:$0x1f]   ;;  %v2556_v63 = vsel %vm559_vm6, %v2554_v46, %v2552_v45  ;;  %s2899_s14 = smov 3 }
  0xc1   :  { %v2547_v49 = vld [vmem:[#allocation1 - $0x240] ss:$105 sm:%s2546_s23]   ;;  %v2649_v1 = vld [vmem:[#allocation1 - $0x19] ss:$7 sm:$0x70]   ;;  %v2523_v19 = vsel %vm482_vm4, %v2521_v48, %v2518_v47  ;;  %s2894_s15 = smov 192 }
  0xc2   :  { %v2559_v50 = vld [vmem:[#allocation1 - $0x23f] ss:$105 sm:%s2558_s24]   ;;  %v2592_v57 = vld [vmem:[#allocation1 + $0x76] ss:$7 sm:$0x1f]   ;;  %v2549_v20 = vsel %vm482_vm4, %v2547_v49, %v2544_v62  ;;  %v2525_v43 = vsel %vm2524_vm3, %v2523_v19, %v2516_v10  ;;  %s2906_s16 = smov 192 }
  0xc3   :  { %v2584_v56 = vld [vmem:[#allocation1 - $0xd4] ss:$63 sm:%s2583_s25]   ;;  %901 = vst.msk [vmem:[#allocation0 + $0x40] ss:$36 sm:$0x3f] %vm402_vm12, %v898_v59   ;;  %v2561_v21 = vsel %vm482_vm4, %v2559_v50, %v2556_v63  ;;  %2526 = vrot.lane.b32.xlu0 %v2525_v43, %s4752_s12  ;;  %s1958_s17 = smov 3 }
  0xc4   :  { %v2595_v58 = vld [vmem:[#allocation1 - $0xd3] ss:$63 sm:%s2594_s26]   ;;  %903 = vst.msk [vmem:[#allocation0 - $0x6d8] ss:$296 sm:$0xc0] %vm402_vm12, %v898_v59   ;;  %v2586_v30 = vsel %vm430_vm1, %v2584_v56, %v2581_v55  ;;  %v2563_v44 = vsel %vm2524_vm3, %v2561_v21, %v2549_v20  ;;  %v4643_v55 = vpop.permute.xlu0 %4642  ;;  %s4753_s18 = smov 8  }
  0xc5   :  { %v2647_v0 = vld [vmem:[#allocation1 + $0x18] ss:$7 sm:$0xf]   ;;  %v2657_v2 = vld [vmem:[#allocation1 + $0x19] ss:$7 sm:$0xf]   ;;  %v2597_v31 = vsel %vm430_vm1, %v2595_v58, %v2592_v57  ;;  %v4645_v62 = vunpack.i.h.bf16 %v4643_v55  ;;  %v4644_v63 = vunpack.i.l.bf16 %v4643_v55  ;;  %2564 = vrot.lane.b32.xlu1 %v2563_v44, %s4752_s12 }
  0xc6   :  { %v2659_v3 = vld [vmem:[#allocation1 - $0x18] ss:$7 sm:$0x70]   ;;  %v2739_v4 = vld [vmem:[#allocation1 + $0x81] ss:$7 sm:$0x7]   ;;  %v2651_v35 = vsel %vm537_vm9, %v2649_v1, %v2647_v0  ;;  %v994_v0 = vpop.permute.xlu1 %993  }
  0xc7   :  { %v2741_v5 = vld [vmem:[#allocation1 + $0x50] ss:$7 sm:$0x38]   ;;  %v2750_v7 = vld [vmem:[#allocation1 + $0x82] ss:$7 sm:$0x7]   ;;  %v2661_v36 = vsel %vm537_vm9, %v2659_v3, %v2657_v2 }
  0xc8   :  { %v2752_v8 = vld [vmem:[#allocation1 + $0x51] ss:$7 sm:$0x38]   ;;  %920 = vst.msk [vmem:[#allocation0 + $0x240] ss:$-220 sm:$0x3] %vm402_vm12, %v917_v6   ;;  %v2743_v37 = vsel %vm743_vm10, %v2741_v5, %v2739_v4 }
  0xc9   :  { %922 = vst.msk [vmem:[#allocation0 + $0x140] ss:$36 sm:$0x3c] %vm402_vm12, %v917_v6   ;;  %924 = vst.msk [vmem:[#allocation0 - $0xbd8] ss:$552 sm:$0xc0] %vm402_vm12, %v917_v6   ;;  %v2754_v38 = vsel %vm743_vm10, %v2752_v8, %v2750_v7 }
  0xca   :  { %v2588_v11 = vld [vmem:[#allocation1 + $0xa6] sm:$0x80]   ;;  %v2599_v12 = vld [vmem:[#allocation1 + $0xa7] sm:$0x80]   ;;  %v2623_v14 = vld [vmem:[#allocation1 + $0x95] sm:$0x8]  }
  0xcb   :  { %v2621_v13 = vld [vmem:[#allocation1 + $0xb4] ss:$7 sm:$0x7]   ;;  %v2627_v15 = vld [vmem:[#allocation1 + $0xb5] ss:$7 sm:$0x7]   ;;  %v2590_v49 = vsel %vm434_vm2, %v2588_v11, %v2586_v30  ;;  %v2601_v50 = vsel %vm434_vm2, %v2599_v12, %v2597_v31 }
  0xcc   :  { %v2629_v16 = vld [vmem:[#allocation1 + $0x96] sm:$0x8]   ;;  %v2686_v17 = vld [vmem:[#allocation1 + $0x7a] ss:$-42 sm:%s5201_s30]   ;;  %v2653_v22 = vld [vmem:[#allocation1 + $0x42] sm:$0x80]   ;;  %v2625_v51 = vsel %vm949_vm11, %v2623_v14, %v2621_v13  ;;  %v2603_v11 = vsel %vm2524_vm3, %v2601_v50, %v2590_v49 }
  0xcd   :  { %v2663_v23 = vld [vmem:[#allocation1 + $0x43] sm:$0x80]   ;;  %v2746_v24 = vld [vmem:[#allocation1 + $0x88] ss:$7 sm:%s5192_s28]   ;;  %v2757_v25 = vld [vmem:[#allocation1 + $0x89] ss:$7 sm:%s5194_s29]   ;;  %v2631_v52 = vsel %vm949_vm11, %v2629_v16, %v2627_v15  ;;  %v2655_v56 = vsel %vm434_vm2, %v2653_v22, %v2651_v35  ;;  %v1028_v16 = vpop.permute.xlu0 %1027   ;;  %v1044_v22 = vpop.permute.xlu1 %1043   ;;  %2604 = vrot.lane.b32.xlu0 %v2603_v11, %s4752_s12 }
  0xce   :  { %v2689_v26 = vld [vmem:[#allocation1 + $0x49] ss:$7 sm:%s5203_s2]   ;;  %v2705_v28 = vld [vmem:[#allocation1 + $0x4a] ss:$7 sm:%s5215_s4]   ;;  %944 = vst.msk [vmem:[#allocation0 + $0x381] sm:$0x80] %vm402_vm12, %v937_v29   ;;  %v2665_v57 = vsel %vm434_vm2, %v2663_v23, %v2661_v36  ;;  %v2748_v58 = vsel %vm482_vm4, %v2746_v24, %v2743_v37  ;;  %v2759_v59 = vsel %vm482_vm4, %v2757_v25, %v2754_v38 }
  0xcf   :  { %v2702_v27 = vld [vmem:[#allocation1 + $0x7b] ss:$-42 sm:%s5213_s3]   ;;  %940 = vst.msk [vmem:[#allocation0 + $0x264] ss:$36 sm:$0x1f] %vm402_vm12, %v937_v29   ;;  %v2691_v45 = vsel %vm499_vm0, %v2689_v26, %v2686_v17  ;;  %v2667_v12 = vsel %vm2666_vm8, %v2665_v57, %v2655_v56  ;;  %v2761_v13 = vsel %vm2666_vm8, %v2759_v59, %v2748_v58  ;;  %vm2830_vm1 = vcmask 1014784  }
  0xd0   :  { %v2693_v32 = vld [vmem:[#allocation1 + $0x18] ss:$7 sm:$0x70]   ;;  %v2709_v33 = vld [vmem:[#allocation1 + $0x19] ss:$7 sm:$0x70]   ;;  %v2707_v46 = vsel %vm499_vm0, %v2705_v28, %v2702_v27  ;;  %v2633_v17 = vsel %vm2524_vm3, %v2631_v52, %v2625_v51 }
  0xd1   :  { %942 = vst.msk [vmem:[#allocation0 - $0x464] ss:$332 sm:$0x60] %vm402_vm12, %v937_v29   ;;  %v2810_v39 = vld [vmem:[#allocation1 + $0x24] ss:$7 sm:%s2809_s5]   ;;  %v2695_v1 = vsel %vm537_vm9, %v2693_v32, %v2691_v45  ;;  %v2711_v2 = vsel %vm537_vm9, %v2709_v33, %v2707_v46  ;;  %v4706_v29 = vpack.i.bf16 %v2761_v13, %v2667_v12  ;;  %2634 = vrot.lane.b32.xlu1 %v2633_v17, %s4752_s12  ;;  %v1064_v36 = vpop.permute.xlu0 %1063   ;;  %v4648_v43 = vpop.permute.xlu1 %4647  ;;  %s1943_s19 = smov 3 }
  0xd2   :  { %v2812_v40 = vld [vmem:[#allocation1 - $0xd] ss:$7 sm:$0x7c]   ;;  %v2823_v42 = vld [vmem:[#allocation1 - $0xc] ss:$7 sm:$0x7c]   ;;  %v4649_v49 = vunpack.i.l.bf16 %v4648_v43 }
  0xd3   :  { %v2821_v41 = vld [vmem:[#allocation1 + $0x25] ss:$7 sm:%s2820_s0]   ;;  %955 = vst.msk [vmem:[#allocation0 + $0x3ac] ss:$36 sm:$0x7] %vm402_vm12, %v952_v34   ;;  %v2814_v5 = vsel %vm587_vm7, %v2812_v40, %v2810_v39  ;;  %4707 = vrot.lane.b32.xlu0 %v4706_v29, %s4753_s18  ;;  %s1946_s20 = smov 12 }
  0xd4   :  { %957 = vst.msk [vmem:[#allocation0 + $0x315] sm:$0x8] %vm402_vm12, %v952_v34   ;;  %v2849_v47 = vld [vmem:[#allocation1 + $0x86] ss:$-42 sm:$0x7]   ;;  %v2825_v6 = vsel %vm587_vm7, %v2823_v42, %v2821_v41  ;;  %s1997_s21 = smov 3 }
  0xd5   :  { %v2851_v48 = vld [vmem:[#allocation1 + $0x24] ss:$7 sm:$0x78]   ;;  %v2861_v54 = vld [vmem:[#allocation1 + $0x25] ss:$7 sm:$0x78]  }
  0xd6   :  { %v2859_v53 = vld [vmem:[#allocation1 + $0x87] ss:$-42 sm:$0x7]   ;;  %v2697_v60 = vld [vmem:[#allocation1 + $0xa4] sm:$0x80]   ;;  %v2853_v7 = vsel %vm512_vm5, %v2851_v48, %v2849_v47  ;;  %v4650_v48 = vunpack.i.h.bf16 %v4648_v43  ;;  %s4754_s22 = smov 4  }
  0xd7   :  { %v2713_v61 = vld [vmem:[#allocation1 + $0xa5] sm:$0x80]   ;;  %v2816_v3 = vld [vmem:[#allocation1 + $0x4e] sm:$0x80]   ;;  %v2827_v4 = vld [vmem:[#allocation1 + $0x4f] sm:$0x80]   ;;  %v2863_v9 = vsel %vm512_vm5, %v2861_v54, %v2859_v53  ;;  %v2699_v18 = vsel %vm434_vm2, %v2697_v60, %v2695_v1  ;;  %v4653_v54 = vpop.permute.xlu0 %4652 }
  0xd8   :  { %997 = vst.msk [vmem:[#allocation0 + $0x2a3] ss:$-220 sm:$0x3] %vm402_vm12, %v994_v0   ;;  %999 = vst.msk [vmem:[#allocation0 + $0x3a3] ss:$-220 sm:$0xc] %vm402_vm12, %v994_v0   ;;  %v2715_v19 = vsel %vm434_vm2, %v2713_v61, %v2711_v2  ;;  %v2818_v23 = vsel %vm434_vm2, %v2816_v3, %v2814_v5  ;;  %v2829_v24 = vsel %vm434_vm2, %v2827_v4, %v2825_v6  ;;  %v4655_v59 = vunpack.i.h.bf16 %v4653_v54  ;;  %v1114_v61 = vpop.permute.xlu1 %1113  }
  0xd9   :  { %1001 = vst.msk [vmem:[#allocation0 + $0xa3] ss:$36 sm:$0x70] %vm402_vm12, %v994_v0   ;;  %1003 = vst.msk [vmem:[#allocation0 + $0x39c] sm:$0x80] %vm402_vm12, %v994_v0   ;;  %v2717_v37 = vsel %vm2666_vm8, %v2715_v19, %v2699_v18  ;;  %v2831_v39 = vsel %vm2830_vm1, %v2829_v24, %v2818_v23  ;;  %v4654_v60 = vunpack.i.l.bf16 %v4653_v54  ;;  %s2004_s23 = smov 192 }
  0xda   :  { %v2855_v8 = vld [vmem:[#allocation1 + $0xb0] sm:$0x80]   ;;  %v2865_v10 = vld [vmem:[#allocation1 + $0xb1] sm:$0x80]   ;;  %976 = vst.msk [vmem:[#allocation0 + $0x19c] sm:$0x80] %vm402_vm12, %v4644_v63   ;;  %2718 = vrot.lane.b32.xlu1 %v2717_v37, %s4753_s18 }
  0xdb   :  { %1020 = vst.msk [vmem:[#allocation0 + $0x2c7] ss:$36 sm:$0x3] %vm402_vm12, %v4645_v62   ;;  %1022 = vst.msk [vmem:[#allocation0 + $0x1c7] ss:$36 sm:$0x3c] %vm402_vm12, %v4645_v62   ;;  %v2857_v25 = vsel %vm434_vm2, %v2855_v8, %v2853_v7  ;;  %v2867_v26 = vsel %vm434_vm2, %v2865_v10, %v2863_v9  ;;  %v1139_v3 = vpop.permute.xlu0 %1138  }
  0xdc   :  { %1024 = vst.msk [vmem:[#allocation0 + $0x2ef] ss:$36 sm:$0xc0] %vm402_vm12, %v4645_v62   ;;  %972 = vst.msk [vmem:[#allocation0 + $0xa3] ss:$36 sm:$0x7] %vm402_vm12, %v4644_v63   ;;  %v2869_v40 = vsel %vm2830_vm1, %v2867_v26, %v2857_v25  ;;  %v1155_v9 = vpop.permute.xlu1 %1154  }
  0xdd   :  { %974 = vst.msk [vmem:[#allocation0 - $0x5d] ss:$36 sm:$0x78] %vm402_vm12, %v4644_v63   ;;  %v2780_v14 = vld [vmem:[#allocation1 + $0xc0] ss:$-42 sm:%s5262_s7]   ;;  %v4711_v53 = vpack.i.bf16 %v2869_v40, %v2831_v39  ;;  %s2056_s24 = smov 192 }
  0xde   :  { %v2783_v15 = vld [vmem:[#allocation1 + $0x8f] ss:$7 sm:%s5264_s8]   ;;  %v2791_v21 = vld [vmem:[#allocation1 + $0x90] ss:$7 sm:%s5270_s10]   ;;  %1051 = vst.msk [vmem:[#allocation0 + $0x1db] sm:$0x80] %vm402_vm12, %v1044_v22  }
  0xdf   :  { %v2788_v20 = vld [vmem:[#allocation1 + $0xc1] ss:$-42 sm:%s5268_s9]   ;;  %1031 = vst.msk [vmem:[#allocation0 + $0x30f] ss:$36 sm:$0xf] %vm402_vm12, %v1028_v16   ;;  %v2785_v32 = vsel %vm499_vm0, %v2783_v15, %v2780_v14  ;;  %4712 = vrot.lane.b32.xlu1 %v4711_v53, %s4754_s22  ;;  %s2034_s25 = smov 3  ;;  %v1180_v15 = vpop.permute.xlu0 %1179  }
  0xe0   :  { %v2888_v27 = vld [vmem:[#allocation1 + $0x8d] ss:$-42 sm:%s2887_s13]   ;;  %1047 = vst.msk [vmem:[#allocation0 + $0xe2] ss:$-220 sm:$0x3] %vm402_vm12, %v1044_v22   ;;  %v2793_v38 = vsel %vm499_vm0, %v2791_v21, %v2788_v20  ;;  %v1203_v19 = vpop.permute.xlu1 %1202   ;;  %s4756_s26 = smov 28  }
  0xe1   :  { %v2890_v28 = vld [vmem:[#allocation1 + $0x5c] ss:$7 sm:$0x3c]   ;;  %1049 = vst.msk [vmem:[#allocation0 - $0x1e] ss:$36 sm:$0x7c] %vm402_vm12, %v1044_v22   ;;  %v2795_v52 = vsel %vm2666_vm8, %v2793_v38, %v2785_v32 }
  0xe2   :  { %v2900_v30 = vld [vmem:[#allocation1 + $0x8e] ss:$-42 sm:%s2899_s14]   ;;  %v2907_v41 = vld [vmem:[#allocation1 + $0x1bb] ss:$-42 sm:%s2906_s16]   ;;  %1071 = vst.msk [vmem:[#allocation0 + $0x3db] sm:$0x80] %vm402_vm12, %v1064_v36   ;;  %v2892_v44 = vsel %vm559_vm6, %v2890_v28, %v2888_v27  ;;  %2796 = vrot.lane.b32.xlu0 %v2795_v52, %s4753_s18 }
  0xe3   :  { %v2902_v31 = vld [vmem:[#allocation1 + $0x5d] ss:$7 sm:$0x3c]   ;;  %v407_v35 = vld [vmem:[#allocation1 + $0x38] ss:$7 sm:$0xff]   ;;  %v1220_v25 = vpop.permute.xlu0 %1219   ;;  %vm2528_vm9 = vcmask 97280  }
  0xe4   :  { %v2895_v33 = vld [vmem:[#allocation1 + $0x1ba] ss:$-42 sm:%s2894_s15]   ;;  %410 = vst.msk [vmem:[#allocation0 + $0x124] ss:$36 sm:$0x3f] %vm402_vm12, %v407_v35   ;;  %v2904_v45 = vsel %vm559_vm6, %v2902_v31, %v2900_v30  ;;  %v4658_v27 = vpop.permute.xlu1 %4657  ;;  %vm2533_vm10 = vcmask 228448  }
  0xe5   :  { %v401_v34 = vld [vmem:[#allocation1] ss:$7 sm:$0xff]   ;;  %412 = vst.msk [vmem:[#allocation0 + $0x128] ss:$36 sm:$0xc0] %vm402_vm12, %v407_v35   ;;  %v2897_v55 = vsel %vm482_vm4, %v2895_v33, %v2892_v44  ;;  %v2909_v56 = vsel %vm482_vm4, %v2907_v41, %v2904_v45  ;;  %v4660_v30 = vunpack.i.h.bf16 %v4658_v27  ;;  %v4659_v31 = vunpack.i.l.bf16 %v4658_v27 }
  0xe6   :  { %403 = vst.msk [vmem:[#allocation0] ss:$36 sm:$0x7f] %vm402_vm12, %v401_v34   ;;  %405 = vst.msk [vmem:[#allocation0 + $0xf9] sm:$0x80] %vm402_vm12, %v401_v34   ;;  %v2911_v2 = vsel %vm2830_vm1, %v2909_v56, %v2897_v55  ;;  %vm2670_vm11 = vcmask 64512  }
  0xe7   :  { %v421_v42 = vld [vmem:[#allocation1 + $0xa8] ss:$7 sm:$0xf]   ;;  %1067 = vst.msk [vmem:[#allocation0 + $0x2e2] ss:$-476 sm:$0x3] %vm402_vm12, %v1064_v36   ;;  %2912 = vrot.lane.b32.xlu0 %v2911_v2, %s4754_s22  ;;  %v1278_v33 = vpop.permute.xlu0 %1277  }
  0xe8   :  { %1069 = vst.msk [vmem:[#allocation0 + $0xe2] ss:$36 sm:$0x7c] %vm402_vm12, %v1064_v36   ;;  %v1959_v46 = vld [vmem:[#allocation1 + $0x24] ss:$7 sm:%s1958_s17]   ;;  %v1289_v35 = vpop.permute.xlu1 %1288   ;;  %vm2677_vm13 = vcmask 228416  }
  0xe9   :  { %v1961_v47 = vld [vmem:[#allocation1 - $0xd] ss:$7 sm:$0x7c]   ;;  %424 = vst.msk [vmem:[#allocation0 + $0x36c] ss:$36 sm:$0xf] %vm402_vm12, %v421_v42  }
  0xea   :  { %v1978_v50 = vld [vmem:[#allocation1 + $0x86] ss:$-42 sm:$0x7]   ;;  %v1980_v51 = vld [vmem:[#allocation1 + $0x24] ss:$7 sm:$0x78]   ;;  %v1963_v62 = vsel %vm587_vm7, %v1961_v47, %v1959_v46 }
  0xeb   :  { %1092 = vst.msk [vmem:[#allocation0 + $0x34e] ss:$36 sm:$0xf] %vm402_vm12, %v4650_v48   ;;  %1083 = vst.msk [vmem:[#allocation0 + $0x206] ss:$36 sm:$0x3f] %vm402_vm12, %v4649_v49   ;;  %v1982_v0 = vsel %vm512_vm5, %v1980_v51, %v1978_v50  ;;  %v4663_v37 = vpop.permute.xlu0 %4662 }
  0xec   :  { %1085 = vst.msk [vmem:[#allocation0 + $0x22e] ss:$36 sm:$0xc0] %vm402_vm12, %v4649_v49   ;;  %v2929_v57 = vld [vmem:[#allocation1 + $0x9b] ss:$7 sm:$0xf]   ;;  %v4665_v38 = vunpack.i.h.bf16 %v4663_v37  ;;  %v4664_v39 = vunpack.i.l.bf16 %v4663_v37  ;;  %v1313_v40 = vpop.permute.xlu1 %1312  }
  0xed   :  { %v2931_v58 = vld [vmem:[#allocation1 + $0x9c] ss:$7 sm:$0xf]   ;;  %v1965_v63 = vld [vmem:[#allocation1 + $0x4e] sm:$0x80]   ;;  %vm2271_vm5 = vcmask 228512  }
  0xee   :  { %v1984_v1 = vld [vmem:[#allocation1 + $0xb0] sm:$0x80]   ;;  %1117 = vst.msk [vmem:[#allocation0 + $0x221] ss:$-220 sm:$0x3] %vm402_vm12, %v1114_v61   ;;  %v2933_v4 = vsel %vm2830_vm1, %v2931_v58, %v2929_v57  ;;  %v1967_v7 = vsel %vm434_vm2, %v1965_v63, %v1963_v62  ;;  %vm2834_vm14 = vcmask 31744  }
  0xef   :  { %1119 = vst.msk [vmem:[#allocation0 + $0x121] ss:$36 sm:$0x7c] %vm402_vm12, %v1114_v61   ;;  %1121 = vst.msk [vmem:[#allocation0 + $0x31a] sm:$0x80] %vm402_vm12, %v1114_v61   ;;  %v1986_v8 = vsel %vm434_vm2, %v1984_v1, %v1982_v0  ;;  %2934 = vrot.lane.b32.xlu1 %v2933_v4, %s4754_s22  ;;  %v1338_v41 = vpop.permute.xlu0 %1337   ;;  %vm2841_vm15 = vcmask 228384  }
  0xf0   :  { %1133 = vst.msk [vmem:[#allocation0 + $0x245] ss:$36 sm:$0x3f] %vm402_vm12, %v4655_v59   ;;  %1135 = vst.msk [vmem:[#allocation0 + $0x26d] ss:$36 sm:$0xc0] %vm402_vm12, %v4655_v59   ;;  %v4716_v13 = vpack.i.bf16 %v1986_v8, %v1967_v7  ;;  %v1350_v42 = vpop.permute.xlu1 %1349  }
  0xf1   :  { %1099 = vst.msk [vmem:[#allocation0 + $0x21] ss:$36 sm:$0x7f] %vm402_vm12, %v4654_v60   ;;  %1101 = vst.msk [vmem:[#allocation0 + $0x11a] sm:$0x80] %vm402_vm12, %v4654_v60  }
  0xf2   :  { %v1944_v5 = vld [vmem:[#allocation1 + $0xc0] ss:$-42 sm:%s1943_s19]   ;;  %1142 = vst.msk [vmem:[#allocation0 + $0x38d] ss:$36 sm:$0xf] %vm402_vm12, %v1139_v3  }
  0xf3   :  { %v1947_v6 = vld [vmem:[#allocation1 + $0x8f] ss:$7 sm:%s1946_s20]   ;;  %v2000_v11 = vld [vmem:[#allocation1 + $0x5c] ss:$7 sm:$0x3c]   ;;  %v1369_v43 = vpop.permute.xlu0 %1368  }
  0xf4   :  { %v1998_v10 = vld [vmem:[#allocation1 + $0x8d] ss:$-42 sm:%s1997_s21]   ;;  %1158 = vst.msk [vmem:[#allocation0 + $0x60] ss:$36 sm:$0x1f] %vm402_vm12, %v1155_v9   ;;  %v1949_v12 = vsel %vm499_vm0, %v1947_v6, %v1944_v5  ;;  %v1389_v44 = vpop.permute.xlu1 %1388   ;;  %vm2100_vm0 = vcmask 195584  }
  0xf5   :  { %1160 = vst.msk [vmem:[#allocation0 - $0xa0] ss:$36 sm:$0x60] %vm402_vm12, %v1155_v9   ;;  %1162 = vst.msk [vmem:[#allocation0 + $0x159] sm:$0x80] %vm402_vm12, %v1155_v9   ;;  %v2002_v16 = vsel %vm559_vm6, %v2000_v11, %v1998_v10  ;;  %1950 = vrot.lane.b32.xlu0 %v1949_v12, %s4748_s11  ;;  %s4755_s11 = smov 32  }
  0xf6   :  { %v2005_v14 = vld [vmem:[#allocation1 + $0x1ba] ss:$-42 sm:%s2004_s23]   ;;  %1183 = vst.msk [vmem:[#allocation0 + $0x260] ss:$-220 sm:$0x3] %vm402_vm12, %v1180_v15   ;;  %4717 = vrot.lane.b32.xlu1 %v4716_v13, %s4755_s11  ;;  %vm2414_vm6 = vcmask 130048  }
  0xf7   :  { %v2054_v17 = vld [vmem:[#allocation1 + $0x6f] ss:$7 sm:$0x3f]   ;;  %1185 = vst.msk [vmem:[#allocation0 + $0x160] ss:$36 sm:$0x1c] %vm402_vm12, %v1180_v15   ;;  %v2007_v22 = vsel %vm482_vm4, %v2005_v14, %v2002_v16  ;;  %v1404_v45 = vpop.permute.xlu0 %1403  }
  0xf8   :  { %v2057_v18 = vld [vmem:[#allocation1 + $0x76] ss:$7 sm:%s2056_s24]   ;;  %1187 = vst.msk [vmem:[#allocation0 + $0x60] ss:$36 sm:$0x60] %vm402_vm12, %v1180_v15   ;;  %v4668_v46 = vpop.permute.xlu1 %4667 }
  0xf9   :  { %1189 = vst.msk [vmem:[#allocation0 + $0x359] sm:$0x80] %vm402_vm12, %v1180_v15   ;;  %1206 = vst.msk [vmem:[#allocation0 + $0x284] ss:$36 sm:$0xf] %vm402_vm12, %v1203_v19   ;;  %v2059_v24 = vsel %vm482_vm4, %v2057_v18, %v2054_v17  ;;  %2008 = vrot.lane.b32.xlu0 %v2007_v22, %s4755_s11  ;;  %v4670_v47 = vunpack.i.h.bf16 %v4668_v46  ;;  %v4669_v48 = vunpack.i.l.bf16 %v4668_v46  ;;  %vm2264_vm4 = vcmask 162816  }
  0xfa   :  { %1208 = vst.msk [vmem:[#allocation0 + $0x184] ss:$36 sm:$0x30] %vm402_vm12, %v1203_v19   ;;  %1210 = vst.msk [vmem:[#allocation0 + $0x2ac] ss:$36 sm:$0xc0] %vm402_vm12, %v1203_v19  }
  0xfb   :  { %v2035_v20 = vld [vmem:[#allocation1 + $0x68] ss:$-42 sm:%s2034_s25]   ;;  %1223 = vst.msk [vmem:[#allocation0 + $0x3cc] ss:$36 sm:$0x3] %vm402_vm12, %v1220_v25   ;;  %v1446_v49 = vpop.permute.xlu0 %1445  }
  0xfc   :  { %v2037_v21 = vld [vmem:[#allocation1 + $0x37] ss:$7 sm:$0x7c]   ;;  %v2025_v23 = vld [vmem:[#allocation1 + $0x6] ss:$7 sm:$0xff]   ;;  %v1485_v50 = vpop.permute.xlu1 %1484  }
  0xfd   :  { %v2018_v26 = vld [vmem:[#allocation1 + $0x9b] ss:$7 sm:$0xf]   ;;  %1225 = vst.msk [vmem:[#allocation0 + $0x2cc] ss:$36 sm:$0xc] %vm402_vm12, %v1220_v25   ;;  %v2039_v28 = vsel %vm587_vm7, %v2037_v21, %v2035_v20  ;;  %v4721_v32 = vpack.i.bf16 %v2059_v24, %v2025_v23 }
  0xfe   :  { %v2041_v29 = vld [vmem:[#allocation1 + $0x92] sm:$0x80]   ;;  %2019 = vrot.lane.b32.xlu1 %v2018_v26, %s4755_s11  ;;  %1260 = vst.msk [vmem:[#allocation0 + $0x2c3] ss:$-220 sm:$0x7] %vm402_vm12, %v4660_v30   ;;  %vm2421_vm7 = vcmask 228480  }
  0xff   :  { %1262 = vst.msk [vmem:[#allocation0 + $0xc3] ss:$36 sm:$0x78] %vm402_vm12, %v4660_v30   ;;  %1264 = vst.msk [vmem:[#allocation0 + $0x3bc] sm:$0x80] %vm402_vm12, %v4660_v30   ;;  %v2043_v34 = vsel %vm434_vm2, %v2041_v29, %v2039_v28  ;;  %4722 = vrot.lane.b32.xlu0 %v4721_v32, %s4756_s26  ;;  %v1503_v51 = vpop.permute.xlu0 %1502   ;;  %vm2107_vm2 = vcmask 228544  }
 0x100   :  { %1241 = vst.msk [vmem:[#allocation0 + $0xc3] ss:$36 sm:$0x3] %vm402_vm12, %v4659_v31   ;;  %1243 = vst.msk [vmem:[#allocation0 - $0x3d] ss:$36 sm:$0x7c] %vm402_vm12, %v4659_v31   ;;  %v1523_v52 = vpop.permute.xlu1 %1522  }
 0x101   :  { %1245 = vst.msk [vmem:[#allocation0 + $0x1bc] sm:$0x80] %vm402_vm12, %v4659_v31   ;;  %1281 = vst.msk [vmem:[#allocation0 + $0x2e7] ss:$-220 sm:$0x3] %vm402_vm12, %v1278_v33  }
 0x102   :  { %1283 = vst.msk [vmem:[#allocation0 + $0x1e7] ss:$36 sm:$0x3c] %vm402_vm12, %v1278_v33   ;;  %1285 = vst.msk [vmem:[#allocation0 + $0x90f] ss:$-220 sm:$0xc0] %vm402_vm12, %v1278_v33   ;;  %2044 = vrot.lane.b32.xlu1 %v2043_v34, %s4756_s26 }
 0x103   :  { %1292 = vst.msk [vmem:[#allocation0 + $0x32f] ss:$36 sm:$0xf] %vm402_vm12, %v1289_v35   ;;  %v2068_v36 = vld [vmem:[#allocation1 + $0xae] ss:$7 sm:$0xf]   ;;  %v4673_v53 = vpop.permute.xlu0 %4672 }
 0x104   :  { %1316 = vst.msk [vmem:[#allocation0 + $0x202] ss:$-220 sm:$0x3] %vm402_vm12, %v1313_v40   ;;  %1318 = vst.msk [vmem:[#allocation0 + $0x102] ss:$36 sm:$0x7c] %vm402_vm12, %v1313_v40   ;;  %2069 = vrot.lane.b32.xlu0 %v2068_v36, %s4756_s26  ;;  %v4675_v54 = vunpack.i.h.bf16 %v4673_v53  ;;  %v4674_v55 = vunpack.i.l.bf16 %v4673_v53  ;;  %v4678_v56 = vpop.permute.xlu1 %4677 }
 0x105   :  { %1320 = vst.msk [vmem:[#allocation0 + $0x2fb] sm:$0x80] %vm402_vm12, %v1313_v40   ;;  %1332 = vst.msk [vmem:[#allocation0 + $0x226] ss:$36 sm:$0x3f] %vm402_vm12, %v4665_v38   ;;  %v4680_v57 = vunpack.i.h.bf16 %v4678_v56  ;;  %v4679_v58 = vunpack.i.l.bf16 %v4678_v56 }
 0x106   :  { %1334 = vst.msk [vmem:[#allocation0 + $0x24e] ss:$36 sm:$0xc0] %vm402_vm12, %v4665_v38   ;;  %1298 = vst.msk [vmem:[#allocation0 + $0x2] ss:$36 sm:$0x7f] %vm402_vm12, %v4664_v39  }
 0x107   :  { %1300 = vst.msk [vmem:[#allocation0 + $0xfb] sm:$0x80] %vm402_vm12, %v4664_v39   ;;  %1341 = vst.msk [vmem:[#allocation0 + $0x36e] ss:$36 sm:$0xf] %vm402_vm12, %v1338_v41   ;;  %v1573_v59 = vpop.permute.xlu0 %1572  }
 0x108   :  { %1353 = vst.msk [vmem:[#allocation0 + $0x41] ss:$36 sm:$0x3f] %vm402_vm12, %v1350_v42   ;;  %1355 = vst.msk [vmem:[#allocation0 - $0x6d7] ss:$296 sm:$0xc0] %vm402_vm12, %v1350_v42   ;;  %v1598_v60 = vpop.permute.xlu1 %1597  }
 0x109   :  { %1372 = vst.msk [vmem:[#allocation0 + $0x241] ss:$-220 sm:$0x3] %vm402_vm12, %v1369_v43   ;;  %1374 = vst.msk [vmem:[#allocation0 + $0x141] ss:$36 sm:$0x3c] %vm402_vm12, %v1369_v43  }
 0x10a   :  { %1376 = vst.msk [vmem:[#allocation0 - $0xbd7] ss:$552 sm:$0xc0] %vm402_vm12, %v1369_v43   ;;  %1392 = vst.msk [vmem:[#allocation0 + $0x265] ss:$36 sm:$0x1f] %vm402_vm12, %v1389_v44  }
 0x10b   :  { %1394 = vst.msk [vmem:[#allocation0 - $0x463] ss:$332 sm:$0x60] %vm402_vm12, %v1389_v44   ;;  %1396 = vst.msk [vmem:[#allocation0 + $0x382] sm:$0x80] %vm402_vm12, %v1389_v44   ;;  %v1614_v61 = vpop.permute.xlu0 %1613  }
 0x10c   :  { %1407 = vst.msk [vmem:[#allocation0 + $0x3ad] ss:$36 sm:$0x7] %vm402_vm12, %v1404_v45   ;;  %1409 = vst.msk [vmem:[#allocation0 + $0x316] sm:$0x8] %vm402_vm12, %v1404_v45   ;;  %v1639_v62 = vpop.permute.xlu1 %1638  }
 0x10d   :  { %1471 = vst.msk [vmem:[#allocation0 + $0x2a4] ss:$36 sm:$0x7] %vm402_vm12, %v4670_v47   ;;  %1473 = vst.msk [vmem:[#allocation0 + $0x1a4] ss:$36 sm:$0x38] %vm402_vm12, %v4670_v47  }
 0x10e   :  { %1475 = vst.msk [vmem:[#allocation0 + $0x2cc] ss:$36 sm:$0xc0] %vm402_vm12, %v4670_v47   ;;  %1424 = vst.msk [vmem:[#allocation0 + $0x80] ss:$36 sm:$0xf] %vm402_vm12, %v4669_v48  }
 0x10f   :  { %1426 = vst.msk [vmem:[#allocation0 - $0x80] ss:$36 sm:$0x70] %vm402_vm12, %v4669_v48   ;;  %1428 = vst.msk [vmem:[#allocation0 + $0x179] sm:$0x80] %vm402_vm12, %v4669_v48   ;;  %v1662_v63 = vpop.permute.xlu0 %1661  }
 0x110   :  { %1449 = vst.msk [vmem:[#allocation0 + $0x280] ss:$-220 sm:$0x3] %vm402_vm12, %v1446_v49   ;;  %1451 = vst.msk [vmem:[#allocation0 + $0x180] ss:$36 sm:$0xc] %vm402_vm12, %v1446_v49   ;;  %v1679_v0 = vpop.permute.xlu1 %1678  }
 0x111   :  { %1453 = vst.msk [vmem:[#allocation0 + $0x80] ss:$36 sm:$0x70] %vm402_vm12, %v1446_v49   ;;  %1455 = vst.msk [vmem:[#allocation0 + $0x379] sm:$0x80] %vm402_vm12, %v1446_v49  }
 0x112   :  { %1488 = vst.msk [vmem:[#allocation0 + $0x3ec] ss:$-220 sm:$0x3] %vm402_vm12, %v1485_v50   ;;  %1490 = vst.msk [vmem:[#allocation0 + $0x2ec] ss:$36 sm:$0xc] %vm402_vm12, %v1485_v50  }
 0x113   :  { %1506 = vst.msk [vmem:[#allocation0 + $0xe3] ss:$-220 sm:$0x3] %vm402_vm12, %v1503_v51   ;;  %1508 = vst.msk [vmem:[#allocation0 - $0x1d] ss:$36 sm:$0x7c] %vm402_vm12, %v1503_v51   ;;  %v4683_v1 = vpop.permute.xlu0 %4682 }
 0x114   :  { %1510 = vst.msk [vmem:[#allocation0 + $0x1dc] sm:$0x80] %vm402_vm12, %v1503_v51   ;;  %1526 = vst.msk [vmem:[#allocation0 + $0x2e3] ss:$-476 sm:$0x3] %vm402_vm12, %v1523_v52   ;;  %v4685_v2 = vunpack.i.h.bf16 %v4683_v1  ;;  %v4684_v3 = vunpack.i.l.bf16 %v4683_v1  ;;  %v1721_v4 = vpop.permute.xlu1 %1720  }
 0x115   :  { %1528 = vst.msk [vmem:[#allocation0 + $0xe3] ss:$36 sm:$0x7c] %vm402_vm12, %v1523_v52   ;;  %1530 = vst.msk [vmem:[#allocation0 + $0x3dc] sm:$0x80] %vm402_vm12, %v1523_v52  }
 0x116   :  { %1551 = vst.msk [vmem:[#allocation0 + $0x34f] ss:$36 sm:$0xf] %vm402_vm12, %v4675_v54   ;;  %1542 = vst.msk [vmem:[#allocation0 + $0x207] ss:$36 sm:$0x3f] %vm402_vm12, %v4674_v55  }
 0x117   :  { %1544 = vst.msk [vmem:[#allocation0 + $0x22f] ss:$36 sm:$0xc0] %vm402_vm12, %v4674_v55   ;;  %1592 = vst.msk [vmem:[#allocation0 + $0x246] ss:$36 sm:$0x3f] %vm402_vm12, %v4680_v57   ;;  %v1755_v5 = vpop.permute.xlu0 %1754  }
 0x118   :  { %1594 = vst.msk [vmem:[#allocation0 + $0x26e] ss:$36 sm:$0xc0] %vm402_vm12, %v4680_v57   ;;  %1558 = vst.msk [vmem:[#allocation0 + $0x22] ss:$36 sm:$0x7f] %vm402_vm12, %v4679_v58   ;;  %v4688_v6 = vpop.permute.xlu1 %4687 }
 0x119   :  { %1560 = vst.msk [vmem:[#allocation0 + $0x11b] sm:$0x80] %vm402_vm12, %v4679_v58   ;;  %1576 = vst.msk [vmem:[#allocation0 + $0x222] ss:$-220 sm:$0x3] %vm402_vm12, %v1573_v59   ;;  %v4690_v7 = vunpack.i.h.bf16 %v4688_v6  ;;  %v4689_v8 = vunpack.i.l.bf16 %v4688_v6 }
 0x11a   :  { %1578 = vst.msk [vmem:[#allocation0 + $0x122] ss:$36 sm:$0x7c] %vm402_vm12, %v1573_v59   ;;  %1580 = vst.msk [vmem:[#allocation0 + $0x31b] sm:$0x80] %vm402_vm12, %v1573_v59  }
 0x11b   :  { %1601 = vst.msk [vmem:[#allocation0 + $0x38e] ss:$36 sm:$0xf] %vm402_vm12, %v1598_v60   ;;  %1617 = vst.msk [vmem:[#allocation0 + $0x61] ss:$36 sm:$0x1f] %vm402_vm12, %v1614_v61   ;;  %v1779_v9 = vpop.permute.xlu0 %1778  }
 0x11c   :  { %1619 = vst.msk [vmem:[#allocation0 - $0x9f] ss:$36 sm:$0x60] %vm402_vm12, %v1614_v61   ;;  %1621 = vst.msk [vmem:[#allocation0 + $0x15a] sm:$0x80] %vm402_vm12, %v1614_v61   ;;  %v1804_v10 = vpop.permute.xlu1 %1803  }
 0x11d   :  { %1642 = vst.msk [vmem:[#allocation0 + $0x261] ss:$-220 sm:$0x3] %vm402_vm12, %v1639_v62   ;;  %1644 = vst.msk [vmem:[#allocation0 + $0x161] ss:$36 sm:$0x1c] %vm402_vm12, %v1639_v62  }
 0x11e   :  { %1646 = vst.msk [vmem:[#allocation0 + $0x61] ss:$36 sm:$0x60] %vm402_vm12, %v1639_v62   ;;  %1648 = vst.msk [vmem:[#allocation0 + $0x35a] sm:$0x80] %vm402_vm12, %v1639_v62  }
 0x11f   :  { %1665 = vst.msk [vmem:[#allocation0 + $0x285] ss:$36 sm:$0xf] %vm402_vm12, %v1662_v63   ;;  %1667 = vst.msk [vmem:[#allocation0 + $0x185] ss:$36 sm:$0x30] %vm402_vm12, %v1662_v63   ;;  %v1816_v11 = vpop.permute.xlu0 %1815  }
 0x120   :  { %1669 = vst.msk [vmem:[#allocation0 + $0x2ad] ss:$36 sm:$0xc0] %vm402_vm12, %v1662_v63   ;;  %1682 = vst.msk [vmem:[#allocation0 + $0x3cd] ss:$36 sm:$0x3] %vm402_vm12, %v1679_v0   ;;  %v1835_v12 = vpop.permute.xlu1 %1834  }
 0x121   :  { %1684 = vst.msk [vmem:[#allocation0 + $0x2cd] ss:$36 sm:$0xc] %vm402_vm12, %v1679_v0   ;;  %1724 = vst.msk [vmem:[#allocation0 + $0x2a0] ss:$-220 sm:$0x3] %vm402_vm12, %v1721_v4  }
 0x122   :  { %1726 = vst.msk [vmem:[#allocation0 + $0x3a0] ss:$-220 sm:$0xc] %vm402_vm12, %v1721_v4   ;;  %1728 = vst.msk [vmem:[#allocation0 + $0xa0] ss:$36 sm:$0x70] %vm402_vm12, %v1721_v4  }
 0x123   :  { %1730 = vst.msk [vmem:[#allocation0 + $0x399] sm:$0x80] %vm402_vm12, %v1721_v4   ;;  %1747 = vst.msk [vmem:[#allocation0 + $0x2c4] ss:$36 sm:$0x3] %vm402_vm12, %v4685_v2   ;;  %v1855_v13 = vpop.permute.xlu0 %1854  }
 0x124   :  { %1749 = vst.msk [vmem:[#allocation0 + $0x1c4] ss:$36 sm:$0x3c] %vm402_vm12, %v4685_v2   ;;  %1751 = vst.msk [vmem:[#allocation0 + $0x2ec] ss:$36 sm:$0xc0] %vm402_vm12, %v4685_v2   ;;  %v1870_v14 = vpop.permute.xlu1 %1869  }
 0x125   :  { %1699 = vst.msk [vmem:[#allocation0 + $0xa0] ss:$36 sm:$0x7] %vm402_vm12, %v4684_v3   ;;  %1701 = vst.msk [vmem:[#allocation0 - $0x60] ss:$36 sm:$0x78] %vm402_vm12, %v4684_v3  }
 0x126   :  { %1703 = vst.msk [vmem:[#allocation0 + $0x199] sm:$0x80] %vm402_vm12, %v4684_v3   ;;  %1758 = vst.msk [vmem:[#allocation0 + $0x30c] ss:$36 sm:$0xf] %vm402_vm12, %v1755_v5  }
 0x127   :  { %1798 = vst.msk [vmem:[#allocation0 + $0x227] ss:$36 sm:$0x3f] %vm402_vm12, %v4690_v7   ;;  %1800 = vst.msk [vmem:[#allocation0 + $0x24f] ss:$36 sm:$0xc0] %vm402_vm12, %v4690_v7   ;;  %v4693_v15 = vpop.permute.xlu0 %4692 }
 0x128   :  { %1764 = vst.msk [vmem:[#allocation0 + $0x3] ss:$36 sm:$0x7f] %vm402_vm12, %v4689_v8   ;;  %1766 = vst.msk [vmem:[#allocation0 + $0xfc] sm:$0x80] %vm402_vm12, %v4689_v8   ;;  %v4695_v16 = vunpack.i.h.bf16 %v4693_v15  ;;  %v4694_v17 = vunpack.i.l.bf16 %v4693_v15  ;;  %v1912_v18 = vpop.permute.xlu1 %1911  }
 0x129   :  { %1782 = vst.msk [vmem:[#allocation0 + $0x203] ss:$-220 sm:$0x3] %vm402_vm12, %v1779_v9   ;;  %1784 = vst.msk [vmem:[#allocation0 + $0x103] ss:$36 sm:$0x7c] %vm402_vm12, %v1779_v9  }
 0x12a   :  { %1786 = vst.msk [vmem:[#allocation0 + $0x2fc] sm:$0x80] %vm402_vm12, %v1779_v9   ;;  %1807 = vst.msk [vmem:[#allocation0 + $0x36f] ss:$36 sm:$0xf] %vm402_vm12, %v1804_v10  }
 0x12b   :  { %1819 = vst.msk [vmem:[#allocation0 + $0x42] ss:$36 sm:$0x3f] %vm402_vm12, %v1816_v11   ;;  %1821 = vst.msk [vmem:[#allocation0 - $0x6d6] ss:$296 sm:$0xc0] %vm402_vm12, %v1816_v11   ;;  %v2099_v19 = vpop.permute.xlu0 %2098  }
 0x12c   :  { %1838 = vst.msk [vmem:[#allocation0 + $0x242] ss:$-220 sm:$0x3] %vm402_vm12, %v1835_v12   ;;  %1840 = vst.msk [vmem:[#allocation0 + $0x142] ss:$36 sm:$0x3c] %vm402_vm12, %v1835_v12   ;;  %v2149_v20 = vpop.permute.xlu1 %2148  }
 0x12d   :  { %1842 = vst.msk [vmem:[#allocation0 - $0xbd6] ss:$552 sm:$0xc0] %vm402_vm12, %v1835_v12   ;;  %1858 = vst.msk [vmem:[#allocation0 + $0x266] ss:$36 sm:$0x1f] %vm402_vm12, %v1855_v13  }
 0x12e   :  { %1860 = vst.msk [vmem:[#allocation0 - $0x462] ss:$332 sm:$0x60] %vm402_vm12, %v1855_v13   ;;  %1862 = vst.msk [vmem:[#allocation0 + $0x383] sm:$0x80] %vm402_vm12, %v1855_v13  }
 0x12f   :  { %1873 = vst.msk [vmem:[#allocation0 + $0x3ae] ss:$36 sm:$0x7] %vm402_vm12, %v1870_v14   ;;  %1875 = vst.msk [vmem:[#allocation0 + $0x317] sm:$0x8] %vm402_vm12, %v1870_v14   ;;  %v2195_v21 = vpop.permute.xlu0 %2194  }
 0x130   :  { %1915 = vst.msk [vmem:[#allocation0 + $0x281] ss:$-220 sm:$0x3] %vm402_vm12, %v1912_v18   ;;  %1917 = vst.msk [vmem:[#allocation0 + $0x181] ss:$36 sm:$0xc] %vm402_vm12, %v1912_v18   ;;  %v2229_v22 = vpop.permute.xlu1 %2228  }
 0x131   :  { %1919 = vst.msk [vmem:[#allocation0 + $0x81] ss:$36 sm:$0x70] %vm402_vm12, %v1912_v18   ;;  %1921 = vst.msk [vmem:[#allocation0 + $0x37a] sm:$0x80] %vm402_vm12, %v1912_v18  }
 0x132   :  { %1937 = vst.msk [vmem:[#allocation0 + $0x2a5] ss:$36 sm:$0x7] %vm402_vm12, %v4695_v16   ;;  %1939 = vst.msk [vmem:[#allocation0 + $0x1a5] ss:$36 sm:$0x38] %vm402_vm12, %v4695_v16  }
 0x133   :  { %1941 = vst.msk [vmem:[#allocation0 + $0x2cd] ss:$36 sm:$0xc0] %vm402_vm12, %v4695_v16   ;;  %1890 = vst.msk [vmem:[#allocation0 + $0x81] ss:$36 sm:$0xf] %vm402_vm12, %v4694_v17   ;;  %v4698_v23 = vpop.permute.xlu0 %4697 }
 0x134   :  { %1892 = vst.msk [vmem:[#allocation0 - $0x7f] ss:$36 sm:$0x70] %vm402_vm12, %v4694_v17   ;;  %1894 = vst.msk [vmem:[#allocation0 + $0x17a] sm:$0x80] %vm402_vm12, %v4694_v17   ;;  %v4700_v24 = vunpack.i.h.bf16 %v4698_v23  ;;  %v4699_v25 = vunpack.i.l.bf16 %v4698_v23  ;;  %v2313_v26 = vpop.permute.xlu1 %2312  }
 0x135   :  { %2102 = vst.msk [vmem:[#allocation0 + $0x62] ss:$36 sm:$0x1f] %vm2100_vm0, %v2099_v19   ;;  %2104 = vst.msk [vmem:[#allocation0 - $0x9e] ss:$36 sm:$0x60] %vm2100_vm0, %v2099_v19  }
 0x136   :  { %2106 = vst.msk [vmem:[#allocation0 + $0x15b] sm:$0x80] %vm2100_vm0, %v2099_v19   ;;  %2152 = vst.msk [vmem:[#allocation0 + $0x262] ss:$-220 sm:$0x3] %vm2100_vm0, %v2149_v20  }
 0x137   :  { %2109 = vst.msk [vmem:[#allocation0 + $0x62] ss:$36 sm:$0x1f] %vm2107_vm2, %v2099_v19   ;;  %2111 = vst.msk [vmem:[#allocation0 - $0x9e] ss:$36 sm:$0x60] %vm2107_vm2, %v2099_v19   ;;  %v2381_v27 = vpop.permute.xlu0 %2380  }
 0x138   :  { %2113 = vst.msk [vmem:[#allocation0 + $0x15b] sm:$0x80] %vm2107_vm2, %v2099_v19   ;;  %2161 = vst.msk [vmem:[#allocation0 + $0x262] ss:$-220 sm:$0x3] %vm2107_vm2, %v2149_v20   ;;  %v2413_v28 = vpop.permute.xlu1 %2412  }
 0x139   :  { %2154 = vst.msk [vmem:[#allocation0 + $0x162] ss:$36 sm:$0x1c] %vm2100_vm0, %v2149_v20   ;;  %2156 = vst.msk [vmem:[#allocation0 + $0x62] ss:$36 sm:$0x60] %vm2100_vm0, %v2149_v20  }
 0x13a   :  { %2158 = vst.msk [vmem:[#allocation0 + $0x35b] sm:$0x80] %vm2100_vm0, %v2149_v20   ;;  %2198 = vst.msk [vmem:[#allocation0 + $0x286] ss:$36 sm:$0xf] %vm2100_vm0, %v2195_v21  }
 0x13b   :  { %2163 = vst.msk [vmem:[#allocation0 + $0x162] ss:$36 sm:$0x1c] %vm2107_vm2, %v2149_v20   ;;  %2165 = vst.msk [vmem:[#allocation0 + $0x62] ss:$36 sm:$0x60] %vm2107_vm2, %v2149_v20   ;;  %v2453_v29 = vpop.permute.xlu0 %2452  }
 0x13c   :  { %2167 = vst.msk [vmem:[#allocation0 + $0x35b] sm:$0x80] %vm2107_vm2, %v2149_v20   ;;  %2205 = vst.msk [vmem:[#allocation0 + $0x286] ss:$36 sm:$0xf] %vm2107_vm2, %v2195_v21   ;;  %v4703_v30 = vpop.permute.xlu1 %4702 }
 0x13d   :  { %2200 = vst.msk [vmem:[#allocation0 + $0x186] ss:$36 sm:$0x30] %vm2100_vm0, %v2195_v21   ;;  %2202 = vst.msk [vmem:[#allocation0 + $0x2ae] ss:$36 sm:$0xc0] %vm2100_vm0, %v2195_v21   ;;  %v4705_v31 = vunpack.i.h.bf16 %v4703_v30  ;;  %v4704_v32 = vunpack.i.l.bf16 %v4703_v30 }
 0x13e   :  { %2207 = vst.msk [vmem:[#allocation0 + $0x186] ss:$36 sm:$0x30] %vm2107_vm2, %v2195_v21   ;;  %2209 = vst.msk [vmem:[#allocation0 + $0x2ae] ss:$36 sm:$0xc0] %vm2107_vm2, %v2195_v21  }
 0x13f   :  { %2232 = vst.msk [vmem:[#allocation0 + $0x3ce] ss:$36 sm:$0x3] %vm2100_vm0, %v2229_v22   ;;  %2234 = vst.msk [vmem:[#allocation0 + $0x2ce] ss:$36 sm:$0xc] %vm2100_vm0, %v2229_v22   ;;  %v2527_v33 = vpop.permute.xlu0 %2526  }
 0x140   :  { %2237 = vst.msk [vmem:[#allocation0 + $0x3ce] ss:$36 sm:$0x3] %vm2107_vm2, %v2229_v22   ;;  %2239 = vst.msk [vmem:[#allocation0 + $0x2ce] ss:$36 sm:$0xc] %vm2107_vm2, %v2229_v22   ;;  %v2565_v34 = vpop.permute.xlu1 %2564  }
 0x141   :  { %2316 = vst.msk [vmem:[#allocation0 + $0x2a1] ss:$-220 sm:$0x3] %vm2264_vm4, %v2313_v26   ;;  %2318 = vst.msk [vmem:[#allocation0 + $0x3a1] ss:$-220 sm:$0xc] %vm2264_vm4, %v2313_v26  }
 0x142   :  { %2320 = vst.msk [vmem:[#allocation0 + $0xa1] ss:$36 sm:$0x70] %vm2264_vm4, %v2313_v26   ;;  %2322 = vst.msk [vmem:[#allocation0 + $0x39a] sm:$0x80] %vm2264_vm4, %v2313_v26   ;;  %v2992_v46 = vld [vmem:[#allocation0 + $0x38] sm:$0xff] }
 0x143   :  { %2362 = vst.msk [vmem:[#allocation0 + $0x2c5] ss:$36 sm:$0x3] %vm2264_vm4, %v4700_v24   ;;  %2364 = vst.msk [vmem:[#allocation0 + $0x1c5] ss:$36 sm:$0x3c] %vm2264_vm4, %v4700_v24   ;;  %v2605_v35 = vpop.permute.xlu0 %2604  }
 0x144   :  { %2366 = vst.msk [vmem:[#allocation0 + $0x2ed] ss:$36 sm:$0xc0] %vm2264_vm4, %v4700_v24   ;;  %2266 = vst.msk [vmem:[#allocation0 + $0xa1] ss:$36 sm:$0x7] %vm2264_vm4, %v4699_v25   ;;  %v2635_v36 = vpop.permute.xlu1 %2634  }
 0x145   :  { %2268 = vst.msk [vmem:[#allocation0 - $0x5f] ss:$36 sm:$0x78] %vm2264_vm4, %v4699_v25   ;;  %2270 = vst.msk [vmem:[#allocation0 + $0x19a] sm:$0x80] %vm2264_vm4, %v4699_v25   ;;  %v3216_v47 = vld [vmem:[#allocation0 + $0x138] sm:$0xff] }
 0x146   :  { %2325 = vst.msk [vmem:[#allocation0 + $0x2a1] ss:$-220 sm:$0x3] %vm2271_vm5, %v2313_v26   ;;  %2327 = vst.msk [vmem:[#allocation0 + $0x3a1] ss:$-220 sm:$0xc] %vm2271_vm5, %v2313_v26  }
 0x147   :  { %2329 = vst.msk [vmem:[#allocation0 + $0xa1] ss:$36 sm:$0x70] %vm2271_vm5, %v2313_v26   ;;  %2331 = vst.msk [vmem:[#allocation0 + $0x39a] sm:$0x80] %vm2271_vm5, %v2313_v26   ;;  %v4708_v37 = vpop.permute.xlu0 %4707  ;;  %v3440_v57 = vld [vmem:[#allocation0 + $0x238] sm:$0xff] }
 0x148   :  { %2369 = vst.msk [vmem:[#allocation0 + $0x2c5] ss:$36 sm:$0x3] %vm2271_vm5, %v4700_v24   ;;  %2371 = vst.msk [vmem:[#allocation0 + $0x1c5] ss:$36 sm:$0x3c] %vm2271_vm5, %v4700_v24   ;;  %v4710_v38 = vunpack.i.h.bf16 %v4708_v37  ;;  %v4709_v39 = vunpack.i.l.bf16 %v4708_v37 }
 0x149   :  { %2373 = vst.msk [vmem:[#allocation0 + $0x2ed] ss:$36 sm:$0xc0] %vm2271_vm5, %v4700_v24   ;;  %2273 = vst.msk [vmem:[#allocation0 + $0xa1] ss:$36 sm:$0x7] %vm2271_vm5, %v4699_v25  }
 0x14a   :  { %2275 = vst.msk [vmem:[#allocation0 - $0x5f] ss:$36 sm:$0x78] %vm2271_vm5, %v4699_v25   ;;  %2277 = vst.msk [vmem:[#allocation0 + $0x19a] sm:$0x80] %vm2271_vm5, %v4699_v25   ;;  %v3664_v19 = vld [vmem:[#allocation0 + $0x338] sm:$0xff] }
 0x14b   :  { %2384 = vst.msk [vmem:[#allocation0 + $0x30d] ss:$36 sm:$0xf] %vm2264_vm4, %v2381_v27  }
 0x14c   :  { %2387 = vst.msk [vmem:[#allocation0 + $0x30d] ss:$36 sm:$0xf] %vm2271_vm5, %v2381_v27   ;;  %v2719_v40 = vpop.permute.xlu1 %2718  }
 0x14d   :  { %2416 = vst.msk [vmem:[#allocation0 + $0xe0] ss:$-220 sm:$0x3] %vm2414_vm6, %v2413_v28   ;;  %2418 = vst.msk [vmem:[#allocation0 - $0x20] ss:$36 sm:$0x7c] %vm2414_vm6, %v2413_v28  }
 0x14e   :  { %2420 = vst.msk [vmem:[#allocation0 + $0x1d9] sm:$0x80] %vm2414_vm6, %v2413_v28   ;;  %2456 = vst.msk [vmem:[#allocation0 + $0x2e0] ss:$-476 sm:$0x3] %vm2414_vm6, %v2453_v29  }
 0x14f   :  { %2423 = vst.msk [vmem:[#allocation0 + $0xe0] ss:$-220 sm:$0x3] %vm2421_vm7, %v2413_v28   ;;  %2425 = vst.msk [vmem:[#allocation0 - $0x20] ss:$36 sm:$0x7c] %vm2421_vm7, %v2413_v28  }
 0x150   :  { %2427 = vst.msk [vmem:[#allocation0 + $0x1d9] sm:$0x80] %vm2421_vm7, %v2413_v28   ;;  %2463 = vst.msk [vmem:[#allocation0 + $0x2e0] ss:$-476 sm:$0x3] %vm2421_vm7, %v2453_v29  }
 0x151   :  { %2458 = vst.msk [vmem:[#allocation0 + $0xe0] ss:$36 sm:$0x7c] %vm2414_vm6, %v2453_v29   ;;  %2460 = vst.msk [vmem:[#allocation0 + $0x3d9] sm:$0x80] %vm2414_vm6, %v2453_v29   ;;  %v4713_v42 = vpop.permute.xlu1 %4712  ;;  %v3048_v30 = vld [vmem:[#allocation0 + $0x78] sm:$0xff] }
 0x152   :  { %2465 = vst.msk [vmem:[#allocation0 + $0xe0] ss:$36 sm:$0x7c] %vm2421_vm7, %v2453_v29   ;;  %2467 = vst.msk [vmem:[#allocation0 + $0x3d9] sm:$0x80] %vm2421_vm7, %v2453_v29   ;;  %v4715_v43 = vunpack.i.h.bf16 %v4713_v42  ;;  %v4714_v44 = vunpack.i.l.bf16 %v4713_v42 }
 0x153   :  { %2506 = vst.msk [vmem:[#allocation0 + $0x34c] ss:$36 sm:$0xf] %vm2414_vm6, %v4705_v31   ;;  %2488 = vst.msk [vmem:[#allocation0 + $0x204] ss:$36 sm:$0x3f] %vm2414_vm6, %v4704_v32  }
 0x154   :  { %2490 = vst.msk [vmem:[#allocation0 + $0x22c] ss:$36 sm:$0xc0] %vm2414_vm6, %v4704_v32   ;;  %v2797_v41 = vpop.permute.xlu0 %2796  }
 0x155   :  { %2509 = vst.msk [vmem:[#allocation0 + $0x34c] ss:$36 sm:$0xf] %vm2421_vm7, %v4705_v31   ;;  %2493 = vst.msk [vmem:[#allocation0 + $0x204] ss:$36 sm:$0x3f] %vm2421_vm7, %v4704_v32  }
 0x156   :  { %2495 = vst.msk [vmem:[#allocation0 + $0x22c] ss:$36 sm:$0xc0] %vm2421_vm7, %v4704_v32   ;;  %v2946_v24 = vld [vmem:[#allocation0] sm:$0xff]  ;;  %v3069_v31 = vld [vmem:[#allocation0 + $0x90] sm:$0xff] }
 0x157   :  { %2530 = vst.msk [vmem:[#allocation0 + $0x43] ss:$36 sm:$0x3f] %vm2528_vm9, %v2527_v33   ;;  %2532 = vst.msk [vmem:[#allocation0 - $0x6d5] ss:$296 sm:$0xc0] %vm2528_vm9, %v2527_v33  }
 0x158   :  { %2535 = vst.msk [vmem:[#allocation0 + $0x43] ss:$36 sm:$0x3f] %vm2533_vm10, %v2527_v33   ;;  %2537 = vst.msk [vmem:[#allocation0 - $0x6d5] ss:$296 sm:$0xc0] %vm2533_vm10, %v2527_v33  }
 0x159   :  { %2568 = vst.msk [vmem:[#allocation0 + $0x243] ss:$-220 sm:$0x3] %vm2528_vm9, %v2565_v34   ;;  %2570 = vst.msk [vmem:[#allocation0 + $0x143] ss:$36 sm:$0x3c] %vm2528_vm9, %v2565_v34   ;;  %v2913_v45 = vpop.permute.xlu0 %2912  }
 0x15a   :  { %2572 = vst.msk [vmem:[#allocation0 - $0xbd5] ss:$552 sm:$0xc0] %vm2528_vm9, %v2565_v34   ;;  %2608 = vst.msk [vmem:[#allocation0 + $0x267] ss:$36 sm:$0x1f] %vm2528_vm9, %v2605_v35  }
 0x15b   :  { %2575 = vst.msk [vmem:[#allocation0 + $0x243] ss:$-220 sm:$0x3] %vm2533_vm10, %v2565_v34   ;;  %2577 = vst.msk [vmem:[#allocation0 + $0x143] ss:$36 sm:$0x3c] %vm2533_vm10, %v2565_v34  }
 0x15c   :  { %2579 = vst.msk [vmem:[#allocation0 - $0xbd5] ss:$552 sm:$0xc0] %vm2533_vm10, %v2565_v34   ;;  %2615 = vst.msk [vmem:[#allocation0 + $0x267] ss:$36 sm:$0x1f] %vm2533_vm10, %v2605_v35  }
 0x15d   :  { %2610 = vst.msk [vmem:[#allocation0 - $0x461] ss:$332 sm:$0x60] %vm2528_vm9, %v2605_v35   ;;  %2612 = vst.msk [vmem:[#allocation0 + $0x384] sm:$0x80] %vm2528_vm9, %v2605_v35   ;;  %v3293_v33 = vld [vmem:[#allocation0 + $0x190] sm:$0xff] }
 0x15e   :  { %2617 = vst.msk [vmem:[#allocation0 - $0x461] ss:$332 sm:$0x60] %vm2533_vm10, %v2605_v35   ;;  %2619 = vst.msk [vmem:[#allocation0 + $0x384] sm:$0x80] %vm2533_vm10, %v2605_v35   ;;  %v3167_v34 = vld [vmem:[#allocation0 + $0x100] sm:$0xff] }
 0x15f   :  { %2638 = vst.msk [vmem:[#allocation0 + $0x3af] ss:$36 sm:$0x7] %vm2528_vm9, %v2635_v36   ;;  %2640 = vst.msk [vmem:[#allocation0 + $0x318] sm:$0x8] %vm2528_vm9, %v2635_v36   ;;  %v2964_v52 = vld [vmem:[#allocation0 + $0x18] sm:$0xff] }
 0x160   :  { %2643 = vst.msk [vmem:[#allocation0 + $0x3af] ss:$36 sm:$0x7] %vm2533_vm10, %v2635_v36   ;;  %2645 = vst.msk [vmem:[#allocation0 + $0x318] sm:$0x8] %vm2533_vm10, %v2635_v36   ;;  %v3090_v58 = vld [vmem:[#allocation0 + $0xa8] sm:$0xff] }
 0x161   :  { %2722 = vst.msk [vmem:[#allocation0 + $0x282] ss:$-220 sm:$0x3] %vm2670_vm11, %v2719_v40   ;;  %2724 = vst.msk [vmem:[#allocation0 + $0x182] ss:$36 sm:$0xc] %vm2670_vm11, %v2719_v40   ;;  %v2935_v48 = vpop.permute.xlu1 %2934  }
 0x162   :  { %2726 = vst.msk [vmem:[#allocation0 + $0x82] ss:$36 sm:$0x70] %vm2670_vm11, %v2719_v40   ;;  %2728 = vst.msk [vmem:[#allocation0 + $0x37b] sm:$0x80] %vm2670_vm11, %v2719_v40   ;;  %v3314_v13 = vld [vmem:[#allocation0 + $0x1a8] sm:$0xff] }
 0x163   :  { %2766 = vst.msk [vmem:[#allocation0 + $0x2a6] ss:$36 sm:$0x7] %vm2670_vm11, %v4710_v38   ;;  %2768 = vst.msk [vmem:[#allocation0 + $0x1a6] ss:$36 sm:$0x38] %vm2670_vm11, %v4710_v38  }
 0x164   :  { %2770 = vst.msk [vmem:[#allocation0 + $0x2ce] ss:$36 sm:$0xc0] %vm2670_vm11, %v4710_v38   ;;  %2672 = vst.msk [vmem:[#allocation0 + $0x82] ss:$36 sm:$0xf] %vm2670_vm11, %v4709_v39  }
 0x165   :  { %2674 = vst.msk [vmem:[#allocation0 - $0x7e] ss:$36 sm:$0x70] %vm2670_vm11, %v4709_v39   ;;  %2676 = vst.msk [vmem:[#allocation0 + $0x17b] sm:$0x80] %vm2670_vm11, %v4709_v39   ;;  %v3188_v49 = vld [vmem:[#allocation0 + $0x118] sm:$0xff] }
 0x166   :  { %2731 = vst.msk [vmem:[#allocation0 + $0x282] ss:$-220 sm:$0x3] %vm2677_vm13, %v2719_v40   ;;  %2733 = vst.msk [vmem:[#allocation0 + $0x182] ss:$36 sm:$0xc] %vm2677_vm13, %v2719_v40  }
 0x167   :  { %2735 = vst.msk [vmem:[#allocation0 + $0x82] ss:$36 sm:$0x70] %vm2677_vm13, %v2719_v40   ;;  %2737 = vst.msk [vmem:[#allocation0 + $0x37b] sm:$0x80] %vm2677_vm13, %v2719_v40   ;;  %v1951_v62 = vpop.permute.xlu0 %1950   ;;  %v3412_v63 = vld [vmem:[#allocation0 + $0x218] sm:$0xff] }
 0x168   :  { %2773 = vst.msk [vmem:[#allocation0 + $0x2a6] ss:$36 sm:$0x7] %vm2677_vm13, %v4710_v38   ;;  %2775 = vst.msk [vmem:[#allocation0 + $0x1a6] ss:$36 sm:$0x38] %vm2677_vm13, %v4710_v38   ;;  %v4718_v3 = vpop.permute.xlu1 %4717 }
 0x169   :  { %2777 = vst.msk [vmem:[#allocation0 + $0x2ce] ss:$36 sm:$0xc0] %vm2677_vm13, %v4710_v38   ;;  %2679 = vst.msk [vmem:[#allocation0 + $0x82] ss:$36 sm:$0xf] %vm2677_vm13, %v4709_v39   ;;  %v4720_v8 = vunpack.i.h.bf16 %v4718_v3  ;;  %v4719_v9 = vunpack.i.l.bf16 %v4718_v3 }
 0x16a   :  { %2681 = vst.msk [vmem:[#allocation0 - $0x7e] ss:$36 sm:$0x70] %vm2677_vm13, %v4709_v39   ;;  %2683 = vst.msk [vmem:[#allocation0 + $0x17b] sm:$0x80] %vm2677_vm13, %v4709_v39   ;;  %v3538_v4 = vld [vmem:[#allocation0 + $0x2a8] sm:$0xff] }
 0x16b   :  { %2800 = vst.msk [vmem:[#allocation0 + $0x3ee] ss:$-220 sm:$0x3] %vm2670_vm11, %v2797_v41   ;;  %2802 = vst.msk [vmem:[#allocation0 + $0x2ee] ss:$36 sm:$0xc] %vm2670_vm11, %v2797_v41   ;;  %v2009_v16 = vpop.permute.xlu0 %2008  }
 0x16c   :  { %2805 = vst.msk [vmem:[#allocation0 + $0x3ee] ss:$-220 sm:$0x3] %vm2677_vm13, %v2797_v41   ;;  %2807 = vst.msk [vmem:[#allocation0 + $0x2ee] ss:$36 sm:$0xc] %vm2677_vm13, %v2797_v41  }
 0x16d   :  { %2874 = vst.msk [vmem:[#allocation0 + $0x2c1] ss:$-220 sm:$0x7] %vm2834_vm14, %v4715_v43   ;;  %2876 = vst.msk [vmem:[#allocation0 + $0xc1] ss:$36 sm:$0x78] %vm2834_vm14, %v4715_v43  }
 0x16e   :  { %2878 = vst.msk [vmem:[#allocation0 + $0x3ba] sm:$0x80] %vm2834_vm14, %v4715_v43   ;;  %2836 = vst.msk [vmem:[#allocation0 + $0xc1] ss:$36 sm:$0x3] %vm2834_vm14, %v4714_v44   ;;  %v3181_v50 = vld [vmem:[#allocation0 + $0x110] sm:$0xff] }
 0x16f   :  { %2838 = vst.msk [vmem:[#allocation0 - $0x3f] ss:$36 sm:$0x7c] %vm2834_vm14, %v4714_v44   ;;  %2840 = vst.msk [vmem:[#allocation0 + $0x1ba] sm:$0x80] %vm2834_vm14, %v4714_v44   ;;  %v3209_v51 = vld [vmem:[#allocation0 + $0x130] sm:$0xff]  ;;  %v4274_v55 = vpack.c.bf16 %v3188_v49, %v3181_v50 }
 0x170   :  { %2881 = vst.msk [vmem:[#allocation0 + $0x2c1] ss:$-220 sm:$0x7] %vm2841_vm15, %v4715_v43   ;;  %2883 = vst.msk [vmem:[#allocation0 + $0xc1] ss:$36 sm:$0x78] %vm2841_vm15, %v4715_v43   ;;  %v4284_v56 = vpack.c.bf16 %v3216_v47, %v3209_v51  ;;  %v2020_v18 = vpop.permute.xlu1 %2019  }
 0x171   :  { %2885 = vst.msk [vmem:[#allocation0 + $0x3ba] sm:$0x80] %vm2841_vm15, %v4715_v43   ;;  %2843 = vst.msk [vmem:[#allocation0 + $0xc1] ss:$36 sm:$0x3] %vm2841_vm15, %v4714_v44   ;;  %v2957_v53 = vld [vmem:[#allocation0 + $0x10] sm:$0xff]  ;;  %v4723_v23 = vpop.permute.xlu0 %4722 }
 0x172   :  { %2845 = vst.msk [vmem:[#allocation0 - $0x3f] ss:$36 sm:$0x7c] %vm2841_vm15, %v4714_v44   ;;  %2847 = vst.msk [vmem:[#allocation0 + $0x1ba] sm:$0x80] %vm2841_vm15, %v4714_v44   ;;  %v2985_v54 = vld [vmem:[#allocation0 + $0x30] sm:$0xff]  ;;  %v4194_v60 = vpack.c.bf16 %v2964_v52, %v2957_v53  ;;  %v4725_v27 = vunpack.i.h.bf16 %v4723_v23  ;;  %v4724_v28 = vunpack.i.l.bf16 %v4723_v23 }
 0x173   :  { %2916 = vst.msk [vmem:[#allocation0 + $0x2e5] ss:$-220 sm:$0x3] %vm2834_vm14, %v2913_v45   ;;  %2918 = vst.msk [vmem:[#allocation0 + $0x1e5] ss:$36 sm:$0x3c] %vm2834_vm14, %v2913_v45   ;;  %v4204_v61 = vpack.c.bf16 %v2992_v46, %v2985_v54 }
 0x174   :  { %2920 = vst.msk [vmem:[#allocation0 + $0x90d] ss:$-220 sm:$0xc0] %vm2834_vm14, %v2913_v45   ;;  %2938 = vst.msk [vmem:[#allocation0 + $0x32d] ss:$36 sm:$0xf] %vm2834_vm14, %v2935_v48   ;;  %v2045_v29 = vpop.permute.xlu1 %2044  }
 0x175   :  { %2923 = vst.msk [vmem:[#allocation0 + $0x2e5] ss:$-220 sm:$0x3] %vm2841_vm15, %v2913_v45   ;;  %2925 = vst.msk [vmem:[#allocation0 + $0x1e5] ss:$36 sm:$0x3c] %vm2841_vm15, %v2913_v45  }
 0x176   :  { %2927 = vst.msk [vmem:[#allocation0 + $0x90d] ss:$-220 sm:$0xc0] %vm2841_vm15, %v2913_v45   ;;  %2941 = vst.msk [vmem:[#allocation0 + $0x32d] ss:$36 sm:$0xf] %vm2841_vm15, %v2935_v48   ;;  %v2070_v46 = vpop.permute.xlu0 %2069  }
 0x177   :  { %v3083_v59 = vld [vmem:[#allocation0 + $0xa0] sm:$0xff]  ;;  %v3405_v0 = vld [vmem:[#allocation0 + $0x210] sm:$0xff]  ;;  %4533 = vst [vmem:[%s5859_s1 + $0x88] sm:$0xff] %v4274_v55   ;;  %4535 = vst [vmem:[%s5859_s1 + $0x98] sm:$0xff] %v4284_v56  }
 0x178   :  { %v3433_v1 = vld [vmem:[#allocation0 + $0x230] sm:$0xff]  ;;  %v4239_v2 = vpack.c.bf16 %v3090_v58, %v3083_v59  ;;  %1954 = vst.msk [vmem:[#allocation0 + $0x3ed] ss:$-220 sm:$0x3] %vm402_vm12, %v1951_v62   ;;  %v3531_v5 = vld [vmem:[#allocation0 + $0x2a0] sm:$0xff]  ;;  %v4354_v6 = vpack.c.bf16 %v3412_v63, %v3405_v0  ;;  %4517 = vst [vmem:[%s5859_s1 + $0x8] sm:$0xff] %v4194_v60  }
 0x179   :  { %1956 = vst.msk [vmem:[#allocation0 + $0x2ed] ss:$36 sm:$0xc] %vm402_vm12, %v1951_v62   ;;  %v4364_v7 = vpack.c.bf16 %v3440_v57, %v3433_v1  ;;  %4519 = vst [vmem:[%s5859_s1 + $0x18] sm:$0xff] %v4204_v61   ;;  %v3762_v10 = vld [vmem:[#allocation0 + $0x3a8] sm:$0xff]  ;;  %v3755_v11 = vld [vmem:[#allocation0 + $0x3a0] sm:$0xff]  ;;  %v4399_v12 = vpack.c.bf16 %v3538_v4, %v3531_v5 }
 0x17a   :  { %4526 = vst [vmem:[%s5859_s1 + $0x50] sm:$0xff] %v4239_v2   ;;  %v3307_v14 = vld [vmem:[#allocation0 + $0x1a0] sm:$0xff]  ;;  %v4479_v15 = vpack.c.bf16 %v3762_v10, %v3755_v11  ;;  %4549 = vst [vmem:[%s5859_s1 + $0x108] sm:$0xff] %v4354_v6   ;;  %v3636_v20 = vld [vmem:[#allocation0 + $0x318] sm:$0xff] }
 0x17b   :  { %4551 = vst [vmem:[%s5859_s1 + $0x118] sm:$0xff] %v4364_v7   ;;  %1991 = vst.msk [vmem:[#allocation0 + $0x2c0] ss:$-220 sm:$0x7] %vm402_vm12, %v4720_v8   ;;  %v4319_v17 = vpack.c.bf16 %v3314_v13, %v3307_v14  ;;  %v3020_v32 = vld [vmem:[#allocation0 + $0x58] sm:$0xff]  ;;  %v3118_v35 = vld [vmem:[#allocation0 + $0xc8] sm:$0xff] }
 0x17c   :  { %1993 = vst.msk [vmem:[#allocation0 + $0xc0] ss:$36 sm:$0x78] %vm402_vm12, %v4720_v8   ;;  %1995 = vst.msk [vmem:[#allocation0 + $0x3b9] sm:$0x80] %vm402_vm12, %v4720_v8   ;;  %v3146_v36 = vld [vmem:[#allocation0 + $0xe8] sm:$0xff] }
 0x17d   :  { %1972 = vst.msk [vmem:[#allocation0 + $0xc0] ss:$36 sm:$0x3] %vm402_vm12, %v4719_v9   ;;  %1974 = vst.msk [vmem:[#allocation0 - $0x40] ss:$36 sm:$0x7c] %vm402_vm12, %v4719_v9  }
 0x17e   :  { %1976 = vst.msk [vmem:[#allocation0 + $0x1b9] sm:$0x80] %vm402_vm12, %v4719_v9   ;;  %4558 = vst [vmem:[%s5859_s1 + $0x150] sm:$0xff] %v4399_v12   ;;  %v3272_v39 = vld [vmem:[#allocation0 + $0x178] sm:$0xff]  ;;  %v3566_v47 = vld [vmem:[#allocation0 + $0x2c8] sm:$0xff] }
 0x17f   :  { %2012 = vst.msk [vmem:[#allocation0 + $0x2e4] ss:$-220 sm:$0x3] %vm402_vm12, %v2009_v16   ;;  %2014 = vst.msk [vmem:[#allocation0 + $0x1e4] ss:$36 sm:$0x3c] %vm402_vm12, %v2009_v16  }
 0x180   :  { %2016 = vst.msk [vmem:[#allocation0 + $0x90c] ss:$-220 sm:$0xc0] %vm402_vm12, %v2009_v16   ;;  %4574 = vst [vmem:[%s5859_s1 + $0x1d0] sm:$0xff] %v4479_v15   ;;  %v3629_v21 = vld [vmem:[#allocation0 + $0x310] sm:$0xff]  ;;  %v3244_v40 = vld [vmem:[#allocation0 + $0x158] sm:$0xff] }
 0x181   :  { %2023 = vst.msk [vmem:[#allocation0 + $0x32c] ss:$36 sm:$0xf] %vm402_vm12, %v2020_v18   ;;  %4542 = vst [vmem:[%s5859_s1 + $0xd0] sm:$0xff] %v4319_v17   ;;  %v3657_v22 = vld [vmem:[#allocation0 + $0x330] sm:$0xff]  ;;  %v4434_v25 = vpack.c.bf16 %v3636_v20, %v3629_v21  ;;  %v3342_v48 = vld [vmem:[#allocation0 + $0x1c8] sm:$0xff] }
 0x182   :  { %v4444_v26 = vpack.c.bf16 %v3664_v19, %v3657_v22  ;;  %2048 = vst.msk [vmem:[#allocation0 + $0x223] ss:$-220 sm:$0x3] %vm402_vm12, %v2045_v29   ;;  %2050 = vst.msk [vmem:[#allocation0 + $0x123] ss:$36 sm:$0x7c] %vm402_vm12, %v2045_v29  }
 0x183   :  { %2052 = vst.msk [vmem:[#allocation0 + $0x31c] sm:$0x80] %vm402_vm12, %v2045_v29   ;;  %v3300_v37 = vld [vmem:[#allocation0 + $0x198] sm:$0xff]  ;;  %4565 = vst [vmem:[%s5859_s1 + $0x188] sm:$0xff] %v4434_v25   ;;  %v3174_v51 = vld [vmem:[#allocation0 + $0x108] sm:$0xff] }
 0x184   :  { %v2951_v38 = vld [vmem:[#allocation0 + $0x8] sm:$0xff]  ;;  %4567 = vst [vmem:[%s5859_s1 + $0x198] sm:$0xff] %v4444_v26   ;;  %2064 = vst.msk [vmem:[#allocation0 + $0x247] ss:$36 sm:$0x3f] %vm402_vm12, %v4725_v27   ;;  %v4314_v41 = vpack.c.bf16 %v3300_v37, %v3293_v33  ;;  %v3013_v42 = vld [vmem:[#allocation0 + $0x50] sm:$0xff]  ;;  %v4269_v62 = vpack.c.bf16 %v3174_v51, %v3167_v34 }
 0x185   :  { %2066 = vst.msk [vmem:[#allocation0 + $0x26f] ss:$36 sm:$0xc0] %vm402_vm12, %v4725_v27   ;;  %2030 = vst.msk [vmem:[#allocation0 + $0x23] ss:$36 sm:$0x7f] %vm402_vm12, %v4724_v28   ;;  %v4189_v45 = vpack.c.bf16 %v2951_v38, %v2946_v24  ;;  %v4214_v52 = vpack.c.bf16 %v3020_v32, %v3013_v42 }
 0x186   :  { %2032 = vst.msk [vmem:[#allocation0 + $0x11c] sm:$0x80] %vm402_vm12, %v4724_v28   ;;  %v3041_v43 = vld [vmem:[#allocation0 + $0x70] sm:$0xff]  ;;  %v3076_v44 = vld [vmem:[#allocation0 + $0x98] sm:$0xff]  ;;  %v3111_v49 = vld [vmem:[#allocation0 + $0xc0] sm:$0xff] }
 0x187   :  { %v3139_v50 = vld [vmem:[#allocation0 + $0xe0] sm:$0xff]  ;;  %v4224_v53 = vpack.c.bf16 %v3048_v30, %v3041_v43  ;;  %v4234_v54 = vpack.c.bf16 %v3076_v44, %v3069_v31  ;;  %2073 = vst.msk [vmem:[#allocation0 + $0x38f] ss:$36 sm:$0xf] %vm402_vm12, %v2070_v46   ;;  %v3790_v56 = vld [vmem:[#allocation0 + $0x3c8] sm:$0xff]  ;;  %4541 = vst [vmem:[%s5859_s1 + $0xc8] sm:$0xff] %v4314_v41   ;;  %v4249_v60 = vpack.c.bf16 %v3118_v35, %v3111_v49 }
 0x188   :  { %v3391_v55 = vld [vmem:[#allocation0 + $0x200] sm:$0xff]  ;;  %v3370_v57 = vld [vmem:[#allocation0 + $0x1e8] sm:$0xff]  ;;  %v3237_v58 = vld [vmem:[#allocation0 + $0x150] sm:$0xff]  ;;  %v4259_v61 = vpack.c.bf16 %v3146_v36, %v3139_v50  ;;  %4190 = vst [vmem:[%s5859_s1] sm:$0xff] %v4189_v45  }
 0x189   :  { %v3265_v59 = vld [vmem:[#allocation0 + $0x170] sm:$0xff]  ;;  %v3496_v63 = vld [vmem:[#allocation0 + $0x278] sm:$0xff]  ;;  %v3335_v2 = vld [vmem:[#allocation0 + $0x1c0] sm:$0xff]  ;;  %v4294_v5 = vpack.c.bf16 %v3244_v40, %v3237_v58  ;;  %4521 = vst [vmem:[%s5859_s1 + $0x28] sm:$0xff] %v4214_v52  }
 0x18a   :  { %v3517_v0 = vld [vmem:[#allocation0 + $0x290] sm:$0xff]  ;;  %v3468_v1 = vld [vmem:[#allocation0 + $0x258] sm:$0xff]  ;;  %v3363_v3 = vld [vmem:[#allocation0 + $0x1e0] sm:$0xff]  ;;  %v4304_v6 = vpack.c.bf16 %v3272_v39, %v3265_v59  ;;  %4523 = vst [vmem:[%s5859_s1 + $0x38] sm:$0xff] %v4224_v53   ;;  %v4329_v11 = vpack.c.bf16 %v3342_v48, %v3335_v2 }
 0x18b   :  { %v3559_v4 = vld [vmem:[#allocation0 + $0x2c0] sm:$0xff]  ;;  %4525 = vst [vmem:[%s5859_s1 + $0x48] sm:$0xff] %v4234_v54   ;;  %v3594_v8 = vld [vmem:[#allocation0 + $0x2e8] sm:$0xff]  ;;  %v4339_v12 = vpack.c.bf16 %v3370_v57, %v3363_v3  ;;  %4528 = vst [vmem:[%s5859_s1 + $0x60] sm:$0xff] %v4249_v60  }
 0x18c   :  { %v3615_v7 = vld [vmem:[#allocation0 + $0x300] sm:$0xff]  ;;  %v3818_v9 = vld [vmem:[#allocation0 + $0x3e8] sm:$0xff]  ;;  %v4409_v14 = vpack.c.bf16 %v3566_v47, %v3559_v4  ;;  %4530 = vst [vmem:[%s5859_s1 + $0x70] sm:$0xff] %v4259_v61   ;;  %4532 = vst [vmem:[%s5859_s1 + $0x80] sm:$0xff] %v4269_v62  }
 0x18d   :  { %v3783_v10 = vld [vmem:[#allocation0 + $0x3c0] sm:$0xff]  ;;  %v3398_v13 = vld [vmem:[#allocation0 + $0x208] sm:$0xff]  ;;  %v5678_v15 = vld [vmem:[#allocation0 + $0x378] sm:$0xff]  ;;  %4537 = vst [vmem:[%s5859_s1 + $0xa8] sm:$0xff] %v4294_v5  }
 0x18e   :  { %v3692_v16 = vld [vmem:[#allocation0 + $0x358] sm:$0xff]  ;;  %v3461_v17 = vld [vmem:[#allocation0 + $0x250] sm:$0xff]  ;;  %v4489_v20 = vpack.c.bf16 %v3790_v56, %v3783_v10  ;;  %4539 = vst [vmem:[%s5859_s1 + $0xb8] sm:$0xff] %v4304_v6   ;;  %v4349_v21 = vpack.c.bf16 %v3398_v13, %v3391_v55  ;;  %v5688_v23 = vld [vmem:[#allocation0 + $0x260] sm:$0xff] }
 0x18f   :  { %v3489_v18 = vld [vmem:[#allocation0 + $0x270] sm:$0xff]  ;;  %v3524_v19 = vld [vmem:[#allocation0 + $0x298] sm:$0xff]  ;;  %v3587_v24 = vld [vmem:[#allocation0 + $0x2e0] sm:$0xff]  ;;  %4544 = vst [vmem:[%s5859_s1 + $0xe0] sm:$0xff] %v4329_v11   ;;  %v4374_v27 = vpack.c.bf16 %v3468_v1, %v3461_v17 }
 0x190   :  { %v5686_v22 = vld [vmem:[#allocation0 + $0x390] sm:$0xff]  ;;  %v3622_v25 = vld [vmem:[#allocation0 + $0x308] sm:$0xff]  ;;  %v3811_v26 = vld [vmem:[#allocation0 + $0x3e0] sm:$0xff]  ;;  %4546 = vst [vmem:[%s5859_s1 + $0xf0] sm:$0xff] %v4339_v12   ;;  %v4384_v28 = vpack.c.bf16 %v3496_v63, %v3489_v18  ;;  %v4394_v29 = vpack.c.bf16 %v3524_v19, %v3517_v0  ;;  %v4419_v34 = vpack.c.bf16 %v3594_v8, %v3587_v24 }
 0x191   :  { %4560 = vst [vmem:[%s5859_s1 + $0x160] sm:$0xff] %v4409_v14   ;;  %v3601_v30 = vld [vmem:[#allocation0 + $0x2f0] sm:$0xff]  ;;  %v5699_v31 = vld [vmem:[#allocation0 + $0x48] sm:$0xff]  ;;  %v5701_v32 = vld [vmem:[#allocation0 + $0x60] sm:$0xff]  ;;  %v4429_v35 = vpack.c.bf16 %v3622_v25, %v3615_v7  ;;  %v4499_v38 = vpack.c.bf16 %v3818_v9, %v3811_v26 }
 0x192   :  { %v5703_v33 = vld [vmem:[#allocation0 + $0x28] sm:$0xff]  ;;  %v3685_v36 = vld [vmem:[#allocation0 + $0x350] sm:$0xff]  ;;  %4576 = vst [vmem:[%s5859_s1 + $0x1e0] sm:$0xff] %v4489_v20   ;;  %4548 = vst [vmem:[%s5859_s1 + $0x100] sm:$0xff] %v4349_v21  }
 0x193   :  { %v3713_v37 = vld [vmem:[#allocation0 + $0x370] sm:$0xff]  ;;  %v5711_v39 = vld [vmem:[#allocation0 + $0xd8] sm:$0xff]  ;;  %v5715_v41 = vld [vmem:[#allocation0 + $0x80] sm:$0xff]  ;;  %4553 = vst [vmem:[%s5859_s1 + $0x128] sm:$0xff] %v4374_v27   ;;  %v4454_v45 = vpack.c.bf16 %v3692_v16, %v3685_v36 }
 0x194   :  { %v5713_v40 = vld [vmem:[#allocation0 + $0xb8] sm:$0xff]  ;;  %v3482_v43 = vld [vmem:[#allocation0 + $0x268] sm:$0xff]  ;;  %4555 = vst [vmem:[%s5859_s1 + $0x138] sm:$0xff] %v4384_v28   ;;  %4557 = vst [vmem:[%s5859_s1 + $0x148] sm:$0xff] %v4394_v29   ;;  %v4464_v46 = vpack.c.bf16 %v5678_v15, %v3713_v37 }
 0x195   :  { %v3748_v42 = vld [vmem:[#allocation0 + $0x398] sm:$0xff]  ;;  %v5727_v47 = vld [vmem:[#allocation0 + $0x248] sm:$0xff]  ;;  %v5729_v48 = vld [vmem:[#allocation0 + $0xf0] sm:$0xff]  ;;  %v4379_v54 = vpack.c.bf16 %v3482_v43, %v5688_v23  ;;  %4562 = vst [vmem:[%s5859_s1 + $0x170] sm:$0xff] %v4419_v34  }
 0x196   :  { %v3608_v44 = vld [vmem:[#allocation0 + $0x2f8] sm:$0xff]  ;;  %v5731_v49 = vld [vmem:[#allocation0 + $0x128] sm:$0xff]  ;;  %v2971_v51 = vld [vmem:[#allocation0 + $0x20] sm:$0xff]  ;;  %4564 = vst [vmem:[%s5859_s1 + $0x180] sm:$0xff] %v4429_v35   ;;  %v4474_v55 = vpack.c.bf16 %v3748_v42, %v5686_v22 }
 0x197   :  { %v4424_v50 = vpack.c.bf16 %v3608_v44, %v3601_v30  ;;  %v2999_v52 = vld [vmem:[#allocation0 + $0x40] sm:$0xff]  ;;  %v3034_v53 = vld [vmem:[#allocation0 + $0x68] sm:$0xff]  ;;  %4578 = vst [vmem:[%s5859_s1 + $0x1f0] sm:$0xff] %v4499_v38   ;;  %v5744_v56 = vld [vmem:[#allocation0 + $0x2d8] sm:$0xff]  ;;  %v4199_v62 = vpack.c.bf16 %v5703_v33, %v2971_v51 }
 0x198   :  { %v5746_v57 = vld [vmem:[#allocation0 + $0x2b8] sm:$0xff]  ;;  %v5748_v58 = vld [vmem:[#allocation0 + $0x280] sm:$0xff]  ;;  %v3062_v59 = vld [vmem:[#allocation0 + $0x88] sm:$0xff]  ;;  %v4209_v63 = vpack.c.bf16 %v5699_v31, %v2999_v52  ;;  %v4219_v0 = vpack.c.bf16 %v3034_v53, %v5701_v32  ;;  %4569 = vst [vmem:[%s5859_s1 + $0x1a8] sm:$0xff] %v4454_v45  }
 0x199   :  { %v3097_v60 = vld [vmem:[#allocation0 + $0xb0] sm:$0xff]  ;;  %4571 = vst [vmem:[%s5859_s1 + $0x1b8] sm:$0xff] %v4464_v46   ;;  %v5759_v1 = vld [vmem:[#allocation0 + $0x348] sm:$0xff]  ;;  %v3251_v2 = vld [vmem:[#allocation0 + $0x160] sm:$0xff]  ;;  %v4229_v7 = vpack.c.bf16 %v3062_v59, %v5715_v41 }
 0x19a   :  { %v3125_v61 = vld [vmem:[#allocation0 + $0xd0] sm:$0xff]  ;;  %v3699_v3 = vld [vmem:[#allocation0 + $0x360] sm:$0xff]  ;;  %4563 = vst [vmem:[%s5859_s1 + $0x178] sm:$0xff] %v4424_v50   ;;  %v3160_v4 = vld [vmem:[#allocation0 + $0xf8] sm:$0xff]  ;;  %v4244_v8 = vpack.c.bf16 %v5713_v40, %v3097_v60 }
 0x19b   :  { %v3195_v5 = vld [vmem:[#allocation0 + $0x120] sm:$0xff]  ;;  %v4254_v9 = vpack.c.bf16 %v5711_v39, %v3125_v61  ;;  %4554 = vst [vmem:[%s5859_s1 + $0x130] sm:$0xff] %v4379_v54   ;;  %4573 = vst [vmem:[%s5859_s1 + $0x1c8] sm:$0xff] %v4474_v55   ;;  %v3426_v10 = vld [vmem:[#allocation0 + $0x228] sm:$0xff]  ;;  %v4264_v16 = vpack.c.bf16 %v3160_v4, %v5729_v48 }
 0x19c   :  { %v3447_v6 = vld [vmem:[#allocation0 + $0x240] sm:$0xff]  ;;  %v3510_v11 = vld [vmem:[#allocation0 + $0x288] sm:$0xff]  ;;  %v3545_v12 = vld [vmem:[#allocation0 + $0x2b0] sm:$0xff]  ;;  %v4279_v17 = vpack.c.bf16 %v5731_v49, %v3195_v5  ;;  %4518 = vst [vmem:[%s5859_s1 + $0x10] sm:$0xff] %v4199_v62  }
 0x19d   :  { %v3573_v13 = vld [vmem:[#allocation0 + $0x2d0] sm:$0xff]  ;;  %v3279_v15 = vld [vmem:[#allocation0 + $0x180] sm:$0xff]  ;;  %v4369_v18 = vpack.c.bf16 %v5727_v47, %v3447_v6  ;;  %4520 = vst [vmem:[%s5859_s1 + $0x20] sm:$0xff] %v4209_v63   ;;  %4522 = vst [vmem:[%s5859_s1 + $0x30] sm:$0xff] %v4219_v0   ;;  %v4389_v25 = vpack.c.bf16 %v3510_v11, %v5748_v58  ;;  %v4404_v26 = vpack.c.bf16 %v5746_v57, %v3545_v12 }
 0x19e   :  { %v3377_v14 = vld [vmem:[#allocation0 + $0x1f0] sm:$0xff]  ;;  %v3230_v19 = vld [vmem:[#allocation0 + $0x148] sm:$0xff]  ;;  %v3328_v20 = vld [vmem:[#allocation0 + $0x1b8] sm:$0xff]  ;;  %v4414_v27 = vpack.c.bf16 %v5744_v56, %v3573_v13  ;;  %4524 = vst [vmem:[%s5859_s1 + $0x40] sm:$0xff] %v4229_v7  }
 0x19f   :  { %v3650_v21 = vld [vmem:[#allocation0 + $0x328] sm:$0xff]  ;;  %v3671_v22 = vld [vmem:[#allocation0 + $0x340] sm:$0xff]  ;;  %4527 = vst [vmem:[%s5859_s1 + $0x58] sm:$0xff] %v4244_v8   ;;  %4529 = vst [vmem:[%s5859_s1 + $0x68] sm:$0xff] %v4254_v9  }
 0x1a0   :  { %v3706_v23 = vld [vmem:[#allocation0 + $0x368] sm:$0xff]  ;;  %v3356_v28 = vld [vmem:[#allocation0 + $0x1d8] sm:$0xff]  ;;  %v3727_v30 = vld [vmem:[#allocation0 + $0x380] sm:$0xff]  ;;  %v4449_v35 = vpack.c.bf16 %v5759_v1, %v3671_v22  ;;  %4531 = vst [vmem:[%s5859_s1 + $0x78] sm:$0xff] %v4264_v16  }
 0x1a1   :  { %v3258_v24 = vld [vmem:[#allocation0 + $0x168] sm:$0xff]  ;;  %v3776_v29 = vld [vmem:[#allocation0 + $0x3b8] sm:$0xff]  ;;  %v3419_v34 = vld [vmem:[#allocation0 + $0x220] sm:$0xff]  ;;  %v4459_v36 = vpack.c.bf16 %v3706_v23, %v3699_v3  ;;  %4534 = vst [vmem:[%s5859_s1 + $0x90] sm:$0xff] %v4279_v17  }
 0x1a2   :  { %v4299_v31 = vpack.c.bf16 %v3258_v24, %v3251_v2  ;;  %v3286_v32 = vld [vmem:[#allocation0 + $0x188] sm:$0xff]  ;;  %v3384_v33 = vld [vmem:[#allocation0 + $0x1f8] sm:$0xff]  ;;  %4552 = vst [vmem:[%s5859_s1 + $0x120] sm:$0xff] %v4369_v18   ;;  %v4359_v40 = vpack.c.bf16 %v3426_v10, %v3419_v34  ;;  %v3643_v41 = vld [vmem:[#allocation0 + $0x320] sm:$0xff] }
 0x1a3   :  { %v3804_v37 = vld [vmem:[#allocation0 + $0x3d8] sm:$0xff]  ;;  %v4309_v38 = vpack.c.bf16 %v3286_v32, %v3279_v15  ;;  %v4344_v39 = vpack.c.bf16 %v3384_v33, %v3377_v14  ;;  %v3223_v42 = vld [vmem:[#allocation0 + $0x140] sm:$0xff]  ;;  %v3321_v43 = vld [vmem:[#allocation0 + $0x1b0] sm:$0xff]  ;;  %4556 = vst [vmem:[%s5859_s1 + $0x140] sm:$0xff] %v4389_v25   ;;  %v4439_v45 = vpack.c.bf16 %v3650_v21, %v3643_v41 }
 0x1a4   :  { %4559 = vst [vmem:[%s5859_s1 + $0x158] sm:$0xff] %v4404_v26   ;;  %4561 = vst [vmem:[%s5859_s1 + $0x168] sm:$0xff] %v4414_v27   ;;  %v3349_v44 = vld [vmem:[#allocation0 + $0x1d0] sm:$0xff]  ;;  %v4289_v46 = vpack.c.bf16 %v3230_v19, %v3223_v42  ;;  %v4324_v47 = vpack.c.bf16 %v3328_v20, %v3321_v43  ;;  %v3734_v48 = vld [vmem:[#allocation0 + $0x388] sm:$0xff] }
 0x1a5   :  { %4538 = vst [vmem:[%s5859_s1 + $0xb0] sm:$0xff] %v4299_v31   ;;  %4568 = vst [vmem:[%s5859_s1 + $0x1a0] sm:$0xff] %v4449_v35   ;;  %v3769_v49 = vld [vmem:[#allocation0 + $0x3b0] sm:$0xff]  ;;  %v4334_v51 = vpack.c.bf16 %v3356_v28, %v3349_v44  ;;  %v4469_v52 = vpack.c.bf16 %v3734_v48, %v3727_v30  ;;  %v3832_v55 = vld [vmem:[#allocation0 + $0x3f8] sm:$0xff] }
 0x1a6   :  { %4570 = vst [vmem:[%s5859_s1 + $0x1b0] sm:$0xff] %v4459_v36   ;;  %v3825_v50 = vld [vmem:[#allocation0 + $0x3f0] sm:$0xff]  ;;  %4540 = vst [vmem:[%s5859_s1 + $0xc0] sm:$0xff] %v4309_v38   ;;  %v4484_v53 = vpack.c.bf16 %v3776_v29, %v3769_v49 }
 0x1a7   :  { %4547 = vst [vmem:[%s5859_s1 + $0xf8] sm:$0xff] %v4344_v39   ;;  %4550 = vst [vmem:[%s5859_s1 + $0x110] sm:$0xff] %v4359_v40   ;;  %v3797_v54 = vld [vmem:[#allocation0 + $0x3d0] sm:$0xff]  ;;  %v4504_v57 = vpack.c.bf16 %v3832_v55, %v3825_v50 }
 0x1a8   :  { %4536 = vst [vmem:[%s5859_s1 + $0xa0] sm:$0xff] %v4289_v46   ;;  %4543 = vst [vmem:[%s5859_s1 + $0xd8] sm:$0xff] %v4324_v47   ;;  %v4494_v56 = vpack.c.bf16 %v3804_v37, %v3797_v54 }
 0x1a9   :  { %4566 = vst [vmem:[%s5859_s1 + $0x190] sm:$0xff] %v4439_v45   ;;  %4545 = vst [vmem:[%s5859_s1 + $0xe8] sm:$0xff] %v4334_v51  }
 0x1aa   :  { %4572 = vst [vmem:[%s5859_s1 + $0x1c0] sm:$0xff] %v4469_v52   ;;  %4575 = vst [vmem:[%s5859_s1 + $0x1d8] sm:$0xff] %v4484_v53  }
 0x1ab   :  { %4577 = vst [vmem:[%s5859_s1 + $0x1e8] sm:$0xff] %v4494_v56   ;;  %4579 = vst [vmem:[%s5859_s1 + $0x1f8] sm:$0xff] %v4504_v57  }

// kernel: alexnet_forward.11
= control target key start
LH: loop header
LB: loop body
LE: loop exit
PB: predicated region body
PF: predicated region fallthrough
CT: control target
= control target key end

     0   :  { %s4432_s1 = inlined_call_operand.vmem [shape: bf16[512,1152], index: 1, kind: input, shape index: {}]   ;;  %s4433_s0 = inlined_call_operand.vmem [shape: bf16[32,512], index: 0, kind: input, shape index: {}]   ;;  %s4434_s2 = inlined_call_operand.vmem [shape: bf16[32,1152], index: 2, kind: output, shape index: {}]  }
   0x1   :  { %v2970_v0 = vld [vmem:[%s4432_s1 + $0x4] ss:$36 sps:$4 sm:$0xff]   ;;  %v2972_v1 = vld [vmem:[%s4432_s1 + $0xc] ss:$36 sps:$4 sm:$0xff]   ;;  %v2978_v5 = vld [vmem:[%s4432_s1 + $0x54] ss:$36 sps:$4 sm:$0xff]  }
   0x2   :  { %1852 = vmatprep.subr.bf16.mxu0 %v2970_v0  ;;  %v2974_v2 = vld [vmem:[%s4432_s1] ss:$36 sps:$4 sm:$0xff]   ;;  %v2975_v3 = vld [vmem:[%s4432_s1 + $0x8] ss:$36 sps:$4 sm:$0xff]   ;;  %1958 = vmatprep.subr.bf16.mxu1 %v2972_v1  ;;  %v2981_v7 = vld [vmem:[%s4432_s1 + $0x50] ss:$36 sps:$4 sm:$0xff]  }
   0x3   :  { %v2976_v4 = vld [vmem:[%s4432_s1 + $0x4c] ss:$36 sps:$4 sm:$0xff]   ;;  %1853 = vmatpush1.bf16.msra.mxu0 %v2974_v2  ;;  %1959 = vmatpush1.bf16.msra.mxu1 %v2975_v3  ;;  %v2982_v8 = vld [vmem:[%s4432_s1 + $0x94] ss:$36 sps:$4 sm:$0xff]   ;;  %v2984_v9 = vld [vmem:[%s4432_s1 + $0x9c] ss:$36 sps:$4 sm:$0xff]  }
   0x4   :  { %v2980_v6 = vld [vmem:[%s4432_s1 + $0x48] ss:$36 sps:$4 sm:$0xff]   ;;  %1854 = vmatprep.subr.bf16.mxu0 %v2976_v4  ;;  %1960 = vmatprep.subr.bf16.mxu1 %v2978_v5  ;;  %v2986_v10 = vld [vmem:[%s4432_s1 + $0x90] ss:$36 sps:$4 sm:$0xff]   ;;  %v2987_v11 = vld [vmem:[%s4432_s1 + $0x98] ss:$36 sps:$4 sm:$0xff]  }
   0x5   :  { %v2988_v12 = vld [vmem:[%s4432_s1 + $0xdc] ss:$36 sps:$4 sm:$0xff]   ;;  %v2990_v13 = vld [vmem:[%s4432_s1 + $0xe4] ss:$36 sps:$4 sm:$0xff]   ;;  %v2996_v17 = vld [vmem:[%s4432_s1 + $0x12c] ss:$36 sps:$4 sm:$0xff]  }
   0x6   :  { %v2992_v14 = vld [vmem:[%s4432_s1 + $0xd8] ss:$36 sps:$4 sm:$0xff]   ;;  %v2993_v15 = vld [vmem:[%s4432_s1 + $0xe0] ss:$36 sps:$4 sm:$0xff]   ;;  %v2999_v19 = vld [vmem:[%s4432_s1 + $0x128] ss:$36 sps:$4 sm:$0xff]  }
   0x7   :  { %1855 = vmatpush1.bf16.msra.mxu0 %v2980_v6  ;;  %1961 = vmatpush1.bf16.msra.mxu1 %v2981_v7  ;;  %v2994_v16 = vld [vmem:[%s4432_s1 + $0x124] ss:$36 sps:$4 sm:$0xff]   ;;  %v3000_v20 = vld [vmem:[%s4432_s1 + $0x16c] ss:$36 sps:$4 sm:$0xff]   ;;  %v3002_v21 = vld [vmem:[%s4432_s1 + $0x174] ss:$36 sps:$4 sm:$0xff]  }
   0x8   :  { %1856 = vmatprep.subr.bf16.mxu0 %v2982_v8  ;;  %1962 = vmatprep.subr.bf16.mxu1 %v2984_v9  ;;  %v2998_v18 = vld [vmem:[%s4432_s1 + $0x120] ss:$36 sps:$4 sm:$0xff]   ;;  %v3004_v22 = vld [vmem:[%s4432_s1 + $0x168] ss:$36 sps:$4 sm:$0xff]   ;;  %v3005_v23 = vld [vmem:[%s4432_s1 + $0x170] ss:$36 sps:$4 sm:$0xff]  }
   0x9   :  { %v3006_v24 = vld [vmem:[%s4432_s1 + $0x1b4] ss:$36 sps:$4 sm:$0xff]   ;;  %v3008_v25 = vld [vmem:[%s4432_s1 + $0x1bc] ss:$36 sps:$4 sm:$0xff]   ;;  %v3014_v29 = vld [vmem:[%s4432_s1 + $0x204] ss:$36 sps:$4 sm:$0xff]  }
   0xa   :  { %v3010_v26 = vld [vmem:[%s4432_s1 + $0x1b0] ss:$36 sps:$4 sm:$0xff]   ;;  %v3011_v27 = vld [vmem:[%s4432_s1 + $0x1b8] ss:$36 sps:$4 sm:$0xff]   ;;  %v3017_v31 = vld [vmem:[%s4432_s1 + $0x200] ss:$36 sps:$4 sm:$0xff]  }
   0xb   :  { %1857 = vmatpush1.bf16.msra.mxu0 %v2986_v10  ;;  %1963 = vmatpush1.bf16.msra.mxu1 %v2987_v11  ;;  %v3012_v28 = vld [vmem:[%s4432_s1 + $0x1fc] ss:$36 sps:$4 sm:$0xff]   ;;  %v3018_v32 = vld [vmem:[%s4432_s1 + $0x244] ss:$36 sps:$4 sm:$0xff]   ;;  %v3020_v33 = vld [vmem:[%s4432_s1 + $0x24c] ss:$36 sps:$4 sm:$0xff]  }
   0xc   :  { %1858 = vmatprep.subr.bf16.mxu0 %v2988_v12  ;;  %1964 = vmatprep.subr.bf16.mxu1 %v2990_v13  ;;  %v3016_v30 = vld [vmem:[%s4432_s1 + $0x1f8] ss:$36 sps:$4 sm:$0xff]   ;;  %v3022_v34 = vld [vmem:[%s4432_s1 + $0x240] ss:$36 sps:$4 sm:$0xff]   ;;  %v3023_v35 = vld [vmem:[%s4432_s1 + $0x248] ss:$36 sps:$4 sm:$0xff]  }
   0xd   :  { %v3024_v36 = vld [vmem:[%s4432_s1 + $0x28c] ss:$36 sps:$4 sm:$0xff]   ;;  %v3026_v37 = vld [vmem:[%s4432_s1 + $0x294] ss:$36 sps:$4 sm:$0xff]   ;;  %v3032_v41 = vld [vmem:[%s4432_s1 + $0x2dc] ss:$36 sps:$4 sm:$0xff]  }
   0xe   :  { %v3028_v38 = vld [vmem:[%s4432_s1 + $0x288] ss:$36 sps:$4 sm:$0xff]   ;;  %v3029_v39 = vld [vmem:[%s4432_s1 + $0x290] ss:$36 sps:$4 sm:$0xff]   ;;  %v3035_v43 = vld [vmem:[%s4432_s1 + $0x2d8] ss:$36 sps:$4 sm:$0xff]  }
   0xf   :  { %1859 = vmatpush1.bf16.msra.mxu0 %v2992_v14  ;;  %1965 = vmatpush1.bf16.msra.mxu1 %v2993_v15  ;;  %v3030_v40 = vld [vmem:[%s4432_s1 + $0x2d4] ss:$36 sps:$4 sm:$0xff]   ;;  %v3036_v44 = vld [vmem:[%s4432_s1 + $0x31c] ss:$36 sps:$4 sm:$0xff]   ;;  %v3038_v45 = vld [vmem:[%s4432_s1 + $0x324] ss:$36 sps:$4 sm:$0xff]  }
  0x10   :  { %1860 = vmatprep.subr.bf16.mxu0 %v2994_v16  ;;  %1966 = vmatprep.subr.bf16.mxu1 %v2996_v17  ;;  %v3034_v42 = vld [vmem:[%s4432_s1 + $0x2d0] ss:$36 sps:$4 sm:$0xff]   ;;  %v3040_v46 = vld [vmem:[%s4432_s1 + $0x318] ss:$36 sps:$4 sm:$0xff]   ;;  %v3041_v48 = vld [vmem:[%s4432_s1 + $0x320] ss:$36 sps:$4 sm:$0xff]  }
  0x11   :  { %v3562_v47 = vld [vmem:[%s4433_s0 + $0x4] ss:$16 sps:$4 sm:$0xff]   ;;  %v3044_v50 = vld [vmem:[%s4432_s1 + $0x36c] ss:$36 sps:$4 sm:$0xff]   ;;  %v3056_v58 = vld [vmem:[%s4432_s1 + $0x3fc] ss:$36 sps:$4 sm:$0xff]  }
  0x12   :  { %v3042_v49 = vld [vmem:[%s4432_s1 + $0x364] ss:$36 sps:$4 sm:$0xff]   ;;  %1884 = vmatprep.mubr.bf16.mxu0 %v3562_v47  ;;  %1990 = vmatprep.mubr.bf16.mxu1 %v3562_v47  ;;  %v3048_v53 = vld [vmem:[%s4432_s1 + $0x3ac] ss:$36 sps:$4 sm:$0xff]   ;;  %v3050_v54 = vld [vmem:[%s4432_s1 + $0x3b4] ss:$36 sps:$4 sm:$0xff]  }
  0x13   :  { %1861 = vmatpush1.bf16.msra.mxu0 %v2998_v18  ;;  %1967 = vmatpush1.bf16.msra.mxu1 %v2999_v19  ;;  %v3046_v51 = vld [vmem:[%s4432_s1 + $0x360] ss:$36 sps:$4 sm:$0xff]   ;;  %v3047_v52 = vld [vmem:[%s4432_s1 + $0x368] ss:$36 sps:$4 sm:$0xff]   ;;  %v3053_v56 = vld [vmem:[%s4432_s1 + $0x3b0] ss:$36 sps:$4 sm:$0xff]  }
  0x14   :  { %1862 = vmatprep.subr.bf16.mxu0 %v3000_v20  ;;  %1968 = vmatprep.subr.bf16.mxu1 %v3002_v21  ;;  %v3052_v55 = vld [vmem:[%s4432_s1 + $0x3a8] ss:$36 sps:$4 sm:$0xff]   ;;  %v3054_v57 = vld [vmem:[%s4432_s1 + $0x3f4] ss:$36 sps:$4 sm:$0xff]   ;;  %v3060_v61 = vld [vmem:[%s4432_s1 + $0x43c] ss:$36 sps:$4 sm:$0xff]  }
  0x15   :  { %v3058_v59 = vld [vmem:[%s4432_s1 + $0x3f0] ss:$36 sps:$4 sm:$0xff]   ;;  %v3059_v60 = vld [vmem:[%s4432_s1 + $0x3f8] ss:$36 sps:$4 sm:$0xff]   ;;  %v3062_v62 = vld [vmem:[%s4432_s1 + $0x444] ss:$36 sps:$4 sm:$0xff]  }
  0x16   :  { %v3064_v63 = vld [vmem:[%s4432_s1 + $0x438] ss:$36 sps:$4 sm:$0xff]   ;;  %v3065_v0 = vld [vmem:[%s4432_s1 + $0x440] ss:$36 sps:$4 sm:$0xff]   ;;  %v3073_v2 = vld [vmem:[%s4432_s1 + $0x48c] ss:$36 sps:$4 sm:$0xff]  }
  0x17   :  { %1863 = vmatpush1.bf16.msra.mxu0 %v3004_v22  ;;  %1969 = vmatpush1.bf16.msra.mxu1 %v3005_v23  ;;  %v3070_v1 = vld [vmem:[%s4432_s1 + $0x484] ss:$36 sps:$4 sm:$0xff]   ;;  %v3632_v5 = vld [vmem:[%s4433_s0] ss:$16 sps:$4 sm:$0xff]   ;;  %v3080_v7 = vld [vmem:[%s4432_s1 + $0x4d4] ss:$36 sps:$4 sm:$0xff]  }
  0x18   :  { %1864 = vmatprep.subr.bf16.mxu0 %v3006_v24  ;;  %1970 = vmatprep.subr.bf16.mxu1 %v3008_v25  ;;  %v3068_v3 = vld [vmem:[%s4432_s1 + $0x480] ss:$36 sps:$4 sm:$0xff]   ;;  %v3071_v4 = vld [vmem:[%s4432_s1 + $0x488] ss:$36 sps:$4 sm:$0xff]   ;;  %v3078_v9 = vld [vmem:[%s4432_s1 + $0x4d0] ss:$36 sps:$4 sm:$0xff]  }
  0x19   :  { %v3077_v6 = vld [vmem:[%s4432_s1 + $0x4cc] ss:$36 sps:$4 sm:$0xff]   ;;  %v3083_v10 = vld [vmem:[%s4432_s1 + $0x514] ss:$36 sps:$4 sm:$0xff]   ;;  %v3086_v11 = vld [vmem:[%s4432_s1 + $0x51c] ss:$36 sps:$4 sm:$0xff]  }
  0x1a   :  { %v3075_v8 = vld [vmem:[%s4432_s1 + $0x4c8] ss:$36 sps:$4 sm:$0xff]   ;;  %v3081_v12 = vld [vmem:[%s4432_s1 + $0x510] ss:$36 sps:$4 sm:$0xff]   ;;  %v3084_v13 = vld [vmem:[%s4432_s1 + $0x518] ss:$36 sps:$4 sm:$0xff]  }
  0x1b   :  { %1865 = vmatpush1.bf16.msra.mxu0 %v3010_v26  ;;  %1971 = vmatpush1.bf16.msra.mxu1 %v3011_v27  ;;  %v3089_v14 = vld [vmem:[%s4432_s1 + $0x55c] ss:$36 sps:$4 sm:$0xff]   ;;  %v3092_v15 = vld [vmem:[%s4432_s1 + $0x564] ss:$36 sps:$4 sm:$0xff]   ;;  %v3098_v19 = vld [vmem:[%s4432_s1 + $0x5ac] ss:$36 sps:$4 sm:$0xff]  }
  0x1c   :  { %1866 = vmatprep.subr.bf16.mxu0 %v3012_v28  ;;  %1972 = vmatprep.subr.bf16.mxu1 %v3014_v29  ;;  %v3087_v16 = vld [vmem:[%s4432_s1 + $0x558] ss:$36 sps:$4 sm:$0xff]   ;;  %v3090_v17 = vld [vmem:[%s4432_s1 + $0x560] ss:$36 sps:$4 sm:$0xff]   ;;  %v3096_v21 = vld [vmem:[%s4432_s1 + $0x5a8] ss:$36 sps:$4 sm:$0xff]  }
  0x1d   :  { %v3095_v18 = vld [vmem:[%s4432_s1 + $0x5a4] ss:$36 sps:$4 sm:$0xff]   ;;  %v3101_v22 = vld [vmem:[%s4432_s1 + $0x5ec] ss:$36 sps:$4 sm:$0xff]   ;;  %v3104_v23 = vld [vmem:[%s4432_s1 + $0x5f4] ss:$36 sps:$4 sm:$0xff]  }
  0x1e   :  { %v3093_v20 = vld [vmem:[%s4432_s1 + $0x5a0] ss:$36 sps:$4 sm:$0xff]   ;;  %v3099_v24 = vld [vmem:[%s4432_s1 + $0x5e8] ss:$36 sps:$4 sm:$0xff]   ;;  %v3102_v26 = vld [vmem:[%s4432_s1 + $0x5f0] ss:$36 sps:$4 sm:$0xff]  }
  0x1f   :  { %1867 = vmatpush1.bf16.msra.mxu0 %v3016_v30  ;;  %1973 = vmatpush1.bf16.msra.mxu1 %v3017_v31  ;;  %v3696_v25 = vld [vmem:[%s4433_s0 + $0x24] ss:$16 sps:$4 sm:$0xff]   ;;  %v3704_v27 = vld [vmem:[%s4433_s0 + $0x20] ss:$16 sps:$4 sm:$0xff]   ;;  %v3108_v31 = vld [vmem:[%s4432_s1 + $0x638] ss:$36 sps:$4 sm:$0xff]  }
  0x20   :  { %1868 = vmatprep.subr.bf16.mxu0 %v3018_v32  ;;  %1974 = vmatprep.subr.bf16.mxu1 %v3020_v33  ;;  %v3107_v28 = vld [vmem:[%s4432_s1 + $0x634] ss:$36 sps:$4 sm:$0xff]   ;;  %v3110_v29 = vld [vmem:[%s4432_s1 + $0x63c] ss:$36 sps:$4 sm:$0xff]  }
  0x21   :  { %v3105_v30 = vld [vmem:[%s4432_s1 + $0x630] ss:$36 sps:$4 sm:$0xff]   ;;  %v3113_v32 = vld [vmem:[%s4432_s1 + $0x67c] ss:$36 sps:$4 sm:$0xff]  }
  0x22   :  { %v3728_v33 = vld [vmem:[%s4433_s0 + $0xc] ss:$16 sps:$4 sm:$0xff]  }
  0x23   :  { %1869 = vmatpush1.bf16.msra.mxu0 %v3022_v34  ;;  %1975 = vmatpush1.bf16.msra.mxu1 %v3023_v35  ;;  %v3116_v34 = vld [vmem:[%s4432_s1 + $0x684] ss:$36 sps:$4 sm:$0xff]   ;;  %v3111_v35 = vld [vmem:[%s4432_s1 + $0x678] ss:$36 sps:$4 sm:$0xff]  }
  0x24   :  { %1870 = vmatprep.subr.bf16.mxu0 %v3024_v36  ;;  %1976 = vmatprep.subr.bf16.mxu1 %v3026_v37  ;;  %v3114_v36 = vld [vmem:[%s4432_s1 + $0x680] ss:$36 sps:$4 sm:$0xff]  }
  0x25   :  { %v3119_v37 = vld [vmem:[%s4432_s1 + $0x6c4] ss:$36 sps:$4 sm:$0xff]  }
  0x27   :  { %1871 = vmatpush1.bf16.msra.mxu0 %v3028_v38  ;;  %1977 = vmatpush1.bf16.msra.mxu1 %v3029_v39  ;;  %v3122_v38 = vld [vmem:[%s4432_s1 + $0x6cc] ss:$36 sps:$4 sm:$0xff]   ;;  %v3117_v39 = vld [vmem:[%s4432_s1 + $0x6c0] ss:$36 sps:$4 sm:$0xff]  }
  0x28   :  { %1872 = vmatprep.subr.bf16.mxu0 %v3030_v40  ;;  %1978 = vmatprep.subr.bf16.mxu1 %v3032_v41  ;;  %v3120_v40 = vld [vmem:[%s4432_s1 + $0x6c8] ss:$36 sps:$4 sm:$0xff]  }
  0x29   :  { %v3125_v41 = vld [vmem:[%s4432_s1 + $0x70c] ss:$36 sps:$4 sm:$0xff]  }
  0x2b   :  { %1873 = vmatpush1.bf16.msra.mxu0 %v3034_v42  ;;  %1979 = vmatpush1.bf16.msra.mxu1 %v3035_v43  ;;  %v3128_v42 = vld [vmem:[%s4432_s1 + $0x714] ss:$36 sps:$4 sm:$0xff]   ;;  %v3123_v43 = vld [vmem:[%s4432_s1 + $0x708] ss:$36 sps:$4 sm:$0xff]  }
  0x2c   :  { %1874 = vmatprep.subr.bf16.mxu0 %v3036_v44  ;;  %1980 = vmatprep.subr.bf16.mxu1 %v3038_v45  ;;  %v3126_v44 = vld [vmem:[%s4432_s1 + $0x710] ss:$36 sps:$4 sm:$0xff]  }
  0x2d   :  { %v3131_v45 = vld [vmem:[%s4432_s1 + $0x754] ss:$36 sps:$4 sm:$0xff]  }
  0x2f   :  { %1875 = vmatpush1.bf16.msra.mxu0 %v3040_v46  ;;  %1981 = vmatpush1.bf16.msra.mxu1 %v3041_v48  ;;  %v3134_v46 = vld [vmem:[%s4432_s1 + $0x75c] ss:$36 sps:$4 sm:$0xff]   ;;  %v3129_v48 = vld [vmem:[%s4432_s1 + $0x750] ss:$36 sps:$4 sm:$0xff]  }
  0x30   :  { %1876 = vmatprep.subr.bf16.mxu0 %v3042_v49  ;;  %1982 = vmatprep.subr.bf16.mxu1 %v3044_v50  ;;  %v3132_v49 = vld [vmem:[%s4432_s1 + $0x758] ss:$36 sps:$4 sm:$0xff]  }
  0x31   :  { %v3137_v50 = vld [vmem:[%s4432_s1 + $0x79c] ss:$36 sps:$4 sm:$0xff]  }
  0x33   :  { %1877 = vmatpush1.bf16.msra.mxu0 %v3046_v51  ;;  %1983 = vmatpush1.bf16.msra.mxu1 %v3047_v52  ;;  %v3140_v51 = vld [vmem:[%s4432_s1 + $0x7a4] ss:$36 sps:$4 sm:$0xff]   ;;  %v3135_v52 = vld [vmem:[%s4432_s1 + $0x798] ss:$36 sps:$4 sm:$0xff]  }
  0x34   :  { %1878 = vmatprep.subr.bf16.mxu0 %v3048_v53  ;;  %1984 = vmatprep.subr.bf16.mxu1 %v3050_v54  ;;  %v3138_v53 = vld [vmem:[%s4432_s1 + $0x7a0] ss:$36 sps:$4 sm:$0xff]  }
  0x35   :  { %v3143_v54 = vld [vmem:[%s4432_s1 + $0x7e4] ss:$36 sps:$4 sm:$0xff]  }
  0x37   :  { %1879 = vmatpush1.bf16.msra.mxu0 %v3052_v55  ;;  %1985 = vmatpush1.bf16.msra.mxu1 %v3053_v56  ;;  %v3146_v55 = vld [vmem:[%s4432_s1 + $0x7ec] ss:$36 sps:$4 sm:$0xff]   ;;  %v3141_v56 = vld [vmem:[%s4432_s1 + $0x7e0] ss:$36 sps:$4 sm:$0xff]  }
  0x38   :  { %1880 = vmatprep.subr.bf16.mxu0 %v3054_v57  ;;  %1986 = vmatprep.subr.bf16.mxu1 %v3056_v58  ;;  %v3144_v57 = vld [vmem:[%s4432_s1 + $0x7e8] ss:$36 sps:$4 sm:$0xff]  }
  0x39   :  { %v3149_v58 = vld [vmem:[%s4432_s1 + $0x82c] ss:$36 sps:$4 sm:$0xff]  }
  0x3b   :  { %1881 = vmatpush1.bf16.msra.mxu0 %v3058_v59  ;;  %1987 = vmatpush1.bf16.msra.mxu1 %v3059_v60  ;;  %v3152_v59 = vld [vmem:[%s4432_s1 + $0x834] ss:$36 sps:$4 sm:$0xff]   ;;  %v3147_v60 = vld [vmem:[%s4432_s1 + $0x828] ss:$36 sps:$4 sm:$0xff]  }
  0x3c   :  { %1882 = vmatprep.subr.bf16.mxu0 %v3060_v61  ;;  %1988 = vmatprep.subr.bf16.mxu1 %v3062_v62  ;;  %v3150_v61 = vld [vmem:[%s4432_s1 + $0x830] ss:$36 sps:$4 sm:$0xff]  }
  0x3d   :  { %v3158_v62 = vld [vmem:[%s4432_s1 + $0x874] ss:$36 sps:$4 sm:$0xff]  }
  0x3f   :  { %1883 = vmatpush1.bf16.msra.mxu0 %v3064_v63  ;;  %1989 = vmatpush1.bf16.msra.mxu1 %v3065_v0  ;;  %v3161_v63 = vld [vmem:[%s4432_s1 + $0x87c] ss:$36 sps:$4 sm:$0xff]   ;;  %v3156_v0 = vld [vmem:[%s4432_s1 + $0x870] ss:$36 sps:$4 sm:$0xff]  }
  0x40   :  { %1905 = vmatprep.subr.bf16.mxu0 %v3070_v1  ;;  %2011 = vmatprep.subr.bf16.mxu1 %v3073_v2  ;;  %v3159_v1 = vld [vmem:[%s4432_s1 + $0x878] ss:$36 sps:$4 sm:$0xff]  }
  0x41   :  { %v3164_v2 = vld [vmem:[%s4432_s1 + $0x8bc] ss:$36 sps:$4 sm:$0xff]  }
  0x42   :  { %1885 = vmatmul.mubr.bf16.vlgmr.msra.gmra.mrb[0].mxu0 %v3632_v5  ;;  %1991 = vmatmul.mubr.bf16.vlgmr.msra.gmra.mrb[0].mxu1 %v3632_v5 }
  0x43   :  { %1906 = vmatpush1.bf16.msra.mxu0 %v3068_v3  ;;  %2012 = vmatpush1.bf16.msra.mxu1 %v3071_v4  ;;  %v3167_v3 = vld [vmem:[%s4432_s1 + $0x8c4] ss:$36 sps:$4 sm:$0xff]   ;;  %v3162_v4 = vld [vmem:[%s4432_s1 + $0x8b8] ss:$36 sps:$4 sm:$0xff]  }
  0x44   :  { %1907 = vmatprep.subr.bf16.mxu0 %v3077_v6  ;;  %2013 = vmatprep.subr.bf16.mxu1 %v3080_v7  ;;  %v3165_v6 = vld [vmem:[%s4432_s1 + $0x8c0] ss:$36 sps:$4 sm:$0xff]   ;;  %v3173_v7 = vld [vmem:[%s4432_s1 + $0x14] ss:$36 sps:$4 sm:$0xff]  }
  0x45   :  { %1894 = vmatprep.mubr.bf16.mxu0 %v3696_v25  ;;  %2000 = vmatprep.mubr.bf16.mxu1 %v3696_v25 }
  0x47   :  { %1908 = vmatpush1.bf16.msra.mxu0 %v3075_v8  ;;  %2014 = vmatpush1.bf16.msra.mxu1 %v3078_v9  ;;  %v3176_v8 = vld [vmem:[%s4432_s1 + $0x1c] ss:$36 sps:$4 sm:$0xff]   ;;  %v3846_v9 = vld [vmem:[%s4433_s0 + $0x8] ss:$16 sps:$4 sm:$0xff]  }
  0x48   :  { %1909 = vmatprep.subr.bf16.mxu0 %v3083_v10  ;;  %2015 = vmatprep.subr.bf16.mxu1 %v3086_v11  ;;  %v3171_v10 = vld [vmem:[%s4432_s1 + $0x10] ss:$36 sps:$4 sm:$0xff]   ;;  %v3174_v11 = vld [vmem:[%s4432_s1 + $0x18] ss:$36 sps:$4 sm:$0xff]  }
  0x4a   :  { %1895 = vmatmul.mubr.bf16.gmra.mrb[4].mxu0 %v3704_v27  ;;  %2001 = vmatmul.mubr.bf16.gmra.mrb[4].mxu1 %v3704_v27 }
  0x4b   :  { %1910 = vmatpush1.bf16.msra.mxu0 %v3081_v12  ;;  %2016 = vmatpush1.bf16.msra.mxu1 %v3084_v13  ;;  %v3179_v12 = vld [vmem:[%s4432_s1 + $0x5c] ss:$36 sps:$4 sm:$0xff]   ;;  %v3182_v13 = vld [vmem:[%s4432_s1 + $0x64] ss:$36 sps:$4 sm:$0xff]  }
  0x4c   :  { %1911 = vmatprep.subr.bf16.mxu0 %v3089_v14  ;;  %2017 = vmatprep.subr.bf16.mxu1 %v3092_v15  ;;  %v3863_v14 = vld [vmem:[%s4433_s0 + $0x2c] ss:$16 sps:$4 sm:$0xff]  }
  0x4d   :  { %1937 = vmatprep.mubr.bf16.mxu0 %v3728_v33  ;;  %2043 = vmatprep.mubr.bf16.mxu1 %v3728_v33  ;;  %v3177_v15 = vld [vmem:[%s4432_s1 + $0x58] ss:$36 sps:$4 sm:$0xff]  }
  0x4f   :  { %1912 = vmatpush1.bf16.msra.mxu0 %v3087_v16  ;;  %2018 = vmatpush1.bf16.msra.mxu1 %v3090_v17  ;;  %v3180_v16 = vld [vmem:[%s4432_s1 + $0x60] ss:$36 sps:$4 sm:$0xff]  }
  0x50   :  { %1913 = vmatprep.subr.bf16.mxu0 %v3095_v18  ;;  %2019 = vmatprep.subr.bf16.mxu1 %v3098_v19  ;;  %v3188_v17 = vld [vmem:[%s4432_s1 + $0xa4] ss:$36 sps:$4 sm:$0xff]   ;;  %v3191_v18 = vld [vmem:[%s4432_s1 + $0xac] ss:$36 sps:$4 sm:$0xff]  }
  0x51   :  { %v3884_v19 = vld [vmem:[%s4433_s0 + $0x28] ss:$16 sps:$4 sm:$0xff]  }
  0x53   :  { %1914 = vmatpush1.bf16.msra.mxu0 %v3093_v20  ;;  %2020 = vmatpush1.bf16.msra.mxu1 %v3096_v21  ;;  %v3186_v20 = vld [vmem:[%s4432_s1 + $0xa0] ss:$36 sps:$4 sm:$0xff]   ;;  %v3189_v21 = vld [vmem:[%s4432_s1 + $0xa8] ss:$36 sps:$4 sm:$0xff]  }
  0x54   :  { %1915 = vmatprep.subr.bf16.mxu0 %v3101_v22  ;;  %2021 = vmatprep.subr.bf16.mxu1 %v3104_v23  ;;  %v3194_v22 = vld [vmem:[%s4432_s1 + $0xec] ss:$36 sps:$4 sm:$0xff]   ;;  %v3197_v23 = vld [vmem:[%s4432_s1 + $0xf4] ss:$36 sps:$4 sm:$0xff]  }
  0x57   :  { %1916 = vmatpush1.bf16.msra.mxu0 %v3099_v24  ;;  %2022 = vmatpush1.bf16.msra.mxu1 %v3102_v26  ;;  %v3192_v24 = vld [vmem:[%s4432_s1 + $0xe8] ss:$36 sps:$4 sm:$0xff]   ;;  %v3195_v26 = vld [vmem:[%s4432_s1 + $0xf0] ss:$36 sps:$4 sm:$0xff]  }
  0x58   :  { %1917 = vmatprep.subr.bf16.mxu0 %v3107_v28  ;;  %2023 = vmatprep.subr.bf16.mxu1 %v3110_v29  ;;  %v3200_v28 = vld [vmem:[%s4432_s1 + $0x134] ss:$36 sps:$4 sm:$0xff]   ;;  %v3203_v29 = vld [vmem:[%s4432_s1 + $0x13c] ss:$36 sps:$4 sm:$0xff]  }
  0x5b   :  { %1918 = vmatpush1.bf16.msra.mxu0 %v3105_v30  ;;  %2024 = vmatpush1.bf16.msra.mxu1 %v3108_v31  ;;  %v3198_v30 = vld [vmem:[%s4432_s1 + $0x130] ss:$36 sps:$4 sm:$0xff]   ;;  %v3201_v31 = vld [vmem:[%s4432_s1 + $0x138] ss:$36 sps:$4 sm:$0xff]  }
  0x5c   :  { %1919 = vmatprep.subr.bf16.mxu0 %v3113_v32  ;;  %2025 = vmatprep.subr.bf16.mxu1 %v3116_v34  ;;  %v3206_v32 = vld [vmem:[%s4432_s1 + $0x17c] ss:$36 sps:$4 sm:$0xff]  }
  0x5d   :  { %v3204_v34 = vld [vmem:[%s4432_s1 + $0x178] ss:$36 sps:$4 sm:$0xff]  }
  0x5f   :  { %1920 = vmatpush1.bf16.msra.mxu0 %v3111_v35  ;;  %2026 = vmatpush1.bf16.msra.mxu1 %v3114_v36  ;;  %v3207_v35 = vld [vmem:[%s4432_s1 + $0x180] ss:$36 sps:$4 sm:$0xff]  }
  0x60   :  { %1921 = vmatprep.subr.bf16.mxu0 %v3119_v37  ;;  %2027 = vmatprep.subr.bf16.mxu1 %v3122_v38  ;;  %v3212_v36 = vld [vmem:[%s4432_s1 + $0x1c4] ss:$36 sps:$4 sm:$0xff]   ;;  %v3215_v37 = vld [vmem:[%s4432_s1 + $0x1cc] ss:$36 sps:$4 sm:$0xff]  }
  0x61   :  { %v3210_v38 = vld [vmem:[%s4432_s1 + $0x1c0] ss:$36 sps:$4 sm:$0xff]  }
  0x63   :  { %1922 = vmatpush1.bf16.msra.mxu0 %v3117_v39  ;;  %2028 = vmatpush1.bf16.msra.mxu1 %v3120_v40  ;;  %v3213_v39 = vld [vmem:[%s4432_s1 + $0x1c8] ss:$36 sps:$4 sm:$0xff]  }
  0x64   :  { %1923 = vmatprep.subr.bf16.mxu0 %v3125_v41  ;;  %2029 = vmatprep.subr.bf16.mxu1 %v3128_v42  ;;  %v3218_v40 = vld [vmem:[%s4432_s1 + $0x20c] ss:$36 sps:$4 sm:$0xff]   ;;  %v3221_v41 = vld [vmem:[%s4432_s1 + $0x214] ss:$36 sps:$4 sm:$0xff]  }
  0x65   :  { %v3216_v42 = vld [vmem:[%s4432_s1 + $0x208] ss:$36 sps:$4 sm:$0xff]  }
  0x67   :  { %1924 = vmatpush1.bf16.msra.mxu0 %v3123_v43  ;;  %2030 = vmatpush1.bf16.msra.mxu1 %v3126_v44  ;;  %v3219_v43 = vld [vmem:[%s4432_s1 + $0x210] ss:$36 sps:$4 sm:$0xff]  }
  0x68   :  { %1925 = vmatprep.subr.bf16.mxu0 %v3131_v45  ;;  %2031 = vmatprep.subr.bf16.mxu1 %v3134_v46  ;;  %v3224_v44 = vld [vmem:[%s4432_s1 + $0x254] ss:$36 sps:$4 sm:$0xff]   ;;  %v3227_v45 = vld [vmem:[%s4432_s1 + $0x25c] ss:$36 sps:$4 sm:$0xff]  }
  0x69   :  { %v3222_v46 = vld [vmem:[%s4432_s1 + $0x250] ss:$36 sps:$4 sm:$0xff]  }
  0x6b   :  { %1926 = vmatpush1.bf16.msra.mxu0 %v3129_v48  ;;  %2032 = vmatpush1.bf16.msra.mxu1 %v3132_v49  ;;  %v3225_v48 = vld [vmem:[%s4432_s1 + $0x258] ss:$36 sps:$4 sm:$0xff]  }
  0x6c   :  { %1927 = vmatprep.subr.bf16.mxu0 %v3137_v50  ;;  %2033 = vmatprep.subr.bf16.mxu1 %v3140_v51  ;;  %v3230_v49 = vld [vmem:[%s4432_s1 + $0x29c] ss:$36 sps:$4 sm:$0xff]   ;;  %v3233_v50 = vld [vmem:[%s4432_s1 + $0x2a4] ss:$36 sps:$4 sm:$0xff]  }
  0x6d   :  { %v3228_v51 = vld [vmem:[%s4432_s1 + $0x298] ss:$36 sps:$4 sm:$0xff]  }
  0x6f   :  { %1928 = vmatpush1.bf16.msra.mxu0 %v3135_v52  ;;  %2034 = vmatpush1.bf16.msra.mxu1 %v3138_v53  ;;  %v3231_v52 = vld [vmem:[%s4432_s1 + $0x2a0] ss:$36 sps:$4 sm:$0xff]  }
  0x70   :  { %1929 = vmatprep.subr.bf16.mxu0 %v3143_v54  ;;  %2035 = vmatprep.subr.bf16.mxu1 %v3146_v55  ;;  %v3236_v53 = vld [vmem:[%s4432_s1 + $0x2e4] ss:$36 sps:$4 sm:$0xff]   ;;  %v3239_v54 = vld [vmem:[%s4432_s1 + $0x2ec] ss:$36 sps:$4 sm:$0xff]  }
  0x71   :  { %v3234_v55 = vld [vmem:[%s4432_s1 + $0x2e0] ss:$36 sps:$4 sm:$0xff]  }
  0x73   :  { %1930 = vmatpush1.bf16.msra.mxu0 %v3141_v56  ;;  %2036 = vmatpush1.bf16.msra.mxu1 %v3144_v57  ;;  %v3237_v56 = vld [vmem:[%s4432_s1 + $0x2e8] ss:$36 sps:$4 sm:$0xff]  }
  0x74   :  { %1931 = vmatprep.subr.bf16.mxu0 %v3149_v58  ;;  %2037 = vmatprep.subr.bf16.mxu1 %v3152_v59  ;;  %v3242_v57 = vld [vmem:[%s4432_s1 + $0x32c] ss:$36 sps:$4 sm:$0xff]   ;;  %v3245_v58 = vld [vmem:[%s4432_s1 + $0x334] ss:$36 sps:$4 sm:$0xff]  }
  0x75   :  { %v3240_v59 = vld [vmem:[%s4432_s1 + $0x328] ss:$36 sps:$4 sm:$0xff]  }
  0x77   :  { %1932 = vmatpush1.bf16.msra.mxu0 %v3147_v60  ;;  %2038 = vmatpush1.bf16.msra.mxu1 %v3150_v61  ;;  %v3243_v60 = vld [vmem:[%s4432_s1 + $0x330] ss:$36 sps:$4 sm:$0xff]  }
  0x78   :  { %1933 = vmatprep.subr.bf16.mxu0 %v3158_v62  ;;  %2039 = vmatprep.subr.bf16.mxu1 %v3161_v63  ;;  %v3248_v61 = vld [vmem:[%s4432_s1 + $0x374] ss:$36 sps:$4 sm:$0xff]   ;;  %v3251_v62 = vld [vmem:[%s4432_s1 + $0x37c] ss:$36 sps:$4 sm:$0xff]  }
  0x79   :  { %v3246_v63 = vld [vmem:[%s4432_s1 + $0x370] ss:$36 sps:$4 sm:$0xff]  }
  0x7b   :  { %1934 = vmatpush1.bf16.msra.mxu0 %v3156_v0  ;;  %2040 = vmatpush1.bf16.msra.mxu1 %v3159_v1  ;;  %v3249_v0 = vld [vmem:[%s4432_s1 + $0x378] ss:$36 sps:$4 sm:$0xff]  }
  0x7c   :  { %1935 = vmatprep.subr.bf16.mxu0 %v3164_v2  ;;  %2041 = vmatprep.subr.bf16.mxu1 %v3167_v3  ;;  %v3254_v1 = vld [vmem:[%s4432_s1 + $0x3bc] ss:$36 sps:$4 sm:$0xff]   ;;  %v3257_v2 = vld [vmem:[%s4432_s1 + $0x3c4] ss:$36 sps:$4 sm:$0xff]  }
  0x7d   :  { %v3252_v3 = vld [vmem:[%s4432_s1 + $0x3b8] ss:$36 sps:$4 sm:$0xff]  }
  0x7f   :  { %1936 = vmatpush1.bf16.msra.mxu0 %v3162_v4  ;;  %2042 = vmatpush1.bf16.msra.mxu1 %v3165_v6  ;;  %v3255_v4 = vld [vmem:[%s4432_s1 + $0x3c0] ss:$36 sps:$4 sm:$0xff]  }
  0x80   :  { %2064 = vmatprep.subr.bf16.mxu0 %v3173_v7  ;;  %2170 = vmatprep.subr.bf16.mxu1 %v3176_v8  ;;  %v3260_v6 = vld [vmem:[%s4432_s1 + $0x404] ss:$36 sps:$4 sm:$0xff]   ;;  %v3263_v7 = vld [vmem:[%s4432_s1 + $0x40c] ss:$36 sps:$4 sm:$0xff]  }
  0x81   :  { %v3258_v8 = vld [vmem:[%s4432_s1 + $0x400] ss:$36 sps:$4 sm:$0xff]  }
  0x82   :  { %1938 = vmatmul.mubr.bf16.vlgmr.msra.gmra.mrb[0].mxu0 %v3846_v9  ;;  %2044 = vmatmul.mubr.bf16.vlgmr.msra.gmra.mrb[0].mxu1 %v3846_v9 }
  0x83   :  { %2065 = vmatpush1.bf16.msra.mxu0 %v3171_v10  ;;  %2171 = vmatpush1.bf16.msra.mxu1 %v3174_v11  ;;  %v3261_v10 = vld [vmem:[%s4432_s1 + $0x408] ss:$36 sps:$4 sm:$0xff]  }
  0x84   :  { %2066 = vmatprep.subr.bf16.mxu0 %v3179_v12  ;;  %2172 = vmatprep.subr.bf16.mxu1 %v3182_v13  ;;  %v3266_v11 = vld [vmem:[%s4432_s1 + $0x44c] ss:$36 sps:$4 sm:$0xff]   ;;  %v3269_v12 = vld [vmem:[%s4432_s1 + $0x454] ss:$36 sps:$4 sm:$0xff]  }
  0x85   :  { %1947 = vmatprep.mubr.bf16.mxu0 %v3863_v14  ;;  %2053 = vmatprep.mubr.bf16.mxu1 %v3863_v14  ;;  %v3264_v13 = vld [vmem:[%s4432_s1 + $0x448] ss:$36 sps:$4 sm:$0xff]  }
  0x87   :  { %2067 = vmatpush1.bf16.msra.mxu0 %v3177_v15  ;;  %2173 = vmatpush1.bf16.msra.mxu1 %v3180_v16  ;;  %v3267_v15 = vld [vmem:[%s4432_s1 + $0x450] ss:$36 sps:$4 sm:$0xff]  }
  0x88   :  { %2068 = vmatprep.subr.bf16.mxu0 %v3188_v17  ;;  %2174 = vmatprep.subr.bf16.mxu1 %v3191_v18  ;;  %v3272_v16 = vld [vmem:[%s4432_s1 + $0x494] ss:$36 sps:$4 sm:$0xff]   ;;  %v3275_v17 = vld [vmem:[%s4432_s1 + $0x49c] ss:$36 sps:$4 sm:$0xff]  }
  0x89   :  { %v3270_v18 = vld [vmem:[%s4432_s1 + $0x490] ss:$36 sps:$4 sm:$0xff]  }
  0x8a   :  { %1948 = vmatmul.mubr.bf16.gmra.mrb[4].mxu0 %v3884_v19  ;;  %2054 = vmatmul.mubr.bf16.gmra.mrb[4].mxu1 %v3884_v19 }
  0x8b   :  { %2069 = vmatpush1.bf16.msra.mxu0 %v3186_v20  ;;  %2175 = vmatpush1.bf16.msra.mxu1 %v3189_v21  ;;  %v3273_v20 = vld [vmem:[%s4432_s1 + $0x498] ss:$36 sps:$4 sm:$0xff]  }
  0x8c   :  { %2070 = vmatprep.subr.bf16.mxu0 %v3194_v22  ;;  %2176 = vmatprep.subr.bf16.mxu1 %v3197_v23  ;;  %v3278_v21 = vld [vmem:[%s4432_s1 + $0x4dc] ss:$36 sps:$4 sm:$0xff]   ;;  %v3281_v22 = vld [vmem:[%s4432_s1 + $0x4e4] ss:$36 sps:$4 sm:$0xff]  }
  0x8d   :  { %2096 = vmatprep.mubr.bf16.mxu0 %v3562_v47  ;;  %2202 = vmatprep.mubr.bf16.mxu1 %v3562_v47  ;;  %v3209_v47 = vld [vmem:[%s4432_s1 + $0x184] ss:$36 sps:$4 sm:$0xff]   ;;  %v3276_v23 = vld [vmem:[%s4432_s1 + $0x4d8] ss:$36 sps:$4 sm:$0xff]  }
  0x8f   :  { %2071 = vmatpush1.bf16.msra.mxu0 %v3192_v24  ;;  %2177 = vmatpush1.bf16.msra.mxu1 %v3195_v26  ;;  %v3279_v24 = vld [vmem:[%s4432_s1 + $0x4e0] ss:$36 sps:$4 sm:$0xff]  }
  0x90   :  { %2072 = vmatprep.subr.bf16.mxu0 %v3200_v28  ;;  %2178 = vmatprep.subr.bf16.mxu1 %v3203_v29  ;;  %v3284_v26 = vld [vmem:[%s4432_s1 + $0x524] ss:$36 sps:$4 sm:$0xff]   ;;  %v3287_v28 = vld [vmem:[%s4432_s1 + $0x52c] ss:$36 sps:$4 sm:$0xff]  }
  0x91   :  { %v3285_v29 = vld [vmem:[%s4432_s1 + $0x528] ss:$36 sps:$4 sm:$0xff]  }
  0x93   :  { %2073 = vmatpush1.bf16.msra.mxu0 %v3198_v30  ;;  %2179 = vmatpush1.bf16.msra.mxu1 %v3201_v31  ;;  %v3290_v30 = vld [vmem:[%s4432_s1 + $0x56c] ss:$36 sps:$4 sm:$0xff]   ;;  %v3293_v31 = vld [vmem:[%s4432_s1 + $0x574] ss:$36 sps:$4 sm:$0xff]  }
  0x94   :  { %2074 = vmatprep.subr.bf16.mxu0 %v3206_v32  ;;  %2180 = vmatprep.subr.bf16.mxu1 %v3209_v47  ;;  %v3291_v32 = vld [vmem:[%s4432_s1 + $0x570] ss:$36 sps:$4 sm:$0xff]  }
  0x95   :  { %v3296_v47 = vld [vmem:[%s4432_s1 + $0x5b4] ss:$36 sps:$4 sm:$0xff]  }
  0x97   :  { %2075 = vmatpush1.bf16.msra.mxu0 %v3204_v34  ;;  %2181 = vmatpush1.bf16.msra.mxu1 %v3207_v35  ;;  %v3299_v34 = vld [vmem:[%s4432_s1 + $0x5bc] ss:$36 sps:$4 sm:$0xff]  }
  0x98   :  { %2076 = vmatprep.subr.bf16.mxu0 %v3212_v36  ;;  %2182 = vmatprep.subr.bf16.mxu1 %v3215_v37  ;;  %v3297_v35 = vld [vmem:[%s4432_s1 + $0x5b8] ss:$36 sps:$4 sm:$0xff]  }
  0x99   :  { %v3302_v36 = vld [vmem:[%s4432_s1 + $0x5fc] ss:$36 sps:$4 sm:$0xff]  }
  0x9a   :  { %v3300_v37 = vld [vmem:[%s4432_s1 + $0x5f8] ss:$36 sps:$4 sm:$0xff]  }
  0x9b   :  { %2077 = vmatpush1.bf16.msra.mxu0 %v3210_v38  ;;  %2183 = vmatpush1.bf16.msra.mxu1 %v3213_v39  ;;  %v3303_v38 = vld [vmem:[%s4432_s1 + $0x600] ss:$36 sps:$4 sm:$0xff]  }
  0x9c   :  { %2078 = vmatprep.subr.bf16.mxu0 %v3218_v40  ;;  %2184 = vmatprep.subr.bf16.mxu1 %v3221_v41  ;;  %v3308_v39 = vld [vmem:[%s4432_s1 + $0x644] ss:$36 sps:$4 sm:$0xff]   ;;  %v3311_v40 = vld [vmem:[%s4432_s1 + $0x64c] ss:$36 sps:$4 sm:$0xff]  }
  0x9d   :  { %v3306_v41 = vld [vmem:[%s4432_s1 + $0x640] ss:$36 sps:$4 sm:$0xff]  }
  0x9f   :  { %2079 = vmatpush1.bf16.msra.mxu0 %v3216_v42  ;;  %2185 = vmatpush1.bf16.msra.mxu1 %v3219_v43  ;;  %v3309_v42 = vld [vmem:[%s4432_s1 + $0x648] ss:$36 sps:$4 sm:$0xff]  }
  0xa0   :  { %2080 = vmatprep.subr.bf16.mxu0 %v3224_v44  ;;  %2186 = vmatprep.subr.bf16.mxu1 %v3227_v45  ;;  %v3314_v43 = vld [vmem:[%s4432_s1 + $0x68c] ss:$36 sps:$4 sm:$0xff]   ;;  %v3317_v44 = vld [vmem:[%s4432_s1 + $0x694] ss:$36 sps:$4 sm:$0xff]  }
  0xa1   :  { %v3312_v45 = vld [vmem:[%s4432_s1 + $0x688] ss:$36 sps:$4 sm:$0xff]  }
  0xa3   :  { %2081 = vmatpush1.bf16.msra.mxu0 %v3222_v46  ;;  %2187 = vmatpush1.bf16.msra.mxu1 %v3225_v48  ;;  %v3315_v46 = vld [vmem:[%s4432_s1 + $0x690] ss:$36 sps:$4 sm:$0xff]  }
  0xa4   :  { %2082 = vmatprep.subr.bf16.mxu0 %v3230_v49  ;;  %2188 = vmatprep.subr.bf16.mxu1 %v3233_v50  ;;  %v3320_v48 = vld [vmem:[%s4432_s1 + $0x6d4] ss:$36 sps:$4 sm:$0xff]   ;;  %v3323_v49 = vld [vmem:[%s4432_s1 + $0x6dc] ss:$36 sps:$4 sm:$0xff]  }
  0xa5   :  { %v3318_v50 = vld [vmem:[%s4432_s1 + $0x6d0] ss:$36 sps:$4 sm:$0xff]  }
  0xa7   :  { %2083 = vmatpush1.bf16.msra.mxu0 %v3228_v51  ;;  %2189 = vmatpush1.bf16.msra.mxu1 %v3231_v52  ;;  %v3321_v51 = vld [vmem:[%s4432_s1 + $0x6d8] ss:$36 sps:$4 sm:$0xff]  }
  0xa8   :  { %2084 = vmatprep.subr.bf16.mxu0 %v3236_v53  ;;  %2190 = vmatprep.subr.bf16.mxu1 %v3239_v54  ;;  %v3326_v52 = vld [vmem:[%s4432_s1 + $0x71c] ss:$36 sps:$4 sm:$0xff]   ;;  %v3329_v53 = vld [vmem:[%s4432_s1 + $0x724] ss:$36 sps:$4 sm:$0xff]  }
  0xa9   :  { %v3324_v54 = vld [vmem:[%s4432_s1 + $0x718] ss:$36 sps:$4 sm:$0xff]  }
  0xab   :  { %2085 = vmatpush1.bf16.msra.mxu0 %v3234_v55  ;;  %2191 = vmatpush1.bf16.msra.mxu1 %v3237_v56  ;;  %v3327_v55 = vld [vmem:[%s4432_s1 + $0x720] ss:$36 sps:$4 sm:$0xff]  }
  0xac   :  { %2086 = vmatprep.subr.bf16.mxu0 %v3242_v57  ;;  %2192 = vmatprep.subr.bf16.mxu1 %v3245_v58  ;;  %v3332_v56 = vld [vmem:[%s4432_s1 + $0x764] ss:$36 sps:$4 sm:$0xff]   ;;  %v3335_v57 = vld [vmem:[%s4432_s1 + $0x76c] ss:$36 sps:$4 sm:$0xff]  }
  0xad   :  { %v3330_v58 = vld [vmem:[%s4432_s1 + $0x760] ss:$36 sps:$4 sm:$0xff]  }
  0xaf   :  { %2087 = vmatpush1.bf16.msra.mxu0 %v3240_v59  ;;  %2193 = vmatpush1.bf16.msra.mxu1 %v3243_v60  ;;  %v3333_v59 = vld [vmem:[%s4432_s1 + $0x768] ss:$36 sps:$4 sm:$0xff]  }
  0xb0   :  { %2088 = vmatprep.subr.bf16.mxu0 %v3248_v61  ;;  %2194 = vmatprep.subr.bf16.mxu1 %v3251_v62  ;;  %v3338_v60 = vld [vmem:[%s4432_s1 + $0x7ac] ss:$36 sps:$4 sm:$0xff]   ;;  %v3341_v61 = vld [vmem:[%s4432_s1 + $0x7b4] ss:$36 sps:$4 sm:$0xff]  }
  0xb1   :  { %v3336_v62 = vld [vmem:[%s4432_s1 + $0x7a8] ss:$36 sps:$4 sm:$0xff]  }
  0xb3   :  { %2089 = vmatpush1.bf16.msra.mxu0 %v3246_v63  ;;  %2195 = vmatpush1.bf16.msra.mxu1 %v3249_v0  ;;  %v3339_v63 = vld [vmem:[%s4432_s1 + $0x7b0] ss:$36 sps:$4 sm:$0xff]  }
  0xb4   :  { %2090 = vmatprep.subr.bf16.mxu0 %v3254_v1  ;;  %2196 = vmatprep.subr.bf16.mxu1 %v3257_v2  ;;  %v3344_v0 = vld [vmem:[%s4432_s1 + $0x7f4] ss:$36 sps:$4 sm:$0xff]   ;;  %v3347_v1 = vld [vmem:[%s4432_s1 + $0x7fc] ss:$36 sps:$4 sm:$0xff]  }
  0xb5   :  { %v3342_v2 = vld [vmem:[%s4432_s1 + $0x7f0] ss:$36 sps:$4 sm:$0xff]  }
  0xb7   :  { %2091 = vmatpush1.bf16.msra.mxu0 %v3252_v3  ;;  %2197 = vmatpush1.bf16.msra.mxu1 %v3255_v4  ;;  %v3345_v3 = vld [vmem:[%s4432_s1 + $0x7f8] ss:$36 sps:$4 sm:$0xff]  }
  0xb8   :  { %2092 = vmatprep.subr.bf16.mxu0 %v3260_v6  ;;  %2198 = vmatprep.subr.bf16.mxu1 %v3263_v7  ;;  %v3350_v4 = vld [vmem:[%s4432_s1 + $0x83c] ss:$36 sps:$4 sm:$0xff]   ;;  %v3353_v6 = vld [vmem:[%s4432_s1 + $0x844] ss:$36 sps:$4 sm:$0xff]  }
  0xb9   :  { %v3348_v7 = vld [vmem:[%s4432_s1 + $0x838] ss:$36 sps:$4 sm:$0xff]  }
  0xbb   :  { %2093 = vmatpush1.bf16.msra.mxu0 %v3258_v8  ;;  %2199 = vmatpush1.bf16.msra.mxu1 %v3261_v10  ;;  %v3351_v8 = vld [vmem:[%s4432_s1 + $0x840] ss:$36 sps:$4 sm:$0xff]  }
  0xbc   :  { %2094 = vmatprep.subr.bf16.mxu0 %v3266_v11  ;;  %2200 = vmatprep.subr.bf16.mxu1 %v3269_v12  ;;  %v3356_v10 = vld [vmem:[%s4432_s1 + $0x884] ss:$36 sps:$4 sm:$0xff]   ;;  %v3359_v11 = vld [vmem:[%s4432_s1 + $0x88c] ss:$36 sps:$4 sm:$0xff]  }
  0xbd   :  { %v3354_v12 = vld [vmem:[%s4432_s1 + $0x880] ss:$36 sps:$4 sm:$0xff]  }
  0xbf   :  { %2095 = vmatpush1.bf16.msra.mxu0 %v3264_v13  ;;  %2201 = vmatpush1.bf16.msra.mxu1 %v3267_v15  ;;  %v3357_v13 = vld [vmem:[%s4432_s1 + $0x888] ss:$36 sps:$4 sm:$0xff]  }
  0xc0   :  { %2117 = vmatprep.subr.bf16.mxu0 %v3272_v16  ;;  %2223 = vmatprep.subr.bf16.mxu1 %v3275_v17  ;;  %v3362_v15 = vld [vmem:[%s4432_s1 + $0x8cc] ss:$36 sps:$4 sm:$0xff]   ;;  %v3365_v16 = vld [vmem:[%s4432_s1 + $0x8d4] ss:$36 sps:$4 sm:$0xff]  }
  0xc1   :  { %v3360_v17 = vld [vmem:[%s4432_s1 + $0x8c8] ss:$36 sps:$4 sm:$0xff]  }
  0xc2   :  { %2097 = vmatmul.mubr.bf16.vlgmr.msra.gmra.mrb[8].mxu0 %v3632_v5  ;;  %2203 = vmatmul.mubr.bf16.vlgmr.msra.gmra.mrb[8].mxu1 %v3632_v5  ;;  %v3282_v5 = vld [vmem:[%s4432_s1 + $0x520] ss:$36 sps:$4 sm:$0xff]  }
  0xc3   :  { %2118 = vmatpush1.bf16.msra.mxu0 %v3270_v18  ;;  %2224 = vmatpush1.bf16.msra.mxu1 %v3273_v20  ;;  %v3363_v18 = vld [vmem:[%s4432_s1 + $0x8d0] ss:$36 sps:$4 sm:$0xff]   ;;  %v3366_v20 = vld [vmem:[%s4432_s1 + $0x260] ss:$36 sps:$4 sm:$0xff]  }
  0xc4   :  { %2119 = vmatprep.subr.bf16.mxu0 %v3278_v21  ;;  %2225 = vmatprep.subr.bf16.mxu1 %v3281_v22  ;;  %v3367_v21 = vld [vmem:[%s4432_s1 + $0x6e0] ss:$36 sps:$4 sm:$0xff]  }
  0xc5   :  { %2106 = vmatprep.mubr.bf16.mxu0 %v3696_v25  ;;  %2212 = vmatprep.mubr.bf16.mxu1 %v3696_v25  ;;  %v3288_v25 = vld [vmem:[%s4432_s1 + $0x568] ss:$36 sps:$4 sm:$0xff]   ;;  %v3368_v22 = vld [vmem:[%s4432_s1 + $0x20] ss:$36 sps:$4 sm:$0xff]  }
  0xc7   :  { %2120 = vmatpush1.bf16.msra.mxu0 %v3276_v23  ;;  %2226 = vmatpush1.bf16.msra.mxu1 %v3279_v24  ;;  %v3369_v23 = vld [vmem:[%s4432_s1 + $0x4a0] ss:$36 sps:$4 sm:$0xff]   ;;  %v3370_v24 = vld [vmem:[%s4432_s1 + $0x2a8] ss:$36 sps:$4 sm:$0xff]  }
  0xc8   :  { %2121 = vmatprep.subr.bf16.mxu0 %v3284_v26  ;;  %2227 = vmatprep.subr.bf16.mxu1 %v3287_v28  ;;  %v3371_v26 = vld [vmem:[%s4432_s1 + $0x728] ss:$36 sps:$4 sm:$0xff]  }
  0xc9   :  { %v3372_v28 = vld [vmem:[%s4432_s1 + $0x68] ss:$36 sps:$4 sm:$0xff]  }
  0xca   :  { %2107 = vmatmul.mubr.bf16.gmra.mrb[12].mxu0 %v3704_v27  ;;  %2213 = vmatmul.mubr.bf16.gmra.mrb[12].mxu1 %v3704_v27  ;;  %v3294_v27 = vld [vmem:[%s4432_s1 + $0x5b0] ss:$36 sps:$4 sm:$0xff]  }
  0xcb   :  { %2122 = vmatpush1.bf16.msra.mxu0 %v3282_v5  ;;  %2228 = vmatpush1.bf16.msra.mxu1 %v3285_v29  ;;  %v3373_v5 = vld [vmem:[%s4432_s1 + $0x4e8] ss:$36 sps:$4 sm:$0xff]   ;;  %v3374_v29 = vld [vmem:[%s4432_s1 + $0x2f0] ss:$36 sps:$4 sm:$0xff]  }
  0xcc   :  { %2123 = vmatprep.subr.bf16.mxu0 %v3290_v30  ;;  %2229 = vmatprep.subr.bf16.mxu1 %v3293_v31  ;;  %v3375_v30 = vld [vmem:[%s4432_s1 + $0x770] ss:$36 sps:$4 sm:$0xff]  }
  0xcd   :  { %2149 = vmatprep.mubr.bf16.mxu0 %v3728_v33  ;;  %2255 = vmatprep.mubr.bf16.mxu1 %v3728_v33  ;;  %v3305_v33 = vld [vmem:[%s4432_s1 + $0x604] ss:$36 sps:$4 sm:$0xff]   ;;  %v3376_v31 = vld [vmem:[%s4432_s1 + $0xb0] ss:$36 sps:$4 sm:$0xff]  }
  0xcf   :  { %2124 = vmatpush1.bf16.msra.mxu0 %v3288_v25  ;;  %2230 = vmatpush1.bf16.msra.mxu1 %v3291_v32  ;;  %v3377_v25 = vld [vmem:[%s4432_s1 + $0x530] ss:$36 sps:$4 sm:$0xff]   ;;  %v3378_v32 = vld [vmem:[%s4432_s1 + $0x338] ss:$36 sps:$4 sm:$0xff]  }
  0xd0   :  { %2125 = vmatprep.subr.bf16.mxu0 %v3296_v47  ;;  %2231 = vmatprep.subr.bf16.mxu1 %v3299_v34  ;;  %v3379_v47 = vld [vmem:[%s4432_s1 + $0x7b8] ss:$36 sps:$4 sm:$0xff]  }
  0xd1   :  { %v3380_v34 = vld [vmem:[%s4432_s1 + $0xf8] ss:$36 sps:$4 sm:$0xff]  }
  0xd3   :  { %2126 = vmatpush1.bf16.msra.mxu0 %v3294_v27  ;;  %2232 = vmatpush1.bf16.msra.mxu1 %v3297_v35  ;;  %v3381_v27 = vld [vmem:[%s4432_s1 + $0x578] ss:$36 sps:$4 sm:$0xff]   ;;  %v3382_v35 = vld [vmem:[%s4432_s1 + $0x380] ss:$36 sps:$4 sm:$0xff]  }
  0xd4   :  { %2127 = vmatprep.subr.bf16.mxu0 %v3302_v36  ;;  %2233 = vmatprep.subr.bf16.mxu1 %v3305_v33  ;;  %v3383_v36 = vld [vmem:[%s4432_s1 + $0x800] ss:$36 sps:$4 sm:$0xff]  }
  0xd5   :  { %v3398_v33 = vld [vmem:[%s4433_s0 + $0x4] ss:$16 sps:$4 sm:$0xff]  }
  0xd7   :  { %2128 = vmatpush1.bf16.msra.mxu0 %v3300_v37  ;;  %2234 = vmatpush1.bf16.msra.mxu1 %v3303_v38  ;;  %v3399_v37 = vld [vmem:[%s4433_s0 + $0xc] ss:$16 sps:$4 sm:$0xff]   ;;  %v3384_v38 = vld [vmem:[%s4432_s1 + $0x140] ss:$36 sps:$4 sm:$0xff]  }
  0xd8   :  { %2129 = vmatprep.subr.bf16.mxu0 %v3308_v39  ;;  %2235 = vmatprep.subr.bf16.mxu1 %v3311_v40  ;;  %v3385_v39 = vld [vmem:[%s4432_s1 + $0x5c0] ss:$36 sps:$4 sm:$0xff]   ;;  %v3386_v40 = vld [vmem:[%s4432_s1 + $0x3c8] ss:$36 sps:$4 sm:$0xff]  }
  0xdb   :  { %2130 = vmatpush1.bf16.msra.mxu0 %v3306_v41  ;;  %2236 = vmatpush1.bf16.msra.mxu1 %v3309_v42  ;;  %v3387_v41 = vld [vmem:[%s4432_s1 + $0x848] ss:$36 sps:$4 sm:$0xff]  }
  0xdc   :  { %2131 = vmatprep.subr.bf16.mxu0 %v3314_v43  ;;  %2237 = vmatprep.subr.bf16.mxu1 %v3317_v44  ;;  %v3388_v42 = vld [vmem:[%s4432_s1 + $0x188] ss:$36 sps:$4 sm:$0xff]   ;;  %v3390_v44 = vld [vmem:[%s4432_s1 + $0x410] ss:$36 sps:$4 sm:$0xff]  }
  0xdd   :  { %v3389_v43 = vld [vmem:[%s4432_s1 + $0x608] ss:$36 sps:$4 sm:$0xff]  }
  0xdf   :  { %2132 = vmatpush1.bf16.msra.mxu0 %v3312_v45  ;;  %2238 = vmatpush1.bf16.msra.mxu1 %v3315_v46  ;;  %v3391_v45 = vld [vmem:[%s4432_s1 + $0x890] ss:$36 sps:$4 sm:$0xff]  }
  0xe0   :  { %2133 = vmatprep.subr.bf16.mxu0 %v3320_v48  ;;  %2239 = vmatprep.subr.bf16.mxu1 %v3323_v49  ;;  %v3392_v46 = vld [vmem:[%s4432_s1 + $0x1d0] ss:$36 sps:$4 sm:$0xff]   ;;  %v3394_v49 = vld [vmem:[%s4432_s1 + $0x458] ss:$36 sps:$4 sm:$0xff]  }
  0xe1   :  { %v3393_v48 = vld [vmem:[%s4432_s1 + $0x650] ss:$36 sps:$4 sm:$0xff]  }
  0xe3   :  { %2134 = vmatpush1.bf16.msra.mxu0 %v3318_v50  ;;  %2240 = vmatpush1.bf16.msra.mxu1 %v3321_v51  ;;  %v3395_v50 = vld [vmem:[%s4432_s1 + $0x8d8] ss:$36 sps:$4 sm:$0xff]  }
  0xe4   :  { %2135 = vmatprep.subr.bf16.mxu0 %v3326_v52  ;;  %2241 = vmatprep.subr.bf16.mxu1 %v3329_v53  ;;  %v3396_v51 = vld [vmem:[%s4432_s1 + $0x218] ss:$36 sps:$4 sm:$0xff]   ;;  %v3400_v53 = vld [vmem:[%s4433_s0] ss:$16 sps:$4 sm:$0xff]  }
  0xe5   :  { %v3397_v52 = vld [vmem:[%s4432_s1 + $0x698] ss:$36 sps:$4 sm:$0xff]  }
  0xe7   :  { %2136 = vmatpush1.bf16.msra.mxu0 %v3324_v54  ;;  %2242 = vmatpush1.bf16.msra.mxu1 %v3327_v55  ;;  %v3401_v54 = vld [vmem:[%s4433_s0 + $0x24] ss:$16 sps:$4 sm:$0xff]   ;;  %v3402_v55 = vld [vmem:[%s4433_s0 + $0x20] ss:$16 sps:$4 sm:$0xff]  }
  0xe8   :  { %2137 = vmatprep.subr.bf16.mxu0 %v3332_v56  ;;  %2243 = vmatprep.subr.bf16.mxu1 %v3335_v57 }
  0xeb   :  { %2138 = vmatpush1.bf16.msra.mxu0 %v3330_v58  ;;  %2244 = vmatpush1.bf16.msra.mxu1 %v3333_v59 }
  0xec   :  { %2139 = vmatprep.subr.bf16.mxu0 %v3338_v60  ;;  %2245 = vmatprep.subr.bf16.mxu1 %v3341_v61 }
  0xef   :  { %2140 = vmatpush1.bf16.msra.mxu0 %v3336_v62  ;;  %2246 = vmatpush1.bf16.msra.mxu1 %v3339_v63 }
  0xf0   :  { %2141 = vmatprep.subr.bf16.mxu0 %v3344_v0  ;;  %2247 = vmatprep.subr.bf16.mxu1 %v3347_v1 }
  0xf3   :  { %2142 = vmatpush1.bf16.msra.mxu0 %v3342_v2  ;;  %2248 = vmatpush1.bf16.msra.mxu1 %v3345_v3 }
  0xf4   :  { %2143 = vmatprep.subr.bf16.mxu0 %v3350_v4  ;;  %2249 = vmatprep.subr.bf16.mxu1 %v3353_v6 }
  0xf7   :  { %2144 = vmatpush1.bf16.msra.mxu0 %v3348_v7  ;;  %2250 = vmatpush1.bf16.msra.mxu1 %v3351_v8 }
  0xf8   :  { %2145 = vmatprep.subr.bf16.mxu0 %v3356_v10  ;;  %2251 = vmatprep.subr.bf16.mxu1 %v3359_v11 }
  0xfb   :  { %2146 = vmatpush1.bf16.msra.mxu0 %v3354_v12  ;;  %2252 = vmatpush1.bf16.msra.mxu1 %v3357_v13 }
  0xfc   :  { %2147 = vmatprep.subr.bf16.mxu0 %v3362_v15  ;;  %2253 = vmatprep.subr.bf16.mxu1 %v3365_v16 }
  0xff   :  { %2148 = vmatpush1.bf16.msra.mxu0 %v3360_v17  ;;  %2254 = vmatpush1.bf16.msra.mxu1 %v3363_v18 }
 0x100   :  { %2882 = vmatprep.subr.bf16.mxu0 %v3366_v20  ;;  %2910 = vmatprep.subr.bf16.mxu1 %v3367_v21 }
 0x102   :  { %2150 = vmatmul.mubr.bf16.vlgmr.msra.gmra.mrb[8].mxu0 %v3846_v9  ;;  %2256 = vmatmul.mubr.bf16.vlgmr.msra.gmra.mrb[8].mxu1 %v3846_v9 }
 0x103   :  { %2883 = vmatpush3.bf16.msra.mxu0 %v3368_v22  ;;  %2911 = vmatpush3.bf16.msra.mxu1 %v3369_v23 }
 0x104   :  { %2884 = vmatprep.subr.bf16.mxu0 %v3370_v24  ;;  %2912 = vmatprep.subr.bf16.mxu1 %v3371_v26 }
 0x105   :  { %2159 = vmatprep.mubr.bf16.mxu0 %v3863_v14  ;;  %2265 = vmatprep.mubr.bf16.mxu1 %v3863_v14 }
 0x107   :  { %2885 = vmatpush3.bf16.msra.mxu0 %v3372_v28  ;;  %2913 = vmatpush3.bf16.msra.mxu1 %v3373_v5 }
 0x108   :  { %2886 = vmatprep.subr.bf16.mxu0 %v3374_v29  ;;  %2914 = vmatprep.subr.bf16.mxu1 %v3375_v30 }
 0x10a   :  { %2160 = vmatmul.mubr.bf16.gmra.mrb[12].mxu0 %v3884_v19  ;;  %2266 = vmatmul.mubr.bf16.gmra.mrb[12].mxu1 %v3884_v19 }
 0x10b   :  { %2887 = vmatpush3.bf16.msra.mxu0 %v3376_v31  ;;  %2915 = vmatpush3.bf16.msra.mxu1 %v3377_v25 }
 0x10c   :  { %2888 = vmatprep.subr.bf16.mxu0 %v3378_v32  ;;  %2916 = vmatprep.subr.bf16.mxu1 %v3379_v47 }
 0x10d   :  { %2308 = vmatprep.mubr.bf16.mxu0 %v3398_v33  ;;  %2357 = vmatprep.mubr.bf16.mxu1 %v3399_v37 }
 0x10f   :  { %2889 = vmatpush3.bf16.msra.mxu0 %v3380_v34  ;;  %2917 = vmatpush3.bf16.msra.mxu1 %v3381_v27 }
 0x110   :  { %2890 = vmatprep.subr.bf16.mxu0 %v3382_v35  ;;  %2918 = vmatprep.subr.bf16.mxu1 %v3383_v36 }
 0x113   :  { %2891 = vmatpush3.bf16.msra.mxu0 %v3384_v38  ;;  %2919 = vmatpush3.bf16.msra.mxu1 %v3385_v39 }
 0x114   :  { %2892 = vmatprep.subr.bf16.mxu0 %v3386_v40  ;;  %2920 = vmatprep.subr.bf16.mxu1 %v3387_v41 }
 0x117   :  { %2893 = vmatpush3.bf16.msra.mxu0 %v3388_v42  ;;  %2921 = vmatpush3.bf16.msra.mxu1 %v3389_v43 }
 0x118   :  { %2894 = vmatprep.subr.bf16.mxu0 %v3390_v44  ;;  %2922 = vmatprep.subr.bf16.mxu1 %v3391_v45 }
 0x11b   :  { %2895 = vmatpush3.bf16.msra.mxu0 %v3392_v46  ;;  %2923 = vmatpush3.bf16.msra.mxu1 %v3393_v48 }
 0x11c   :  { %2896 = vmatprep.subr.bf16.mxu0 %v3394_v49  ;;  %2924 = vmatprep.subr.bf16.mxu1 %v3395_v50 }
 0x11f   :  { %2897 = vmatpush3.bf16.msra.mxu0 %v3396_v51  ;;  %2925 = vmatpush3.bf16.msra.mxu1 %v3397_v52 }
 0x122   :  { %2309 = vmatmul.mubr.bf16.vlgmr.msra.gmra.mrb[16].mxu0 %v3400_v53  ;;  %2358 = vmatmul.mubr.bf16.vlgmr.msra.gmra.mrb[16].mxu1 %v3846_v9 }
 0x123   :  { %2316 = vmatprep.mubr.bf16.mxu0 %v3401_v54  ;;  %2365 = vmatprep.mubr.bf16.mxu1 %v3863_v14 }
 0x12a   :  { %2317 = vmatmul.mubr.bf16.gmra.mrb[20].mxu0 %v3402_v55  ;;  %2366 = vmatmul.mubr.bf16.gmra.mrb[20].mxu1 %v3884_v19 }
 0x155   :  { %v1939_v56 = vpop.f32.mrb[0].mxu0  ;;  %v2045_v57 = vpop.f32.mrb[0].mxu1 }
 0x156   :  { %v2374_v58 = vmax.f32 %v1939_v56, 0.0  ;;  %v2376_v59 = vmax.f32 %v2045_v57, 0.0  ;;  %v1941_v60 = vpop.f32.mrb[1].mxu0  ;;  %v2047_v9 = vpop.f32.mrb[1].mxu1 }
 0x157   :  { %v2375_v61 = vmax.f32 %v1941_v60, 0.0  ;;  %v2377_v62 = vmax.f32 %v2047_v9, 0.0  ;;  %v1943_v63 = vpop.f32.mrb[2].mxu0  ;;  %v2049_v0 = vpop.f32.mrb[2].mxu1 }
 0x158   :  { %v2383_v1 = vmax.f32 %v1943_v63, 0.0  ;;  %v2385_v2 = vmax.f32 %v2049_v0, 0.0  ;;  %v1945_v14 = vpop.f32.mrb[3].mxu0  ;;  %v2051_v3 = vpop.f32.mrb[3].mxu1 }
 0x159   :  { %v2862_v4 = vpack.c.bf16 %v2375_v61, %v2374_v58  ;;  %v2863_v6 = vpack.c.bf16 %v2377_v62, %v2376_v59  ;;  %v2384_v7 = vmax.f32 %v1945_v14, 0.0  ;;  %v2386_v8 = vmax.f32 %v2051_v3, 0.0 }
 0x15b   :  { %2522 = vst [vmem:[%s4434_s2] sm:$0xff] %v2862_v4  ;;  %2523 = vst [vmem:[%s4434_s2 + $0x8] sm:$0xff] %v2863_v6  ;;  %v2867_v19 = vpack.c.bf16 %v2384_v7, %v2383_v1  ;;  %v2868_v10 = vpack.c.bf16 %v2386_v8, %v2385_v2 }
 0x15d   :  { %2527 = vst [vmem:[%s4434_s2 + $0x24] sm:$0xff] %v2867_v19  ;;  %2528 = vst [vmem:[%s4434_s2 + $0x2c] sm:$0xff] %v2868_v10  ;;  %v1949_v11 = vpop.f32.mrb[4].mxu0  ;;  %v2055_v12 = vpop.f32.mrb[4].mxu1 }
 0x15e   :  { %v2392_v13 = vmax.f32 %v1949_v11, 0.0  ;;  %v2394_v15 = vmax.f32 %v2055_v12, 0.0  ;;  %v1951_v16 = vpop.f32.mrb[5].mxu0  ;;  %v2057_v17 = vpop.f32.mrb[5].mxu1 }
 0x15f   :  { %v2393_v18 = vmax.f32 %v1951_v16, 0.0  ;;  %v2395_v20 = vmax.f32 %v2057_v17, 0.0  ;;  %v1953_v21 = vpop.f32.mrb[6].mxu0  ;;  %v2059_v22 = vpop.f32.mrb[6].mxu1 }
 0x160   :  { %v2401_v23 = vmax.f32 %v1953_v21, 0.0  ;;  %v2403_v24 = vmax.f32 %v2059_v22, 0.0  ;;  %v1955_v26 = vpop.f32.mrb[7].mxu0  ;;  %v2061_v28 = vpop.f32.mrb[7].mxu1 }
 0x161   :  { %v2872_v5 = vpack.c.bf16 %v2393_v18, %v2392_v13  ;;  %v2873_v29 = vpack.c.bf16 %v2395_v20, %v2394_v15  ;;  %v2402_v30 = vmax.f32 %v1955_v26, 0.0  ;;  %v2404_v31 = vmax.f32 %v2061_v28, 0.0 }
 0x163   :  { %2532 = vst [vmem:[%s4434_s2 + $0x48] sm:$0xff] %v2872_v5  ;;  %2533 = vst [vmem:[%s4434_s2 + $0x50] sm:$0xff] %v2873_v29  ;;  %v2877_v25 = vpack.c.bf16 %v2402_v30, %v2401_v23  ;;  %v2878_v32 = vpack.c.bf16 %v2404_v31, %v2403_v24 }
 0x165   :  { %2537 = vst [vmem:[%s4434_s2 + $0x6c] sm:$0xff] %v2877_v25  ;;  %2538 = vst [vmem:[%s4434_s2 + $0x74] sm:$0xff] %v2878_v32 }
 0x1d5   :  { %v2151_v47 = vpop.f32.mrb[8].mxu0  ;;  %v2257_v34 = vpop.f32.mrb[8].mxu1 }
 0x1d6   :  { %v2378_v27 = vmax.f32 %v2151_v47, 0.0  ;;  %v2380_v35 = vmax.f32 %v2257_v34, 0.0  ;;  %v2153_v36 = vpop.f32.mrb[9].mxu0  ;;  %v2259_v33 = vpop.f32.mrb[9].mxu1 }
 0x1d7   :  { %v2379_v37 = vmax.f32 %v2153_v36, 0.0  ;;  %v2381_v38 = vmax.f32 %v2259_v33, 0.0  ;;  %v2155_v39 = vpop.f32.mrb[10].mxu0  ;;  %v2261_v40 = vpop.f32.mrb[10].mxu1 }
 0x1d8   :  { %v2387_v41 = vmax.f32 %v2155_v39, 0.0  ;;  %v2389_v42 = vmax.f32 %v2261_v40, 0.0  ;;  %v2157_v43 = vpop.f32.mrb[11].mxu0  ;;  %v2263_v44 = vpop.f32.mrb[11].mxu1 }
 0x1d9   :  { %v2864_v45 = vpack.c.bf16 %v2379_v37, %v2378_v27  ;;  %v2865_v46 = vpack.c.bf16 %v2381_v38, %v2380_v35  ;;  %v2388_v48 = vmax.f32 %v2157_v43, 0.0  ;;  %v2390_v49 = vmax.f32 %v2263_v44, 0.0 }
 0x1db   :  { %2524 = vst [vmem:[%s4434_s2 + $0x10] sm:$0xff] %v2864_v45  ;;  %2525 = vst [vmem:[%s4434_s2 + $0x18] sm:$0xff] %v2865_v46  ;;  %v2869_v50 = vpack.c.bf16 %v2388_v48, %v2387_v41  ;;  %v2870_v51 = vpack.c.bf16 %v2390_v49, %v2389_v42 }
 0x1dd   :  { %2529 = vst [vmem:[%s4434_s2 + $0x34] sm:$0xff] %v2869_v50  ;;  %2530 = vst [vmem:[%s4434_s2 + $0x3c] sm:$0xff] %v2870_v51  ;;  %v2161_v52 = vpop.f32.mrb[12].mxu0  ;;  %v2267_v53 = vpop.f32.mrb[12].mxu1 }
 0x1de   :  { %v2396_v54 = vmax.f32 %v2161_v52, 0.0  ;;  %v2398_v55 = vmax.f32 %v2267_v53, 0.0  ;;  %v2163_v56 = vpop.f32.mrb[13].mxu0  ;;  %v2269_v57 = vpop.f32.mrb[13].mxu1 }
 0x1df   :  { %v2397_v58 = vmax.f32 %v2163_v56, 0.0  ;;  %v2399_v59 = vmax.f32 %v2269_v57, 0.0  ;;  %v2165_v60 = vpop.f32.mrb[14].mxu0  ;;  %v2271_v9 = vpop.f32.mrb[14].mxu1 }
 0x1e0   :  { %v2405_v61 = vmax.f32 %v2165_v60, 0.0  ;;  %v2407_v62 = vmax.f32 %v2271_v9, 0.0  ;;  %v2167_v63 = vpop.f32.mrb[15].mxu0  ;;  %v2273_v0 = vpop.f32.mrb[15].mxu1 }
 0x1e1   :  { %v2874_v1 = vpack.c.bf16 %v2397_v58, %v2396_v54  ;;  %v2875_v2 = vpack.c.bf16 %v2399_v59, %v2398_v55  ;;  %v2406_v14 = vmax.f32 %v2167_v63, 0.0  ;;  %v2408_v3 = vmax.f32 %v2273_v0, 0.0 }
 0x1e3   :  { %2534 = vst [vmem:[%s4434_s2 + $0x58] sm:$0xff] %v2874_v1  ;;  %2535 = vst [vmem:[%s4434_s2 + $0x60] sm:$0xff] %v2875_v2  ;;  %v2879_v4 = vpack.c.bf16 %v2406_v14, %v2405_v61  ;;  %v2880_v6 = vpack.c.bf16 %v2408_v3, %v2407_v62 }
 0x1e5   :  { %2539 = vst [vmem:[%s4434_s2 + $0x7c] sm:$0xff] %v2879_v4  ;;  %2540 = vst [vmem:[%s4434_s2 + $0x84] sm:$0xff] %v2880_v6 }
 0x1f5   :  { %v2898_v7 = vpop.f32.mrb[16].mxu0  ;;  %v2926_v8 = vpop.f32.mrb[16].mxu1 }
 0x1f6   :  { %v2899_v19 = vpop.f32.mrb[17].mxu0  ;;  %v2927_v10 = vpop.f32.mrb[17].mxu1 }
 0x1f7   :  { %v2900_v11 = vadd.f32 %v2899_v19, %v2898_v7  ;;  %v2928_v12 = vadd.f32 %v2927_v10, %v2926_v8  ;;  %v2901_v13 = vpop.f32.mrb[18].mxu0  ;;  %v2929_v15 = vpop.f32.mrb[18].mxu1 }
 0x1f8   :  { %v2902_v16 = vpop.f32.mrb[19].mxu0  ;;  %v2930_v17 = vpop.f32.mrb[19].mxu1 }
 0x1f9   :  { %v2360_v18 = vadd.f32 %v2928_v12, %v2900_v11  ;;  %v2903_v20 = vadd.f32 %v2902_v16, %v2901_v13  ;;  %v2931_v21 = vadd.f32 %v2930_v17, %v2929_v15 }
 0x1fb   :  { %v2382_v22 = vmax.f32 %v2360_v18, 0.0  ;;  %v2363_v23 = vadd.f32 %v2931_v21, %v2903_v20 }
 0x1fd   :  { %v2866_v24 = vpack.c.bf16 %v2382_v22, %v2382_v22  ;;  %v2391_v26 = vmax.f32 %v2363_v23, 0.0  ;;  %v2904_v28 = vpop.f32.mrb[20].mxu0  ;;  %v2932_v5 = vpop.f32.mrb[20].mxu1 }
 0x1fe   :  { %v2905_v29 = vpop.f32.mrb[21].mxu0  ;;  %v2933_v30 = vpop.f32.mrb[21].mxu1 }
 0x1ff   :  { %2526 = vst [vmem:[%s4434_s2 + $0x20] sm:$0xf] %v2866_v24  ;;  %v2871_v31 = vpack.c.bf16 %v2391_v26, %v2391_v26  ;;  %v2906_v25 = vadd.f32 %v2905_v29, %v2904_v28  ;;  %v2934_v32 = vadd.f32 %v2933_v30, %v2932_v5  ;;  %v2907_v47 = vpop.f32.mrb[22].mxu0  ;;  %v2935_v34 = vpop.f32.mrb[22].mxu1 }
 0x200   :  { %v2908_v27 = vpop.f32.mrb[23].mxu0  ;;  %v2936_v35 = vpop.f32.mrb[23].mxu1 }
 0x201   :  { %2531 = vst [vmem:[%s4434_s2 + $0x44] sm:$0xf] %v2871_v31  ;;  %v2368_v36 = vadd.f32 %v2934_v32, %v2906_v25  ;;  %v2909_v33 = vadd.f32 %v2908_v27, %v2907_v47  ;;  %v2937_v37 = vadd.f32 %v2936_v35, %v2935_v34 }
 0x203   :  { %v2400_v38 = vmax.f32 %v2368_v36, 0.0  ;;  %v2371_v39 = vadd.f32 %v2937_v37, %v2909_v33 }
 0x205   :  { %v2876_v40 = vpack.c.bf16 %v2400_v38, %v2400_v38  ;;  %v2409_v41 = vmax.f32 %v2371_v39, 0.0 }
 0x207   :  { %2536 = vst [vmem:[%s4434_s2 + $0x68] sm:$0xf] %v2876_v40  ;;  %v2881_v42 = vpack.c.bf16 %v2409_v41, %v2409_v41 }
 0x209   :  { %2541 = vst [vmem:[%s4434_s2 + $0x8c] sm:$0xf] %v2881_v42 }

// kernel: alexnet_forward.12
= control target key start
LH: loop header
LB: loop body
LE: loop exit
PB: predicated region body
PF: predicated region fallthrough
CT: control target
= control target key end

     0   :  { %s473_s6 = smov 0   ;;  %s475_s7 = smov 0   ;;  %s584_s0 = inlined_call_operand.vmem [shape: bf16[9,8192], index: 0, kind: input, shape index: {}]   ;;  %s585_s1 = inlined_call_operand.vmem [shape: bf16[1,8192], index: 1, kind: output, shape index: {}]  }
   0x1   :  { %s477_s8 = smov 0  }
   0x2 LB: > { %s396_s9 = sadd.s32 4294967295, %s460_s8   ;;  %s490_s10 = sadd.s32 1, %s460_s8   ;;  %s460_s8 = sphi %s477_s8, %s596_s8   ;;  %s456_s7 = sphi %s475_s7, %s595_s7   ;;  %s452_s6 = sphi %s473_s6, %s594_s6  }
   0x3   : > { %s15_s11 = ssub.s32 %s460_s8, %s490_s10  ;;  %s18_s12 = sadd.s32 1, %s456_s7 }
   0x4   : > { %p16_p0 = scmp.eq.s32.totalorder %s15_s11, 0  ;;  %p25_p1 = scmp.ne.s32.totalorder %s456_s7, %s452_s6 }
   0x5   : > { %p26_p2 = scmp.eq.s32.totalorder %s460_s8, 0  ;;  %p399_p4 = scmp.ge.s32.totalorder %s460_s8, 8 }
   0x6   : > { %s499_s13 = scalar_select %p16_p0, %s456_s7, %s18_s12  }
   0x7   : > { %p27_p3 = por %p26_p2, %p25_p1  ;;  %77 = sbr.rel (%p399_p4) target bundleno = 22 (0x16), region = 16 }
   0xe   : > { %80 = sbr.rel (!%p27_p3) target bundleno = 22 (0x16), region = 20  ;;  %s82_s14 = sand.u32 (%p27_p3), 1, %s456_s7  }
   0xf   : > { %s412_s15 = sshll.u32 (%p27_p3), %s460_s8, 5  ;;  %s400_s16 = sshll.u32 (%p27_p3), %s82_s14, 6 }
  0x10   : > { %s87_s19 = scalar_lea.vmem (%p27_p3), %s584_s0, %s412_s15  ;;  %s84_s20 = scalar_lea.vmem (%p27_p3), [#allocation2], %s400_s16 }
  0x11   : > { %v100_v0 = vld [vmem:[%s87_s19] sm:$0xff] (%p27_p3)  ;;  %v102_v1 = vld [vmem:[%s87_s19 + $0x8] sm:$0xff] (%p27_p3)  ;;  %v104_v2 = vld [vmem:[%s87_s19 + $0x10] sm:$0xff] (%p27_p3) }
  0x12   : > { %101 = vst [vmem:[%s84_s20] sm:$0xff] (%p27_p3), %v100_v0  ;;  %103 = vst [vmem:[%s84_s20 + $0x8] sm:$0xff] (%p27_p3), %v102_v1  ;;  %v106_v3 = vld [vmem:[%s87_s19 + $0x18] sm:$0xff] (%p27_p3)  ;;  %v108_v4 = vld [vmem:[%s87_s19 + $0x100] sm:$0xff] (%p27_p3) }
  0x13   : > { %105 = vst [vmem:[%s84_s20 + $0x10] sm:$0xff] (%p27_p3), %v104_v2  ;;  %v110_v5 = vld [vmem:[%s87_s19 + $0x108] sm:$0xff] (%p27_p3)  ;;  %107 = vst [vmem:[%s84_s20 + $0x18] sm:$0xff] (%p27_p3), %v106_v3  ;;  %v112_v6 = vld [vmem:[%s87_s19 + $0x110] sm:$0xff] (%p27_p3) }
  0x14   : > { %109 = vst [vmem:[%s84_s20 + $0x20] sm:$0xff] (%p27_p3), %v108_v4  ;;  %111 = vst [vmem:[%s84_s20 + $0x28] sm:$0xff] (%p27_p3), %v110_v5  ;;  %v114_v7 = vld [vmem:[%s87_s19 + $0x118] sm:$0xff] (%p27_p3) }
  0x15   : > { %113 = vst [vmem:[%s84_s20 + $0x30] sm:$0xff] %v112_v6  ;;  %115 = vst [vmem:[%s84_s20 + $0x38] sm:$0xff] %v114_v7 }
  0x16 PF: > { %p403_p5 = scmp.ge.s32.totalorder %s460_s8, 1  ;;  %p120_p6 = scmp.lt.s32.totalorder %s460_s8, 9 }
  0x18   : > { %p121_p7 = pnand %p403_p5, %p120_p6 }
  0x19   : > { %s127_s21 = sand.u32 (!%p121_p7), 1, %s452_s6   ;;  %v263_v8 = vlaneseq (!%p121_p7)  ;;  %v462_v9 = vmov (!%p121_p7), 1966171168   ;;  %vm175_vm0 = vcmask (!%p121_p7), 1040384   ;;  %vm307_vm1 = vsmask.f32 (!%p121_p7), 256 }
  0x1a   : > { %124 = sbr.rel (%p121_p7) target bundleno = 63 (0x3f), region = 43  ;;  %s404_s22 = sshll.u32 (!%p121_p7), %s127_s21, 6  ;;  %v510_v10 = vunpack.c.l.s4 (!%p121_p7), %v462_v9  ;;  %vm309_vm2 = vcmask (!%p121_p7), 1041409   ;;  %vm310_vm3 = vsmask.f32 (!%p121_p7), 1280  ;;  %vm313_vm4 = vcmask (!%p121_p7), 1042434   ;;  %vm525_vm8 = vmand (!%p121_p7), %vm175_vm0, %vm307_vm1 }
  0x1b   : > { %s129_s23 = scalar_lea.vmem (!%p121_p7), [#allocation2], %s404_s22  ;;  %v513_v15 = vshrl.u32 (!%p121_p7), %v263_v8, 7  ;;  %vm314_vm5 = vsmask.f32 (!%p121_p7), 2304  ;;  %vm317_vm6 = vcmask (!%p121_p7), 1043459   ;;  %vm531_vm9 = vmand (!%p121_p7), %vm309_vm2, %vm310_vm3  ;;  %s543_s24 = sshll.u32 (!%p121_p7), %s396_s9, 3 }
  0x1c   : > { %v151_v11 = vld [vmem:[%s129_s23] sm:$0xff] (!%p121_p7)  ;;  %v152_v12 = vld [vmem:[%s129_s23 + $0x8] sm:$0xff] (!%p121_p7)  ;;  %v153_v13 = vld [vmem:[%s129_s23 + $0x10] sm:$0xff] (!%p121_p7)  ;;  %v262_v14 = vunpack.c.0.s8 (!%p121_p7), %v510_v10  ;;  %vm318_vm7 = vsmask.f32 (!%p121_p7), 3328  ;;  %p147_p8 = scmp.lt.s32.totalorder (!%p121_p7), %s543_s24, 63 }
  0x1d   : > { %v154_v16 = vld [vmem:[%s129_s23 + $0x18] sm:$0xff] (!%p121_p7)  ;;  %v155_v17 = vld [vmem:[%s129_s23 + $0x20] sm:$0x11] (!%p121_p7)  ;;  %v156_v18 = vld [vmem:[%s129_s23 + $0x28] sm:$0x11] (!%p121_p7)  ;;  %v159_v19 = vunpack.c.l.bf16 (!%p121_p7), %v151_v11  ;;  %v160_v20 = vunpack.c.h.bf16 (!%p121_p7), %v151_v11  ;;  %v161_v21 = vunpack.c.l.bf16 (!%p121_p7), %v152_v12  ;;  %v162_v22 = vunpack.c.h.bf16 (!%p121_p7), %v152_v12 }
  0x1e   : > { %v157_v23 = vld [vmem:[%s129_s23 + $0x30] sm:$0x11] (!%p121_p7)  ;;  %v158_v24 = vld [vmem:[%s129_s23 + $0x38] sm:$0x11] (!%p121_p7)  ;;  %v163_v25 = vunpack.c.l.bf16 (!%p121_p7), %v153_v13  ;;  %v164_v26 = vunpack.c.h.bf16 (!%p121_p7), %v153_v13  ;;  %v165_v27 = vunpack.c.l.bf16 (!%p121_p7), %v154_v16  ;;  %v166_v28 = vunpack.c.h.bf16 (!%p121_p7), %v154_v16  ;;  %vm312_vm10 = vmor (!%p121_p7), %vm531_vm9, %vm525_vm8 }
  0x1f   : > { %v167_v29 = vunpack.c.l.bf16 (!%p121_p7), %v155_v17  ;;  %v168_v30 = vunpack.c.h.bf16 (!%p121_p7), %v155_v17  ;;  %v169_v31 = vunpack.c.l.bf16 (!%p121_p7), %v156_v18  ;;  %v170_v32 = vunpack.c.h.bf16 (!%p121_p7), %v156_v18  ;;  %vm315_vm11 = vmand (!%p121_p7), %vm313_vm4, %vm314_vm5 }
  0x20   : > { %v171_v33 = vunpack.c.l.bf16 (!%p121_p7), %v157_v23  ;;  %v172_v34 = vunpack.c.h.bf16 (!%p121_p7), %v157_v23  ;;  %v173_v35 = vunpack.c.l.bf16 (!%p121_p7), %v158_v24  ;;  %v174_v36 = vunpack.c.h.bf16 (!%p121_p7), %v158_v24  ;;  %vm550_vm12 = vmor (!%p121_p7), %vm315_vm11, %vm312_vm10 }
  0x21   : > { %v176_v37 = vsel %vm175_vm0, %v167_v29, -inf  ;;  %v184_v38 = vsel %vm175_vm0, %v168_v30, -inf  ;;  %v192_v39 = vsel %vm175_vm0, %v169_v31, -inf  ;;  %v200_v40 = vsel %vm175_vm0, %v170_v32, -inf  ;;  %vm556_vm13 = vmand %vm317_vm6, %vm318_vm7  ;;  %s598_s24 = smov (!%p147_p8, %s543_s24), 63 }
  0x22   : > { %v177_v41 = vmax.f32 %v159_v19, %v176_v37  ;;  %v185_v42 = vmax.f32 %v160_v20, %v184_v38  ;;  %v193_v43 = vmax.f32 %v161_v21, %v192_v39  ;;  %v201_v44 = vmax.f32 %v162_v22, %v200_v40  ;;  %vm320_vm15 = vmor %vm556_vm13, %vm550_vm12  ;;  %s149_s27 = scalar_lea.vmem %s585_s1, %s598_s24 }
  0x23   : > { %v208_v45 = vsel %vm175_vm0, %v171_v33, -inf  ;;  %v216_v46 = vsel %vm175_vm0, %v172_v34, -inf  ;;  %v224_v47 = vsel %vm175_vm0, %v173_v35, -inf  ;;  %v232_v48 = vsel %vm175_vm0, %v174_v36, -inf }
  0x24   : > { %v178_v49 = vrot.slane %v177_v41, 4  ;;  %v186_v50 = vrot.slane %v185_v42, 4  ;;  %v194_v51 = vrot.slane %v193_v43, 4  ;;  %v202_v52 = vrot.slane %v201_v44, 4 }
  0x25   : > { %v209_v53 = vmax.f32 %v163_v25, %v208_v45  ;;  %v217_v54 = vmax.f32 %v164_v26, %v216_v46  ;;  %v225_v55 = vmax.f32 %v165_v27, %v224_v47  ;;  %v233_v56 = vmax.f32 %v166_v28, %v232_v48 }
  0x26   : > { %v179_v58 = vmax.f32 %v177_v41, %v178_v49  ;;  %v187_v59 = vmax.f32 %v185_v42, %v186_v50  ;;  %v195_v60 = vmax.f32 %v193_v43, %v194_v51  ;;  %v203_v61 = vmax.f32 %v201_v44, %v202_v52 }
  0x27   : > { %v210_v63 = vrot.slane %v209_v53, 4  ;;  %v218_v0 = vrot.slane %v217_v54, 4  ;;  %v226_v1 = vrot.slane %v225_v55, 4  ;;  %v234_v2 = vrot.slane %v233_v56, 4 }
  0x28   : > { %v180_v3 = vrot.slane %v179_v58, 2  ;;  %v188_v4 = vrot.slane %v187_v59, 2  ;;  %v196_v5 = vrot.slane %v195_v60, 2  ;;  %v204_v6 = vrot.slane %v203_v61, 2 }
  0x29   : > { %v211_v7 = vmax.f32 %v209_v53, %v210_v63  ;;  %v219_v8 = vmax.f32 %v217_v54, %v218_v0  ;;  %v227_v9 = vmax.f32 %v225_v55, %v226_v1  ;;  %v235_v11 = vmax.f32 %v233_v56, %v234_v2  ;;  %v337_v54 = vld [vmem:[%s149_s27] sm:$0xff] }
  0x2a   : > { %v181_v12 = vmax.f32 %v179_v58, %v180_v3  ;;  %v189_v13 = vmax.f32 %v187_v59, %v188_v4  ;;  %v197_v16 = vmax.f32 %v195_v60, %v196_v5  ;;  %v205_v17 = vmax.f32 %v203_v61, %v204_v6 }
  0x2b   : > { %v212_v18 = vrot.slane %v211_v7, 2  ;;  %v220_v19 = vrot.slane %v219_v8, 2  ;;  %v228_v20 = vrot.slane %v227_v9, 2  ;;  %v236_v21 = vrot.slane %v235_v11, 2 }
  0x2c   : > { %v182_v22 = vrot.slane %v181_v12, 1  ;;  %v190_v23 = vrot.slane %v189_v13, 1  ;;  %v198_v24 = vrot.slane %v197_v16, 1  ;;  %v206_v25 = vrot.slane %v205_v17, 1 }
  0x2d   : > { %v213_v26 = vmax.f32 %v211_v7, %v212_v18  ;;  %v221_v27 = vmax.f32 %v219_v8, %v220_v19  ;;  %v229_v28 = vmax.f32 %v227_v9, %v228_v20  ;;  %v237_v29 = vmax.f32 %v235_v11, %v236_v21 }
  0x2e   : > { %v183_v31 = vmax.f32 %v181_v12, %v182_v22  ;;  %v191_v32 = vmax.f32 %v189_v13, %v190_v23  ;;  %v199_v33 = vmax.f32 %v197_v16, %v198_v24  ;;  %v207_v34 = vmax.f32 %v205_v17, %v206_v25 }
  0x2f   : > { %v214_v36 = vrot.slane %v213_v26, 1  ;;  %v222_v37 = vrot.slane %v221_v27, 1  ;;  %v230_v38 = vrot.slane %v229_v28, 1  ;;  %v238_v39 = vrot.slane %v237_v29, 1 }
  0x30   : > { %v406_v40 = vpack.c.bf16 %v191_v32, %v183_v31  ;;  %v407_v41 = vpack.c.bf16 %v207_v34, %v199_v33  ;;  %v265_v42 = vsub.s32 %v262_v14, %v513_v15  ;;  %vm321_vm14 = vcmask 1044484  }
  0x31   : > { %v215_v43 = vmax.f32 %v213_v26, %v214_v36  ;;  %v223_v44 = vmax.f32 %v221_v27, %v222_v37  ;;  %v231_v45 = vmax.f32 %v229_v28, %v230_v38  ;;  %v239_v46 = vmax.f32 %v237_v29, %v238_v39 }
  0x32   : > { %v266_v47 = vrot.slane %v406_v40, %v265_v42  ;;  %v273_v48 = vrot.slane %v407_v41, %v265_v42  ;;  %vm322_vm0 = vsmask.f32 4352  ;;  %vm325_vm1 = vcmask 1045509  }
  0x33   : > { %v408_v49 = vpack.c.bf16 %v223_v44, %v215_v43  ;;  %v409_v50 = vpack.c.bf16 %v239_v46, %v231_v45  ;;  %vm323_vm2 = vmand %vm321_vm14, %vm322_vm0  ;;  %vm326_vm3 = vsmask.f32 5376  ;;  %vm329_vm5 = vcmask 1046534  }
  0x34   : > { %v288_v10 = vcombine.low %v266_v47, %v273_v48  ;;  %vm324_vm4 = vmor %vm323_vm2, %vm320_vm15  ;;  %vm330_vm6 = vsmask.f32 6400  ;;  %vm333_vm9 = vcmask 1047559   ;;  %vm334_vm10 = vsmask.f32 7424 }
  0x35   : > { %v280_v14 = vrot.slane %v408_v49, %v265_v42  ;;  %v287_v15 = vrot.slane %v409_v50, %v265_v42  ;;  %vm327_vm7 = vmand %vm325_vm1, %vm326_vm3 }
  0x36   : > { %vm328_vm8 = vmor %vm327_vm7, %vm324_vm4  ;;  %v296_v52 = vrot.slane %v288_v10, %v265_v42 }
  0x37   : > { %v289_v51 = vcombine.low %v280_v14, %v287_v15  ;;  %vm331_vm11 = vmand %vm329_vm5, %vm330_vm6 }
  0x38   : > { %vm332_vm12 = vmor %vm331_vm11, %vm328_vm8 }
  0x39   : > { %v303_v53 = vrot.slane %v289_v51, %v265_v42  ;;  %vm335_vm13 = vmand %vm333_vm9, %vm334_vm10 }
  0x3a   : > { %vm336_vm14 = vmor %vm335_vm13, %vm332_vm12 }
  0x3b   : > { %v304_v55 = vcombine.low %v296_v52, %v303_v53 }
  0x3d   : > { %v338_v56 = vsel %vm336_vm14, %v304_v55, %v337_v54 }
  0x3e   : > { %339 = vst [vmem:[%s149_s27] sm:$0xff] %v338_v56 }
  0x3f PF: > { %p8_p9 = scmp.ge.s32.totalorder %s490_s10, 10   ;;  %s594_s6 = smov %s456_s7 }
  0x40   : > { %s595_s7 = smov %s499_s13  ;;  %s596_s8 = smov %s490_s10 }
  0x41   :  { %10 = sbr.rel (!%p8_p9) target bundleno = 2 (0x2), region = 82 }

// kernel: squeeze.4
= control target key start
LH: loop header
LB: loop body
LE: loop exit
PB: predicated region body
PF: predicated region fallthrough
CT: control target
= control target key end

     0   :  { %vm141_vm0 = vcmask 1045508   ;;  %s153_s14 = smov 3  ;;  %s180_s15 = smov 48  ;;  %vm157_vm1 = vcmask 1044482   ;;  %vm198_vm2 = vcmask 1045506   ;;  %vm378_vm3 = vcmask 1044483   ;;  %s4596_s0 = inlined_call_operand.vmem [shape: bf16[7744], index: 0, kind: input, shape index: {}]   ;;  %s4597_s1 = inlined_call_operand.vmem [shape: bf16[32,2,11,11], index: 1, kind: output, shape index: {}]  }
   0x1   :  { %v3548_v0 = vld [vmem:[%s4596_s0 + $0x18] sm:$0xff]   ;;  %v3549_v1 = vld [vmem:[%s4596_s0 + $0x10] sm:$0xff]   ;;  %v3550_v2 = vld [vmem:[%s4596_s0 + $0x8] sm:$0xff]   ;;  %s3741_s16 = smov 125   ;;  %s194_s17 = smov 3  ;;  %vm407_vm4 = vcmask 1045509  }
   0x2   :  { %v3214_v3 = vunpack.c.l.bf16 %v3548_v0  ;;  %v3219_v4 = vunpack.c.h.bf16 %v3549_v1  ;;  %v3222_v5 = vunpack.c.l.bf16 %v3550_v2  ;;  %v3223_v6 = vunpack.c.h.bf16 %v3550_v2  ;;  %v3225_v7 = vld [vmem:[%s4596_s0] sm:$0xff]   ;;  %s139_s0 = smov 48  ;;  %s3742_s18 = smov 127  }
   0x3   :  { %v3227_v8 = vunpack.c.h.bf16 %v3225_v7  ;;  %v3215_v9 = vunpack.c.h.bf16 %v3548_v0  ;;  %v3218_v10 = vunpack.c.l.bf16 %v3549_v1  ;;  %v3226_v11 = vunpack.c.l.bf16 %v3225_v7  ;;  %s233_s19 = smov 3  ;;  %s3743_s20 = smov 122  }
   0x4   :  { %36 = vst [vmem:[#allocation1 + $0x30] sm:$0xff] %v3214_v3  ;;  %52 = vst [vmem:[#allocation1 + $0x28] sm:$0xff] %v3219_v4  ;;  %s219_s21 = smov 3  ;;  %s3744_s22 = smov 126   ;;  %vm974_vm5 = vcmask 1045507   ;;  %vm130_vm6 = vcmask 89088  }
   0x5   :  { %84 = vst [vmem:[#allocation1 + $0x18] sm:$0xff] %v3223_v6  ;;  %100 = vst [vmem:[#allocation1 + $0x10] sm:$0xff] %v3222_v5  ;;  %s265_s23 = smov 3  ;;  %s3745_s24 = smov 124   ;;  %vm998_vm7 = vcmask 1044484   ;;  %vm1774_vm8 = vcmask 965632  }
   0x6   :  { %115 = vst [vmem:[#allocation1 + $0x8] sm:$0xff] %v3227_v8  ;;  %20 = vst [vmem:[#allocation1 + $0x38] sm:$0xff] %v3215_v9  ;;  %s251_s25 = smov 48  ;;  %s3746_s26 = smov 123   ;;  %vm1824_vm9 = vcmask 982016   ;;  %vm1806_vm10 = vcmask 973824  }
   0x7   :  { %68 = vst [vmem:[#allocation1 + $0x20] sm:$0xff] %v3218_v10  ;;  %128 = vst [vmem:[#allocation1] sm:$0xff] %v3226_v11  ;;  %s296_s27 = smov 48  ;;  %s3747_s28 = smov 120   ;;  %vm1882_vm11 = vcmask 998400   ;;  %vm1850_vm12 = vcmask 990208  }
   0x8   :  { %s278_s29 = smov 3  ;;  %s3748_s30 = smov 121   ;;  %vm1944_vm13 = vcmask 1014784   ;;  %vm1912_vm14 = vcmask 1006592   ;;  %vm2004_vm15 = vcmask 1031168  }
   0x9   :  { %s3749_s2 = smov 118   ;;  %s310_s3 = smov 3 }
   0xa   :  { %s3750_s4 = smov 119   ;;  %s349_s5 = smov 3 }
   0xb   :  { %s3751_s6 = smov 116   ;;  %s335_s7 = smov 48 }
   0xc   :  { %v268_v32 = vld [vmem:[#allocation1 + $0x4a] ss:$-11 sm:$0x1c]   ;;  %s3752_s8 = smov 117   ;;  %s376_s9 = smov 24 }
   0xd   :  { %v169_v12 = vld [vmem:[#allocation1 + $0x35] ss:$-11 sm:$0x1f]   ;;  %v266_v31 = vld [vmem:[#allocation1 + $0x13] ss:$-11 sm:%s265_s23]   ;;  %s3753_s10 = smov 114  }
   0xe   :  { %v137_v13 = vld [vmem:[#allocation1 + $0x24] ss:$-11 sm:$0xf]   ;;  %170 = vrot.lane.b32.xlu1 %v169_v12, %s3741_s16  ;;  %v210_v15 = vld [vmem:[#allocation1 + $0x33] ss:$-11 sm:$0x1f]   ;;  %v270_v36 = vsel %vm157_vm1, %v268_v32, %v266_v31 }
   0xf   :  { %v140_v14 = vld [vmem:[#allocation1 + $0x66] ss:$-11 sm:%s139_s0]   ;;  %v156_v18 = vld [vmem:[#allocation1 + $0x48] ss:$-11 sm:$0x1c]   ;;  %s3754_s11 = smov 115  }
  0x10   :  { %v142_v16 = vsel %vm141_vm0, %v140_v14, %v137_v13  ;;  %v154_v17 = vld [vmem:[#allocation1 + $0x11] ss:$-11 sm:%s153_s14]   ;;  %v178_v19 = vld [vmem:[#allocation1 + $0x22] ss:$-11 sm:$0xf]   ;;  %s3755_s12 = smov 112  }
  0x11   :  { %143 = vrot.lane.b32.xlu0 %v142_v16, %s3742_s18  ;;  %v181_v20 = vld [vmem:[#allocation1 + $0x64] ss:$-11 sm:%s180_s15]   ;;  %v158_v21 = vsel %vm157_vm1, %v156_v18, %v154_v17  ;;  %v197_v23 = vld [vmem:[#allocation1 + $0x46] ss:$-11 sm:$0x3c]   ;;  %s388_s13 = smov 3 }
  0x12   :  { %211 = vrot.lane.b32.xlu1 %v210_v15, %s3743_s20  ;;  %v195_v22 = vld [vmem:[#allocation1 + $0x4] ss:$55 sm:%s194_s17]   ;;  %v183_v24 = vsel %vm141_vm0, %v181_v20, %v178_v19  ;;  %v234_v25 = vld [vmem:[#allocation1 + $0x2] ss:$55 sm:%s233_s19]   ;;  %s3756_s0 = smov 113   ;;  %s432_s14 = smov 3 }
  0x13   :  { %v236_v26 = vld [vmem:[#allocation1 + $0x44] ss:$-11 sm:$0x3c]   ;;  %v199_v27 = vsel %vm198_vm2, %v197_v23, %v195_v22  ;;  %v220_v28 = vld [vmem:[#allocation1 + $0x15] ss:$-11 sm:%s219_s21]   ;;  %s3757_s15 = smov 110  }
  0x14   :  { %v222_v29 = vld [vmem:[#allocation1 + $0x4c] ss:$-11 sm:$0x1c]   ;;  %v238_v30 = vsel %vm198_vm2, %v236_v26, %v234_v25  ;;  %v249_v34 = vld [vmem:[#allocation1 + $0x26] ss:$-11 sm:$0xf]  }
  0x15   :  { %159 = vrot.lane.b32.xlu0 %v158_v21, %s3744_s22  ;;  %v224_v33 = vsel %vm157_vm1, %v222_v29, %v220_v28  ;;  %v252_v35 = vld [vmem:[#allocation1 + $0x68] ss:$-11 sm:%s251_s25]   ;;  %v294_v37 = vld [vmem:[#allocation1 + $0x24] ss:$-11 sm:$0xf]   ;;  %s419_s16 = smov 3 }
  0x16   :  { %184 = vrot.lane.b32.xlu1 %v183_v24, %s3745_s24  ;;  %v297_v38 = vld [vmem:[#allocation1 + $0x66] ss:$-11 sm:%s296_s27]   ;;  %v254_v39 = vsel %vm141_vm0, %v252_v35, %v249_v34  ;;  %v281_v41 = vld [vmem:[#allocation1 + $0x42] ss:$-11 sm:$0x3c]   ;;  %s3758_s17 = smov 111  }
  0x17   :  { %v279_v40 = vld [vmem:[#allocation1] ss:$55 sm:%s278_s29]   ;;  %v299_v42 = vsel %vm141_vm0, %v297_v38, %v294_v37  ;;  %v389_v60 = vld [vmem:[#allocation1 + $0x2] ss:$55 sm:%s388_s13]   ;;  %s464_s18 = smov 3  ;;  %s3759_s19 = smov 108  }
  0x18   :  { %v283_v43 = vsel %vm198_vm2, %v281_v41, %v279_v40  ;;  %v311_v44 = vld [vmem:[#allocation1 + $0x11] ss:$-11 sm:%s310_s3]   ;;  %v313_v45 = vld [vmem:[#allocation1 + $0x48] ss:$-11 sm:$0x1c]   ;;  %s450_s20 = smov 48 }
  0x19   :  { %200 = vrot.lane.b32.xlu0 %v199_v27, %s3746_s26  ;;  %v324_v46 = vld [vmem:[#allocation1 + $0x35] ss:$-11 sm:$0x1f]   ;;  %v350_v47 = vld [vmem:[#allocation1 + $0xf] ss:$-11 sm:%s349_s5]   ;;  %v315_v49 = vsel %vm157_vm1, %v313_v45, %v311_v44  ;;  %s3760_s21 = smov 109  }
  0x1a   :  { %239 = vrot.lane.b32.xlu1 %v238_v30, %s3747_s28  ;;  %v352_v48 = vld [vmem:[#allocation1 + $0x51] ss:$-11 sm:$0x3c]   ;;  %v333_v50 = vld [vmem:[#allocation1 + $0x22] ss:$-11 sm:$0xf]  }
  0x1b   :  { %v336_v51 = vld [vmem:[#allocation1 + $0x64] ss:$-11 sm:%s335_s7]   ;;  %v354_v52 = vsel %vm198_vm2, %v352_v48, %v350_v47  ;;  %v374_v53 = vld [vmem:[#allocation1 + $0x20] ss:$-11 sm:$0x7]   ;;  %s489_s22 = smov 48 }
  0x1c   :  { %v377_v54 = vld [vmem:[#allocation1 + $0x57] ss:$-11 sm:%s376_s9]   ;;  %v338_v55 = vsel %vm141_vm0, %v336_v51, %v333_v50  ;;  %v404_v57 = vld [vmem:[#allocation1 + $0x31] ss:$-11 sm:$0x1f]   ;;  %s3761_s23 = smov 106  }
  0x1d   :  { %225 = vrot.lane.b32.xlu0 %v224_v33, %s3748_s30  ;;  %v379_v56 = vsel %vm378_vm3, %v377_v54, %v374_v53  ;;  %v406_v58 = vld [vmem:[#allocation1 + $0x37] sm:$0x20]   ;;  %v365_v59 = vld [vmem:[#allocation1 + $0x33] ss:$-11 sm:$0x1f]   ;;  %s3762_s24 = smov 107  }
  0x1e   :  { %271 = vrot.lane.b32.xlu1 %v270_v36, %s3749_s2  ;;  %v391_v61 = vld [vmem:[#allocation1 + $0x44] ss:$-11 sm:$0x3c]   ;;  %v408_v62 = vsel %vm407_vm4, %v406_v58, %v404_v57  ;;  %v435_v0 = vld [vmem:[#allocation1 + $0x42] ss:$-11 sm:$0x3c]  }
  0x1f   :  { %v433_v63 = vld [vmem:[#allocation1] ss:$55 sm:%s432_s14]   ;;  %v393_v1 = vsel %vm198_vm2, %v391_v61, %v389_v60  ;;  %v422_v3 = vld [vmem:[#allocation1 + $0x4a] ss:$-11 sm:$0x1c]   ;;  %s3763_s25 = smov 104  }
  0x20   :  { %v420_v2 = vld [vmem:[#allocation1 + $0x13] ss:$-11 sm:%s419_s16]   ;;  %v437_v4 = vsel %vm198_vm2, %v435_v0, %v433_v63  ;;  %v448_v8 = vld [vmem:[#allocation1 + $0x24] ss:$-11 sm:$0xf]   ;;  %s503_s26 = smov 3 }
  0x21   :  { %255 = vrot.lane.b32.xlu0 %v254_v39, %s3750_s4  ;;  %v465_v5 = vld [vmem:[#allocation1 + $0x11] ss:$-11 sm:%s464_s18]   ;;  %v467_v6 = vld [vmem:[#allocation1 + $0x48] ss:$-11 sm:$0x1c]   ;;  %v424_v7 = vsel %vm157_vm1, %v422_v3, %v420_v2  ;;  %s3764_s27 = smov 105  }
  0x22   :  { %300 = vrot.lane.b32.xlu1 %v299_v42, %s3751_s6  ;;  %v451_v9 = vld [vmem:[#allocation1 + $0x66] ss:$-11 sm:%s450_s20]   ;;  %v469_v10 = vsel %vm157_vm1, %v467_v6, %v465_v5  ;;  %v487_v11 = vld [vmem:[#allocation1 + $0x22] ss:$-11 sm:$0xf]   ;;  %s542_s28 = smov 3 }
  0x23   :  { %v490_v12 = vld [vmem:[#allocation1 + $0x64] ss:$-11 sm:%s489_s22]   ;;  %v453_v13 = vsel %vm141_vm0, %v451_v9, %v448_v8  ;;  %v478_v15 = vld [vmem:[#allocation1 + $0x35] ss:$-11 sm:$0x1f]   ;;  %s3765_s29 = smov 102  }
  0x24   :  { %v492_v14 = vsel %vm141_vm0, %v490_v12, %v487_v11  ;;  %v504_v16 = vld [vmem:[#allocation1 + $0xf] ss:$-11 sm:%s503_s26]   ;;  %v506_v17 = vld [vmem:[#allocation1 + $0x51] ss:$-11 sm:$0x3c]   ;;  %s530_s30 = smov 24 }
  0x25   :  { %284 = vrot.lane.b32.xlu0 %v283_v43, %s3752_s8  ;;  %v519_v18 = vld [vmem:[#allocation1 + $0x33] ss:$-11 sm:$0x1f]   ;;  %s3766_s2 = smov 103   ;;  %v543_v19 = vld [vmem:[#allocation1 + $0xd] ss:$-11 sm:%s542_s28]   ;;  %v508_v21 = vsel %vm198_vm2, %v506_v17, %v504_v16 }
  0x26   :  { %325 = vrot.lane.b32.xlu1 %v324_v46, %s3753_s10  ;;  %v545_v20 = vld [vmem:[#allocation1 + $0x4f] ss:$-11 sm:$0x3c]   ;;  %s575_s3 = smov 24  ;;  %s3767_s4 = smov 100  }
  0x27   :  { %v528_v22 = vld [vmem:[#allocation1 + $0x20] ss:$-11 sm:$0x7]   ;;  %v547_v24 = vsel %vm198_vm2, %v545_v20, %v543_v19  ;;  %s3768_s5 = smov 101   ;;  %s3769_s6 = smov 98  }
  0x28   :  { %v531_v23 = vld [vmem:[#allocation1 + $0x57] ss:$-11 sm:%s530_s30]   ;;  %v573_v25 = vld [vmem:[#allocation1 + $0x1e] ss:$-11 sm:$0x7]   ;;  %s586_s7 = smov 3 }
  0x29   :  { %316 = vrot.lane.b32.xlu0 %v315_v49, %s3754_s11  ;;  %v576_v26 = vld [vmem:[#allocation1 + $0x55] ss:$-11 sm:%s575_s3]   ;;  %v533_v27 = vsel %vm378_vm3, %v531_v23, %v528_v22  ;;  %v558_v28 = vld [vmem:[#allocation1 + $0x31] ss:$-11 sm:$0x1f]   ;;  %s3770_s8 = smov 99  }
  0x2a   :  { %355 = vrot.lane.b32.xlu1 %v354_v52, %s3755_s12  ;;  %v560_v29 = vld [vmem:[#allocation1 + $0x37] sm:$0x20]   ;;  %v578_v30 = vsel %vm378_vm3, %v576_v26, %v573_v25  ;;  %v602_v31 = vld [vmem:[#allocation1 + $0x2f] ss:$-11 sm:$0x1f]   ;;  %s3771_s9 = smov 96  }
  0x2b   :  { %v604_v32 = vld [vmem:[#allocation1 + $0x35] sm:$0x20]   ;;  %v562_v33 = vsel %vm407_vm4, %v560_v29, %v558_v28  ;;  %v587_v34 = vld [vmem:[#allocation1] ss:$55 sm:%s586_s7]   ;;  %s617_s10 = smov 3  ;;  %s3772_s11 = smov 97  }
  0x2c   :  { %v589_v35 = vld [vmem:[#allocation1 + $0x42] ss:$-11 sm:$0x3c]   ;;  %v606_v36 = vsel %vm407_vm4, %v604_v32, %v602_v31  ;;  %s656_s12 = smov 3  ;;  %s3773_s13 = smov 94  }
  0x2d   :  { %339 = vrot.lane.b32.xlu0 %v338_v55, %s3756_s0  ;;  %v591_v37 = vsel %vm198_vm2, %v589_v35, %v587_v34  ;;  %v618_v38 = vld [vmem:[#allocation1 + $0x11] ss:$-11 sm:%s617_s10]   ;;  %v620_v39 = vld [vmem:[#allocation1 + $0x48] ss:$-11 sm:$0x1c]   ;;  %s642_s0 = smov 48 }
  0x2e   :  { %380 = vrot.lane.b32.xlu1 %v379_v56, %s3757_s15  ;;  %v631_v40 = vld [vmem:[#allocation1 + $0x35] ss:$-11 sm:$0x1f]   ;;  %s3774_s14 = smov 95   ;;  %v657_v41 = vld [vmem:[#allocation1 + $0xf] ss:$-11 sm:%s656_s12]   ;;  %v622_v43 = vsel %vm157_vm1, %v620_v39, %v618_v38 }
  0x2f   :  { %v659_v42 = vld [vmem:[#allocation1 + $0x51] ss:$-11 sm:$0x3c]   ;;  %s683_s15 = smov 24  ;;  %s3775_s16 = smov 92  }
  0x30   :  { %v640_v44 = vld [vmem:[#allocation1 + $0x22] ss:$-11 sm:$0xf]   ;;  %v661_v46 = vsel %vm198_vm2, %v659_v42, %v657_v41  ;;  %v681_v47 = vld [vmem:[#allocation1 + $0x20] ss:$-11 sm:$0x7]  }
  0x31   :  { %366 = vrot.lane.b32.xlu0 %v365_v59, %s3758_s17  ;;  %v643_v45 = vld [vmem:[#allocation1 + $0x64] ss:$-11 sm:%s642_s0]   ;;  %s3776_s17 = smov 93   ;;  %s3777_s18 = smov 90   ;;  %v713_v52 = vld [vmem:[#allocation1 + $0x37] sm:$0x20]  }
  0x32   :  { %409 = vrot.lane.b32.xlu1 %v408_v62, %s3759_s19  ;;  %v684_v48 = vld [vmem:[#allocation1 + $0x57] ss:$-11 sm:%s683_s15]   ;;  %v645_v49 = vsel %vm141_vm0, %v643_v45, %v640_v44  ;;  %s695_s19 = smov 3  ;;  %s3778_s20 = smov 91   ;;  %v758_v3 = vld [vmem:[#allocation1 + $0x35] sm:$0x20]  }
  0x33   :  { %v686_v50 = vsel %vm378_vm3, %v684_v48, %v681_v47  ;;  %v711_v51 = vld [vmem:[#allocation1 + $0x31] ss:$-11 sm:$0x1f]   ;;  %v672_v53 = vld [vmem:[#allocation1 + $0x33] ss:$-11 sm:$0x1f]  }
  0x34   :  { %s3779_s22 = smov 88   ;;  %v696_v54 = vld [vmem:[#allocation1 + $0xd] ss:$-11 sm:%s695_s19]   ;;  %v698_v55 = vld [vmem:[#allocation1 + $0x4f] ss:$-11 sm:$0x3c]   ;;  %v715_v56 = vsel %vm407_vm4, %v713_v52, %v711_v51 }
  0x35   :  { %394 = vrot.lane.b32.xlu0 %v393_v1, %s3760_s21  ;;  %s740_s21 = smov 3  ;;  %v743_v58 = vld [vmem:[#allocation1 + $0x4d] ss:$-11 sm:$0x3c]   ;;  %v700_v59 = vsel %vm198_vm2, %v698_v55, %v696_v54  ;;  %s3781_s26 = smov 86  }
  0x36   :  { %438 = vrot.lane.b32.xlu1 %v437_v4, %s3761_s23  ;;  %s728_s23 = smov 24  ;;  %v741_v57 = vld [vmem:[#allocation1 + $0xb] ss:$-11 sm:%s740_s21]   ;;  %v771_v63 = vld [vmem:[#allocation1 + $0x1c] ss:$-11 sm:$0x7]  }
  0x37   :  { %v726_v60 = vld [vmem:[#allocation1 + $0x1e] ss:$-11 sm:$0x7]   ;;  %v745_v62 = vsel %vm198_vm2, %v743_v58, %v741_v57  ;;  %s3783_s28 = smov 84   ;;  %v796_v6 = vld [vmem:[#allocation1 + $0x33] sm:$0x20]  }
  0x38   :  { %v729_v61 = vld [vmem:[#allocation1 + $0x55] ss:$-11 sm:%s728_s23]   ;;  %v756_v2 = vld [vmem:[#allocation1 + $0x2f] ss:$-11 sm:$0x1f]   ;;  %s3785_s30 = smov 82  }
  0x39   :  { %425 = vrot.lane.b32.xlu0 %v424_v7, %s3762_s24  ;;  %s3780_s24 = smov 89   ;;  %v731_v1 = vsel %vm378_vm3, %v729_v61, %v726_v60  ;;  %v794_v5 = vld [vmem:[#allocation1 + $0x2d] ss:$-11 sm:$0x1f]   ;;  %v760_v7 = vsel %vm407_vm4, %v758_v3, %v756_v2  ;;  %s3786_s3 = smov 83  }
  0x3a   :  { %470 = vrot.lane.b32.xlu1 %v469_v10, %s3763_s25  ;;  %s773_s25 = smov 24  ;;  %v798_v8 = vsel %vm407_vm4, %v796_v6, %v794_v5  ;;  %v785_v9 = vld [vmem:[#allocation1 + $0x35] ss:$-11 sm:$0x1f]   ;;  %s3788_s7 = smov 81  }
  0x3b   :  { %v774_v0 = vld [vmem:[#allocation1 + $0x53] ss:$-11 sm:%s773_s25]   ;;  %v812_v11 = vld [vmem:[#allocation1 + $0x51] ss:$-11 sm:$0x3c]   ;;  %s3790_s10 = smov 79  }
  0x3c   :  { %v776_v4 = vsel %vm378_vm3, %v774_v0, %v771_v63  ;;  %v825_v12 = vld [vmem:[#allocation1 + $0x33] ss:$-11 sm:$0x1f]   ;;  %v834_v16 = vld [vmem:[#allocation1 + $0x20] ss:$-11 sm:$0x7]  }
  0x3d   :  { %454 = vrot.lane.b32.xlu0 %v453_v13, %s3764_s27  ;;  %s3782_s27 = smov 87   ;;  %v881_v19 = vld [vmem:[#allocation1 + $0x1e] ss:$-11 sm:$0x7]   ;;  %v868_v23 = vld [vmem:[#allocation1 + $0x37] sm:$0x20]  }
  0x3e   :  { %493 = vrot.lane.b32.xlu1 %v492_v14, %s3765_s29  ;;  %s3784_s29 = smov 85   ;;  %v853_v14 = vld [vmem:[#allocation1 + $0x4f] ss:$-11 sm:$0x3c]   ;;  %s895_s12 = smov 3 }
  0x3f   :  { %v866_v22 = vld [vmem:[#allocation1 + $0x31] ss:$-11 sm:$0x1f]   ;;  %v911_v25 = vld [vmem:[#allocation1 + $0x2f] ss:$-11 sm:$0x1f]  }
  0x40   :  { %v913_v26 = vld [vmem:[#allocation1 + $0x35] sm:$0x20]   ;;  %s940_s0 = smov 3  ;;  %v896_v28 = vld [vmem:[#allocation1 + $0xb] ss:$-11 sm:%s895_s12]   ;;  %s928_s15 = smov 24 }
  0x41   :  { %479 = vrot.lane.b32.xlu0 %v478_v15, %s3766_s2  ;;  %s809_s2 = smov 3  ;;  %v898_v29 = vld [vmem:[#allocation1 + $0x4d] ss:$-11 sm:$0x3c]   ;;  %v929_v35 = vld [vmem:[#allocation1 + $0x53] ss:$-11 sm:%s928_s15]  }
  0x42   :  { %520 = vrot.lane.b32.xlu1 %v519_v18, %s3767_s4  ;;  %s850_s4 = smov 3  ;;  %v810_v10 = vld [vmem:[#allocation1 + $0xf] ss:$-11 sm:%s809_s2]   ;;  %v943_v32 = vld [vmem:[#allocation1 + $0x40] ss:$-11 sm:$0x1c]  }
  0x43   :  { %v851_v13 = vld [vmem:[#allocation1 + $0xd] ss:$-11 sm:%s850_s4]   ;;  %v814_v15 = vsel %vm198_vm2, %v812_v11, %v810_v10  ;;  %v926_v34 = vld [vmem:[#allocation1 + $0x1c] ss:$-11 sm:$0x7]   ;;  %s3797_s19 = smov 70  }
  0x44   :  { %v855_v18 = vsel %vm198_vm2, %v853_v14, %v851_v13  ;;  %v941_v31 = vld [vmem:[#allocation1 + $0x9] ss:$44 sm:%s940_s0]   ;;  %v931_v39 = vsel %vm378_vm3, %v929_v35, %v926_v34  ;;  %v958_v41 = vld [vmem:[#allocation1 + $0x33] sm:$0x20]   ;;  %v997_v45 = vld [vmem:[#allocation1 + $0x32] sm:$0x10]  }
  0x45   :  { %509 = vrot.lane.b32.xlu0 %v508_v21, %s3768_s5  ;;  %s3787_s5 = smov 80   ;;  %v973_v38 = vld [vmem:[#allocation1 + $0x5c] ss:$-11 sm:$0x38]   ;;  %s3799_s21 = smov 68  }
  0x46   :  { %548 = vrot.lane.b32.xlu1 %v547_v24, %s3769_s6  ;;  %s836_s6 = smov 24  ;;  %v995_v44 = vld [vmem:[#allocation1 + $0x2b] ss:$-11 sm:$0xf]   ;;  %s3800_s23 = smov 69  }
  0x47   :  { %v837_v17 = vld [vmem:[#allocation1 + $0x57] ss:$-11 sm:%s836_s6]   ;;  %v999_v48 = vsel %vm998_vm7, %v997_v45, %v995_v44  ;;  %s3801_s25 = smov 66   ;;  %v1024_v54 = vld [vmem:[#allocation1 + $0x31] ss:$-11 sm:$0x1f]  }
  0x48   :  { %v839_v21 = vsel %vm378_vm3, %v837_v17, %v834_v16  ;;  %v1052_v57 = vld [vmem:[#allocation1 + $0x4d] ss:$-11 sm:$0x3c]   ;;  %v1033_v60 = vld [vmem:[#allocation1 + $0x1e] ss:$-11 sm:$0x7]  }
  0x49   :  { %534 = vrot.lane.b32.xlu0 %v533_v27, %s3770_s8  ;;  %s883_s8 = smov 24  ;;  %v870_v27 = vsel %vm407_vm4, %v868_v23, %v866_v22  ;;  %v1080_v0 = vld [vmem:[#allocation1 + $0x1c] ss:$-11 sm:$0x7]   ;;  %s3805_s2 = smov 62  }
  0x4a   :  { %579 = vrot.lane.b32.xlu1 %v578_v30, %s3771_s9  ;;  %s3789_s9 = smov 78   ;;  %v884_v20 = vld [vmem:[#allocation1 + $0x55] ss:$-11 sm:%s883_s8]   ;;  %v915_v30 = vsel %vm407_vm4, %v913_v26, %v911_v25  ;;  %v1067_v5 = vld [vmem:[#allocation1 + $0x35] sm:$0x20]   ;;  %s3806_s4 = smov 63  }
  0x4b   :  { %v886_v24 = vsel %vm378_vm3, %v884_v20, %v881_v19  ;;  %s3807_s6 = smov 60   ;;  %v1097_v13 = vld [vmem:[#allocation1 + $0x40] ss:$-11 sm:$0x1c]   ;;  %s3809_s8 = smov 58  }
  0x4c   :  { %v1139_v17 = vld [vmem:[#allocation1 + $0x3e] ss:$-11 sm:$0x1c]   ;;  %v1123_v20 = vld [vmem:[#allocation1 + $0x1a] ss:$-11 sm:$0x7]  }
  0x4d   :  { %563 = vrot.lane.b32.xlu0 %v562_v33, %s3772_s11  ;;  %s3791_s11 = smov 76   ;;  %v900_v33 = vsel %vm198_vm2, %v898_v29, %v896_v28  ;;  %v1167_v25 = vld [vmem:[#allocation1 + $0x5a] ss:$-11 sm:$0x38]   ;;  %v1154_v29 = vld [vmem:[#allocation1 + $0x32] sm:$0x10]  }
  0x4e   :  { %607 = vrot.lane.b32.xlu1 %v606_v36, %s3773_s13  ;;  %s3792_s13 = smov 77   ;;  %v945_v36 = vsel %vm157_vm1, %v943_v32, %v941_v31  ;;  %v1152_v28 = vld [vmem:[#allocation1 + $0x2b] ss:$-11 sm:$0xf]   ;;  %s3813_s12 = smov 54  }
  0x4f   :  { %v1189_v32 = vld [vmem:[#allocation1 + $0x29] ss:$-11 sm:$0xf]   ;;  %v1156_v34 = vsel %vm998_vm7, %v1154_v29, %v1152_v28  ;;  %s3814_s0 = smov 55   ;;  %s3815_s15 = smov 52  }
  0x50   :  { %v1761_v28 = vld [vmem:[#allocation1 + $0x23] ss:$-11 sm:$0xf]  }
  0x51   :  { %592 = vrot.lane.b32.xlu0 %v591_v37, %s3774_s14  ;;  %s3793_s14 = smov 74   ;;  %v971_v37 = vld [vmem:[#allocation1 + $0x1a] ss:$-11 sm:$0x7]  }
  0x52   :  { %632 = vrot.lane.b32.xlu1 %v631_v40, %s3775_s16  ;;  %s3794_s16 = smov 75   ;;  %v956_v40 = vld [vmem:[#allocation1 + $0x2d] ss:$-11 sm:$0x1f]   ;;  %v975_v42 = vsel %vm974_vm5, %v973_v38, %v971_v37 }
  0x53   :  { %v129_v37 = vld [vmem:[#allocation1] ss:$11 sm:$0x3f]  }
  0x54   :  { %131 = vst.msk [vmem:[#allocation0] ss:$183 sm:$0x3] %vm130_vm6, %v129_v37   ;;  %133 = vst.msk [vmem:[#allocation0 + $0x5] ss:$183 sm:$0xc] %vm130_vm6, %v129_v37  }
  0x55   :  { %623 = vrot.lane.b32.xlu0 %v622_v43, %s3776_s17  ;;  %s3795_s17 = smov 72   ;;  %135 = vst.msk [vmem:[#allocation0 - $0xa] ss:$188 sm:$0x30] %vm130_vm6, %v129_v37  }
  0x56   :  { %662 = vrot.lane.b32.xlu1 %v661_v46, %s3777_s18  ;;  %s3796_s18 = smov 73   ;;  %v960_v46 = vsel %vm407_vm4, %v958_v41, %v956_v40 }
  0x59   :  { %646 = vrot.lane.b32.xlu0 %v645_v49, %s3778_s20  ;;  %s3798_s20 = smov 71  }
  0x5a   :  { %687 = vrot.lane.b32.xlu1 %v686_v50, %s3779_s22  ;;  %s1008_s22 = smov 3  ;;  %v986_v50 = vld [vmem:[#allocation1 + $0x33] ss:$-11 sm:$0x1f]  }
  0x5b   :  { %v1009_v52 = vld [vmem:[#allocation1 + $0xd] ss:$-11 sm:%s1008_s22]   ;;  %s3820_s22 = smov 49  }
  0x5d   :  { %673 = vrot.lane.b32.xlu0 %v672_v53, %s3780_s24  ;;  %s1049_s24 = smov 3  ;;  %v1011_v53 = vld [vmem:[#allocation1 + $0x4f] ss:$-11 sm:$0x3c]  }
  0x5e   :  { %716 = vrot.lane.b32.xlu1 %v715_v56, %s3781_s26  ;;  %s1035_s26 = smov 24  ;;  %v1050_v56 = vld [vmem:[#allocation1 + $0xb] ss:$-11 sm:%s1049_s24]   ;;  %v1013_v58 = vsel %vm198_vm2, %v1011_v53, %v1009_v52  ;;  %v1272_v53 = vld [vmem:[#allocation1 + $0x1a] ss:$-11 sm:$0x7]  }
  0x5f   :  { %v1036_v61 = vld [vmem:[#allocation1 + $0x55] ss:$-11 sm:%s1035_s26]   ;;  %s3821_s24 = smov 46   ;;  %s3823_s26 = smov 44  }
  0x60   :  { %v1038_v2 = vsel %vm378_vm3, %v1036_v61, %v1033_v60  ;;  %v1299_v61 = vld [vmem:[#allocation1 + $0x2b] ss:$-11 sm:$0xf]  }
  0x61   :  { %701 = vrot.lane.b32.xlu0 %v700_v59, %s3782_s27  ;;  %s3802_s27 = smov 67  }
  0x62   :  { %746 = vrot.lane.b32.xlu1 %v745_v62, %s3783_s28  ;;  %s1082_s28 = smov 24  ;;  %v1054_v62 = vsel %vm198_vm2, %v1052_v57, %v1050_v56  ;;  %v1257_v57 = vld [vmem:[#allocation1 + $0x2d] ss:$-11 sm:$0x1f]  }
  0x65   :  { %732 = vrot.lane.b32.xlu0 %v731_v1, %s3784_s29  ;;  %s3803_s29 = smov 64   ;;  %v1083_v1 = vld [vmem:[#allocation1 + $0x53] ss:$-11 sm:%s1082_s28]   ;;  %s3825_s28 = smov 42  }
  0x66   :  { %777 = vrot.lane.b32.xlu1 %v776_v4, %s3785_s30  ;;  %s3804_s30 = smov 65   ;;  %v1065_v4 = vld [vmem:[#allocation1 + $0x2f] ss:$-11 sm:$0x1f]   ;;  %v1085_v6 = vsel %vm378_vm3, %v1083_v1, %v1080_v0 }
  0x67   :  { %v1069_v10 = vsel %vm407_vm4, %v1067_v5, %v1065_v4 }
  0x69   :  { %761 = vrot.lane.b32.xlu0 %v760_v7, %s3786_s3  ;;  %s1094_s3 = smov 3 }
  0x6a   :  { %799 = vrot.lane.b32.xlu1 %v798_v8, %s3787_s5  ;;  %v1108_v8 = vld [vmem:[#allocation1 + $0x2d] ss:$-11 sm:$0x1f]   ;;  %s1136_s5 = smov 3 }
  0x6b   :  { %v1137_v16 = vld [vmem:[#allocation1 + $0x7] ss:$44 sm:%s1136_s5]   ;;  %s3828_s5 = smov 41  }
  0x6c   :  { %v1141_v22 = vsel %vm157_vm1, %v1139_v17, %v1137_v16  ;;  %v1341_v17 = vld [vmem:[#allocation1 + $0x29] ss:$-11 sm:$0xf]  }
  0x6d   :  { %786 = vrot.lane.b32.xlu0 %v785_v9, %s3788_s7  ;;  %v1110_v9 = vld [vmem:[#allocation1 + $0x33] sm:$0x20]   ;;  %s3808_s7 = smov 61  }
  0x6e   :  { %826 = vrot.lane.b32.xlu1 %v825_v12, %s3789_s9  ;;  %v1095_v12 = vld [vmem:[#allocation1 + $0x9] ss:$44 sm:%s1094_s3]   ;;  %v1112_v14 = vsel %vm407_vm4, %v1110_v9, %v1108_v8  ;;  %s3810_s9 = smov 59   ;;  %s1770_s3 = smov 48 }
  0x6f   :  { %v1312_v9 = vld [vmem:[#allocation1 + $0x18] ss:$-11 sm:$0x7]  }
  0x71   :  { %815 = vrot.lane.b32.xlu0 %v814_v15, %s3790_s10  ;;  %s3811_s10 = smov 56  }
  0x72   :  { %856 = vrot.lane.b32.xlu1 %v855_v18, %s3791_s11  ;;  %v1099_v18 = vsel %vm157_vm1, %v1097_v13, %v1095_v12  ;;  %s3812_s11 = smov 57   ;;  %v1354_v13 = vld [vmem:[#allocation1 + $0x16] ss:$-11 sm:$0x7]  }
  0x75   :  { %840 = vrot.lane.b32.xlu0 %v839_v21, %s3792_s13  ;;  %v1125_v21 = vld [vmem:[#allocation1 + $0x5c] ss:$-11 sm:$0x38]   ;;  %s1202_s13 = smov 3 }
  0x76   :  { %887 = vrot.lane.b32.xlu1 %v886_v24, %s3793_s14  ;;  %v1165_v24 = vld [vmem:[#allocation1 + $0x18] ss:$-11 sm:$0x7]   ;;  %v1127_v26 = vsel %vm974_vm5, %v1125_v21, %v1123_v20  ;;  %s1243_s14 = smov 3  ;;  %v1203_v41 = vld [vmem:[#allocation1 + $0xb] ss:$-11 sm:%s1202_s13]  }
  0x77   :  { %v1244_v45 = vld [vmem:[#allocation1 + $0x9] ss:$44 sm:%s1243_s14]   ;;  %s3832_s13 = smov 37   ;;  %s3833_s14 = smov 10  }
  0x78   :  { %v1378_v21 = vld [vmem:[#allocation1 + $0x27] ss:$-11 sm:$0xf]  }
  0x79   :  { %871 = vrot.lane.b32.xlu0 %v870_v27, %s3794_s16  ;;  %s1229_s16 = smov 24 }
  0x7a   :  { %916 = vrot.lane.b32.xlu1 %v915_v30, %s3795_s17  ;;  %v1169_v30 = vsel %vm974_vm5, %v1167_v25, %v1165_v24  ;;  %s3816_s17 = smov 53  }
  0x7d   :  { %901 = vrot.lane.b32.xlu0 %v900_v33, %s3796_s18  ;;  %v1191_v33 = vld [vmem:[#allocation1 + $0x30] sm:$0x10]   ;;  %s3817_s18 = smov 50  }
  0x7e   :  { %946 = vrot.lane.b32.xlu1 %v945_v36, %s3797_s19  ;;  %v1193_v36 = vsel %vm998_vm7, %v1191_v33, %v1189_v32  ;;  %s3818_s19 = smov 51  }
  0x80   :  { %v171_v43 = vpop.permute.xlu1 %170  }
  0x81   :  { %932 = vrot.lane.b32.xlu0 %v931_v39, %s3798_s20  ;;  %174 = vst.msk [vmem:[#allocation0 + $0x381] ss:$-188 sm:$0x7] %vm130_vm6, %v171_v43   ;;  %176 = vst.msk [vmem:[#allocation0 + $0x386] ss:$-188 sm:$0x18] %vm130_vm6, %v171_v43  }
  0x82   :  { %976 = vrot.lane.b32.xlu1 %v975_v42, %s3799_s21  ;;  %v1180_v39 = vld [vmem:[#allocation1 + $0x31] ss:$-11 sm:$0x1f]   ;;  %v1205_v42 = vld [vmem:[#allocation1 + $0x4d] ss:$-11 sm:$0x3c]  }
  0x83   :  { %v144_v47 = vpop.permute.xlu0 %143   ;;  %v1218_v43 = vld [vmem:[#allocation1 + $0x3a] ss:$-11 sm:$0x3f]   ;;  %s3819_s20 = smov 48   ;;  %s1285_s21 = smov 3 }
  0x84   :  { %147 = vst.msk [vmem:[#allocation0 + $0x261] ss:$-188 sm:$0x7] %vm130_vm6, %v144_v47   ;;  %149 = vst.msk [vmem:[#allocation0 - $0xab4] ss:$930 sm:$0x18] %vm130_vm6, %v144_v47   ;;  %v212_v49 = vpop.permute.xlu1 %211  }
  0x85   :  { %151 = vst.msk [vmem:[#allocation0 + $0x313] sm:$0x20] %vm130_vm6, %v144_v47   ;;  %961 = vrot.lane.b32.xlu0 %v960_v46, %s3800_s23  ;;  %215 = vst.msk [vmem:[#allocation0 + $0x360] ss:$-188 sm:$0x7] %vm130_vm6, %v212_v49   ;;  %v1207_v47 = vsel %vm198_vm2, %v1205_v42, %v1203_v41  ;;  %s1325_s23 = smov 3 }
  0x86   :  { %217 = vst.msk [vmem:[#allocation0 + $0x365] ss:$-188 sm:$0x18] %vm130_vm6, %v212_v49   ;;  %1000 = vrot.lane.b32.xlu1 %v999_v48, %s3801_s25  ;;  %v1246_v46 = vld [vmem:[#allocation1 + $0x40] ss:$-11 sm:$0x1c]  }
  0x87   :  { %v160_v51 = vpop.permute.xlu0 %159   ;;  %v1227_v49 = vld [vmem:[#allocation1 + $0x1c] ss:$-11 sm:$0x7]   ;;  %v1286_v1 = vld [vmem:[#allocation1 + $0x7] ss:$44 sm:%s1285_s21]   ;;  %s3822_s25 = smov 47  }
  0x88   :  { %163 = vst.msk [vmem:[#allocation0 + $0x120] ss:$-188 sm:$0x3] %vm130_vm6, %v160_v51   ;;  %165 = vst.msk [vmem:[#allocation0 + $0x4b8] ss:$-183 sm:$0xc] %vm130_vm6, %v160_v51   ;;  %v185_v55 = vpop.permute.xlu1 %184  }
  0x89   :  { %167 = vst.msk [vmem:[#allocation0 + $0x1d3] sm:$0x10] %vm130_vm6, %v160_v51   ;;  %987 = vrot.lane.b32.xlu0 %v986_v50, %s3802_s27  ;;  %188 = vst.msk [vmem:[#allocation0 + $0x240] ss:$-188 sm:$0x7] %vm130_vm6, %v185_v55   ;;  %v1248_v51 = vsel %vm157_vm1, %v1246_v46, %v1244_v45  ;;  %s3824_s27 = smov 45  }
  0x8a   :  { %190 = vst.msk [vmem:[#allocation0 - $0xad5] ss:$930 sm:$0x18] %vm130_vm6, %v185_v55   ;;  %192 = vst.msk [vmem:[#allocation0 + $0x2f2] sm:$0x20] %vm130_vm6, %v185_v55   ;;  %1025 = vrot.lane.b32.xlu1 %v1024_v54, %s3803_s29  ;;  %s3826_s29 = smov 43  }
  0x8b   :  { %v201_v59 = vpop.permute.xlu0 %200   ;;  %v1230_v50 = vld [vmem:[#allocation1 + $0x53] ss:$-11 sm:%s1229_s16]   ;;  %v1274_v54 = vld [vmem:[#allocation1 + $0x5c] ss:$-11 sm:$0x38]   ;;  %s3834_s16 = smov 35  }
  0x8c   :  { %204 = vst.msk [vmem:[#allocation0 + $0x43] ss:$930 sm:$0x3] %vm130_vm6, %v201_v59   ;;  %206 = vst.msk [vmem:[#allocation0 + $0x497] ss:$-183 sm:$0xc] %vm130_vm6, %v201_v59   ;;  %v240_v63 = vpop.permute.xlu1 %239   ;;  %v1232_v55 = vsel %vm378_vm3, %v1230_v50, %v1227_v49 }
  0x8d   :  { %208 = vst.msk [vmem:[#allocation0 + $0x4a6] ss:$-188 sm:$0x30] %vm130_vm6, %v201_v59   ;;  %1014 = vrot.lane.b32.xlu0 %v1013_v58, %s3804_s30  ;;  %243 = vst.msk [vmem:[#allocation0 + $0x22] ss:$930 sm:$0x3] %vm130_vm6, %v240_v63   ;;  %v1276_v59 = vsel %vm974_vm5, %v1274_v54, %v1272_v53 }
  0x8e   :  { %245 = vst.msk [vmem:[#allocation0 + $0x476] ss:$-183 sm:$0xc] %vm130_vm6, %v240_v63   ;;  %247 = vst.msk [vmem:[#allocation0 + $0x485] ss:$-188 sm:$0x30] %vm130_vm6, %v240_v63   ;;  %1055 = vrot.lane.b32.xlu1 %v1054_v62, %s3805_s2 }
  0x8f   :  { %v226_v3 = vpop.permute.xlu0 %225   ;;  %v1259_v58 = vld [vmem:[#allocation1 + $0x33] sm:$0x20]   ;;  %v1301_v62 = vld [vmem:[#allocation1 + $0x32] sm:$0x10]   ;;  %v1326_v5 = vld [vmem:[#allocation1 + $0x5] ss:$44 sm:%s1325_s23]  }
  0x90   :  { %229 = vst.msk [vmem:[#allocation0 + $0x163] ss:$-188 sm:$0x3] %vm130_vm6, %v226_v3   ;;  %231 = vst.msk [vmem:[#allocation0 + $0x50a] ss:$-188 sm:$0x1c] %vm130_vm6, %v226_v3   ;;  %v272_v7 = vpop.permute.xlu1 %271   ;;  %v1261_v63 = vsel %vm407_vm4, %v1259_v58, %v1257_v57  ;;  %v1303_v3 = vsel %vm998_vm7, %v1301_v62, %v1299_v61 }
  0x91   :  { %1039 = vrot.lane.b32.xlu0 %v1038_v2, %s3806_s4  ;;  %275 = vst.msk [vmem:[#allocation0 + $0x142] ss:$-188 sm:$0x3] %vm130_vm6, %v272_v7   ;;  %277 = vst.msk [vmem:[#allocation0 + $0x4e9] ss:$-188 sm:$0x1c] %vm130_vm6, %v272_v7  }
  0x92   :  { %1086 = vrot.lane.b32.xlu1 %v1085_v6, %s3807_s6  ;;  %v1288_v2 = vld [vmem:[#allocation1 + $0x3e] ss:$-11 sm:$0x1c]   ;;  %v1328_v6 = vld [vmem:[#allocation1 + $0x3c] ss:$-11 sm:$0x1c]  }
  0x93   :  { %v256_v11 = vpop.permute.xlu0 %255   ;;  %v1290_v7 = vsel %vm157_vm1, %v1288_v2, %v1286_v1  ;;  %s1763_s30 = smov 48  ;;  %s3827_s2 = smov 40   ;;  %v1416_v41 = vld [vmem:[#allocation1 + $0x5c] ss:$-11 sm:$0x38]   ;;  %vm1972_vm3 = vcmask 1022976  }
  0x94   :  { %259 = vst.msk [vmem:[#allocation0 + $0x283] ss:$-188 sm:$0x3] %vm130_vm6, %v256_v11   ;;  %261 = vst.msk [vmem:[#allocation0 + $0x288] ss:$-188 sm:$0xc] %vm130_vm6, %v256_v11   ;;  %v301_v15 = vpop.permute.xlu1 %300  }
  0x95   :  { %263 = vst.msk [vmem:[#allocation0 + $0x6e6] ss:$-188 sm:$0x30] %vm130_vm6, %v256_v11   ;;  %1070 = vrot.lane.b32.xlu0 %v1069_v10, %s3808_s7  ;;  %304 = vst.msk [vmem:[#allocation0 + $0x262] ss:$-188 sm:$0x7] %vm130_vm6, %v301_v15   ;;  %v1330_v11 = vsel %vm157_vm1, %v1328_v6, %v1326_v5 }
  0x96   :  { %306 = vst.msk [vmem:[#allocation0 - $0xab3] ss:$930 sm:$0x18] %vm130_vm6, %v301_v15   ;;  %308 = vst.msk [vmem:[#allocation0 + $0x314] sm:$0x20] %vm130_vm6, %v301_v15   ;;  %1113 = vrot.lane.b32.xlu1 %v1112_v14, %s3809_s8  ;;  %s1391_s4 = smov 3 }
  0x97   :  { %v285_v19 = vpop.permute.xlu0 %284   ;;  %v1314_v10 = vld [vmem:[#allocation1 + $0x5a] ss:$-11 sm:$0x38]   ;;  %v1356_v14 = vld [vmem:[#allocation1 + $0x58] ss:$-11 sm:$0x38]  }
  0x98   :  { %288 = vst.msk [vmem:[#allocation0 + $0x1] ss:$930 sm:$0x3] %vm130_vm6, %v285_v19   ;;  %290 = vst.msk [vmem:[#allocation0 + $0x455] ss:$-183 sm:$0xc] %vm130_vm6, %v285_v19   ;;  %v326_v23 = vpop.permute.xlu1 %325   ;;  %v1316_v15 = vsel %vm974_vm5, %v1314_v10, %v1312_v9 }
  0x99   :  { %292 = vst.msk [vmem:[#allocation0 + $0x464] ss:$-188 sm:$0x30] %vm130_vm6, %v285_v19   ;;  %1100 = vrot.lane.b32.xlu0 %v1099_v18, %s3810_s9  ;;  %329 = vst.msk [vmem:[#allocation0 + $0x382] ss:$-188 sm:$0x7] %vm130_vm6, %v326_v23   ;;  %v1358_v19 = vsel %vm974_vm5, %v1356_v14, %v1354_v13 }
  0x9a   :  { %331 = vst.msk [vmem:[#allocation0 + $0x387] ss:$-188 sm:$0x18] %vm130_vm6, %v326_v23   ;;  %1142 = vrot.lane.b32.xlu1 %v1141_v22, %s3811_s10  ;;  %v1343_v18 = vld [vmem:[#allocation1 + $0x30] sm:$0x10]   ;;  %s3829_s6 = smov 38  }
  0x9b   :  { %v317_v27 = vpop.permute.xlu0 %316   ;;  %v1380_v22 = vld [vmem:[#allocation1 + $0x2e] sm:$0x10]   ;;  %v1345_v23 = vsel %vm998_vm7, %v1343_v18, %v1341_v17  ;;  %v1764_v29 = vld [vmem:[#allocation1 + $0x65] ss:$-11 sm:%s1763_s30]   ;;  %s1793_s7 = smov 3  ;;  %s1800_s8 = smov 3 }
  0x9c   :  { %320 = vst.msk [vmem:[#allocation0 + $0x121] ss:$-188 sm:$0x3] %vm130_vm6, %v317_v27   ;;  %322 = vst.msk [vmem:[#allocation0 + $0x4c8] ss:$-188 sm:$0x1c] %vm130_vm6, %v317_v27   ;;  %v356_v31 = vpop.permute.xlu1 %355   ;;  %v1382_v25 = vsel %vm998_vm7, %v1380_v22, %v1378_v21  ;;  %v1766_v37 = vsel %vm141_vm0, %v1764_v29, %v1761_v28 }
  0x9d   :  { %1128 = vrot.lane.b32.xlu0 %v1127_v26, %s3812_s11  ;;  %359 = vst.msk [vmem:[#allocation0 + $0x100] ss:$-188 sm:$0x3] %vm130_vm6, %v356_v31   ;;  %361 = vst.msk [vmem:[#allocation0 + $0x55e] ss:$-188 sm:$0xc] %vm130_vm6, %v356_v31  }
  0x9e   :  { %363 = vst.msk [vmem:[#allocation0 + $0x563] ss:$-188 sm:$0x30] %vm130_vm6, %v356_v31   ;;  %1170 = vrot.lane.b32.xlu1 %v1169_v30, %s3813_s12  ;;  %v1369_v26 = vld [vmem:[#allocation1 + $0x3a] ss:$-11 sm:$0x3f]  }
  0x9f   :  { %v340_v35 = vpop.permute.xlu0 %339   ;;  %v1768_v30 = vld [vmem:[#allocation1 + $0x24] ss:$-11 sm:$0xf]   ;;  %s3830_s9 = smov 39   ;;  %s1869_s10 = smov 3  ;;  %vm2036_vm4 = vcmask 1039360  }
  0xa0   :  { %343 = vst.msk [vmem:[#allocation0 + $0x241] ss:$-188 sm:$0x7] %vm130_vm6, %v340_v35   ;;  %345 = vst.msk [vmem:[#allocation0 - $0xad4] ss:$930 sm:$0x18] %vm130_vm6, %v340_v35   ;;  %v381_v38 = vpop.permute.xlu1 %380  }
  0xa1   :  { %347 = vst.msk [vmem:[#allocation0 + $0x2f3] sm:$0x20] %vm130_vm6, %v340_v35   ;;  %1157 = vrot.lane.b32.xlu0 %v1156_v34, %s3814_s0  ;;  %384 = vst.msk [vmem:[#allocation0 + $0x220] ss:$-188 sm:$0x7] %vm130_vm6, %v381_v38   ;;  %s3831_s11 = smov 36  }
  0xa2   :  { %386 = vst.msk [vmem:[#allocation0 + $0x5c7] ss:$-188 sm:$0x18] %vm130_vm6, %v381_v38   ;;  %1194 = vrot.lane.b32.xlu1 %v1193_v36, %s3815_s15  ;;  %v1771_v31 = vld [vmem:[#allocation1 + $0x66] ss:$-11 sm:%s1770_s3]   ;;  %s1876_s12 = smov 3 }
  0xa3   :  { %v367_v40 = vpop.permute.xlu0 %366   ;;  %v1392_v33 = vld [vmem:[#allocation1 + $0x9] ss:$44 sm:%s1391_s4]   ;;  %v1394_v34 = vld [vmem:[#allocation1 + $0x40] ss:$-11 sm:$0x1c]   ;;  %v1773_v38 = vsel %vm141_vm0, %v1771_v31, %v1768_v30  ;;  %s1931_s0 = smov 3 }
  0xa4   :  { %370 = vst.msk [vmem:[#allocation0 + $0x361] ss:$-188 sm:$0x7] %vm130_vm6, %v367_v40   ;;  %372 = vst.msk [vmem:[#allocation0 + $0x366] ss:$-188 sm:$0x18] %vm130_vm6, %v367_v40   ;;  %v410_v44 = vpop.permute.xlu1 %409   ;;  %v1396_v40 = vsel %vm157_vm1, %v1394_v34, %v1392_v33 }
  0xa5   :  { %1181 = vrot.lane.b32.xlu0 %v1180_v39, %s3816_s17  ;;  %413 = vst.msk [vmem:[#allocation0 + $0x340] ss:$-188 sm:$0x7] %vm130_vm6, %v410_v44   ;;  %415 = vst.msk [vmem:[#allocation0 + $0x345] ss:$-188 sm:$0x18] %vm130_vm6, %v410_v44  }
  0xa6   :  { %417 = vst.msk [vmem:[#allocation0 + $0x3f2] sm:$0x20] %vm130_vm6, %v410_v44   ;;  %1219 = vrot.lane.b32.xlu1 %v1218_v43, %s3817_s18  ;;  %v1405_v35 = vld [vmem:[#allocation1 + $0x38] ss:$-11 sm:$0x3f]   ;;  %s1938_s15 = smov 3 }
  0xa7   :  { %v395_v48 = vpop.permute.xlu0 %394   ;;  %v1414_v39 = vld [vmem:[#allocation1 + $0x1a] ss:$-11 sm:$0x7]   ;;  %v1794_v42 = vld [vmem:[#allocation1 + $0x5] ss:$44 sm:%s1793_s7]   ;;  %s1993_s17 = smov 48 }
  0xa8   :  { %398 = vst.msk [vmem:[#allocation0 + $0x23] ss:$930 sm:$0x3] %vm130_vm6, %v395_v48   ;;  %400 = vst.msk [vmem:[#allocation0 + $0x477] ss:$-183 sm:$0xc] %vm130_vm6, %v395_v48   ;;  %v439_v52 = vpop.permute.xlu1 %438   ;;  %v1418_v54 = vsel %vm974_vm5, %v1416_v41, %v1414_v39 }
  0xa9   :  { %402 = vst.msk [vmem:[#allocation0 + $0x486] ss:$-188 sm:$0x30] %vm130_vm6, %v395_v48   ;;  %1208 = vrot.lane.b32.xlu0 %v1207_v47, %s3818_s19  ;;  %442 = vst.msk [vmem:[#allocation0 + $0x2] ss:$930 sm:$0x3] %vm130_vm6, %v439_v52   ;;  %v1775_v48 = vsel %vm1774_vm8, %v1773_v38, %v1766_v37 }
  0xaa   :  { %444 = vst.msk [vmem:[#allocation0 + $0x456] ss:$-183 sm:$0xc] %vm130_vm6, %v439_v52   ;;  %446 = vst.msk [vmem:[#allocation0 + $0x465] ss:$-188 sm:$0x30] %vm130_vm6, %v439_v52   ;;  %1249 = vrot.lane.b32.xlu1 %v1248_v51, %s3819_s20 }
  0xab   :  { %v426_v56 = vpop.permute.xlu0 %425   ;;  %v1821_v44 = vld [vmem:[#allocation1 + $0x34] ss:$-11 sm:$0x1f]   ;;  %v1796_v46 = vld [vmem:[#allocation1 + $0x3c] ss:$-11 sm:$0x1c]  }
  0xac   :  { %429 = vst.msk [vmem:[#allocation0 + $0x143] ss:$-188 sm:$0x3] %vm130_vm6, %v426_v56   ;;  %431 = vst.msk [vmem:[#allocation0 + $0x4ea] ss:$-188 sm:$0x1c] %vm130_vm6, %v426_v56   ;;  %v471_v60 = vpop.permute.xlu1 %470   ;;  %v1798_v58 = vsel %vm157_vm1, %v1796_v46, %v1794_v42 }
  0xad   :  { %1233 = vrot.lane.b32.xlu0 %v1232_v55, %s3820_s22  ;;  %474 = vst.msk [vmem:[#allocation0 + $0x122] ss:$-188 sm:$0x3] %vm130_vm6, %v471_v60   ;;  %476 = vst.msk [vmem:[#allocation0 + $0x4c9] ss:$-188 sm:$0x1c] %vm130_vm6, %v471_v60  }
  0xae   :  { %1277 = vrot.lane.b32.xlu1 %v1276_v59, %s3821_s24  ;;  %v1823_v45 = vld [vmem:[#allocation1 + $0x35] ss:$-11 sm:$0x1f]   ;;  %v1803_v49 = vld [vmem:[#allocation1 + $0x3d] ss:$-11 sm:$0x1c]  }
  0xaf   :  { %v455_v0 = vpop.permute.xlu0 %454   ;;  %v1801_v47 = vld [vmem:[#allocation1 + $0x6] ss:$44 sm:%s1800_s8]   ;;  %v1841_v60 = vld [vmem:[#allocation1 + $0x58] ss:$-11 sm:$0x38]   ;;  %v1825_v61 = vsel %vm1824_vm9, %v1823_v45, %v1821_v44  ;;  %s3835_s18 = smov 8  }
  0xb0   :  { %458 = vst.msk [vmem:[#allocation0 + $0x263] ss:$-188 sm:$0x3] %vm130_vm6, %v455_v0   ;;  %460 = vst.msk [vmem:[#allocation0 + $0x268] ss:$-188 sm:$0xc] %vm130_vm6, %v455_v0   ;;  %v494_v4 = vpop.permute.xlu1 %493   ;;  %v1805_v59 = vsel %vm157_vm1, %v1803_v49, %v1801_v47 }
  0xb1   :  { %462 = vst.msk [vmem:[#allocation0 + $0x6c6] ss:$-188 sm:$0x30] %vm130_vm6, %v455_v0   ;;  %1262 = vrot.lane.b32.xlu0 %v1261_v63, %s3822_s25  ;;  %497 = vst.msk [vmem:[#allocation0 + $0x242] ss:$-188 sm:$0x7] %vm130_vm6, %v494_v4   ;;  %v1807_v5 = vsel %vm1806_vm10, %v1805_v59, %v1798_v58 }
  0xb2   :  { %499 = vst.msk [vmem:[#allocation0 - $0xad3] ss:$930 sm:$0x18] %vm130_vm6, %v494_v4   ;;  %501 = vst.msk [vmem:[#allocation0 + $0x2f4] sm:$0x20] %vm130_vm6, %v494_v4   ;;  %1304 = vrot.lane.b32.xlu1 %v1303_v3, %s3823_s26  ;;  %s2000_s19 = smov 48 }
  0xb3   :  { %v480_v8 = vpop.permute.xlu0 %479   ;;  %v1870_v50 = vld [vmem:[#allocation1 + $0x3] ss:$55 sm:%s1869_s10]   ;;  %v1845_v62 = vld [vmem:[#allocation1 + $0x17] ss:$-11 sm:$0x7]   ;;  %s1959_s20 = smov 3 }
  0xb4   :  { %483 = vst.msk [vmem:[#allocation0 + $0x383] ss:$-188 sm:$0x3] %vm130_vm6, %v480_v8   ;;  %485 = vst.msk [vmem:[#allocation0 + $0x388] ss:$-188 sm:$0x1c] %vm130_vm6, %v480_v8   ;;  %v521_v12 = vpop.permute.xlu1 %520  }
  0xb5   :  { %1291 = vrot.lane.b32.xlu0 %v1290_v7, %s3824_s27  ;;  %524 = vst.msk [vmem:[#allocation0 + $0x362] ss:$-188 sm:$0x7] %vm130_vm6, %v521_v12   ;;  %526 = vst.msk [vmem:[#allocation0 + $0x367] ss:$-188 sm:$0x18] %vm130_vm6, %v521_v12  }
  0xb6   :  { %1331 = vrot.lane.b32.xlu1 %v1330_v11, %s3825_s28  ;;  %v1872_v52 = vld [vmem:[#allocation1 + $0x45] ss:$-11 sm:$0x3c]   ;;  %v1839_v56 = vld [vmem:[#allocation1 + $0x16] ss:$-11 sm:$0x7]  }
  0xb7   :  { %v510_v16 = vpop.permute.xlu0 %509   ;;  %v1879_v53 = vld [vmem:[#allocation1 + $0x46] ss:$-11 sm:$0x3c]   ;;  %v1847_v63 = vld [vmem:[#allocation1 + $0x59] ss:$-11 sm:$0x38]   ;;  %v1874_v1 = vsel %vm198_vm2, %v1872_v52, %v1870_v50  ;;  %v1843_v9 = vsel %vm974_vm5, %v1841_v60, %v1839_v56 }
  0xb8   :  { %513 = vst.msk [vmem:[#allocation0 + $0x101] ss:$-188 sm:$0x3] %vm130_vm6, %v510_v16   ;;  %515 = vst.msk [vmem:[#allocation0 + $0x555] ss:$-183 sm:$0xc] %vm130_vm6, %v510_v16   ;;  %v549_v20 = vpop.permute.xlu1 %548   ;;  %v1849_v10 = vsel %vm974_vm5, %v1847_v63, %v1845_v62 }
  0xb9   :  { %517 = vst.msk [vmem:[#allocation0 + $0x564] ss:$-188 sm:$0x30] %vm130_vm6, %v510_v16   ;;  %1317 = vrot.lane.b32.xlu0 %v1316_v15, %s3826_s29  ;;  %552 = vst.msk [vmem:[#allocation0 + $0xe0] ss:$-188 sm:$0x3] %vm130_vm6, %v549_v20   ;;  %v1851_v21 = vsel %vm1850_vm12, %v1849_v10, %v1843_v9 }
  0xba   :  { %554 = vst.msk [vmem:[#allocation0 + $0x53e] ss:$-188 sm:$0xc] %vm130_vm6, %v549_v20   ;;  %556 = vst.msk [vmem:[#allocation0 + $0x543] ss:$-188 sm:$0x30] %vm130_vm6, %v549_v20   ;;  %1359 = vrot.lane.b32.xlu1 %v1358_v19, %s3827_s2 }
  0xbb   :  { %v535_v24 = vpop.permute.xlu0 %534   ;;  %v1877_v55 = vld [vmem:[#allocation1 + $0x4] ss:$55 sm:%s1876_s12]   ;;  %v1934_v4 = vld [vmem:[#allocation1 + $0x4b] ss:$-11 sm:$0x1c]   ;;  %s3836_s21 = smov 9  }
  0xbc   :  { %538 = vst.msk [vmem:[#allocation0 + $0x221] ss:$-188 sm:$0x7] %vm130_vm6, %v535_v24   ;;  %540 = vst.msk [vmem:[#allocation0 + $0x5c8] ss:$-188 sm:$0x18] %vm130_vm6, %v535_v24   ;;  %v580_v27 = vpop.permute.xlu1 %579   ;;  %v1881_v2 = vsel %vm198_vm2, %v1879_v53, %v1877_v55 }
  0xbd   :  { %1346 = vrot.lane.b32.xlu0 %v1345_v23, %s3828_s5  ;;  %583 = vst.msk [vmem:[#allocation0 + $0x200] ss:$-188 sm:$0x7] %vm130_vm6, %v580_v27   ;;  %585 = vst.msk [vmem:[#allocation0 + $0x5a7] ss:$-188 sm:$0x18] %vm130_vm6, %v580_v27   ;;  %v1883_v13 = vsel %vm1882_vm11, %v1881_v2, %v1874_v1 }
  0xbe   :  { %1383 = vrot.lane.b32.xlu1 %v1382_v25, %s3829_s6  ;;  %v1932_v3 = vld [vmem:[#allocation1 + $0x14] ss:$-11 sm:%s1931_s0]   ;;  %v1941_v7 = vld [vmem:[#allocation1 + $0x4c] ss:$-11 sm:$0x1c]   ;;  %s1966_s22 = smov 3 }
  0xbf   :  { %v564_v32 = vpop.permute.xlu0 %563   ;;  %v1939_v6 = vld [vmem:[#allocation1 + $0x15] ss:$-11 sm:%s1938_s15]   ;;  %v1901_v11 = vld [vmem:[#allocation1 + $0x27] ss:$-11 sm:$0xf]   ;;  %v1936_v17 = vsel %vm157_vm1, %v1934_v4, %v1932_v3  ;;  %s3837_s23 = smov 6  }
  0xc0   :  { %567 = vst.msk [vmem:[#allocation0 + $0x341] ss:$-188 sm:$0x7] %vm130_vm6, %v564_v32   ;;  %569 = vst.msk [vmem:[#allocation0 + $0x346] ss:$-188 sm:$0x18] %vm130_vm6, %v564_v32   ;;  %v608_v36 = vpop.permute.xlu1 %607   ;;  %v1943_v18 = vsel %vm157_vm1, %v1941_v7, %v1939_v6 }
  0xc1   :  { %571 = vst.msk [vmem:[#allocation0 + $0x3f3] sm:$0x20] %vm130_vm6, %v564_v32   ;;  %1370 = vrot.lane.b32.xlu0 %v1369_v26, %s3830_s9  ;;  %611 = vst.msk [vmem:[#allocation0 + $0x320] ss:$-188 sm:$0x7] %vm130_vm6, %v608_v36   ;;  %v1945_v29 = vsel %vm1944_vm13, %v1943_v18, %v1936_v17  ;;  %s2023_s24 = smov 3 }
  0xc2   :  { %613 = vst.msk [vmem:[#allocation0 + $0x325] ss:$-188 sm:$0x18] %vm130_vm6, %v608_v36   ;;  %615 = vst.msk [vmem:[#allocation0 + $0x3d2] sm:$0x20] %vm130_vm6, %v608_v36   ;;  %1406 = vrot.lane.b32.xlu1 %v1405_v35, %s3831_s11  ;;  %s3838_s25 = smov 7  }
  0xc3   :  { %v593_v43 = vpop.permute.xlu0 %592   ;;  %v1903_v12 = vld [vmem:[#allocation1 + $0x2e] sm:$0x10]   ;;  %v1909_v15 = vld [vmem:[#allocation1 + $0x2f] sm:$0x10]   ;;  %v1994_v20 = vld [vmem:[#allocation1 + $0x67] ss:$-11 sm:%s1993_s17]  }
  0xc4   :  { %596 = vst.msk [vmem:[#allocation0 + $0x3] ss:$930 sm:$0x3] %vm130_vm6, %v593_v43   ;;  %598 = vst.msk [vmem:[#allocation0 + $0x457] ss:$-183 sm:$0xc] %vm130_vm6, %v593_v43   ;;  %v633_v51 = vpop.permute.xlu1 %632   ;;  %v1905_v25 = vsel %vm998_vm7, %v1903_v12, %v1901_v11 }
  0xc5   :  { %600 = vst.msk [vmem:[#allocation0 + $0x466] ss:$-188 sm:$0x30] %vm130_vm6, %v593_v43   ;;  %1397 = vrot.lane.b32.xlu0 %v1396_v40, %s3832_s13  ;;  %636 = vst.msk [vmem:[#allocation0 + $0x384] ss:$-188 sm:$0x3] %vm130_vm6, %v633_v51  }
  0xc6   :  { %638 = vst.msk [vmem:[#allocation0 + $0x389] ss:$-188 sm:$0x1c] %vm130_vm6, %v633_v51   ;;  %1776 = vrot.lane.b32.xlu1 %v1775_v48, %s3833_s14  ;;  %v1907_v14 = vld [vmem:[#allocation1 + $0x28] ss:$-11 sm:$0xf]  }
  0xc7   :  { %v624_v57 = vpop.permute.xlu0 %623   ;;  %v1991_v19 = vld [vmem:[#allocation1 + $0x25] ss:$-11 sm:$0xf]   ;;  %v2001_v23 = vld [vmem:[#allocation1 + $0x68] ss:$-11 sm:%s2000_s19]   ;;  %v1911_v26 = vsel %vm998_vm7, %v1909_v15, %v1907_v14  ;;  %s2030_s26 = smov 3 }
  0xc8   :  { %627 = vst.msk [vmem:[#allocation0 + $0x123] ss:$-188 sm:$0x3] %vm130_vm6, %v624_v57   ;;  %629 = vst.msk [vmem:[#allocation0 + $0x4ca] ss:$-188 sm:$0x1c] %vm130_vm6, %v624_v57   ;;  %v663_v0 = vpop.permute.xlu1 %662   ;;  %v1996_v33 = vsel %vm141_vm0, %v1994_v20, %v1991_v19  ;;  %v1913_v35 = vsel %vm1912_vm14, %v1911_v26, %v1905_v25 }
  0xc9   :  { %1419 = vrot.lane.b32.xlu0 %v1418_v54, %s3834_s16  ;;  %666 = vst.msk [vmem:[#allocation0 + $0x102] ss:$-188 sm:$0x3] %vm130_vm6, %v663_v0   ;;  %668 = vst.msk [vmem:[#allocation0 + $0x556] ss:$-183 sm:$0xc] %vm130_vm6, %v663_v0  }
  0xca   :  { %670 = vst.msk [vmem:[#allocation0 + $0x565] ss:$-188 sm:$0x30] %vm130_vm6, %v663_v0   ;;  %1826 = vrot.lane.b32.xlu1 %v1825_v61, %s3835_s18  ;;  %v1998_v22 = vld [vmem:[#allocation1 + $0x26] ss:$-11 sm:$0xf]  }
  0xcb   :  { %v647_v8 = vpop.permute.xlu0 %646   ;;  %v1960_v27 = vld [vmem:[#allocation1 + $0x1] ss:$55 sm:%s1959_s20]   ;;  %v2003_v34 = vsel %vm141_vm0, %v2001_v23, %v1998_v22  ;;  %s1429_s27 = smov 3  ;;  %s3839_s28 = smov 4   ;;  %v1445_v58 = vld [vmem:[#allocation1 + $0x32] sm:$0x10]  }
  0xcc   :  { %650 = vst.msk [vmem:[#allocation0 + $0x243] ss:$-188 sm:$0x3] %vm130_vm6, %v647_v8   ;;  %652 = vst.msk [vmem:[#allocation0 + $0x248] ss:$-188 sm:$0xc] %vm130_vm6, %v647_v8   ;;  %v688_v16 = vpop.permute.xlu1 %687   ;;  %v2005_v41 = vsel %vm2004_vm15, %v2003_v34, %v1996_v33 }
  0xcd   :  { %654 = vst.msk [vmem:[#allocation0 + $0x6a6] ss:$-188 sm:$0x30] %vm130_vm6, %v647_v8   ;;  %1808 = vrot.lane.b32.xlu0 %v1807_v5, %s3836_s21  ;;  %691 = vst.msk [vmem:[#allocation0 + $0x222] ss:$-188 sm:$0x7] %vm130_vm6, %v688_v16  }
  0xce   :  { %693 = vst.msk [vmem:[#allocation0 + $0x5c9] ss:$-188 sm:$0x18] %vm130_vm6, %v688_v16   ;;  %1884 = vrot.lane.b32.xlu1 %v1883_v13, %s3837_s23  ;;  %v1962_v28 = vld [vmem:[#allocation1 + $0x43] ss:$-11 sm:$0x3c]  }
  0xcf   :  { %v674_v24 = vpop.permute.xlu0 %673   ;;  %v1967_v30 = vld [vmem:[#allocation1 + $0x2] ss:$55 sm:%s1966_s22]   ;;  %v1964_v37 = vsel %vm198_vm2, %v1962_v28, %v1960_v27  ;;  %v2026_v40 = vld [vmem:[#allocation1 + $0x49] ss:$-11 sm:$0x1c]   ;;  %s3840_s29 = smov 5  }
  0xd0   :  { %677 = vst.msk [vmem:[#allocation0 + $0x363] ss:$-188 sm:$0x3] %vm130_vm6, %v674_v24   ;;  %679 = vst.msk [vmem:[#allocation0 + $0x368] ss:$-188 sm:$0x1c] %vm130_vm6, %v674_v24   ;;  %v717_v32 = vpop.permute.xlu1 %716  }
  0xd1   :  { %v1969_v31 = vld [vmem:[#allocation1 + $0x44] ss:$-11 sm:$0x3c]   ;;  %1852 = vrot.lane.b32.xlu0 %v1851_v21, %s3838_s25  ;;  %720 = vst.msk [vmem:[#allocation0 + $0x342] ss:$-188 sm:$0x7] %vm130_vm6, %v717_v32  }
  0xd2   :  { %722 = vst.msk [vmem:[#allocation0 + $0x347] ss:$-188 sm:$0x18] %vm130_vm6, %v717_v32   ;;  %724 = vst.msk [vmem:[#allocation0 + $0x3f4] sm:$0x20] %vm130_vm6, %v717_v32   ;;  %1946 = vrot.lane.b32.xlu1 %v1945_v29, %s3839_s28  ;;  %v1971_v38 = vsel %vm198_vm2, %v1969_v31, %v1967_v30  ;;  %s3841_s30 = smov 2  }
  0xd3   :  { %v702_v36 = vpop.permute.xlu0 %701   ;;  %v2024_v39 = vld [vmem:[#allocation1 + $0x12] ss:$-11 sm:%s2023_s24]   ;;  %v2033_v43 = vld [vmem:[#allocation1 + $0x4a] ss:$-11 sm:$0x1c]   ;;  %v1973_v47 = vsel %vm1972_vm3, %v1971_v38, %v1964_v37  ;;  %s3842_s2 = smov 3  }
  0xd4   :  { %705 = vst.msk [vmem:[#allocation0 + $0xe1] ss:$-188 sm:$0x3] %vm130_vm6, %v702_v36   ;;  %707 = vst.msk [vmem:[#allocation0 + $0x535] ss:$-183 sm:$0xc] %vm130_vm6, %v702_v36   ;;  %v747_v44 = vpop.permute.xlu1 %746   ;;  %v2028_v49 = vsel %vm157_vm1, %v2026_v40, %v2024_v39 }
  0xd5   :  { %709 = vst.msk [vmem:[#allocation0 + $0x544] ss:$-188 sm:$0x30] %vm130_vm6, %v702_v36   ;;  %v2031_v42 = vld [vmem:[#allocation1 + $0x13] ss:$-11 sm:%s2030_s26]   ;;  %1914 = vrot.lane.b32.xlu0 %v1913_v35, %s3840_s29  ;;  %s3843_s3 = smov 34  }
  0xd6   :  { %v1430_v45 = vld [vmem:[#allocation1 + $0x7] ss:$44 sm:%s1429_s27]   ;;  %v1432_v46 = vld [vmem:[#allocation1 + $0x3e] ss:$-11 sm:$0x1c]   ;;  %2006 = vrot.lane.b32.xlu1 %v2005_v41, %s3841_s30  ;;  %v2035_v50 = vsel %vm157_vm1, %v2033_v43, %v2031_v42  ;;  %s1471_s4 = smov 3 }
  0xd7   :  { %750 = vst.msk [vmem:[#allocation0 + $0xc0] ss:$-188 sm:$0x3] %vm130_vm6, %v747_v44   ;;  %752 = vst.msk [vmem:[#allocation0 + $0x51e] ss:$-188 sm:$0xc] %vm130_vm6, %v747_v44   ;;  %v733_v48 = vpop.permute.xlu0 %732   ;;  %v1434_v51 = vsel %vm157_vm1, %v1432_v46, %v1430_v45  ;;  %v2037_v55 = vsel %vm2036_vm4, %v2035_v50, %v2028_v49 }
  0xd8   :  { %754 = vst.msk [vmem:[#allocation0 + $0x523] ss:$-188 sm:$0x30] %vm130_vm6, %v747_v44   ;;  %736 = vst.msk [vmem:[#allocation0 + $0x201] ss:$-188 sm:$0x7] %vm130_vm6, %v733_v48   ;;  %v778_v52 = vpop.permute.xlu1 %777  }
  0xd9   :  { %738 = vst.msk [vmem:[#allocation0 + $0x5a8] ss:$-188 sm:$0x18] %vm130_vm6, %v733_v48   ;;  %1974 = vrot.lane.b32.xlu0 %v1973_v47, %s3842_s2  ;;  %v1458_v53 = vld [vmem:[#allocation1 + $0x18] ss:$-11 sm:$0x7]  }
  0xda   :  { %v1460_v54 = vld [vmem:[#allocation1 + $0x5a] ss:$-11 sm:$0x38]   ;;  %781 = vst.msk [vmem:[#allocation0 + $0x1e0] ss:$-188 sm:$0x7] %vm130_vm6, %v778_v52   ;;  %1435 = vrot.lane.b32.xlu1 %v1434_v51, %s3843_s3 }
  0xdb   :  { %783 = vst.msk [vmem:[#allocation0 + $0x587] ss:$-188 sm:$0x18] %vm130_vm6, %v778_v52   ;;  %v762_v56 = vpop.permute.xlu0 %761   ;;  %v1443_v57 = vld [vmem:[#allocation1 + $0x2b] ss:$-11 sm:$0xf]   ;;  %v1462_v59 = vsel %vm974_vm5, %v1460_v54, %v1458_v53 }
  0xdc   :  { %765 = vst.msk [vmem:[#allocation0 + $0x321] ss:$-188 sm:$0x7] %vm130_vm6, %v762_v56   ;;  %767 = vst.msk [vmem:[#allocation0 + $0x326] ss:$-188 sm:$0x18] %vm130_vm6, %v762_v56   ;;  %v800_v60 = vpop.permute.xlu1 %799   ;;  %v1447_v63 = vsel %vm998_vm7, %v1445_v58, %v1443_v57 }
  0xdd   :  { %769 = vst.msk [vmem:[#allocation0 + $0x3d3] sm:$0x20] %vm130_vm6, %v762_v56   ;;  %s3844_s5 = smov 1   ;;  %v1485_v61 = vld [vmem:[#allocation1 + $0x29] ss:$-11 sm:$0xf]  }
  0xde   :  { %2038 = vrot.lane.b32.xlu0 %v2037_v55, %s3844_s5  ;;  %v1487_v62 = vld [vmem:[#allocation1 + $0x30] sm:$0x10]   ;;  %803 = vst.msk [vmem:[#allocation0 + $0x300] ss:$-188 sm:$0x7] %vm130_vm6, %v800_v60   ;;  %s1511_s6 = smov 3 }
  0xdf   :  { %805 = vst.msk [vmem:[#allocation0 + $0x305] ss:$-188 sm:$0x18] %vm130_vm6, %v800_v60   ;;  %807 = vst.msk [vmem:[#allocation0 + $0x3b2] sm:$0x20] %vm130_vm6, %v800_v60   ;;  %v787_v0 = vpop.permute.xlu0 %786   ;;  %s3845_s7 = smov 32   ;;  %v1489_v3 = vsel %vm998_vm7, %v1487_v62, %v1485_v61 }
  0xe0   :  { %1463 = vrot.lane.b32.xlu1 %v1462_v59, %s3845_s7  ;;  %v1472_v1 = vld [vmem:[#allocation1 + $0x5] ss:$44 sm:%s1471_s4]   ;;  %v1474_v2 = vld [vmem:[#allocation1 + $0x3c] ss:$-11 sm:$0x1c]   ;;  %s3846_s8 = smov 33   ;;  %v827_v4 = vpop.permute.xlu1 %826  }
  0xe1   :  { %790 = vst.msk [vmem:[#allocation0 + $0x385] ss:$-188 sm:$0x3] %vm130_vm6, %v787_v0   ;;  %792 = vst.msk [vmem:[#allocation0 + $0x38a] ss:$-188 sm:$0x1c] %vm130_vm6, %v787_v0   ;;  %v1476_v7 = vsel %vm157_vm1, %v1474_v2, %v1472_v1 }
  0xe2   :  { %1448 = vrot.lane.b32.xlu0 %v1447_v63, %s3846_s8  ;;  %v1512_v5 = vld [vmem:[#allocation1 + $0x3] ss:$55 sm:%s1511_s6]   ;;  %830 = vst.msk [vmem:[#allocation0 + $0x364] ss:$-188 sm:$0x3] %vm130_vm6, %v827_v4   ;;  %s1540_s9 = smov 3 }
  0xe3   :  { %v1514_v6 = vld [vmem:[#allocation1 + $0x45] ss:$-11 sm:$0x3c]   ;;  %832 = vst.msk [vmem:[#allocation0 + $0x369] ss:$-188 sm:$0x1c] %vm130_vm6, %v827_v4   ;;  %v816_v8 = vpop.permute.xlu0 %815  }
  0xe4   :  { %s3847_s10 = smov 30   ;;  %v1498_v9 = vld [vmem:[#allocation1 + $0x16] ss:$-11 sm:$0x7]   ;;  %v1516_v11 = vsel %vm198_vm2, %v1514_v6, %v1512_v5  ;;  %s3848_s11 = smov 31   ;;  %v857_v12 = vpop.permute.xlu1 %856   ;;  %vm1815_vm8 = vcmask 89160  }
  0xe5   :  { %1490 = vrot.lane.b32.xlu1 %v1489_v3, %s3847_s10  ;;  %v1500_v10 = vld [vmem:[#allocation1 + $0x58] ss:$-11 sm:$0x38]   ;;  %819 = vst.msk [vmem:[#allocation0 + $0x103] ss:$-188 sm:$0x3] %vm130_vm6, %v816_v8  }
  0xe6   :  { %821 = vst.msk [vmem:[#allocation0 + $0x557] ss:$-183 sm:$0xc] %vm130_vm6, %v816_v8   ;;  %823 = vst.msk [vmem:[#allocation0 + $0x566] ss:$-188 sm:$0x30] %vm130_vm6, %v816_v8   ;;  %1477 = vrot.lane.b32.xlu0 %v1476_v7, %s3848_s11  ;;  %v1502_v15 = vsel %vm974_vm5, %v1500_v10, %v1498_v9 }
  0xe7   :  { %v1541_v13 = vld [vmem:[#allocation1 + $0x14] ss:$-11 sm:%s1540_s9]   ;;  %v1543_v14 = vld [vmem:[#allocation1 + $0x4b] ss:$-11 sm:$0x1c]   ;;  %s1567_s12 = smov 48  ;;  %v841_v16 = vpop.permute.xlu0 %840  }
  0xe8   :  { %860 = vst.msk [vmem:[#allocation0 + $0xe2] ss:$-188 sm:$0x3] %vm130_vm6, %v857_v12   ;;  %862 = vst.msk [vmem:[#allocation0 + $0x536] ss:$-183 sm:$0xc] %vm130_vm6, %v857_v12   ;;  %v1545_v19 = vsel %vm157_vm1, %v1543_v14, %v1541_v13  ;;  %v888_v20 = vpop.permute.xlu1 %887  }
  0xe9   :  { %864 = vst.msk [vmem:[#allocation0 + $0x545] ss:$-188 sm:$0x30] %vm130_vm6, %v857_v12   ;;  %s3849_s13 = smov 28   ;;  %v1529_v18 = vld [vmem:[#allocation1 + $0x2e] sm:$0x10]  }
  0xea   :  { %1517 = vrot.lane.b32.xlu1 %v1516_v11, %s3849_s13  ;;  %v1527_v17 = vld [vmem:[#allocation1 + $0x27] ss:$-11 sm:$0xf]   ;;  %844 = vst.msk [vmem:[#allocation0 + $0x223] ss:$-188 sm:$0x3] %vm130_vm6, %v841_v16  }
  0xeb   :  { %846 = vst.msk [vmem:[#allocation0 - $0x51c] ss:$742 sm:$0xc] %vm130_vm6, %v841_v16   ;;  %848 = vst.msk [vmem:[#allocation0 + $0x2d6] sm:$0x10] %vm130_vm6, %v841_v16   ;;  %s3850_s0 = smov 29   ;;  %v1531_v23 = vsel %vm998_vm7, %v1529_v18, %v1527_v17  ;;  %v872_v24 = vpop.permute.xlu0 %871  }
  0xec   :  { %1503 = vrot.lane.b32.xlu0 %v1502_v15, %s3850_s0  ;;  %v1565_v21 = vld [vmem:[#allocation1 + $0x25] ss:$-11 sm:$0xf]   ;;  %891 = vst.msk [vmem:[#allocation0 + $0x202] ss:$-188 sm:$0x7] %vm130_vm6, %v888_v20   ;;  %v917_v26 = vpop.permute.xlu1 %916  }
  0xed   :  { %v1568_v22 = vld [vmem:[#allocation1 + $0x67] ss:$-11 sm:%s1567_s12]   ;;  %893 = vst.msk [vmem:[#allocation0 + $0x5a9] ss:$-188 sm:$0x18] %vm130_vm6, %v888_v20   ;;  %s3851_s14 = smov 26  }
  0xee   :  { %1546 = vrot.lane.b32.xlu1 %v1545_v19, %s3851_s14  ;;  %875 = vst.msk [vmem:[#allocation0 + $0x343] ss:$-188 sm:$0x3] %vm130_vm6, %v872_v24   ;;  %877 = vst.msk [vmem:[#allocation0 + $0x348] ss:$-188 sm:$0x1c] %vm130_vm6, %v872_v24   ;;  %v1570_v25 = vsel %vm141_vm0, %v1568_v22, %v1565_v21 }
  0xef   :  { %879 = vst.msk [vmem:[#allocation0 + $0x3f5] sm:$0x20] %vm130_vm6, %v872_v24   ;;  %s1581_s15 = smov 3  ;;  %s3852_s16 = smov 27   ;;  %924 = vst.msk [vmem:[#allocation0 + $0x3d4] sm:$0x20] %vm130_vm6, %v917_v26   ;;  %v902_v28 = vpop.permute.xlu0 %901  }
  0xf0   :  { %1532 = vrot.lane.b32.xlu0 %v1531_v23, %s3852_s16  ;;  %920 = vst.msk [vmem:[#allocation0 + $0x322] ss:$-188 sm:$0x7] %vm130_vm6, %v917_v26   ;;  %922 = vst.msk [vmem:[#allocation0 + $0x327] ss:$-188 sm:$0x18] %vm130_vm6, %v917_v26   ;;  %v947_v32 = vpop.permute.xlu1 %946  }
  0xf1   :  { %v1556_v27 = vld [vmem:[#allocation1 + $0x38] ss:$-11 sm:$0x3f]   ;;  %s1619_s17 = smov 3  ;;  %s3853_s18 = smov 24   ;;  %vm1886_vm9 = vcmask 48128  }
  0xf2   :  { %1571 = vrot.lane.b32.xlu1 %v1570_v25, %s3853_s18  ;;  %v1582_v29 = vld [vmem:[#allocation1 + $0x7] ss:$44 sm:%s1581_s15]   ;;  %v1584_v30 = vld [vmem:[#allocation1 + $0x3e] ss:$-11 sm:$0x1c]   ;;  %s3854_s19 = smov 25  }
  0xf3   :  { %905 = vst.msk [vmem:[#allocation0 + $0xc1] ss:$-188 sm:$0x3] %vm130_vm6, %v902_v28   ;;  %907 = vst.msk [vmem:[#allocation0 + $0x515] ss:$-183 sm:$0xc] %vm130_vm6, %v902_v28   ;;  %v1586_v35 = vsel %vm157_vm1, %v1584_v30, %v1582_v29  ;;  %v933_v36 = vpop.permute.xlu0 %932  }
  0xf4   :  { %909 = vst.msk [vmem:[#allocation0 + $0x524] ss:$-188 sm:$0x30] %vm130_vm6, %v902_v28   ;;  %v1595_v31 = vld [vmem:[#allocation1 + $0x36] ss:$-11 sm:$0x1f]   ;;  %1557 = vrot.lane.b32.xlu0 %v1556_v27, %s3854_s19  ;;  %v977_v40 = vpop.permute.xlu1 %976  }
  0xf5   :  { %v1620_v33 = vld [vmem:[#allocation1 + $0x5] ss:$44 sm:%s1619_s17]   ;;  %v1622_v34 = vld [vmem:[#allocation1 + $0x3c] ss:$-11 sm:$0x1c]   ;;  %s3855_s20 = smov 22  }
  0xf6   :  { %950 = vst.msk [vmem:[#allocation0 + $0xa0] ss:$742 sm:$0x3] %vm130_vm6, %v947_v32   ;;  %952 = vst.msk [vmem:[#allocation0 + $0x438] ss:$-183 sm:$0xc] %vm130_vm6, %v947_v32   ;;  %1596 = vrot.lane.b32.xlu1 %v1595_v31, %s3855_s20  ;;  %v1624_v39 = vsel %vm157_vm1, %v1622_v34, %v1620_v33 }
  0xf7   :  { %954 = vst.msk [vmem:[#allocation0 + $0x153] sm:$0x10] %vm130_vm6, %v947_v32   ;;  %v1604_v37 = vld [vmem:[#allocation1 + $0x18] ss:$-11 sm:$0x7]   ;;  %s3856_s21 = smov 23   ;;  %v962_v44 = vpop.permute.xlu0 %961  }
  0xf8   :  { %v1606_v38 = vld [vmem:[#allocation1 + $0x5a] ss:$-11 sm:$0x38]   ;;  %936 = vst.msk [vmem:[#allocation0 + $0x1e1] ss:$-188 sm:$0x7] %vm130_vm6, %v933_v36   ;;  %1587 = vrot.lane.b32.xlu0 %v1586_v35, %s3856_s21  ;;  %v1001_v48 = vpop.permute.xlu1 %1000  }
  0xf9   :  { %938 = vst.msk [vmem:[#allocation0 + $0x588] ss:$-188 sm:$0x18] %vm130_vm6, %v933_v36   ;;  %v1648_v41 = vld [vmem:[#allocation1 + $0x16] ss:$-11 sm:$0x7]   ;;  %v1608_v43 = vsel %vm974_vm5, %v1606_v38, %v1604_v37 }
  0xfa   :  { %v1650_v42 = vld [vmem:[#allocation1 + $0x58] ss:$-11 sm:$0x38]   ;;  %980 = vst.msk [vmem:[#allocation0 + $0x1c0] ss:$-188 sm:$0x7] %vm130_vm6, %v977_v40  }
  0xfb   :  { %982 = vst.msk [vmem:[#allocation0 + $0x60f] ss:$-183 sm:$0x18] %vm130_vm6, %v977_v40   ;;  %984 = vst.msk [vmem:[#allocation0 + $0x272] sm:$0x20] %vm130_vm6, %v977_v40   ;;  %s3857_s22 = smov 20   ;;  %v1652_v47 = vsel %vm974_vm5, %v1650_v42, %v1648_v41  ;;  %v988_v52 = vpop.permute.xlu0 %987  }
  0xfc   :  { %1625 = vrot.lane.b32.xlu1 %v1624_v39, %s3857_s22  ;;  %v1633_v45 = vld [vmem:[#allocation1 + $0x29] ss:$-11 sm:$0xf]   ;;  %v1635_v46 = vld [vmem:[#allocation1 + $0x30] sm:$0x10]   ;;  %s1661_s23 = smov 3  ;;  %v1026_v56 = vpop.permute.xlu1 %1025  }
  0xfd   :  { %965 = vst.msk [vmem:[#allocation0 + $0x301] ss:$-188 sm:$0x7] %vm130_vm6, %v962_v44   ;;  %967 = vst.msk [vmem:[#allocation0 + $0x306] ss:$-188 sm:$0x18] %vm130_vm6, %v962_v44   ;;  %v1637_v51 = vsel %vm998_vm7, %v1635_v46, %v1633_v45 }
  0xfe   :  { %969 = vst.msk [vmem:[#allocation0 + $0x3b3] sm:$0x20] %vm130_vm6, %v962_v44   ;;  %s3858_s24 = smov 21   ;;  %v1677_v49 = vld [vmem:[#allocation1 + $0x27] ss:$-11 sm:$0xf]  }
  0xff   :  { %1609 = vrot.lane.b32.xlu0 %v1608_v43, %s3858_s24  ;;  %v1679_v50 = vld [vmem:[#allocation1 + $0x2e] sm:$0x10]   ;;  %1004 = vst.msk [vmem:[#allocation0 + $0x2e0] ss:$-188 sm:$0x7] %vm130_vm6, %v1001_v48   ;;  %s1704_s25 = smov 3  ;;  %v1015_v60 = vpop.permute.xlu0 %1014  }
 0x100   :  { %1006 = vst.msk [vmem:[#allocation0 - $0x801] ss:$742 sm:$0x18] %vm130_vm6, %v1001_v48   ;;  %s3859_s26 = smov 18   ;;  %v1662_v53 = vld [vmem:[#allocation1 + $0x3] ss:$55 sm:%s1661_s23]   ;;  %v1681_v55 = vsel %vm998_vm7, %v1679_v50, %v1677_v49  ;;  %v1056_v0 = vpop.permute.xlu1 %1055  }
 0x101   :  { %1653 = vrot.lane.b32.xlu1 %v1652_v47, %s3859_s26  ;;  %v1664_v54 = vld [vmem:[#allocation1 + $0x45] ss:$-11 sm:$0x3c]   ;;  %991 = vst.msk [vmem:[#allocation0 + $0x365] ss:$-188 sm:$0x3] %vm130_vm6, %v988_v52  }
 0x102   :  { %993 = vst.msk [vmem:[#allocation0 + $0x36a] ss:$-188 sm:$0x1c] %vm130_vm6, %v988_v52   ;;  %s1690_s27 = smov 3  ;;  %s3860_s28 = smov 19   ;;  %v1666_v59 = vsel %vm198_vm2, %v1664_v54, %v1662_v53  ;;  %vm1833_vm5 = vcmask 89152  }
 0x103   :  { %1638 = vrot.lane.b32.xlu0 %v1637_v51, %s3860_s28  ;;  %v1705_v57 = vld [vmem:[#allocation1 + $0x1] ss:$55 sm:%s1704_s25]   ;;  %1029 = vst.msk [vmem:[#allocation0 + $0x344] ss:$-188 sm:$0x3] %vm130_vm6, %v1026_v56   ;;  %s1736_s29 = smov 3  ;;  %v1040_v4 = vpop.permute.xlu0 %1039  }
 0x104   :  { %v1707_v58 = vld [vmem:[#allocation1 + $0x43] ss:$-11 sm:$0x3c]   ;;  %1031 = vst.msk [vmem:[#allocation0 + $0x349] ss:$-188 sm:$0x1c] %vm130_vm6, %v1026_v56   ;;  %v1087_v8 = vpop.permute.xlu1 %1086  }
 0x105   :  { %s3861_s30 = smov 16   ;;  %v1691_v61 = vld [vmem:[#allocation1 + $0x14] ss:$-11 sm:%s1690_s27]   ;;  %v1693_v62 = vld [vmem:[#allocation1 + $0x4b] ss:$-11 sm:$0x1c]   ;;  %v1709_v63 = vsel %vm198_vm2, %v1707_v58, %v1705_v57 }
 0x106   :  { %1682 = vrot.lane.b32.xlu1 %v1681_v55, %s3861_s30  ;;  %1018 = vst.msk [vmem:[#allocation0 + $0xe3] ss:$-188 sm:$0x3] %vm130_vm6, %v1015_v60   ;;  %1020 = vst.msk [vmem:[#allocation0 + $0x537] ss:$-183 sm:$0xc] %vm130_vm6, %v1015_v60   ;;  %v1695_v3 = vsel %vm157_vm1, %v1693_v62, %v1691_v61 }
 0x107   :  { %1022 = vst.msk [vmem:[#allocation0 + $0x546] ss:$-188 sm:$0x30] %vm130_vm6, %v1015_v60   ;;  %s1722_s2 = smov 48  ;;  %s3862_s3 = smov 17   ;;  %v1071_v10 = vpop.permute.xlu0 %1070   ;;  %vm1828_vm2 = vcmask 64512  }
 0x108   :  { %1667 = vrot.lane.b32.xlu0 %v1666_v59, %s3862_s3  ;;  %v1737_v1 = vld [vmem:[#allocation1 + $0x12] ss:$-11 sm:%s1736_s29]   ;;  %v1739_v2 = vld [vmem:[#allocation1 + $0x49] ss:$-11 sm:$0x1c]   ;;  %s3863_s4 = smov 14   ;;  %v1114_v11 = vpop.permute.xlu1 %1113  }
 0x109   :  { %1059 = vst.msk [vmem:[#allocation0 + $0xc2] ss:$-188 sm:$0x3] %vm130_vm6, %v1056_v0   ;;  %1061 = vst.msk [vmem:[#allocation0 + $0x516] ss:$-183 sm:$0xc] %vm130_vm6, %v1056_v0   ;;  %v1741_v7 = vsel %vm157_vm1, %v1739_v2, %v1737_v1 }
 0x10a   :  { %1063 = vst.msk [vmem:[#allocation0 + $0x525] ss:$-188 sm:$0x30] %vm130_vm6, %v1056_v0   ;;  %1710 = vrot.lane.b32.xlu1 %v1709_v63, %s3863_s4  ;;  %v1720_v5 = vld [vmem:[#allocation1 + $0x25] ss:$-11 sm:$0xf]  }
 0x10b   :  { %v1723_v6 = vld [vmem:[#allocation1 + $0x67] ss:$-11 sm:%s1722_s2]   ;;  %1043 = vst.msk [vmem:[#allocation0 + $0x203] ss:$-188 sm:$0x3] %vm130_vm6, %v1040_v4   ;;  %s3864_s5 = smov 15   ;;  %v1101_v13 = vpop.permute.xlu0 %1100  }
 0x10c   :  { %1045 = vst.msk [vmem:[#allocation0 - $0x53c] ss:$742 sm:$0xc] %vm130_vm6, %v1040_v4   ;;  %1047 = vst.msk [vmem:[#allocation0 + $0x2b6] sm:$0x10] %vm130_vm6, %v1040_v4   ;;  %1696 = vrot.lane.b32.xlu0 %v1695_v3, %s3864_s5  ;;  %v1725_v9 = vsel %vm141_vm0, %v1723_v6, %v1720_v5  ;;  %s3865_s6 = smov 12   ;;  %v1143_v14 = vpop.permute.xlu1 %1142  }
 0x10d   :  { %1090 = vst.msk [vmem:[#allocation0 + $0x1e2] ss:$-188 sm:$0x7] %vm130_vm6, %v1087_v8   ;;  %1092 = vst.msk [vmem:[#allocation0 + $0x589] ss:$-188 sm:$0x18] %vm130_vm6, %v1087_v8  }
 0x10e   :  { %1742 = vrot.lane.b32.xlu1 %v1741_v7, %s3865_s6  ;;  %1074 = vst.msk [vmem:[#allocation0 + $0x323] ss:$-188 sm:$0x3] %vm130_vm6, %v1071_v10   ;;  %1076 = vst.msk [vmem:[#allocation0 + $0x328] ss:$-188 sm:$0x1c] %vm130_vm6, %v1071_v10  }
 0x10f   :  { %1078 = vst.msk [vmem:[#allocation0 + $0x3d5] sm:$0x20] %vm130_vm6, %v1071_v10   ;;  %s3866_s7 = smov 13   ;;  %1117 = vst.msk [vmem:[#allocation0 + $0x302] ss:$-188 sm:$0x7] %vm130_vm6, %v1114_v11   ;;  %v1129_v15 = vpop.permute.xlu0 %1128  }
 0x110   :  { %1726 = vrot.lane.b32.xlu0 %v1725_v9, %s3866_s7  ;;  %1119 = vst.msk [vmem:[#allocation0 + $0x307] ss:$-188 sm:$0x18] %vm130_vm6, %v1114_v11   ;;  %1121 = vst.msk [vmem:[#allocation0 + $0x3b4] sm:$0x20] %vm130_vm6, %v1114_v11   ;;  %s3867_s8 = smov 11   ;;  %v1171_v16 = vpop.permute.xlu1 %1170  }
 0x111   :  { %v1752_v12 = vld [vmem:[#allocation1 + $0x36] ss:$-11 sm:$0x1f]   ;;  %1104 = vst.msk [vmem:[#allocation0 + $0xa1] ss:$742 sm:$0x3] %vm130_vm6, %v1101_v13  }
 0x112   :  { %1106 = vst.msk [vmem:[#allocation0 + $0x448] ss:$-188 sm:$0x1c] %vm130_vm6, %v1101_v13   ;;  %1146 = vst.msk [vmem:[#allocation0 + $0x80] ss:$742 sm:$0x3] %vm130_vm6, %v1143_v14  }
 0x113   :  { %1148 = vst.msk [vmem:[#allocation0 + $0x418] ss:$-183 sm:$0xc] %vm130_vm6, %v1143_v14   ;;  %1150 = vst.msk [vmem:[#allocation0 + $0x133] sm:$0x10] %vm130_vm6, %v1143_v14   ;;  %v1158_v17 = vpop.permute.xlu0 %1157   ;;  %vm1778_vm0 = vcmask 80896  }
 0x114   :  { %1753 = vrot.lane.b32.xlu0 %v1752_v12, %s3867_s8  ;;  %1132 = vst.msk [vmem:[#allocation0 + $0x1c1] ss:$-188 sm:$0x7] %vm130_vm6, %v1129_v15   ;;  %1134 = vst.msk [vmem:[#allocation0 + $0x624] ss:$-188 sm:$0x38] %vm130_vm6, %v1129_v15   ;;  %v1195_v18 = vpop.permute.xlu1 %1194  }
 0x115   :  { %1174 = vst.msk [vmem:[#allocation0 + $0x1a0] ss:$-188 sm:$0x7] %vm130_vm6, %v1171_v16   ;;  %1176 = vst.msk [vmem:[#allocation0 + $0x5ef] ss:$-183 sm:$0x18] %vm130_vm6, %v1171_v16  }
 0x116   :  { %1178 = vst.msk [vmem:[#allocation0 + $0x252] sm:$0x20] %vm130_vm6, %v1171_v16   ;;  %1161 = vst.msk [vmem:[#allocation0 + $0x2e1] ss:$-188 sm:$0x7] %vm130_vm6, %v1158_v17   ;;  %vm1785_vm1 = vcmask 89168  }
 0x117   :  { %1163 = vst.msk [vmem:[#allocation0 - $0x800] ss:$742 sm:$0x18] %vm130_vm6, %v1158_v17   ;;  %1198 = vst.msk [vmem:[#allocation0 + $0x2c0] ss:$-188 sm:$0x7] %vm130_vm6, %v1195_v18   ;;  %v1182_v19 = vpop.permute.xlu0 %1181  }
 0x118   :  { %1200 = vst.msk [vmem:[#allocation0 - $0x821] ss:$742 sm:$0x18] %vm130_vm6, %v1195_v18   ;;  %1185 = vst.msk [vmem:[#allocation0 + $0x345] ss:$-188 sm:$0x3] %vm130_vm6, %v1182_v19   ;;  %v1220_v20 = vpop.permute.xlu1 %1219  }
 0x119   :  { %1187 = vst.msk [vmem:[#allocation0 + $0x34a] ss:$-188 sm:$0x1c] %vm130_vm6, %v1182_v19   ;;  %1223 = vst.msk [vmem:[#allocation0 + $0x3e0] ss:$-188 sm:$0x7] %vm130_vm6, %v1220_v20  }
 0x11a   :  { %1225 = vst.msk [vmem:[#allocation0 + $0x3e5] ss:$-188 sm:$0x38] %vm130_vm6, %v1220_v20   ;;  %vm1810_vm7 = vcmask 72704   ;;  %vm1893_vm10 = vcmask 89136   ;;  %vm1854_vm11 = vcmask 56320  }
 0x11b   :  { %v1209_v21 = vpop.permute.xlu0 %1208   ;;  %vm1861_vm12 = vcmask 89144   ;;  %vm1948_vm13 = vcmask 31744   ;;  %vm1953_vm14 = vcmask 89120   ;;  %vm1916_vm15 = vcmask 39936   ;;  %v2142_v8 = vld [vmem:[#allocation0 + $0x68] sm:$0xff]  ;;  %v2464_v12 = vld [vmem:[#allocation0 + $0x1d8] sm:$0xff] }
 0x11c   :  { %1212 = vst.msk [vmem:[#allocation0 + $0xc3] ss:$-188 sm:$0x3] %vm130_vm6, %v1209_v21   ;;  %1214 = vst.msk [vmem:[#allocation0 + $0x517] ss:$-183 sm:$0xc] %vm130_vm6, %v1209_v21   ;;  %v1250_v22 = vpop.permute.xlu1 %1249  }
 0x11d   :  { %1216 = vst.msk [vmem:[#allocation0 + $0x526] ss:$-188 sm:$0x30] %vm130_vm6, %v1209_v21   ;;  %1253 = vst.msk [vmem:[#allocation0 + $0xa2] ss:$742 sm:$0x3] %vm130_vm6, %v1250_v22  }
 0x11e   :  { %1255 = vst.msk [vmem:[#allocation0 + $0x449] ss:$-188 sm:$0x1c] %vm130_vm6, %v1250_v22   ;;  %vm1923_vm3 = vcmask 89128   ;;  %vm2008_vm4 = vcmask 15360   ;;  %v4302_v17 = vld [vmem:[#allocation0 + $0x1a8] sm:$0xff] }
 0x11f   :  { %v1234_v23 = vpop.permute.xlu0 %1233  }
 0x120   :  { %1237 = vst.msk [vmem:[#allocation0 + $0x1e3] ss:$-188 sm:$0x3] %vm130_vm6, %v1234_v23   ;;  %1239 = vst.msk [vmem:[#allocation0 - $0x55c] ss:$742 sm:$0xc] %vm130_vm6, %v1234_v23   ;;  %v1278_v24 = vpop.permute.xlu1 %1277  }
 0x121   :  { %1241 = vst.msk [vmem:[#allocation0 + $0x296] sm:$0x10] %vm130_vm6, %v1234_v23   ;;  %1281 = vst.msk [vmem:[#allocation0 + $0x1c2] ss:$-188 sm:$0x7] %vm130_vm6, %v1278_v24  }
 0x122   :  { %1283 = vst.msk [vmem:[#allocation0 + $0x625] ss:$-188 sm:$0x38] %vm130_vm6, %v1278_v24   ;;  %v4304_v24 = vld [vmem:[#allocation0 + $0x318] sm:$0xff] }
 0x123   :  { %v1263_v25 = vpop.permute.xlu0 %1262  }
 0x124   :  { %1266 = vst.msk [vmem:[#allocation0 + $0x303] ss:$-188 sm:$0x3] %vm130_vm6, %v1263_v25   ;;  %1268 = vst.msk [vmem:[#allocation0 + $0x308] ss:$-188 sm:$0x1c] %vm130_vm6, %v1263_v25   ;;  %v1305_v26 = vpop.permute.xlu1 %1304  }
 0x125   :  { %1270 = vst.msk [vmem:[#allocation0 + $0x3b5] sm:$0x20] %vm130_vm6, %v1263_v25   ;;  %1308 = vst.msk [vmem:[#allocation0 + $0x2e2] ss:$-188 sm:$0x7] %vm130_vm6, %v1305_v26   ;;  %v4306_v25 = vld [vmem:[#allocation0 + $0x3d8] sm:$0xff] }
 0x126   :  { %1310 = vst.msk [vmem:[#allocation0 - $0x7ff] ss:$742 sm:$0x18] %vm130_vm6, %v1305_v26  }
 0x127   :  { %v1292_v27 = vpop.permute.xlu0 %1291  }
 0x128   :  { %1295 = vst.msk [vmem:[#allocation0 + $0x81] ss:$742 sm:$0x3] %vm130_vm6, %v1292_v27   ;;  %1297 = vst.msk [vmem:[#allocation0 + $0x428] ss:$-188 sm:$0x1c] %vm130_vm6, %v1292_v27   ;;  %v1332_v28 = vpop.permute.xlu1 %1331  }
 0x129   :  { %1335 = vst.msk [vmem:[#allocation0 + $0x60] ss:$742 sm:$0x3] %vm130_vm6, %v1332_v28   ;;  %1337 = vst.msk [vmem:[#allocation0 + $0x3f8] ss:$-183 sm:$0xc] %vm130_vm6, %v1332_v28  }
 0x12a   :  { %1339 = vst.msk [vmem:[#allocation0 + $0x113] sm:$0x10] %vm130_vm6, %v1332_v28   ;;  %v2632_v13 = vld [vmem:[#allocation0 + $0x298] sm:$0xff] }
 0x12b   :  { %v1318_v29 = vpop.permute.xlu0 %1317  }
 0x12c   :  { %1321 = vst.msk [vmem:[#allocation0 + $0x1a1] ss:$-188 sm:$0x7] %vm130_vm6, %v1318_v29   ;;  %1323 = vst.msk [vmem:[#allocation0 + $0x604] ss:$-188 sm:$0x38] %vm130_vm6, %v1318_v29   ;;  %v1360_v30 = vpop.permute.xlu1 %1359  }
 0x12d   :  { %1363 = vst.msk [vmem:[#allocation0 + $0x180] ss:$-188 sm:$0x7] %vm130_vm6, %v1360_v30   ;;  %1365 = vst.msk [vmem:[#allocation0 + $0x5cf] ss:$-183 sm:$0x18] %vm130_vm6, %v1360_v30  }
 0x12e   :  { %1367 = vst.msk [vmem:[#allocation0 + $0x232] sm:$0x20] %vm130_vm6, %v1360_v30  }
 0x12f   :  { %v1347_v31 = vpop.permute.xlu0 %1346  }
 0x130   :  { %1350 = vst.msk [vmem:[#allocation0 + $0x2c1] ss:$-188 sm:$0x7] %vm130_vm6, %v1347_v31   ;;  %1352 = vst.msk [vmem:[#allocation0 - $0x820] ss:$742 sm:$0x18] %vm130_vm6, %v1347_v31   ;;  %v1384_v32 = vpop.permute.xlu1 %1383  }
 0x131   :  { %1387 = vst.msk [vmem:[#allocation0 + $0x2a0] ss:$-188 sm:$0x7] %vm130_vm6, %v1384_v32   ;;  %1389 = vst.msk [vmem:[#allocation0 - $0x841] ss:$742 sm:$0x18] %vm130_vm6, %v1384_v32  }
 0x132   :  { %v2289_v14 = vld [vmem:[#allocation0 + $0x110] sm:$0xff]  ;;  %v4315_v32 = vld [vmem:[#allocation0 + $0xc8] sm:$0xff] }
 0x133   :  { %v1371_v33 = vpop.permute.xlu0 %1370  }
 0x134   :  { %1374 = vst.msk [vmem:[#allocation0 + $0x3e1] ss:$-188 sm:$0x7] %vm130_vm6, %v1371_v33   ;;  %1376 = vst.msk [vmem:[#allocation0 + $0x3e6] ss:$-188 sm:$0x38] %vm130_vm6, %v1371_v33   ;;  %v1407_v34 = vpop.permute.xlu1 %1406  }
 0x135   :  { %1410 = vst.msk [vmem:[#allocation0 + $0x3c0] ss:$-188 sm:$0x7] %vm130_vm6, %v1407_v34   ;;  %1412 = vst.msk [vmem:[#allocation0 + $0x3c5] ss:$-188 sm:$0x38] %vm130_vm6, %v1407_v34  }
 0x136   :  { %v4317_v33 = vld [vmem:[#allocation0] sm:$0xff] }
 0x137   :  { %v1398_v35 = vpop.permute.xlu0 %1397  }
 0x138   :  { %1401 = vst.msk [vmem:[#allocation0 + $0xa3] ss:$742 sm:$0x3] %vm130_vm6, %v1398_v35   ;;  %1403 = vst.msk [vmem:[#allocation0 + $0x44a] ss:$-188 sm:$0x1c] %vm130_vm6, %v1398_v35   ;;  %v1777_v36 = vpop.permute.xlu1 %1776  }
 0x139   :  { %1780 = vst.msk [vmem:[#allocation0 + $0x260] ss:$-188 sm:$0x7] %vm1778_vm0, %v1777_v36   ;;  %1782 = vst.msk [vmem:[#allocation0 - $0xab5] ss:$930 sm:$0x18] %vm1778_vm0, %v1777_v36  }
 0x13a   :  { %1784 = vst.msk [vmem:[#allocation0 + $0x312] sm:$0x20] %vm1778_vm0, %v1777_v36   ;;  %vm2015_vm0 = vcmask 89104  }
 0x13b   :  { %1787 = vst.msk [vmem:[#allocation0 + $0x260] ss:$-188 sm:$0x7] %vm1785_vm1, %v1777_v36   ;;  %1789 = vst.msk [vmem:[#allocation0 - $0xab5] ss:$930 sm:$0x18] %vm1785_vm1, %v1777_v36   ;;  %v1420_v37 = vpop.permute.xlu0 %1419  }
 0x13c   :  { %1791 = vst.msk [vmem:[#allocation0 + $0x312] sm:$0x20] %vm1785_vm1, %v1777_v36   ;;  %v1827_v38 = vpop.permute.xlu1 %1826   ;;  %vm1976_vm1 = vcmask 23552   ;;  %v2100_v18 = vld [vmem:[#allocation0 + $0x38] sm:$0xff] }
 0x13d   :  { %1423 = vst.msk [vmem:[#allocation0 + $0x1c3] ss:$-188 sm:$0x3] %vm130_vm6, %v1420_v37   ;;  %1425 = vst.msk [vmem:[#allocation0 - $0x6f4] ss:$930 sm:$0xc] %vm130_vm6, %v1420_v37  }
 0x13e   :  { %1427 = vst.msk [vmem:[#allocation0 + $0x626] ss:$-188 sm:$0x30] %vm130_vm6, %v1420_v37  }
 0x13f   :  { %1830 = vst.msk [vmem:[#allocation0 + $0x380] ss:$-188 sm:$0x7] %vm1828_vm2, %v1827_v38   ;;  %1832 = vst.msk [vmem:[#allocation0 + $0x385] ss:$-188 sm:$0x18] %vm1828_vm2, %v1827_v38   ;;  %v1809_v39 = vpop.permute.xlu0 %1808  }
 0x140   :  { %1835 = vst.msk [vmem:[#allocation0 + $0x380] ss:$-188 sm:$0x7] %vm1833_vm5, %v1827_v38   ;;  %1837 = vst.msk [vmem:[#allocation0 + $0x385] ss:$-188 sm:$0x18] %vm1833_vm5, %v1827_v38   ;;  %v1885_v40 = vpop.permute.xlu1 %1884  }
 0x141   :  { %1812 = vst.msk [vmem:[#allocation0 + $0x63] ss:$742 sm:$0x3] %vm1810_vm7, %v1809_v39   ;;  %1814 = vst.msk [vmem:[#allocation0 + $0x40a] ss:$-188 sm:$0x1c] %vm1810_vm7, %v1809_v39  }
 0x142   :  { %1817 = vst.msk [vmem:[#allocation0 + $0x63] ss:$742 sm:$0x3] %vm1815_vm8, %v1809_v39   ;;  %1819 = vst.msk [vmem:[#allocation0 + $0x40a] ss:$-188 sm:$0x1c] %vm1815_vm8, %v1809_v39  }
 0x143   :  { %1888 = vst.msk [vmem:[#allocation0 + $0x42] ss:$930 sm:$0x3] %vm1886_vm9, %v1885_v40   ;;  %1890 = vst.msk [vmem:[#allocation0 + $0x496] ss:$-183 sm:$0xc] %vm1886_vm9, %v1885_v40   ;;  %v1853_v41 = vpop.permute.xlu0 %1852  }
 0x144   :  { %1892 = vst.msk [vmem:[#allocation0 + $0x4a5] ss:$-188 sm:$0x30] %vm1886_vm9, %v1885_v40   ;;  %v1947_v42 = vpop.permute.xlu1 %1946   ;;  %vm1983_vm2 = vcmask 89112   ;;  %vm2040_vm5 = vcmask 7168   ;;  %vm2045_vm7 = vcmask 89096  }
 0x145   :  { %1895 = vst.msk [vmem:[#allocation0 + $0x42] ss:$930 sm:$0x3] %vm1893_vm10, %v1885_v40   ;;  %1897 = vst.msk [vmem:[#allocation0 + $0x496] ss:$-183 sm:$0xc] %vm1893_vm10, %v1885_v40  }
 0x146   :  { %1899 = vst.msk [vmem:[#allocation0 + $0x4a5] ss:$-188 sm:$0x30] %vm1893_vm10, %v1885_v40   ;;  %v2583_v56 = vld [vmem:[#allocation0 + $0x260] sm:$0xff]  ;;  %v2254_v19 = vld [vmem:[#allocation0 + $0xe8] sm:$0xff]  ;;  %v2541_v39 = vld [vmem:[#allocation0 + $0x230] sm:$0xff] }
 0x147   :  { %1856 = vst.msk [vmem:[#allocation0 + $0x183] ss:$-188 sm:$0x3] %vm1854_vm11, %v1853_v41   ;;  %1858 = vst.msk [vmem:[#allocation0 - $0x734] ss:$930 sm:$0xc] %vm1854_vm11, %v1853_v41   ;;  %v1915_v43 = vpop.permute.xlu0 %1914  }
 0x148   :  { %1860 = vst.msk [vmem:[#allocation0 + $0x5e6] ss:$-188 sm:$0x30] %vm1854_vm11, %v1853_v41   ;;  %v2007_v44 = vpop.permute.xlu1 %2006   ;;  %v2835_v61 = vld [vmem:[#allocation0 + $0x380] sm:$0xff] }
 0x149   :  { %1863 = vst.msk [vmem:[#allocation0 + $0x183] ss:$-188 sm:$0x3] %vm1861_vm12, %v1853_v41   ;;  %1865 = vst.msk [vmem:[#allocation0 - $0x734] ss:$930 sm:$0xc] %vm1861_vm12, %v1853_v41  }
 0x14a   :  { %1867 = vst.msk [vmem:[#allocation0 + $0x5e6] ss:$-188 sm:$0x30] %vm1861_vm12, %v1853_v41   ;;  %v4319_v41 = vld [vmem:[#allocation0 + $0x2f8] sm:$0xff] }
 0x14b   :  { %1950 = vst.msk [vmem:[#allocation0 + $0x162] ss:$-188 sm:$0x3] %vm1948_vm13, %v1947_v42   ;;  %1952 = vst.msk [vmem:[#allocation0 + $0x509] ss:$-188 sm:$0x1c] %vm1948_vm13, %v1947_v42   ;;  %v1975_v45 = vpop.permute.xlu0 %1974  }
 0x14c   :  { %1955 = vst.msk [vmem:[#allocation0 + $0x162] ss:$-188 sm:$0x3] %vm1953_vm14, %v1947_v42   ;;  %1957 = vst.msk [vmem:[#allocation0 + $0x509] ss:$-188 sm:$0x1c] %vm1953_vm14, %v1947_v42   ;;  %v1436_v46 = vpop.permute.xlu1 %1435  }
 0x14d   :  { %1918 = vst.msk [vmem:[#allocation0 + $0x2a3] ss:$-188 sm:$0x3] %vm1916_vm15, %v1915_v43   ;;  %1920 = vst.msk [vmem:[#allocation0 + $0x2a8] ss:$-188 sm:$0xc] %vm1916_vm15, %v1915_v43  }
 0x14e   :  { %1922 = vst.msk [vmem:[#allocation0 + $0x356] sm:$0x10] %vm1916_vm15, %v1915_v43   ;;  %v4321_v42 = vld [vmem:[#allocation0 + $0x188] sm:$0xff] }
 0x14f   :  { %1925 = vst.msk [vmem:[#allocation0 + $0x2a3] ss:$-188 sm:$0x3] %vm1923_vm3, %v1915_v43   ;;  %1927 = vst.msk [vmem:[#allocation0 + $0x2a8] ss:$-188 sm:$0xc] %vm1923_vm3, %v1915_v43  }
 0x150   :  { %1929 = vst.msk [vmem:[#allocation0 + $0x356] sm:$0x10] %vm1923_vm3, %v1915_v43   ;;  %v2039_v47 = vpop.permute.xlu0 %2038   ;;  %v2065_v3 = vld [vmem:[#allocation0 + $0x10] sm:$0xff]  ;;  %v4323_v43 = vld [vmem:[#allocation0 + $0x3b8] sm:$0xff] }
 0x151   :  { %2010 = vst.msk [vmem:[#allocation0 + $0x282] ss:$-188 sm:$0x7] %vm2008_vm4, %v2007_v44   ;;  %2012 = vst.msk [vmem:[#allocation0 - $0xa93] ss:$930 sm:$0x18] %vm2008_vm4, %v2007_v44  }
 0x152   :  { %2014 = vst.msk [vmem:[#allocation0 + $0x334] sm:$0x20] %vm2008_vm4, %v2007_v44   ;;  %v1464_v48 = vpop.permute.xlu1 %1463  }
 0x153   :  { %2017 = vst.msk [vmem:[#allocation0 + $0x282] ss:$-188 sm:$0x7] %vm2015_vm0, %v2007_v44   ;;  %2019 = vst.msk [vmem:[#allocation0 - $0xa93] ss:$930 sm:$0x18] %vm2015_vm0, %v2007_v44  }
 0x154   :  { %2021 = vst.msk [vmem:[#allocation0 + $0x334] sm:$0x20] %vm2015_vm0, %v2007_v44   ;;  %v1449_v49 = vpop.permute.xlu0 %1448  }
 0x155   :  { %1978 = vst.msk [vmem:[#allocation0 + $0x21] ss:$930 sm:$0x3] %vm1976_vm1, %v1975_v45   ;;  %1980 = vst.msk [vmem:[#allocation0 + $0x475] ss:$-183 sm:$0xc] %vm1976_vm1, %v1975_v45  }
 0x156   :  { %1982 = vst.msk [vmem:[#allocation0 + $0x484] ss:$-188 sm:$0x30] %vm1976_vm1, %v1975_v45   ;;  %v2317_v9 = vld [vmem:[#allocation0 + $0x130] sm:$0xff] }
 0x157   :  { %1985 = vst.msk [vmem:[#allocation0 + $0x21] ss:$930 sm:$0x3] %vm1983_vm2, %v1975_v45   ;;  %1987 = vst.msk [vmem:[#allocation0 + $0x475] ss:$-183 sm:$0xc] %vm1983_vm2, %v1975_v45   ;;  %v1491_v50 = vpop.permute.xlu1 %1490  }
 0x158   :  { %1989 = vst.msk [vmem:[#allocation0 + $0x484] ss:$-188 sm:$0x30] %vm1983_vm2, %v1975_v45   ;;  %v1478_v51 = vpop.permute.xlu0 %1477  }
 0x159   :  { %1439 = vst.msk [vmem:[#allocation0 + $0x82] ss:$742 sm:$0x3] %vm130_vm6, %v1436_v46   ;;  %1441 = vst.msk [vmem:[#allocation0 + $0x429] ss:$-188 sm:$0x1c] %vm130_vm6, %v1436_v46  }
 0x15a   :  { %2042 = vst.msk [vmem:[#allocation0 + $0x141] ss:$-188 sm:$0x3] %vm2040_vm5, %v2039_v47   ;;  %2044 = vst.msk [vmem:[#allocation0 + $0x4e8] ss:$-188 sm:$0x1c] %vm2040_vm5, %v2039_v47  }
 0x15b   :  { %2047 = vst.msk [vmem:[#allocation0 + $0x141] ss:$-188 sm:$0x3] %vm2045_vm7, %v2039_v47   ;;  %2049 = vst.msk [vmem:[#allocation0 + $0x4e8] ss:$-188 sm:$0x1c] %vm2045_vm7, %v2039_v47  }
 0x15c   :  { %1467 = vst.msk [vmem:[#allocation0 + $0x1a2] ss:$-188 sm:$0x7] %vm130_vm6, %v1464_v48   ;;  %1469 = vst.msk [vmem:[#allocation0 + $0x605] ss:$-188 sm:$0x38] %vm130_vm6, %v1464_v48   ;;  %v1518_v52 = vpop.permute.xlu1 %1517  }
 0x15d   :  { %1452 = vst.msk [vmem:[#allocation0 + $0x2e3] ss:$-188 sm:$0x3] %vm130_vm6, %v1449_v49   ;;  %1454 = vst.msk [vmem:[#allocation0 + $0x2e8] ss:$-188 sm:$0xc] %vm130_vm6, %v1449_v49  }
 0x15e   :  { %1456 = vst.msk [vmem:[#allocation0 + $0x396] sm:$0x10] %vm130_vm6, %v1449_v49   ;;  %1494 = vst.msk [vmem:[#allocation0 + $0x2c2] ss:$-188 sm:$0x7] %vm130_vm6, %v1491_v50   ;;  %v1504_v53 = vpop.permute.xlu0 %1503   ;;  %v4308_v26 = vld [vmem:[#allocation0 + $0x250] sm:$0xff] }
 0x15f   :  { %1496 = vst.msk [vmem:[#allocation0 - $0x81f] ss:$742 sm:$0x18] %vm130_vm6, %v1491_v50   ;;  %1481 = vst.msk [vmem:[#allocation0 + $0x61] ss:$742 sm:$0x3] %vm130_vm6, %v1478_v51  }
 0x160   :  { %1483 = vst.msk [vmem:[#allocation0 + $0x408] ss:$-188 sm:$0x1c] %vm130_vm6, %v1478_v51   ;;  %1521 = vst.msk [vmem:[#allocation0 + $0x40] ss:$930 sm:$0x3] %vm130_vm6, %v1518_v52   ;;  %v1547_v54 = vpop.permute.xlu1 %1546  }
 0x161   :  { %1523 = vst.msk [vmem:[#allocation0 + $0x49e] ss:$-188 sm:$0xc] %vm130_vm6, %v1518_v52   ;;  %1525 = vst.msk [vmem:[#allocation0 + $0x4a3] ss:$-188 sm:$0x30] %vm130_vm6, %v1518_v52  }
 0x162   :  { %1507 = vst.msk [vmem:[#allocation0 + $0x181] ss:$-188 sm:$0x7] %vm130_vm6, %v1504_v53   ;;  %1509 = vst.msk [vmem:[#allocation0 + $0x5e4] ss:$-188 sm:$0x38] %vm130_vm6, %v1504_v53   ;;  %v1533_v55 = vpop.permute.xlu0 %1532  }
 0x163   :  { %1550 = vst.msk [vmem:[#allocation0 + $0x160] ss:$-188 sm:$0x3] %vm130_vm6, %v1547_v54   ;;  %1552 = vst.msk [vmem:[#allocation0 + $0x4f8] ss:$-183 sm:$0xc] %vm130_vm6, %v1547_v54  }
 0x164   :  { %1554 = vst.msk [vmem:[#allocation0 + $0x213] sm:$0x10] %vm130_vm6, %v1547_v54   ;;  %1536 = vst.msk [vmem:[#allocation0 + $0x2a1] ss:$-188 sm:$0x7] %vm130_vm6, %v1533_v55   ;;  %v1572_v58 = vpop.permute.xlu1 %1571   ;;  %v4338_v50 = vld [vmem:[#allocation0 + $0x98] sm:$0xff] }
 0x165   :  { %1538 = vst.msk [vmem:[#allocation0 - $0x840] ss:$742 sm:$0x18] %vm130_vm6, %v1533_v55   ;;  %1575 = vst.msk [vmem:[#allocation0 + $0x280] ss:$-188 sm:$0x7] %vm130_vm6, %v1572_v58  }
 0x166   :  { %1577 = vst.msk [vmem:[#allocation0 - $0xa95] ss:$930 sm:$0x18] %vm130_vm6, %v1572_v58   ;;  %1579 = vst.msk [vmem:[#allocation0 + $0x332] sm:$0x20] %vm130_vm6, %v1572_v58   ;;  %v1558_v60 = vpop.permute.xlu0 %1557   ;;  %v2779_v15 = vld [vmem:[#allocation0 + $0x340] sm:$0xff] }
 0x167   :  { %1561 = vst.msk [vmem:[#allocation0 + $0x3c1] ss:$-188 sm:$0x7] %vm130_vm6, %v1558_v60   ;;  %1563 = vst.msk [vmem:[#allocation0 + $0x3c6] ss:$-188 sm:$0x38] %vm130_vm6, %v1558_v60  }
 0x168   :  { %v2590_v57 = vld [vmem:[#allocation0 + $0x268] sm:$0xff]  ;;  %v1597_v63 = vpop.permute.xlu1 %1596   ;;  %v4340_v51 = vld [vmem:[#allocation0 + $0x158] sm:$0xff] }
 0x169   :  { %v3421_v59 = vpack.c.bf16 %v2590_v57, %v2583_v56  ;;  %1600 = vst.msk [vmem:[#allocation0 + $0x3a0] ss:$-188 sm:$0x7] %vm130_vm6, %v1597_v63   ;;  %1602 = vst.msk [vmem:[#allocation0 + $0x3a5] ss:$-188 sm:$0x18] %vm130_vm6, %v1597_v63  }
 0x16a   :  { %v2842_v62 = vld [vmem:[#allocation0 + $0x388] sm:$0xff]  ;;  %v1588_v1 = vpop.permute.xlu0 %1587  }
 0x16b   :  { %3588 = vst [vmem:[%s4597_s1 + $0x130] sm:$0xff] %v3421_v59   ;;  %v3511_v0 = vpack.c.bf16 %v2842_v62, %v2835_v61  ;;  %1591 = vst.msk [vmem:[#allocation0 + $0x83] ss:$742 sm:$0x3] %vm130_vm6, %v1588_v1   ;;  %v4342_v52 = vld [vmem:[#allocation0 + $0x208] sm:$0xff] }
 0x16c   :  { %1593 = vst.msk [vmem:[#allocation0 + $0x42a] ss:$-188 sm:$0x1c] %vm130_vm6, %v1588_v1   ;;  %v4353_v60 = vld [vmem:[#allocation0 + $0x2c8] sm:$0xff] }
 0x16d   :  { %3606 = vst [vmem:[%s4597_s1 + $0x1c0] sm:$0xff] %v3511_v0  }
 0x16e   :  { %v1626_v2 = vpop.permute.xlu1 %1625   ;;  %v2072_v4 = vld [vmem:[#allocation0 + $0x18] sm:$0xff] }
 0x16f   :  { %1629 = vst.msk [vmem:[#allocation0 + $0x62] ss:$742 sm:$0x3] %vm130_vm6, %v1626_v2   ;;  %1631 = vst.msk [vmem:[#allocation0 + $0x409] ss:$-188 sm:$0x1c] %vm130_vm6, %v1626_v2   ;;  %v3236_v6 = vpack.c.bf16 %v2072_v4, %v2065_v3 }
 0x170   :  { %v4369_v3 = vld [vmem:[#allocation0 + $0x78] sm:$0xff]  ;;  %v4371_v4 = vld [vmem:[#allocation0 + $0x120] sm:$0xff] }
 0x171   :  { %v1610_v5 = vpop.permute.xlu0 %1609   ;;  %3551 = vst [vmem:[%s4597_s1 + $0x8] sm:$0xff] %v3236_v6  }
 0x172   :  { %1613 = vst.msk [vmem:[#allocation0 + $0x1a3] ss:$-188 sm:$0x3] %vm130_vm6, %v1610_v5   ;;  %1615 = vst.msk [vmem:[#allocation0 - $0x714] ss:$930 sm:$0xc] %vm130_vm6, %v1610_v5  }
 0x173   :  { %1617 = vst.msk [vmem:[#allocation0 + $0x606] ss:$-188 sm:$0x30] %vm130_vm6, %v1610_v5   ;;  %v1654_v7 = vpop.permute.xlu1 %1653   ;;  %v2324_v10 = vld [vmem:[#allocation0 + $0x138] sm:$0xff] }
 0x174   :  { %1657 = vst.msk [vmem:[#allocation0 + $0x182] ss:$-188 sm:$0x7] %vm130_vm6, %v1654_v7   ;;  %1659 = vst.msk [vmem:[#allocation0 + $0x5e5] ss:$-188 sm:$0x38] %vm130_vm6, %v1654_v7   ;;  %v3326_v16 = vpack.c.bf16 %v2324_v10, %v2317_v9 }
 0x175   :  { %v1639_v11 = vpop.permute.xlu0 %1638  }
 0x176   :  { %1642 = vst.msk [vmem:[#allocation0 + $0x2c3] ss:$-188 sm:$0x3] %vm130_vm6, %v1639_v11   ;;  %1644 = vst.msk [vmem:[#allocation0 + $0x2c8] ss:$-188 sm:$0xc] %vm130_vm6, %v1639_v11  }
 0x177   :  { %1646 = vst.msk [vmem:[#allocation0 + $0x376] sm:$0x10] %vm130_vm6, %v1639_v11   ;;  %v2786_v20 = vld [vmem:[#allocation0 + $0x348] sm:$0xff]  ;;  %v2135_v21 = vld [vmem:[#allocation0 + $0x60] sm:$0xff]  ;;  %v2296_v22 = vld [vmem:[#allocation0 + $0x118] sm:$0xff] }
 0x178   :  { %v1683_v23 = vpop.permute.xlu1 %1682   ;;  %v3491_v27 = vpack.c.bf16 %v2786_v20, %v2779_v15  ;;  %v2457_v28 = vld [vmem:[#allocation0 + $0x1d0] sm:$0xff]  ;;  %v3261_v30 = vpack.c.bf16 %v2142_v8, %v2135_v21  ;;  %v3316_v31 = vpack.c.bf16 %v2296_v22, %v2289_v14  ;;  %3569 = vst [vmem:[%s4597_s1 + $0x98] sm:$0xff] %v3326_v16   ;;  %v4387_v14 = vld [vmem:[#allocation0 + $0x2a8] sm:$0xff]  ;;  %v4403_v21 = vld [vmem:[#allocation0 + $0x1b8] sm:$0xff] }
 0x179   :  { %v2625_v29 = vld [vmem:[#allocation0 + $0x290] sm:$0xff]  ;;  %1686 = vst.msk [vmem:[#allocation0 + $0x2a2] ss:$-188 sm:$0x7] %vm130_vm6, %v1683_v23   ;;  %v2247_v35 = vld [vmem:[#allocation0 + $0xe0] sm:$0xff]  ;;  %v3376_v37 = vpack.c.bf16 %v2464_v12, %v2457_v28  ;;  %v4405_v22 = vld [vmem:[#allocation0 + $0x48] sm:$0xff] }
 0x17a   :  { %1688 = vst.msk [vmem:[#allocation0 - $0x83f] ss:$742 sm:$0x18] %vm130_vm6, %v1683_v23   ;;  %v2093_v34 = vld [vmem:[#allocation0 + $0x30] sm:$0xff]  ;;  %v2415_v36 = vld [vmem:[#allocation0 + $0x1a0] sm:$0xff]  ;;  %v3436_v38 = vpack.c.bf16 %v2632_v13, %v2625_v29  ;;  %v1668_v40 = vpop.permute.xlu0 %1667   ;;  %3602 = vst [vmem:[%s4597_s1 + $0x1a0] sm:$0xff] %v3491_v27   ;;  %v3301_v48 = vpack.c.bf16 %v2254_v19, %v2247_v35 }
 0x17b   :  { %v2576_v44 = vld [vmem:[#allocation0 + $0x258] sm:$0xff]  ;;  %v2737_v45 = vld [vmem:[#allocation0 + $0x310] sm:$0xff]  ;;  %v3246_v47 = vpack.c.bf16 %v2100_v18, %v2093_v34  ;;  %3556 = vst [vmem:[%s4597_s1 + $0x30] sm:$0xff] %v3261_v30   ;;  %3567 = vst [vmem:[%s4597_s1 + $0x88] sm:$0xff] %v3316_v31   ;;  %v3361_v49 = vpack.c.bf16 %v4302_v17, %v2415_v36 }
 0x17c   :  { %v2905_v46 = vld [vmem:[#allocation0 + $0x3d0] sm:$0xff]  ;;  %1671 = vst.msk [vmem:[#allocation0 + $0x41] ss:$930 sm:$0x3] %vm130_vm6, %v1668_v40   ;;  %v2548_v53 = vld [vmem:[#allocation0 + $0x238] sm:$0xff]  ;;  %v2059_v54 = vld [vmem:[#allocation0 + $0x8] sm:$0xff]  ;;  %v3416_v56 = vpack.c.bf16 %v2576_v44, %v4308_v26  ;;  %v3476_v57 = vpack.c.bf16 %v4304_v24, %v2737_v45  ;;  %v1711_v59 = vpop.permute.xlu1 %1710  }
 0x17d   :  { %1673 = vst.msk [vmem:[#allocation0 + $0x495] ss:$-183 sm:$0xc] %vm130_vm6, %v1668_v40   ;;  %1675 = vst.msk [vmem:[#allocation0 + $0x4a4] ss:$-188 sm:$0x30] %vm130_vm6, %v1668_v40   ;;  %v3536_v58 = vpack.c.bf16 %v4306_v25, %v2905_v46  ;;  %v3406_v61 = vpack.c.bf16 %v2548_v53, %v2541_v39  ;;  %v3231_v1 = vpack.c.bf16 %v2059_v54, %v4317_v33 }
 0x17e   :  { %v2219_v55 = vld [vmem:[#allocation0 + $0xc0] sm:$0xff]  ;;  %3579 = vst [vmem:[%s4597_s1 + $0xe8] sm:$0xff] %v3376_v37   ;;  %3591 = vst [vmem:[%s4597_s1 + $0x148] sm:$0xff] %v3436_v38   ;;  %v2709_v63 = vld [vmem:[#allocation0 + $0x2f0] sm:$0xff]  ;;  %v1697_v12 = vpop.permute.xlu0 %1696  }
 0x17f   :  { %v2387_v62 = vld [vmem:[#allocation0 + $0x180] sm:$0xff]  ;;  %v2877_v0 = vld [vmem:[#allocation0 + $0x3b0] sm:$0xff]  ;;  %3553 = vst [vmem:[%s4597_s1 + $0x18] sm:$0xff] %v3246_v47   ;;  %v3291_v2 = vpack.c.bf16 %v4315_v32, %v2219_v55  ;;  %3564 = vst [vmem:[%s4597_s1 + $0x70] sm:$0xff] %v3301_v48   ;;  %v3466_v9 = vpack.c.bf16 %v4319_v41, %v2709_v63 }
 0x180   :  { %3576 = vst [vmem:[%s4597_s1 + $0xd0] sm:$0xff] %v3361_v49   ;;  %1714 = vst.msk [vmem:[#allocation0 + $0x20] ss:$930 sm:$0x3] %vm130_vm6, %v1711_v59   ;;  %v2177_v5 = vld [vmem:[#allocation0 + $0x90] sm:$0xff]  ;;  %v3351_v7 = vpack.c.bf16 %v4321_v42, %v2387_v62  ;;  %v2499_v8 = vld [vmem:[#allocation0 + $0x200] sm:$0xff]  ;;  %v3526_v10 = vpack.c.bf16 %v4323_v43, %v2877_v0  ;;  %v1743_v28 = vpop.permute.xlu1 %1742  }
 0x181   :  { %1716 = vst.msk [vmem:[#allocation0 + $0x47e] ss:$-188 sm:$0xc] %vm130_vm6, %v1711_v59   ;;  %1718 = vst.msk [vmem:[#allocation0 + $0x483] ss:$-188 sm:$0x30] %vm130_vm6, %v1711_v59   ;;  %v3276_v18 = vpack.c.bf16 %v4338_v50, %v2177_v5  ;;  %v3391_v20 = vpack.c.bf16 %v4342_v52, %v2499_v8 }
 0x182   :  { %v2345_v6 = vld [vmem:[#allocation0 + $0x150] sm:$0xff]  ;;  %3587 = vst [vmem:[%s4597_s1 + $0x128] sm:$0xff] %v3416_v56   ;;  %3599 = vst [vmem:[%s4597_s1 + $0x188] sm:$0xff] %v3476_v57   ;;  %v4385_v13 = vld [vmem:[#allocation0 + $0x1e8] sm:$0xff]  ;;  %v1727_v46 = vpop.permute.xlu0 %1726  }
 0x183   :  { %3611 = vst [vmem:[%s4597_s1 + $0x1e8] sm:$0xff] %v3536_v58   ;;  %v2793_v11 = vld [vmem:[#allocation0 + $0x350] sm:$0xff]  ;;  %3585 = vst [vmem:[%s4597_s1 + $0x118] sm:$0xff] %v3406_v61   ;;  %v2667_v16 = vld [vmem:[#allocation0 + $0x2c0] sm:$0xff]  ;;  %v3336_v19 = vpack.c.bf16 %v4340_v51, %v2345_v6 }
 0x184   :  { %v2821_v15 = vld [vmem:[#allocation0 + $0x370] sm:$0xff]  ;;  %v2828_v17 = vld [vmem:[#allocation0 + $0x378] sm:$0xff]  ;;  %3232 = vst [vmem:[%s4597_s1] sm:$0xff] %v3231_v1   ;;  %3562 = vst [vmem:[%s4597_s1 + $0x60] sm:$0xff] %v3291_v2   ;;  %v3451_v26 = vpack.c.bf16 %v4353_v60, %v2667_v16 }
 0x185   :  { %1700 = vst.msk [vmem:[#allocation0 + $0x161] ss:$-188 sm:$0x3] %vm130_vm6, %v1697_v12   ;;  %1702 = vst.msk [vmem:[#allocation0 + $0x508] ss:$-188 sm:$0x1c] %vm130_vm6, %v1697_v12   ;;  %v3506_v27 = vpack.c.bf16 %v2828_v17, %v2821_v15 }
 0x186   :  { %v2800_v23 = vld [vmem:[#allocation0 + $0x358] sm:$0xff]  ;;  %v2149_v24 = vld [vmem:[#allocation0 + $0x70] sm:$0xff]  ;;  %v2310_v25 = vld [vmem:[#allocation0 + $0x128] sm:$0xff]  ;;  %3574 = vst [vmem:[%s4597_s1 + $0xc0] sm:$0xff] %v3351_v7   ;;  %v1754_v17 = vpop.permute.xlu0 %1753  }
 0x187   :  { %3597 = vst [vmem:[%s4597_s1 + $0x178] sm:$0xff] %v3466_v9   ;;  %3609 = vst [vmem:[%s4597_s1 + $0x1d8] sm:$0xff] %v3526_v10   ;;  %v4417_v29 = vld [vmem:[#allocation0 + $0x3e8] sm:$0xff]  ;;  %v4419_v30 = vld [vmem:[#allocation0 + $0x278] sm:$0xff]  ;;  %v3496_v32 = vpack.c.bf16 %v2800_v23, %v2793_v11  ;;  %v3266_v36 = vpack.c.bf16 %v4369_v3, %v2149_v24  ;;  %v3321_v37 = vpack.c.bf16 %v2310_v25, %v4371_v4 }
 0x188   :  { %v4421_v31 = vld [vmem:[#allocation0 + $0x328] sm:$0xff]  ;;  %v2471_v33 = vld [vmem:[#allocation0 + $0x1e0] sm:$0xff]  ;;  %v2261_v35 = vld [vmem:[#allocation0 + $0xf0] sm:$0xff]  ;;  %3559 = vst [vmem:[%s4597_s1 + $0x48] sm:$0xff] %v3276_v18  }
 0x189   :  { %v2639_v34 = vld [vmem:[#allocation0 + $0x2a0] sm:$0xff]  ;;  %3571 = vst [vmem:[%s4597_s1 + $0xa8] sm:$0xff] %v3336_v19   ;;  %3582 = vst [vmem:[%s4597_s1 + $0x100] sm:$0xff] %v3391_v20   ;;  %v4437_v38 = vld [vmem:[#allocation0 + $0x198] sm:$0xff]  ;;  %v3381_v44 = vpack.c.bf16 %v4385_v13, %v2471_v33 }
 0x18a   :  { %1746 = vst.msk [vmem:[#allocation0 + $0x140] ss:$-188 sm:$0x3] %vm130_vm6, %v1743_v28   ;;  %1748 = vst.msk [vmem:[#allocation0 + $0x4d8] ss:$-183 sm:$0xc] %vm130_vm6, %v1743_v28   ;;  %v3441_v45 = vpack.c.bf16 %v4387_v14, %v2639_v34 }
 0x18b   :  { %1750 = vst.msk [vmem:[#allocation0 + $0x1f3] sm:$0x10] %vm130_vm6, %v1743_v28   ;;  %v4439_v39 = vld [vmem:[#allocation0 + $0xd8] sm:$0xff]  ;;  %v4441_v40 = vld [vmem:[#allocation0 + $0x28] sm:$0xff]  ;;  %v2107_v42 = vld [vmem:[#allocation0 + $0x40] sm:$0xff] }
 0x18c   :  { %v2268_v41 = vld [vmem:[#allocation0 + $0xf8] sm:$0xff]  ;;  %v2429_v43 = vld [vmem:[#allocation0 + $0x1b0] sm:$0xff]  ;;  %3594 = vst [vmem:[%s4597_s1 + $0x160] sm:$0xff] %v3451_v26   ;;  %3605 = vst [vmem:[%s4597_s1 + $0x1b8] sm:$0xff] %v3506_v27   ;;  %v3251_v54 = vpack.c.bf16 %v4405_v22, %v2107_v42 }
 0x18d   :  { %v4451_v47 = vld [vmem:[#allocation0 + $0x308] sm:$0xff]  ;;  %v4455_v49 = vld [vmem:[#allocation0 + $0x240] sm:$0xff]  ;;  %3603 = vst [vmem:[%s4597_s1 + $0x1a8] sm:$0xff] %v3496_v32   ;;  %v3306_v50 = vpack.c.bf16 %v2268_v41, %v2261_v35  ;;  %v2597_v51 = vld [vmem:[#allocation0 + $0x270] sm:$0xff]  ;;  %v3366_v55 = vpack.c.bf16 %v4403_v21, %v2429_v43 }
 0x18e   :  { %v4453_v48 = vld [vmem:[#allocation0 + $0x3c8] sm:$0xff]  ;;  %v2751_v52 = vld [vmem:[#allocation0 + $0x320] sm:$0xff]  ;;  %3557 = vst [vmem:[%s4597_s1 + $0x38] sm:$0xff] %v3266_v36   ;;  %3568 = vst [vmem:[%s4597_s1 + $0x90] sm:$0xff] %v3321_v37   ;;  %v3426_v61 = vpack.c.bf16 %v4419_v30, %v2597_v51 }
 0x18f   :  { %v2919_v53 = vld [vmem:[#allocation0 + $0x3e0] sm:$0xff]  ;;  %1730 = vst.msk [vmem:[#allocation0 + $0x281] ss:$-188 sm:$0x7] %vm130_vm6, %v1727_v46   ;;  %1734 = vst.msk [vmem:[#allocation0 + $0x333] sm:$0x20] %vm130_vm6, %v1727_v46   ;;  %v3481_v62 = vpack.c.bf16 %v4421_v31, %v2751_v52 }
 0x190   :  { %1732 = vst.msk [vmem:[#allocation0 - $0xa94] ss:$930 sm:$0x18] %vm130_vm6, %v1727_v46   ;;  %v4471_v56 = vld [vmem:[#allocation0 + $0xa8] sm:$0xff]  ;;  %v2079_v58 = vld [vmem:[#allocation0 + $0x20] sm:$0xff]  ;;  %v2233_v59 = vld [vmem:[#allocation0 + $0xd0] sm:$0xff]  ;;  %v3541_v63 = vpack.c.bf16 %v4417_v29, %v2919_v53 }
 0x191   :  { %v4473_v57 = vld [vmem:[#allocation0 + $0x168] sm:$0xff]  ;;  %v2401_v60 = vld [vmem:[#allocation0 + $0x190] sm:$0xff]  ;;  %3580 = vst [vmem:[%s4597_s1 + $0xf0] sm:$0xff] %v3381_v44   ;;  %3592 = vst [vmem:[%s4597_s1 + $0x150] sm:$0xff] %v3441_v45   ;;  %v3241_v6 = vpack.c.bf16 %v4441_v40, %v2079_v58  ;;  %v3296_v7 = vpack.c.bf16 %v4439_v39, %v2233_v59 }
 0x192   :  { %v2513_v0 = vld [vmem:[#allocation0 + $0x210] sm:$0xff]  ;;  %v2688_v1 = vld [vmem:[#allocation0 + $0x2d8] sm:$0xff]  ;;  %3565 = vst [vmem:[%s4597_s1 + $0x78] sm:$0xff] %v3306_v50   ;;  %v2562_v3 = vld [vmem:[#allocation0 + $0x248] sm:$0xff]  ;;  %v3356_v8 = vpack.c.bf16 %v4437_v38, %v2401_v60 }
 0x193   :  { %v4484_v2 = vld [vmem:[#allocation0 + $0x398] sm:$0xff]  ;;  %v2723_v4 = vld [vmem:[#allocation0 + $0x300] sm:$0xff]  ;;  %3554 = vst [vmem:[%s4597_s1 + $0x20] sm:$0xff] %v3251_v54   ;;  %3577 = vst [vmem:[%s4597_s1 + $0xd8] sm:$0xff] %v3366_v55   ;;  %v3411_v14 = vpack.c.bf16 %v2562_v3, %v4455_v49 }
 0x194   :  { %v2891_v5 = vld [vmem:[#allocation0 + $0x3c0] sm:$0xff]  ;;  %v2170_v9 = vld [vmem:[#allocation0 + $0x88] sm:$0xff]  ;;  %v2492_v10 = vld [vmem:[#allocation0 + $0x1f8] sm:$0xff]  ;;  %3589 = vst [vmem:[%s4597_s1 + $0x138] sm:$0xff] %v3426_v61   ;;  %v3471_v15 = vpack.c.bf16 %v4451_v47, %v2723_v4 }
 0x195   :  { %v2520_v11 = vld [vmem:[#allocation0 + $0x218] sm:$0xff]  ;;  %v2191_v12 = vld [vmem:[#allocation0 + $0xa0] sm:$0xff]  ;;  %3600 = vst [vmem:[%s4597_s1 + $0x190] sm:$0xff] %v3481_v62   ;;  %v3531_v16 = vpack.c.bf16 %v4453_v48, %v2891_v5  ;;  %3612 = vst [vmem:[%s4597_s1 + $0x1f0] sm:$0xff] %v3541_v63  }
 0x196   :  { %v2359_v13 = vld [vmem:[#allocation0 + $0x160] sm:$0xff]  ;;  %v2660_v18 = vld [vmem:[#allocation0 + $0x2b8] sm:$0xff]  ;;  %v2338_v20 = vld [vmem:[#allocation0 + $0x148] sm:$0xff]  ;;  %v3396_v21 = vpack.c.bf16 %v2520_v11, %v2513_v0  ;;  %3552 = vst [vmem:[%s4597_s1 + $0x10] sm:$0xff] %v3241_v6   ;;  %v3281_v24 = vpack.c.bf16 %v4471_v56, %v2191_v12 }
 0x197   :  { %v2807_v19 = vld [vmem:[#allocation0 + $0x360] sm:$0xff]  ;;  %v2681_v22 = vld [vmem:[#allocation0 + $0x2d0] sm:$0xff]  ;;  %3563 = vst [vmem:[%s4597_s1 + $0x68] sm:$0xff] %v3296_v7   ;;  %v3341_v25 = vpack.c.bf16 %v4473_v57, %v2359_v13  ;;  %3575 = vst [vmem:[%s4597_s1 + $0xc8] sm:$0xff] %v3356_v8  }
 0x198   :  { %v2849_v23 = vld [vmem:[#allocation0 + $0x390] sm:$0xff]  ;;  %1757 = vst.msk [vmem:[#allocation0 + $0x3a1] ss:$-188 sm:$0x7] %vm130_vm6, %v1754_v17   ;;  %v2128_v26 = vld [vmem:[#allocation0 + $0x58] sm:$0xff]  ;;  %v2275_v27 = vld [vmem:[#allocation0 + $0x100] sm:$0xff]  ;;  %v3456_v31 = vpack.c.bf16 %v2688_v1, %v2681_v22 }
 0x199   :  { %1759 = vst.msk [vmem:[#allocation0 + $0x3a6] ss:$-188 sm:$0x18] %vm130_vm6, %v1754_v17   ;;  %v2163_v28 = vld [vmem:[#allocation0 + $0x80] sm:$0xff]  ;;  %v2485_v30 = vld [vmem:[#allocation0 + $0x1f0] sm:$0xff]  ;;  %3586 = vst [vmem:[%s4597_s1 + $0x120] sm:$0xff] %v3411_v14   ;;  %v3516_v32 = vpack.c.bf16 %v4484_v2, %v2849_v23 }
 0x19a   :  { %v2331_v29 = vld [vmem:[#allocation0 + $0x140] sm:$0xff]  ;;  %3598 = vst [vmem:[%s4597_s1 + $0x180] sm:$0xff] %v3471_v15   ;;  %3610 = vst [vmem:[%s4597_s1 + $0x1e0] sm:$0xff] %v3531_v16   ;;  %v2450_v33 = vld [vmem:[#allocation0 + $0x1c8] sm:$0xff]  ;;  %v3271_v39 = vpack.c.bf16 %v2170_v9, %v2163_v28  ;;  %v3386_v41 = vpack.c.bf16 %v2492_v10, %v2485_v30 }
 0x19b   :  { %v2940_v34 = vld [vmem:[#allocation0 + $0x3f8] sm:$0xff]  ;;  %v2618_v35 = vld [vmem:[#allocation0 + $0x288] sm:$0xff]  ;;  %3583 = vst [vmem:[%s4597_s1 + $0x108] sm:$0xff] %v3396_v21   ;;  %v2653_v36 = vld [vmem:[#allocation0 + $0x2b0] sm:$0xff]  ;;  %v3331_v40 = vpack.c.bf16 %v2338_v20, %v2331_v29 }
 0x19c   :  { %v2814_v37 = vld [vmem:[#allocation0 + $0x368] sm:$0xff]  ;;  %v2765_v38 = vld [vmem:[#allocation0 + $0x330] sm:$0xff]  ;;  %3560 = vst [vmem:[%s4597_s1 + $0x50] sm:$0xff] %v3281_v24   ;;  %3572 = vst [vmem:[%s4597_s1 + $0xb0] sm:$0xff] %v3341_v25   ;;  %v3446_v45 = vpack.c.bf16 %v2660_v18, %v2653_v36 }
 0x19d   :  { %v2772_v42 = vld [vmem:[#allocation0 + $0x338] sm:$0xff]  ;;  %v2121_v43 = vld [vmem:[#allocation0 + $0x50] sm:$0xff]  ;;  %v2282_v44 = vld [vmem:[#allocation0 + $0x108] sm:$0xff]  ;;  %3595 = vst [vmem:[%s4597_s1 + $0x168] sm:$0xff] %v3456_v31   ;;  %v3501_v46 = vpack.c.bf16 %v2814_v37, %v2807_v19 }
 0x19e   :  { %3607 = vst [vmem:[%s4597_s1 + $0x1c8] sm:$0xff] %v3516_v32   ;;  %v3486_v47 = vpack.c.bf16 %v2772_v42, %v2765_v38  ;;  %v2443_v48 = vld [vmem:[#allocation0 + $0x1c0] sm:$0xff]  ;;  %v2933_v50 = vld [vmem:[#allocation0 + $0x3f0] sm:$0xff]  ;;  %v3256_v51 = vpack.c.bf16 %v2128_v26, %v2121_v43  ;;  %3558 = vst [vmem:[%s4597_s1 + $0x40] sm:$0xff] %v3271_v39   ;;  %v3311_v52 = vpack.c.bf16 %v2282_v44, %v2275_v27 }
 0x19f   :  { %v2611_v49 = vld [vmem:[#allocation0 + $0x280] sm:$0xff]  ;;  %3570 = vst [vmem:[%s4597_s1 + $0xa0] sm:$0xff] %v3331_v40   ;;  %3581 = vst [vmem:[%s4597_s1 + $0xf8] sm:$0xff] %v3386_v41   ;;  %v2212_v53 = vld [vmem:[#allocation0 + $0xb8] sm:$0xff]  ;;  %v3371_v54 = vpack.c.bf16 %v2450_v33, %v2443_v48  ;;  %v3546_v56 = vpack.c.bf16 %v2940_v34, %v2933_v50 }
 0x1a0   :  { %v3431_v55 = vpack.c.bf16 %v2618_v35, %v2611_v49  ;;  %3593 = vst [vmem:[%s4597_s1 + $0x158] sm:$0xff] %v3446_v45   ;;  %3604 = vst [vmem:[%s4597_s1 + $0x1b0] sm:$0xff] %v3501_v46   ;;  %v2702_v57 = vld [vmem:[#allocation0 + $0x2e8] sm:$0xff]  ;;  %v2380_v58 = vld [vmem:[#allocation0 + $0x178] sm:$0xff] }
 0x1a1   :  { %3601 = vst [vmem:[%s4597_s1 + $0x198] sm:$0xff] %v3486_v47   ;;  %v2527_v59 = vld [vmem:[#allocation0 + $0x220] sm:$0xff]  ;;  %3555 = vst [vmem:[%s4597_s1 + $0x28] sm:$0xff] %v3256_v51   ;;  %v2534_v60 = vld [vmem:[#allocation0 + $0x228] sm:$0xff] }
 0x1a2   :  { %3566 = vst [vmem:[%s4597_s1 + $0x80] sm:$0xff] %v3311_v52   ;;  %v2205_v61 = vld [vmem:[#allocation0 + $0xb0] sm:$0xff]  ;;  %3578 = vst [vmem:[%s4597_s1 + $0xe0] sm:$0xff] %v3371_v54   ;;  %v2870_v63 = vld [vmem:[#allocation0 + $0x3a8] sm:$0xff]  ;;  %v3401_v0 = vpack.c.bf16 %v2534_v60, %v2527_v59 }
 0x1a3   :  { %v2373_v62 = vld [vmem:[#allocation0 + $0x170] sm:$0xff]  ;;  %3590 = vst [vmem:[%s4597_s1 + $0x140] sm:$0xff] %v3431_v55   ;;  %3613 = vst [vmem:[%s4597_s1 + $0x1f8] sm:$0xff] %v3546_v56   ;;  %v3286_v1 = vpack.c.bf16 %v2212_v53, %v2205_v61  ;;  %v2695_v3 = vld [vmem:[#allocation0 + $0x2e0] sm:$0xff] }
 0x1a4   :  { %v3346_v2 = vpack.c.bf16 %v2380_v58, %v2373_v62  ;;  %v2863_v4 = vld [vmem:[#allocation0 + $0x3a0] sm:$0xff]  ;;  %v3461_v5 = vpack.c.bf16 %v2702_v57, %v2695_v3  ;;  %3584 = vst [vmem:[%s4597_s1 + $0x110] sm:$0xff] %v3401_v0  }
 0x1a5   :  { %v3521_v6 = vpack.c.bf16 %v2870_v63, %v2863_v4  ;;  %3561 = vst [vmem:[%s4597_s1 + $0x58] sm:$0xff] %v3286_v1  }
 0x1a6   :  { %3573 = vst [vmem:[%s4597_s1 + $0xb8] sm:$0xff] %v3346_v2   ;;  %3596 = vst [vmem:[%s4597_s1 + $0x170] sm:$0xff] %v3461_v5  }
 0x1a7   :  { %3608 = vst [vmem:[%s4597_s1 + $0x1d0] sm:$0xff] %v3521_v6  }

// kernel: alexnet_forward.13
= control target key start
LH: loop header
LB: loop body
LE: loop exit
PB: predicated region body
PF: predicated region fallthrough
CT: control target
= control target key end

     0   :  { %v710_v1 = vmov 0   ;;  %s918_s1 = inlined_call_operand.vmem [shape: bf16[384,256], index: 1, kind: input, shape index: {}]   ;;  %s919_s0 = inlined_call_operand.vmem [shape: bf16[48,384], index: 0, kind: input, shape index: {}]   ;;  %s920_s2 = inlined_call_operand.vmem [shape: bf16[48,256], index: 2, kind: output, shape index: {}]  }
   0x1   :  { %v626_v0 = vld [vmem:[%s918_s1 + $0x4] ss:$8 sps:$4 sm:$0xff]   ;;  %455 = vmatprep.mubr.bf16.mxu0 %v710_v1  ;;  %v628_v2 = vld [vmem:[%s918_s1] ss:$8 sps:$4 sm:$0xff]   ;;  %v629_v3 = vld [vmem:[%s918_s1 + $0x14] ss:$8 sps:$4 sm:$0xff]  }
   0x2   :  { %360 = vmatprep.subr.bf16.mxu1 %v626_v0  ;;  %v631_v4 = vld [vmem:[%s918_s1 + $0x10] ss:$8 sps:$4 sm:$0xff]   ;;  %v632_v5 = vld [vmem:[%s918_s1 + $0x24] ss:$8 sps:$4 sm:$0xff]   ;;  %v634_v6 = vld [vmem:[%s918_s1 + $0x20] ss:$8 sps:$4 sm:$0xff]  }
   0x3   :  { %361 = vmatpush1.bf16.msra.mxu1 %v628_v2  ;;  %v635_v7 = vld [vmem:[%s918_s1 + $0x34] ss:$8 sps:$4 sm:$0xff]   ;;  %v637_v8 = vld [vmem:[%s918_s1 + $0x30] ss:$8 sps:$4 sm:$0xff]   ;;  %v650_v9 = vld [vmem:[%s918_s1 + $0x104] ss:$8 sps:$4 sm:$0xff]  }
   0x4   :  { %362 = vmatprep.subr.bf16.mxu1 %v629_v3  ;;  %v652_v10 = vld [vmem:[%s918_s1 + $0x100] ss:$8 sps:$4 sm:$0xff]   ;;  %v638_v11 = vld [vmem:[%s918_s1 + $0x44] ss:$8 sps:$4 sm:$0xff]   ;;  %423 = vmatprep.subr.bf16.mxu0 %v650_v9  ;;  %v656_v12 = vld [vmem:[%s918_s1 + $0x114] ss:$8 sps:$4 sm:$0xff]  }
   0x5   :  { %424 = vmatpush1.bf16.msra.mxu0 %v652_v10  ;;  %v658_v13 = vld [vmem:[%s918_s1 + $0x110] ss:$8 sps:$4 sm:$0xff]   ;;  %v640_v14 = vld [vmem:[%s918_s1 + $0x40] ss:$8 sps:$4 sm:$0xff]   ;;  %v641_v15 = vld [vmem:[%s918_s1 + $0x54] ss:$8 sps:$4 sm:$0xff]  }
   0x6   :  { %425 = vmatprep.subr.bf16.mxu0 %v656_v12  ;;  %v662_v16 = vld [vmem:[%s918_s1 + $0x124] ss:$8 sps:$4 sm:$0xff]   ;;  %v664_v17 = vld [vmem:[%s918_s1 + $0x120] ss:$8 sps:$4 sm:$0xff]   ;;  %v643_v18 = vld [vmem:[%s918_s1 + $0x50] ss:$8 sps:$4 sm:$0xff]  }
   0x7   :  { %363 = vmatpush1.bf16.msra.mxu1 %v631_v4  ;;  %v668_v19 = vld [vmem:[%s918_s1 + $0x134] ss:$8 sps:$4 sm:$0xff]   ;;  %v644_v20 = vld [vmem:[%s918_s1 + $0x64] ss:$8 sps:$4 sm:$0xff]   ;;  %v670_v21 = vld [vmem:[%s918_s1 + $0x130] ss:$8 sps:$4 sm:$0xff]  }
   0x8   :  { %364 = vmatprep.subr.bf16.mxu1 %v632_v5  ;;  %v646_v22 = vld [vmem:[%s918_s1 + $0x60] ss:$8 sps:$4 sm:$0xff]   ;;  %v674_v23 = vld [vmem:[%s918_s1 + $0x144] ss:$8 sps:$4 sm:$0xff]   ;;  %v647_v24 = vld [vmem:[%s918_s1 + $0x74] ss:$8 sps:$4 sm:$0xff]  }
   0x9   :  { %426 = vmatpush1.bf16.msra.mxu0 %v658_v13  ;;  %v676_v25 = vld [vmem:[%s918_s1 + $0x140] ss:$8 sps:$4 sm:$0xff]   ;;  %v649_v26 = vld [vmem:[%s918_s1 + $0x70] ss:$8 sps:$4 sm:$0xff]   ;;  %v680_v27 = vld [vmem:[%s918_s1 + $0x154] ss:$8 sps:$4 sm:$0xff]  }
   0xa   :  { %427 = vmatprep.subr.bf16.mxu0 %v662_v16  ;;  %v653_v28 = vld [vmem:[%s918_s1 + $0x84] ss:$8 sps:$4 sm:$0xff]   ;;  %v682_v29 = vld [vmem:[%s918_s1 + $0x150] ss:$8 sps:$4 sm:$0xff]   ;;  %v655_v30 = vld [vmem:[%s918_s1 + $0x80] ss:$8 sps:$4 sm:$0xff]  }
   0xb   :  { %365 = vmatpush1.bf16.msra.mxu1 %v634_v6  ;;  %v686_v31 = vld [vmem:[%s918_s1 + $0x164] ss:$8 sps:$4 sm:$0xff]   ;;  %v659_v32 = vld [vmem:[%s918_s1 + $0x94] ss:$8 sps:$4 sm:$0xff]   ;;  %v661_v33 = vld [vmem:[%s918_s1 + $0x90] ss:$8 sps:$4 sm:$0xff]  }
   0xc   :  { %366 = vmatprep.subr.bf16.mxu1 %v635_v7  ;;  %v688_v34 = vld [vmem:[%s918_s1 + $0x160] ss:$8 sps:$4 sm:$0xff]   ;;  %v701_v35 = vld [vmem:[%s919_s0 + $0x4] ss:$12 sps:$4 sm:$0xff]   ;;  %v692_v36 = vld [vmem:[%s918_s1 + $0x174] ss:$8 sps:$4 sm:$0xff]  }
   0xd   :  { %428 = vmatpush1.bf16.msra.mxu0 %v664_v17  ;;  %v665_v37 = vld [vmem:[%s918_s1 + $0xa4] ss:$8 sps:$4 sm:$0xff]   ;;  %392 = vmatprep.mubr.bf16.mxu1 %v701_v35  ;;  %v694_v38 = vld [vmem:[%s918_s1 + $0x170] ss:$8 sps:$4 sm:$0xff]   ;;  %v667_v39 = vld [vmem:[%s918_s1 + $0xa0] ss:$8 sps:$4 sm:$0xff]  }
   0xe   :  { %429 = vmatprep.subr.bf16.mxu0 %v668_v19  ;;  %v671_v40 = vld [vmem:[%s918_s1 + $0xb4] ss:$8 sps:$4 sm:$0xff]   ;;  %v673_v42 = vld [vmem:[%s918_s1 + $0xb0] ss:$8 sps:$4 sm:$0xff]   ;;  %v677_v43 = vld [vmem:[%s918_s1 + $0xc4] ss:$8 sps:$4 sm:$0xff]  }
   0xf   :  { %367 = vmatpush1.bf16.msra.mxu1 %v637_v8  ;;  %v698_v41 = vld [vmem:[%s919_s0 + $0x8] ss:$12 sps:$4 sm:$0xff]   ;;  %v702_v46 = vld [vmem:[%s919_s0 + $0x20] ss:$12 sps:$4 sm:$0xff]   ;;  %v685_v47 = vld [vmem:[%s918_s1 + $0xd0] ss:$8 sps:$4 sm:$0xff]  }
  0x10   :  { %368 = vmatprep.subr.bf16.mxu1 %v638_v11  ;;  %v679_v44 = vld [vmem:[%s918_s1 + $0xc0] ss:$8 sps:$4 sm:$0xff]   ;;  %v683_v45 = vld [vmem:[%s918_s1 + $0xd4] ss:$8 sps:$4 sm:$0xff]   ;;  %v689_v48 = vld [vmem:[%s918_s1 + $0xe4] ss:$8 sps:$4 sm:$0xff]  }
  0x11   :  { %430 = vmatpush1.bf16.msra.mxu0 %v670_v21  ;;  %v691_v49 = vld [vmem:[%s918_s1 + $0xe0] ss:$8 sps:$4 sm:$0xff]   ;;  %v695_v50 = vld [vmem:[%s918_s1 + $0xf4] ss:$8 sps:$4 sm:$0xff]   ;;  %v706_v51 = vld [vmem:[%s919_s0 + $0x38] ss:$12 sps:$4 sm:$0xff]  }
  0x12   :  { %431 = vmatprep.subr.bf16.mxu0 %v674_v23  ;;  %v697_v52 = vld [vmem:[%s918_s1 + $0xf0] ss:$8 sps:$4 sm:$0xff]   ;;  %v699_v53 = vld [vmem:[%s919_s0] ss:$12 sps:$4 sm:$0xff]   ;;  %v703_v54 = vld [vmem:[%s919_s0 + $0x1c] ss:$12 sps:$4 sm:$0xff]  }
  0x13   :  { %369 = vmatpush1.bf16.msra.mxu1 %v640_v14  ;;  %v705_v55 = vld [vmem:[%s919_s0 + $0x18] ss:$12 sps:$4 sm:$0xff]   ;;  %v707_v56 = vld [vmem:[%s919_s0 + $0x34] ss:$12 sps:$4 sm:$0xff]   ;;  %v709_v57 = vld [vmem:[%s919_s0 + $0x30] ss:$12 sps:$4 sm:$0xff]  }
  0x14   :  { %370 = vmatprep.subr.bf16.mxu1 %v641_v15 }
  0x15   :  { %432 = vmatpush1.bf16.msra.mxu0 %v676_v25 }
  0x16   :  { %433 = vmatprep.subr.bf16.mxu0 %v680_v27 }
  0x17   :  { %371 = vmatpush1.bf16.msra.mxu1 %v643_v18 }
  0x18   :  { %372 = vmatprep.subr.bf16.mxu1 %v644_v20 }
  0x19   :  { %434 = vmatpush1.bf16.msra.mxu0 %v682_v29 }
  0x1a   :  { %435 = vmatprep.subr.bf16.mxu0 %v686_v31 }
  0x1b   :  { %373 = vmatpush1.bf16.msra.mxu1 %v646_v22 }
  0x1c   :  { %374 = vmatprep.subr.bf16.mxu1 %v647_v24 }
  0x1d   :  { %436 = vmatpush1.bf16.msra.mxu0 %v688_v34 }
  0x1e   :  { %437 = vmatprep.subr.bf16.mxu0 %v692_v36 }
  0x1f   :  { %375 = vmatpush1.bf16.msra.mxu1 %v649_v26 }
  0x20   :  { %376 = vmatprep.subr.bf16.mxu1 %v653_v28 }
  0x21   :  { %438 = vmatpush1.bf16.msra.mxu0 %v694_v38 }
  0x23   :  { %377 = vmatpush1.bf16.msra.mxu1 %v655_v30 }
  0x24   :  { %378 = vmatprep.subr.bf16.mxu1 %v659_v32  ;;  %456 = vmatmul.mubr.bf16.vlgmr.msra.gmra.mrb[0].mxu0 %v698_v41 }
  0x25   :  { %465 = vmatprep.mubr.bf16.mxu0 %v710_v1 }
  0x27   :  { %379 = vmatpush1.bf16.msra.mxu1 %v661_v33 }
  0x28   :  { %380 = vmatprep.subr.bf16.mxu1 %v665_v37 }
  0x2b   :  { %381 = vmatpush1.bf16.msra.mxu1 %v667_v39 }
  0x2c   :  { %382 = vmatprep.subr.bf16.mxu1 %v671_v40  ;;  %466 = vmatmul.mubr.bf16.gmra.mrb[4].mxu0 %v702_v46 }
  0x2d   :  { %475 = vmatprep.mubr.bf16.mxu0 %v710_v1 }
  0x2f   :  { %383 = vmatpush1.bf16.msra.mxu1 %v673_v42 }
  0x30   :  { %384 = vmatprep.subr.bf16.mxu1 %v677_v43 }
  0x33   :  { %385 = vmatpush1.bf16.msra.mxu1 %v679_v44 }
  0x34   :  { %386 = vmatprep.subr.bf16.mxu1 %v683_v45  ;;  %476 = vmatmul.mubr.bf16.gmra.mrb[8].mxu0 %v706_v51 }
  0x37   :  { %387 = vmatpush1.bf16.msra.mxu1 %v685_v47 }
  0x38   :  { %388 = vmatprep.subr.bf16.mxu1 %v689_v48 }
  0x3b   :  { %389 = vmatpush1.bf16.msra.mxu1 %v691_v49 }
  0x3c   :  { %390 = vmatprep.subr.bf16.mxu1 %v695_v50 }
  0x3f   :  { %391 = vmatpush1.bf16.msra.mxu1 %v697_v52 }
  0x42   :  { %393 = vmatmul.mubr.bf16.vlgmr.msra.gmra.mrb[0].mxu1 %v699_v53 }
  0x43   :  { %402 = vmatprep.mubr.bf16.mxu1 %v703_v54 }
  0x4a   :  { %403 = vmatmul.mubr.bf16.gmra.mrb[4].mxu1 %v705_v55 }
  0x4b   :  { %412 = vmatprep.mubr.bf16.mxu1 %v707_v56 }
  0x52   :  { %413 = vmatmul.mubr.bf16.gmra.mrb[8].mxu1 %v709_v57 }
  0xf7   :  { %v457_v58 = vpop.f32.mrb[0].mxu0 }
  0xf8   :  { %v459_v59 = vpop.f32.mrb[1].mxu0 }
  0xf9   :  { %v461_v60 = vpop.f32.mrb[2].mxu0 }
  0xfa   :  { %v463_v61 = vpop.f32.mrb[3].mxu0 }
  0xff   :  { %v467_v62 = vpop.f32.mrb[4].mxu0 }
 0x100   :  { %v469_v63 = vpop.f32.mrb[5].mxu0 }
 0x101   :  { %v471_v0 = vpop.f32.mrb[6].mxu0 }
 0x102   :  { %v473_v1 = vpop.f32.mrb[7].mxu0 }
 0x107   :  { %v477_v2 = vpop.f32.mrb[8].mxu0 }
 0x108   :  { %v479_v3 = vpop.f32.mrb[9].mxu0 }
 0x109   :  { %v481_v4 = vpop.f32.mrb[10].mxu0 }
 0x10a   :  { %v483_v5 = vpop.f32.mrb[11].mxu0 }
 0x115   :  { %v394_v6 = vpop.f32.mrb[0].mxu1 }
 0x116   :  { %v458_v7 = vadd.f32 %v457_v58, %v394_v6  ;;  %v396_v8 = vpop.f32.mrb[1].mxu1 }
 0x117   :  { %v460_v9 = vadd.f32 %v459_v59, %v396_v8  ;;  %v398_v10 = vpop.f32.mrb[2].mxu1 }
 0x118   :  { %v486_v11 = vmax.f32 %v458_v7, 0.0  ;;  %v462_v12 = vadd.f32 %v461_v60, %v398_v10  ;;  %v400_v13 = vpop.f32.mrb[3].mxu1 }
 0x119   :  { %v487_v14 = vmax.f32 %v460_v9, 0.0  ;;  %v464_v15 = vadd.f32 %v463_v61, %v400_v13 }
 0x11a   :  { %v488_v16 = vmax.f32 %v462_v12, 0.0 }
 0x11b   :  { %v607_v17 = vpack.c.bf16 %v487_v14, %v486_v11  ;;  %v489_v18 = vmax.f32 %v464_v15, 0.0 }
 0x11d   :  { %534 = vst [vmem:[%s920_s2] sm:$0xff] %v607_v17  ;;  %v608_v19 = vpack.c.bf16 %v489_v18, %v488_v16  ;;  %v404_v20 = vpop.f32.mrb[4].mxu1 }
 0x11e   :  { %v468_v21 = vadd.f32 %v467_v62, %v404_v20  ;;  %v406_v22 = vpop.f32.mrb[5].mxu1 }
 0x11f   :  { %535 = vst [vmem:[%s920_s2 + $0x8] sm:$0xff] %v608_v19  ;;  %v470_v23 = vadd.f32 %v469_v63, %v406_v22  ;;  %v408_v24 = vpop.f32.mrb[6].mxu1 }
 0x120   :  { %v490_v25 = vmax.f32 %v468_v21, 0.0  ;;  %v472_v26 = vadd.f32 %v471_v0, %v408_v24  ;;  %v410_v27 = vpop.f32.mrb[7].mxu1 }
 0x121   :  { %v491_v28 = vmax.f32 %v470_v23, 0.0  ;;  %v474_v29 = vadd.f32 %v473_v1, %v410_v27 }
 0x122   :  { %v492_v30 = vmax.f32 %v472_v26, 0.0 }
 0x123   :  { %v609_v31 = vpack.c.bf16 %v491_v28, %v490_v25  ;;  %v493_v32 = vmax.f32 %v474_v29, 0.0 }
 0x125   :  { %536 = vst [vmem:[%s920_s2 + $0x10] sm:$0xff] %v609_v31  ;;  %v610_v33 = vpack.c.bf16 %v493_v32, %v492_v30  ;;  %v414_v34 = vpop.f32.mrb[8].mxu1 }
 0x126   :  { %v478_v35 = vadd.f32 %v477_v2, %v414_v34  ;;  %v416_v36 = vpop.f32.mrb[9].mxu1 }
 0x127   :  { %537 = vst [vmem:[%s920_s2 + $0x18] sm:$0xff] %v610_v33  ;;  %v480_v37 = vadd.f32 %v479_v3, %v416_v36  ;;  %v418_v38 = vpop.f32.mrb[10].mxu1 }
 0x128   :  { %v494_v39 = vmax.f32 %v478_v35, 0.0  ;;  %v482_v40 = vadd.f32 %v481_v4, %v418_v38  ;;  %v420_v41 = vpop.f32.mrb[11].mxu1 }
 0x129   :  { %v495_v42 = vmax.f32 %v480_v37, 0.0  ;;  %v484_v43 = vadd.f32 %v483_v5, %v420_v41 }
 0x12a   :  { %v496_v44 = vmax.f32 %v482_v40, 0.0 }
 0x12b   :  { %v611_v45 = vpack.c.bf16 %v495_v42, %v494_v39  ;;  %v497_v46 = vmax.f32 %v484_v43, 0.0 }
 0x12d   :  { %538 = vst [vmem:[%s920_s2 + $0x20] sm:$0xff] %v611_v45  ;;  %v612_v47 = vpack.c.bf16 %v497_v46, %v496_v44 }
 0x12f   :  { %539 = vst [vmem:[%s920_s2 + $0x28] sm:$0xff] %v612_v47 }

// kernel: alexnet_forward.14
= control target key start
LH: loop header
LB: loop body
LE: loop exit
PB: predicated region body
PF: predicated region fallthrough
CT: control target
= control target key end

     0   :  { %s742_s1 = inlined_call_operand.vmem [shape: bf16[512,128], index: 1, kind: input, shape index: {}]   ;;  %s743_s0 = inlined_call_operand.vmem [shape: bf16[32,512], index: 0, kind: input, shape index: {}]   ;;  %s744_s2 = inlined_call_operand.vmem [shape: bf16[32,128], index: 2, kind: output, shape index: {}]  }
   0x1   :  { %v557_v0 = vld [vmem:[%s742_s1 + $0x40] sm:$0xff]   ;;  %v561_v4 = vld [vmem:[%s742_s1 + $0x48] sm:$0xff]   ;;  %v565_v8 = vld [vmem:[%s742_s1 + $0x50] sm:$0xff]  }
   0x2   :  { %v558_v1 = vld [vmem:[%s742_s1 + $0xc0] sm:$0xff]   ;;  %501 = vmatprep.subr.bf16.mxu0 %v557_v0  ;;  %v562_v5 = vld [vmem:[%s742_s1 + $0xc8] sm:$0xff]   ;;  %v566_v9 = vld [vmem:[%s742_s1 + $0xd0] sm:$0xff]  }
   0x3   :  { %v559_v2 = vld [vmem:[%s742_s1] sm:$0xff]   ;;  %529 = vmatprep.subr.bf16.mxu1 %v558_v1  ;;  %v563_v6 = vld [vmem:[%s742_s1 + $0x8] sm:$0xff]   ;;  %v567_v10 = vld [vmem:[%s742_s1 + $0x10] sm:$0xff]  }
   0x4   :  { %v560_v3 = vld [vmem:[%s742_s1 + $0x80] sm:$0xff]   ;;  %502 = vmatpush3.bf16.msra.mxu0 %v559_v2  ;;  %v564_v7 = vld [vmem:[%s742_s1 + $0x88] sm:$0xff]   ;;  %v568_v11 = vld [vmem:[%s742_s1 + $0x90] sm:$0xff]  }
   0x5   :  { %530 = vmatpush3.bf16.msra.mxu1 %v560_v3  ;;  %503 = vmatprep.subr.bf16.mxu0 %v561_v4  ;;  %v569_v12 = vld [vmem:[%s742_s1 + $0x58] sm:$0xff]   ;;  %v573_v16 = vld [vmem:[%s742_s1 + $0x60] sm:$0xff]   ;;  %v577_v20 = vld [vmem:[%s742_s1 + $0x68] sm:$0xff]  }
   0x6   :  { %531 = vmatprep.subr.bf16.mxu1 %v562_v5  ;;  %v570_v13 = vld [vmem:[%s742_s1 + $0xd8] sm:$0xff]   ;;  %v574_v17 = vld [vmem:[%s742_s1 + $0xe0] sm:$0xff]   ;;  %v578_v21 = vld [vmem:[%s742_s1 + $0xe8] sm:$0xff]  }
   0x7   :  { %v571_v14 = vld [vmem:[%s742_s1 + $0x18] sm:$0xff]   ;;  %v575_v18 = vld [vmem:[%s742_s1 + $0x20] sm:$0xff]   ;;  %v579_v22 = vld [vmem:[%s742_s1 + $0x28] sm:$0xff]  }
   0x8   :  { %504 = vmatpush3.bf16.msra.mxu0 %v563_v6  ;;  %v572_v15 = vld [vmem:[%s742_s1 + $0x98] sm:$0xff]   ;;  %v576_v19 = vld [vmem:[%s742_s1 + $0xa0] sm:$0xff]   ;;  %v580_v23 = vld [vmem:[%s742_s1 + $0xa8] sm:$0xff]  }
   0x9   :  { %532 = vmatpush3.bf16.msra.mxu1 %v564_v7  ;;  %505 = vmatprep.subr.bf16.mxu0 %v565_v8  ;;  %v581_v24 = vld [vmem:[%s742_s1 + $0x70] sm:$0xff]   ;;  %v585_v28 = vld [vmem:[%s742_s1 + $0x78] sm:$0xff]  }
   0xa   :  { %533 = vmatprep.subr.bf16.mxu1 %v566_v9  ;;  %v582_v25 = vld [vmem:[%s742_s1 + $0xf0] sm:$0xff]   ;;  %v586_v29 = vld [vmem:[%s742_s1 + $0xf8] sm:$0xff]  }
   0xb   :  { %v583_v26 = vld [vmem:[%s742_s1 + $0x30] sm:$0xff]   ;;  %v587_v30 = vld [vmem:[%s742_s1 + $0x38] sm:$0xff]  }
   0xc   :  { %506 = vmatpush3.bf16.msra.mxu0 %v567_v10  ;;  %v584_v27 = vld [vmem:[%s742_s1 + $0xb0] sm:$0xff]   ;;  %v588_v31 = vld [vmem:[%s742_s1 + $0xb8] sm:$0xff]  }
   0xd   :  { %534 = vmatpush3.bf16.msra.mxu1 %v568_v11  ;;  %507 = vmatprep.subr.bf16.mxu0 %v569_v12  ;;  %v589_v32 = vld [vmem:[%s743_s0] ss:$16 sps:$4 sm:$0xff]   ;;  %v591_v33 = vld [vmem:[%s743_s0 + $0x4] ss:$16 sps:$4 sm:$0xff]   ;;  %v592_v34 = vld [vmem:[%s743_s0 + $0x8] ss:$16 sps:$4 sm:$0xff]  }
   0xe   :  { %535 = vmatprep.subr.bf16.mxu1 %v570_v13  ;;  %v594_v35 = vld [vmem:[%s743_s0 + $0xc] ss:$16 sps:$4 sm:$0xff]   ;;  %348 = vmatprep.mubr.bf16.mxu0 %v591_v33  ;;  %v595_v36 = vld [vmem:[%s743_s0 + $0x24] ss:$16 sps:$4 sm:$0xff]   ;;  %v599_v38 = vld [vmem:[%s743_s0 + $0x20] ss:$16 sps:$4 sm:$0xff]  }
   0xf   :  { %397 = vmatprep.mubr.bf16.mxu1 %v594_v35  ;;  %v597_v37 = vld [vmem:[%s743_s0 + $0x2c] ss:$16 sps:$4 sm:$0xff]   ;;  %v600_v39 = vld [vmem:[%s743_s0 + $0x28] ss:$16 sps:$4 sm:$0xff]  }
  0x10   :  { %508 = vmatpush3.bf16.msra.mxu0 %v571_v14 }
  0x11   :  { %536 = vmatpush3.bf16.msra.mxu1 %v572_v15  ;;  %509 = vmatprep.subr.bf16.mxu0 %v573_v16 }
  0x12   :  { %537 = vmatprep.subr.bf16.mxu1 %v574_v17 }
  0x14   :  { %510 = vmatpush3.bf16.msra.mxu0 %v575_v18 }
  0x15   :  { %538 = vmatpush3.bf16.msra.mxu1 %v576_v19  ;;  %511 = vmatprep.subr.bf16.mxu0 %v577_v20 }
  0x16   :  { %539 = vmatprep.subr.bf16.mxu1 %v578_v21 }
  0x18   :  { %512 = vmatpush3.bf16.msra.mxu0 %v579_v22 }
  0x19   :  { %540 = vmatpush3.bf16.msra.mxu1 %v580_v23  ;;  %513 = vmatprep.subr.bf16.mxu0 %v581_v24 }
  0x1a   :  { %541 = vmatprep.subr.bf16.mxu1 %v582_v25 }
  0x1c   :  { %514 = vmatpush3.bf16.msra.mxu0 %v583_v26 }
  0x1d   :  { %542 = vmatpush3.bf16.msra.mxu1 %v584_v27  ;;  %515 = vmatprep.subr.bf16.mxu0 %v585_v28 }
  0x1e   :  { %543 = vmatprep.subr.bf16.mxu1 %v586_v29 }
  0x20   :  { %516 = vmatpush3.bf16.msra.mxu0 %v587_v30 }
  0x21   :  { %544 = vmatpush3.bf16.msra.mxu1 %v588_v31 }
  0x23   :  { %349 = vmatmul.mubr.bf16.vlgmr.msra.gmra.mrb[0].mxu0 %v589_v32 }
  0x24   :  { %398 = vmatmul.mubr.bf16.vlgmr.msra.gmra.mrb[0].mxu1 %v592_v34  ;;  %356 = vmatprep.mubr.bf16.mxu0 %v595_v36 }
  0x25   :  { %405 = vmatprep.mubr.bf16.mxu1 %v597_v37 }
  0x2b   :  { %357 = vmatmul.mubr.bf16.gmra.mrb[4].mxu0 %v599_v38 }
  0x2c   :  { %406 = vmatmul.mubr.bf16.gmra.mrb[4].mxu1 %v600_v39 }
  0xf6   :  { %v517_v40 = vpop.f32.mrb[0].mxu0 }
  0xf7   :  { %v545_v41 = vpop.f32.mrb[0].mxu1  ;;  %v518_v42 = vpop.f32.mrb[1].mxu0 }
  0xf8   :  { %v519_v43 = vadd.f32 %v518_v42, %v517_v40  ;;  %v546_v44 = vpop.f32.mrb[1].mxu1  ;;  %v520_v45 = vpop.f32.mrb[2].mxu0 }
  0xf9   :  { %v547_v46 = vadd.f32 %v546_v44, %v545_v41  ;;  %v548_v47 = vpop.f32.mrb[2].mxu1  ;;  %v521_v48 = vpop.f32.mrb[3].mxu0 }
  0xfa   :  { %v522_v49 = vadd.f32 %v521_v48, %v520_v45  ;;  %v549_v50 = vpop.f32.mrb[3].mxu1 }
  0xfb   :  { %v400_v51 = vadd.f32 %v547_v46, %v519_v43  ;;  %v550_v52 = vadd.f32 %v549_v50, %v548_v47 }
  0xfd   :  { %v403_v53 = vadd.f32 %v550_v52, %v522_v49  ;;  %v414_v55 = vmax.f32 %v400_v51, 0.0 }
  0xfe   :  { %v523_v54 = vpop.f32.mrb[4].mxu0 }
  0xff   :  { %v415_v56 = vmax.f32 %v403_v53, 0.0  ;;  %v551_v57 = vpop.f32.mrb[4].mxu1  ;;  %v524_v58 = vpop.f32.mrb[5].mxu0 }
 0x100   :  { %v525_v59 = vadd.f32 %v524_v58, %v523_v54  ;;  %v552_v60 = vpop.f32.mrb[5].mxu1  ;;  %v526_v61 = vpop.f32.mrb[6].mxu0 }
 0x101   :  { %v493_v62 = vpack.c.bf16 %v415_v56, %v414_v55  ;;  %v553_v63 = vadd.f32 %v552_v60, %v551_v57  ;;  %v554_v0 = vpop.f32.mrb[6].mxu1  ;;  %v527_v1 = vpop.f32.mrb[7].mxu0 }
 0x102   :  { %v528_v2 = vadd.f32 %v527_v1, %v526_v61  ;;  %v555_v3 = vpop.f32.mrb[7].mxu1 }
 0x103   :  { %494 = vst [vmem:[%s744_s2] sm:$0xff] %v493_v62   ;;  %v408_v4 = vadd.f32 %v553_v63, %v525_v59  ;;  %v556_v5 = vadd.f32 %v555_v3, %v554_v0 }
 0x105   :  { %v411_v6 = vadd.f32 %v556_v5, %v528_v2  ;;  %v416_v7 = vmax.f32 %v408_v4, 0.0 }
 0x107   :  { %v417_v8 = vmax.f32 %v411_v6, 0.0 }
 0x109   :  { %v498_v9 = vpack.c.bf16 %v417_v8, %v416_v7 }
 0x10b   :  { %500 = vst [vmem:[%s744_s2 + $0x8] sm:$0xff] %v498_v9  }

// kernel: alexnet_forward.15
= control target key start
LH: loop header
LB: loop body
LE: loop exit
PB: predicated region body
PF: predicated region fallthrough
CT: control target
= control target key end

     0   :  { %s620_s1 = inlined_call_operand.vmem [shape: bf16[384,128], index: 1, kind: input, shape index: {}]   ;;  %s621_s0 = inlined_call_operand.vmem [shape: bf16[32,384], index: 0, kind: input, shape index: {}]   ;;  %s622_s2 = inlined_call_operand.vmem [shape: bf16[32,128], index: 2, kind: output, shape index: {}]  }
   0x1   :  { %v477_v0 = vld [vmem:[%s620_s1 + $0x40] sm:$0xff]   ;;  %v480_v3 = vld [vmem:[%s620_s1 + $0x48] sm:$0xff]   ;;  %v483_v6 = vld [vmem:[%s620_s1 + $0x50] sm:$0xff]  }
   0x2   :  { %v478_v1 = vld [vmem:[%s620_s1] sm:$0xff]   ;;  %419 = vmatprep.subr.bf16.mxu0 %v477_v0  ;;  %v481_v4 = vld [vmem:[%s620_s1 + $0x8] sm:$0xff]   ;;  %v484_v7 = vld [vmem:[%s620_s1 + $0x10] sm:$0xff]  }
   0x3   :  { %v479_v2 = vld [vmem:[%s620_s1 + $0x80] sm:$0xff]   ;;  %420 = vmatpush3.bf16.msra.mxu0 %v478_v1  ;;  %v482_v5 = vld [vmem:[%s620_s1 + $0x88] sm:$0xff]   ;;  %v485_v8 = vld [vmem:[%s620_s1 + $0x90] sm:$0xff]  }
   0x4   :  { %457 = vmatprep.subr.bf16.mxu1 %v479_v2  ;;  %421 = vmatprep.subr.bf16.mxu0 %v480_v3  ;;  %v486_v9 = vld [vmem:[%s620_s1 + $0x58] sm:$0xff]   ;;  %v489_v12 = vld [vmem:[%s620_s1 + $0x60] sm:$0xff]   ;;  %v492_v15 = vld [vmem:[%s620_s1 + $0x68] sm:$0xff]  }
   0x5   :  { %458 = vmatpush3.bf16.msra.mxu1 %v479_v2  ;;  %v487_v10 = vld [vmem:[%s620_s1 + $0x18] sm:$0xff]   ;;  %v491_v13 = vld [vmem:[%s620_s1 + $0xa0] sm:$0xff]   ;;  %v494_v16 = vld [vmem:[%s620_s1 + $0xa8] sm:$0xff]  }
   0x6   :  { %459 = vmatprep.subr.bf16.mxu1 %v482_v5  ;;  %v488_v11 = vld [vmem:[%s620_s1 + $0x98] sm:$0xff]   ;;  %v490_v14 = vld [vmem:[%s620_s1 + $0x20] sm:$0xff]   ;;  %v493_v17 = vld [vmem:[%s620_s1 + $0x28] sm:$0xff]  }
   0x7   :  { %422 = vmatpush3.bf16.msra.mxu0 %v481_v4  ;;  %v495_v18 = vld [vmem:[%s620_s1 + $0x70] sm:$0xff]   ;;  %v498_v21 = vld [vmem:[%s620_s1 + $0x78] sm:$0xff]   ;;  %v501_v26 = vld [vmem:[%s621_s0] ss:$12 sps:$4 sm:$0xff]  }
   0x8   :  { %423 = vmatprep.subr.bf16.mxu0 %v483_v6  ;;  %v496_v19 = vld [vmem:[%s620_s1 + $0x30] sm:$0xff]   ;;  %v500_v22 = vld [vmem:[%s620_s1 + $0xb8] sm:$0xff]   ;;  %v505_v28 = vld [vmem:[%s621_s0 + $0x20] ss:$12 sps:$4 sm:$0xff]  }
   0x9   :  { %460 = vmatpush3.bf16.msra.mxu1 %v482_v5  ;;  %v497_v20 = vld [vmem:[%s620_s1 + $0xb0] sm:$0xff]   ;;  %v499_v25 = vld [vmem:[%s620_s1 + $0x38] sm:$0xff]  }
   0xa   :  { %461 = vmatprep.subr.bf16.mxu1 %v485_v8  ;;  %v503_v23 = vld [vmem:[%s621_s0 + $0x4] ss:$12 sps:$4 sm:$0xff]   ;;  %v504_v24 = vld [vmem:[%s621_s0 + $0x8] ss:$12 sps:$4 sm:$0xff]  }
   0xb   :  { %424 = vmatpush3.bf16.msra.mxu0 %v484_v7  ;;  %276 = vmatprep.mubr.bf16.mxu0 %v503_v23  ;;  %v506_v27 = vld [vmem:[%s621_s0 + $0x1c] ss:$12 sps:$4 sm:$0xff]   ;;  %v508_v29 = vld [vmem:[%s621_s0 + $0x18] ss:$12 sps:$4 sm:$0xff]  }
   0xc   :  { %425 = vmatprep.subr.bf16.mxu0 %v486_v9  ;;  %473 = vmatprep.mubr.bf16.mxu1 %v504_v24 }
   0xd   :  { %462 = vmatpush3.bf16.msra.mxu1 %v485_v8 }
   0xe   :  { %463 = vmatprep.subr.bf16.mxu1 %v488_v11 }
   0xf   :  { %426 = vmatpush3.bf16.msra.mxu0 %v487_v10 }
  0x10   :  { %427 = vmatprep.subr.bf16.mxu0 %v489_v12 }
  0x11   :  { %464 = vmatpush3.bf16.msra.mxu1 %v488_v11 }
  0x12   :  { %465 = vmatprep.subr.bf16.mxu1 %v491_v13 }
  0x13   :  { %428 = vmatpush3.bf16.msra.mxu0 %v490_v14 }
  0x14   :  { %429 = vmatprep.subr.bf16.mxu0 %v492_v15 }
  0x15   :  { %466 = vmatpush3.bf16.msra.mxu1 %v491_v13 }
  0x16   :  { %467 = vmatprep.subr.bf16.mxu1 %v494_v16 }
  0x17   :  { %430 = vmatpush3.bf16.msra.mxu0 %v493_v17 }
  0x18   :  { %431 = vmatprep.subr.bf16.mxu0 %v495_v18 }
  0x19   :  { %468 = vmatpush3.bf16.msra.mxu1 %v494_v16 }
  0x1a   :  { %469 = vmatprep.subr.bf16.mxu1 %v497_v20 }
  0x1b   :  { %432 = vmatpush3.bf16.msra.mxu0 %v496_v19 }
  0x1c   :  { %433 = vmatprep.subr.bf16.mxu0 %v498_v21 }
  0x1d   :  { %470 = vmatpush3.bf16.msra.mxu1 %v497_v20 }
  0x1e   :  { %471 = vmatprep.subr.bf16.mxu1 %v500_v22 }
  0x1f   :  { %434 = vmatpush3.bf16.msra.mxu0 %v499_v25 }
  0x21   :  { %472 = vmatpush3.bf16.msra.mxu1 %v500_v22 }
  0x22   :  { %277 = vmatmul.mubr.bf16.vlgmr.msra.gmra.mrb[0].mxu0 %v501_v26 }
  0x23   :  { %284 = vmatprep.mubr.bf16.mxu0 %v506_v27 }
  0x24   :  { %474 = vmatmul.mubr.bf16.vlgmr.msra.gmra.mrb[0].mxu1 %v505_v28 }
  0x2a   :  { %285 = vmatmul.mubr.bf16.gmra.mrb[4].mxu0 %v508_v29 }
  0xf5   :  { %v435_v30 = vpop.f32.mrb[0].mxu0 }
  0xf6   :  { %v436_v31 = vpop.f32.mrb[1].mxu0 }
  0xf7   :  { %v437_v32 = vadd.f32 %v436_v31, %v435_v30  ;;  %v438_v33 = vpop.f32.mrb[2].mxu0  ;;  %v475_v34 = vpop.f32.mrb[0].mxu1 }
  0xf8   :  { %v439_v35 = vpop.f32.mrb[3].mxu0  ;;  %v327_v36 = vpop.f32.mrb[1].mxu1 }
  0xf9   :  { %v440_v37 = vadd.f32 %v439_v35, %v438_v33  ;;  %v328_v38 = vadd.f32 %v437_v32, %v327_v36  ;;  %v476_v39 = vpop.f32.mrb[2].mxu1 }
  0xfa   :  { %v330_v40 = vpop.f32.mrb[3].mxu1 }
  0xfb   :  { %v331_v41 = vadd.f32 %v440_v37, %v330_v40  ;;  %v342_v42 = vmax.f32 %v328_v38, 0.0 }
  0xfd   :  { %v343_v43 = vmax.f32 %v331_v41, 0.0  ;;  %v441_v44 = vpop.f32.mrb[4].mxu0 }
  0xfe   :  { %v442_v45 = vpop.f32.mrb[5].mxu0 }
  0xff   :  { %v411_v46 = vpack.c.bf16 %v343_v43, %v342_v42  ;;  %v443_v47 = vadd.f32 %v442_v45, %v441_v44  ;;  %v444_v48 = vpop.f32.mrb[6].mxu0 }
 0x100   :  { %v445_v49 = vpop.f32.mrb[7].mxu0 }
 0x101   :  { %412 = vst [vmem:[%s622_s2] sm:$0xff] %v411_v46   ;;  %v336_v50 = vadd.f32 %v475_v34, %v443_v47  ;;  %v446_v51 = vadd.f32 %v445_v49, %v444_v48 }
 0x103   :  { %v339_v52 = vadd.f32 %v476_v39, %v446_v51  ;;  %v344_v53 = vmax.f32 %v336_v50, 0.0 }
 0x105   :  { %v345_v54 = vmax.f32 %v339_v52, 0.0 }
 0x107   :  { %v416_v55 = vpack.c.bf16 %v345_v54, %v344_v53 }
 0x109   :  { %418 = vst [vmem:[%s622_s2 + $0x8] sm:$0xff] %v416_v55  }

// kernel: squeeze.5
= control target key start
LH: loop header
LB: loop body
LE: loop exit
PB: predicated region body
PF: predicated region fallthrough
CT: control target
= control target key end

     0   :  { %s1165_s8 = smov 122   ;;  %s1166_s9 = smov 124   ;;  %vm19_vm0 = vcmask 15360   ;;  %s1625_s0 = inlined_call_operand.vmem [shape: bf16[256], index: 0, kind: input, shape index: {}]   ;;  %s1626_s1 = inlined_call_operand.vmem [shape: bf16[32,2,2,2], index: 1, kind: output, shape index: {}]  }
   0x1   :  { %v14_v0 = vld [vmem:[%s1625_s0] sm:$0x1]  ;;  %s1164_s0 = smov 126   ;;  %s1167_s10 = smov 120  }
   0x2   :  { %v15_v1 = vunpack.c.l.bf16 %v14_v0  ;;  %s1168_s11 = smov 118   ;;  %s1169_s12 = smov 116  }
   0x3   :  { %s1170_s13 = smov 114   ;;  %s1171_s14 = smov 112  }
   0x4   :  { %17 = vst [vmem:[#allocation1] sm:$0x3] %v15_v1  ;;  %s1172_s15 = smov 110   ;;  %s1173_s16 = smov 108  }
   0x5   :  { %s1174_s17 = smov 106   ;;  %s1175_s18 = smov 104  }
   0x6   :  { %s1176_s19 = smov 102   ;;  %s1177_s20 = smov 100  }
   0x7   :  { %s1178_s21 = smov 98   ;;  %s1179_s22 = smov 96  }
   0x8   :  { %s1180_s23 = smov 94   ;;  %s1181_s24 = smov 92  }
   0x9   :  { %s1182_s25 = smov 90   ;;  %s1183_s26 = smov 88  }
   0xa   :  { %s1184_s27 = smov 86   ;;  %s1185_s28 = smov 84  }
   0xb   :  { %v23_v2 = vld [vmem:[#allocation1] sm:$0x3]   ;;  %s1186_s29 = smov 82   ;;  %s1187_s30 = smov 80  }
   0xc   :  { %v39_v3 = vld [vmem:[#allocation1] sm:$0x3]   ;;  %24 = vrot.lane.b32.xlu0 %v23_v2, %s1164_s0  ;;  %s1188_s2 = smov 78   ;;  %s1189_s3 = smov 76  }
   0xd   :  { %40 = vrot.lane.b32.xlu1 %v39_v3, %s1165_s8  ;;  %v31_v4 = vld [vmem:[#allocation1] sm:$0x3]   ;;  %s1190_s4 = smov 74   ;;  %s1191_s5 = smov 72  }
   0xe   :  { %v47_v5 = vld [vmem:[#allocation1] sm:$0x3]   ;;  %s1192_s6 = smov 70   ;;  %s1193_s7 = smov 68  }
   0xf   :  { %v55_v6 = vld [vmem:[#allocation1] sm:$0x3]   ;;  %s1194_s0 = smov 66   ;;  %s1195_s8 = smov 64  }
  0x10   :  { %32 = vrot.lane.b32.xlu0 %v31_v4, %s1166_s9  ;;  %v63_v7 = vld [vmem:[#allocation1] sm:$0x3]   ;;  %s1196_s9 = smov 62  }
  0x11   :  { %48 = vrot.lane.b32.xlu1 %v47_v5, %s1167_s10  ;;  %v71_v8 = vld [vmem:[#allocation1] sm:$0x3]   ;;  %s1197_s10 = smov 60  }
  0x12   :  { %v79_v9 = vld [vmem:[#allocation1] sm:$0x3]  }
  0x13   :  { %v87_v10 = vld [vmem:[#allocation1] sm:$0x3]  }
  0x14   :  { %56 = vrot.lane.b32.xlu0 %v55_v6, %s1168_s11  ;;  %v95_v11 = vld [vmem:[#allocation1] sm:$0x3]   ;;  %s1198_s11 = smov 58  }
  0x15   :  { %64 = vrot.lane.b32.xlu1 %v63_v7, %s1169_s12  ;;  %v103_v12 = vld [vmem:[#allocation1] sm:$0x3]   ;;  %s1199_s12 = smov 56  }
  0x16   :  { %v111_v13 = vld [vmem:[#allocation1] sm:$0x3]  }
  0x17   :  { %v119_v14 = vld [vmem:[#allocation1] sm:$0x3]  }
  0x18   :  { %72 = vrot.lane.b32.xlu0 %v71_v8, %s1170_s13  ;;  %v127_v15 = vld [vmem:[#allocation1] sm:$0x3]   ;;  %s1200_s13 = smov 54  }
  0x19   :  { %80 = vrot.lane.b32.xlu1 %v79_v9, %s1171_s14  ;;  %v18_v16 = vld [vmem:[#allocation1] sm:$0x3]   ;;  %s1201_s14 = smov 52  }
  0x1a   :  { %v135_v17 = vld [vmem:[#allocation1] sm:$0x3]   ;;  %20 = vst.msk [vmem:[#allocation0] sm:$0x1] %vm19_vm0, %v18_v16   ;;  %22 = vst.msk [vmem:[#allocation0 + $0xff] sm:$0x2] %vm19_vm0, %v18_v16  }
  0x1b   :  { %v143_v18 = vld [vmem:[#allocation1] sm:$0x3]  }
  0x1c   :  { %88 = vrot.lane.b32.xlu0 %v87_v10, %s1172_s15  ;;  %v151_v19 = vld [vmem:[#allocation1] sm:$0x3]   ;;  %s1202_s15 = smov 50   ;;  %v1226_v10 = vmov 0.0  }
  0x1d   :  { %96 = vrot.lane.b32.xlu1 %v95_v11, %s1173_s16  ;;  %v159_v20 = vld [vmem:[#allocation1] sm:$0x3]   ;;  %s1203_s16 = smov 48  }
  0x1e   :  { %v167_v21 = vld [vmem:[#allocation1] sm:$0x3]  }
  0x1f   :  { %v175_v22 = vld [vmem:[#allocation1] sm:$0x3]  }
  0x20   :  { %104 = vrot.lane.b32.xlu0 %v103_v12, %s1174_s17  ;;  %v183_v23 = vld [vmem:[#allocation1] sm:$0x3]   ;;  %s1204_s17 = smov 46  }
  0x21   :  { %112 = vrot.lane.b32.xlu1 %v111_v13, %s1175_s18  ;;  %v191_v24 = vld [vmem:[#allocation1] sm:$0x3]   ;;  %s1205_s18 = smov 44  }
  0x22   :  { %v199_v25 = vld [vmem:[#allocation1] sm:$0x3]  }
  0x23   :  { %v207_v26 = vld [vmem:[#allocation1] sm:$0x3]  }
  0x24   :  { %120 = vrot.lane.b32.xlu0 %v119_v14, %s1176_s19  ;;  %v215_v27 = vld [vmem:[#allocation1] sm:$0x3]   ;;  %s1206_s19 = smov 42  }
  0x25   :  { %128 = vrot.lane.b32.xlu1 %v127_v15, %s1177_s20  ;;  %v223_v28 = vld [vmem:[#allocation1] sm:$0x3]   ;;  %s1207_s20 = smov 40  }
  0x26   :  { %v231_v29 = vld [vmem:[#allocation1] sm:$0x3]  }
  0x27   :  { %v239_v30 = vld [vmem:[#allocation1] sm:$0x3]  }
  0x28   :  { %136 = vrot.lane.b32.xlu0 %v135_v17, %s1178_s21  ;;  %v247_v31 = vld [vmem:[#allocation1] sm:$0x3]   ;;  %s1208_s21 = smov 38  }
  0x29   :  { %144 = vrot.lane.b32.xlu1 %v143_v18, %s1179_s22  ;;  %v255_v32 = vld [vmem:[#allocation1] sm:$0x3]   ;;  %s1209_s22 = smov 36  }
  0x2a   :  { %v263_v33 = vld [vmem:[#allocation1] sm:$0x3]  }
  0x2b   :  { %v271_v34 = vld [vmem:[#allocation1] sm:$0x3]  }
  0x2c   :  { %152 = vrot.lane.b32.xlu0 %v151_v19, %s1180_s23  ;;  %v279_v35 = vld [vmem:[#allocation1] sm:$0x3]   ;;  %s1210_s23 = smov 34  }
  0x2d   :  { %160 = vrot.lane.b32.xlu1 %v159_v20, %s1181_s24  ;;  %v287_v36 = vld [vmem:[#allocation1] sm:$0x3]   ;;  %s1211_s24 = smov 32  }
  0x2e   :  { %v295_v37 = vld [vmem:[#allocation1] sm:$0x3]  }
  0x2f   :  { %v303_v38 = vld [vmem:[#allocation1] sm:$0x3]  }
  0x30   :  { %168 = vrot.lane.b32.xlu0 %v167_v21, %s1182_s25  ;;  %v311_v39 = vld [vmem:[#allocation1] sm:$0x3]   ;;  %s1212_s25 = smov 30  }
  0x31   :  { %176 = vrot.lane.b32.xlu1 %v175_v22, %s1183_s26  ;;  %v319_v40 = vld [vmem:[#allocation1] sm:$0x3]   ;;  %s1213_s26 = smov 28  }
  0x32   :  { %v327_v41 = vld [vmem:[#allocation1] sm:$0x3]  }
  0x33   :  { %v335_v42 = vld [vmem:[#allocation1] sm:$0x3]  }
  0x34   :  { %184 = vrot.lane.b32.xlu0 %v183_v23, %s1184_s27  ;;  %v343_v43 = vld [vmem:[#allocation1] sm:$0x3]   ;;  %s1214_s27 = smov 26  }
  0x35   :  { %192 = vrot.lane.b32.xlu1 %v191_v24, %s1185_s28  ;;  %v351_v44 = vld [vmem:[#allocation1] sm:$0x3]   ;;  %s1215_s28 = smov 24  }
  0x36   :  { %v359_v45 = vld [vmem:[#allocation1] sm:$0x3]  }
  0x37   :  { %v367_v46 = vld [vmem:[#allocation1] sm:$0x3]  }
  0x38   :  { %200 = vrot.lane.b32.xlu0 %v199_v25, %s1186_s29  ;;  %v375_v47 = vld [vmem:[#allocation1] sm:$0x3]   ;;  %s1216_s29 = smov 22  }
  0x39   :  { %208 = vrot.lane.b32.xlu1 %v207_v26, %s1187_s30  ;;  %v383_v48 = vld [vmem:[#allocation1] sm:$0x3]   ;;  %s1217_s30 = smov 20  }
  0x3a   :  { %v391_v49 = vld [vmem:[#allocation1] sm:$0x3]  }
  0x3b   :  { %v399_v50 = vld [vmem:[#allocation1] sm:$0x3]  }
  0x3c   :  { %216 = vrot.lane.b32.xlu0 %v215_v27, %s1188_s2  ;;  %v407_v51 = vld [vmem:[#allocation1] sm:$0x3]   ;;  %s1218_s2 = smov 18  }
  0x3d   :  { %224 = vrot.lane.b32.xlu1 %v223_v28, %s1189_s3  ;;  %v415_v52 = vld [vmem:[#allocation1] sm:$0x3]   ;;  %s1219_s3 = smov 16  }
  0x3e   :  { %v423_v53 = vld [vmem:[#allocation1] sm:$0x3]  }
  0x3f   :  { %v431_v54 = vld [vmem:[#allocation1] sm:$0x3]  }
  0x40   :  { %232 = vrot.lane.b32.xlu0 %v231_v29, %s1190_s4  ;;  %v439_v55 = vld [vmem:[#allocation1] sm:$0x3]   ;;  %s1220_s4 = smov 14  }
  0x41   :  { %240 = vrot.lane.b32.xlu1 %v239_v30, %s1191_s5  ;;  %v447_v56 = vld [vmem:[#allocation1] sm:$0x3]   ;;  %s1221_s5 = smov 12  }
  0x42   :  { %v455_v57 = vld [vmem:[#allocation1] sm:$0x3]  }
  0x43   :  { %v463_v58 = vld [vmem:[#allocation1] sm:$0x3]  }
  0x44   :  { %248 = vrot.lane.b32.xlu0 %v247_v31, %s1192_s6  ;;  %v471_v59 = vld [vmem:[#allocation1] sm:$0x3]   ;;  %s1222_s6 = smov 10  }
  0x45   :  { %256 = vrot.lane.b32.xlu1 %v255_v32, %s1193_s7  ;;  %v479_v60 = vld [vmem:[#allocation1] sm:$0x3]   ;;  %s1223_s7 = smov 8  }
  0x46   :  { %v487_v61 = vld [vmem:[#allocation1] sm:$0x3]  }
  0x47   :  { %v495_v62 = vld [vmem:[#allocation1] sm:$0x3]  }
  0x48   :  { %264 = vrot.lane.b32.xlu0 %v263_v33, %s1194_s0  ;;  %v503_v1 = vld [vmem:[#allocation1] sm:$0x3]   ;;  %s1224_s0 = smov 6  }
  0x49   :  { %272 = vrot.lane.b32.xlu1 %v271_v34, %s1195_s8  ;;  %v511_v2 = vld [vmem:[#allocation1] sm:$0x3]   ;;  %s1225_s8 = smov 4  }
  0x4a   :  { %v519_v5 = vld [vmem:[#allocation1] sm:$0x3]  }
  0x4c   :  { %280 = vrot.lane.b32.xlu0 %v279_v35, %s1196_s9  ;;  %s1227_s9 = smov 2  }
  0x4d   :  { %288 = vrot.lane.b32.xlu1 %v287_v36, %s1197_s10 }
  0x50   :  { %296 = vrot.lane.b32.xlu0 %v295_v37, %s1198_s11 }
  0x51   :  { %304 = vrot.lane.b32.xlu1 %v303_v38, %s1199_s12 }
  0x54   :  { %312 = vrot.lane.b32.xlu0 %v311_v39, %s1200_s13 }
  0x55   :  { %320 = vrot.lane.b32.xlu1 %v319_v40, %s1201_s14 }
  0x58   :  { %328 = vrot.lane.b32.xlu0 %v327_v41, %s1202_s15 }
  0x59   :  { %336 = vrot.lane.b32.xlu1 %v335_v42, %s1203_s16 }
  0x5c   :  { %344 = vrot.lane.b32.xlu0 %v343_v43, %s1204_s17 }
  0x5d   :  { %352 = vrot.lane.b32.xlu1 %v351_v44, %s1205_s18 }
  0x60   :  { %360 = vrot.lane.b32.xlu0 %v359_v45, %s1206_s19 }
  0x61   :  { %368 = vrot.lane.b32.xlu1 %v367_v46, %s1207_s20 }
  0x64   :  { %376 = vrot.lane.b32.xlu0 %v375_v47, %s1208_s21 }
  0x65   :  { %384 = vrot.lane.b32.xlu1 %v383_v48, %s1209_s22 }
  0x68   :  { %392 = vrot.lane.b32.xlu0 %v391_v49, %s1210_s23 }
  0x69   :  { %400 = vrot.lane.b32.xlu1 %v399_v50, %s1211_s24 }
  0x6c   :  { %408 = vrot.lane.b32.xlu0 %v407_v51, %s1212_s25 }
  0x6d   :  { %416 = vrot.lane.b32.xlu1 %v415_v52, %s1213_s26 }
  0x70   :  { %424 = vrot.lane.b32.xlu0 %v423_v53, %s1214_s27 }
  0x71   :  { %432 = vrot.lane.b32.xlu1 %v431_v54, %s1215_s28 }
  0x74   :  { %440 = vrot.lane.b32.xlu0 %v439_v55, %s1216_s29 }
  0x75   :  { %448 = vrot.lane.b32.xlu1 %v447_v56, %s1217_s30 }
  0x78   :  { %456 = vrot.lane.b32.xlu0 %v455_v57, %s1218_s2 }
  0x79   :  { %464 = vrot.lane.b32.xlu1 %v463_v58, %s1219_s3 }
  0x7c   :  { %472 = vrot.lane.b32.xlu0 %v471_v59, %s1220_s4 }
  0x7d   :  { %480 = vrot.lane.b32.xlu1 %v479_v60, %s1221_s5 }
  0x7e   :  { %v25_v63 = vpop.permute.xlu0 %24  }
  0x7f   :  { %v41_v0 = vpop.permute.xlu1 %40   ;;  %28 = vst.msk [vmem:[#allocation0 + $0x1] sm:$0x1] %vm19_vm0, %v25_v63   ;;  %30 = vst.msk [vmem:[#allocation0 + $0x100] sm:$0x2] %vm19_vm0, %v25_v63  }
  0x80   :  { %44 = vst.msk [vmem:[#allocation0 + $0x9] sm:$0x1] %vm19_vm0, %v41_v0   ;;  %46 = vst.msk [vmem:[#allocation0 + $0x108] sm:$0x2] %vm19_vm0, %v41_v0   ;;  %488 = vrot.lane.b32.xlu0 %v487_v61, %s1222_s6 }
  0x81   :  { %496 = vrot.lane.b32.xlu1 %v495_v62, %s1223_s7 }
  0x82   :  { %v33_v3 = vpop.permute.xlu0 %32  }
  0x83   :  { %v49_v4 = vpop.permute.xlu1 %48   ;;  %36 = vst.msk [vmem:[#allocation0 + $0x8] sm:$0x1] %vm19_vm0, %v33_v3   ;;  %38 = vst.msk [vmem:[#allocation0 + $0x107] sm:$0x2] %vm19_vm0, %v33_v3  }
  0x84   :  { %52 = vst.msk [vmem:[#allocation0 + $0x10] sm:$0x1] %vm19_vm0, %v49_v4   ;;  %54 = vst.msk [vmem:[#allocation0 + $0x10f] sm:$0x2] %vm19_vm0, %v49_v4   ;;  %504 = vrot.lane.b32.xlu0 %v503_v1, %s1224_s0 }
  0x85   :  { %512 = vrot.lane.b32.xlu1 %v511_v2, %s1225_s8 }
  0x86   :  { %v531_v6 = vld [vmem:[#allocation0] sm:$0x3]  ;;  %v57_v8 = vpop.permute.xlu0 %56  }
  0x87   :  { %v752_v7 = vld [vmem:[#allocation0 + $0x100] sm:$0x3]  ;;  %v65_v9 = vpop.permute.xlu1 %64   ;;  %v532_v11 = vpack.c.bf16 %v1226_v10, %v531_v6  ;;  %60 = vst.msk [vmem:[#allocation0 + $0x11] sm:$0x1] %vm19_vm0, %v57_v8   ;;  %62 = vst.msk [vmem:[#allocation0 + $0x110] sm:$0x2] %vm19_vm0, %v57_v8  }
  0x88   :  { %v753_v12 = vpack.c.bf16 %v1226_v10, %v752_v7  ;;  %68 = vst.msk [vmem:[#allocation0 + $0x18] sm:$0x1] %vm19_vm0, %v65_v9   ;;  %70 = vst.msk [vmem:[#allocation0 + $0x117] sm:$0x2] %vm19_vm0, %v65_v9   ;;  %520 = vrot.lane.b32.xlu0 %v519_v5, %s1227_s9 }
  0x89   :  { %534 = vst [vmem:[%s1626_s1] sm:$0x1] %v532_v11 }
  0x8a   :  { %1068 = vst [vmem:[%s1626_s1 + $0x20] sm:$0x1] %v753_v12  ;;  %v536_v13 = vld [vmem:[#allocation0 + $0x8] sm:$0x3]  ;;  %v73_v15 = vpop.permute.xlu0 %72  }
  0x8b   :  { %v759_v14 = vld [vmem:[#allocation0 + $0x108] sm:$0x3]  ;;  %v81_v16 = vpop.permute.xlu1 %80   ;;  %v537_v17 = vpack.c.bf16 %v1226_v10, %v536_v13  ;;  %76 = vst.msk [vmem:[#allocation0 + $0x19] sm:$0x1] %vm19_vm0, %v73_v15   ;;  %78 = vst.msk [vmem:[#allocation0 + $0x118] sm:$0x2] %vm19_vm0, %v73_v15  }
  0x8c   :  { %v760_v18 = vpack.c.bf16 %v1226_v10, %v759_v14  ;;  %84 = vst.msk [vmem:[#allocation0 + $0x20] sm:$0x1] %vm19_vm0, %v81_v16   ;;  %86 = vst.msk [vmem:[#allocation0 + $0x11f] sm:$0x2] %vm19_vm0, %v81_v16  }
  0x8d   :  { %1037 = vst [vmem:[%s1626_s1 + $0x1] sm:$0x1] %v537_v17 }
  0x8e   :  { %1069 = vst [vmem:[%s1626_s1 + $0x21] sm:$0x1] %v760_v18  ;;  %v766_v19 = vld [vmem:[#allocation0 + $0x110] sm:$0x3]  ;;  %v89_v21 = vpop.permute.xlu0 %88  }
  0x8f   :  { %v542_v20 = vld [vmem:[#allocation0 + $0x10] sm:$0x3]  ;;  %v97_v22 = vpop.permute.xlu1 %96   ;;  %v767_v23 = vpack.c.bf16 %v1226_v10, %v766_v19  ;;  %92 = vst.msk [vmem:[#allocation0 + $0x21] sm:$0x1] %vm19_vm0, %v89_v21   ;;  %94 = vst.msk [vmem:[#allocation0 + $0x120] sm:$0x2] %vm19_vm0, %v89_v21  }
  0x90   :  { %v543_v24 = vpack.c.bf16 %v1226_v10, %v542_v20  ;;  %100 = vst.msk [vmem:[#allocation0 + $0x28] sm:$0x1] %vm19_vm0, %v97_v22   ;;  %102 = vst.msk [vmem:[#allocation0 + $0x127] sm:$0x2] %vm19_vm0, %v97_v22  }
  0x91   :  { %1070 = vst [vmem:[%s1626_s1 + $0x22] sm:$0x1] %v767_v23 }
  0x92   :  { %1038 = vst [vmem:[%s1626_s1 + $0x2] sm:$0x1] %v543_v24  ;;  %v549_v25 = vld [vmem:[#allocation0 + $0x18] sm:$0x3]  ;;  %v105_v27 = vpop.permute.xlu0 %104  }
  0x93   :  { %v773_v26 = vld [vmem:[#allocation0 + $0x118] sm:$0x3]  ;;  %v113_v28 = vpop.permute.xlu1 %112   ;;  %v550_v29 = vpack.c.bf16 %v1226_v10, %v549_v25  ;;  %108 = vst.msk [vmem:[#allocation0 + $0x29] sm:$0x1] %vm19_vm0, %v105_v27   ;;  %110 = vst.msk [vmem:[#allocation0 + $0x128] sm:$0x2] %vm19_vm0, %v105_v27  }
  0x94   :  { %v774_v30 = vpack.c.bf16 %v1226_v10, %v773_v26  ;;  %116 = vst.msk [vmem:[#allocation0 + $0x30] sm:$0x1] %vm19_vm0, %v113_v28   ;;  %118 = vst.msk [vmem:[#allocation0 + $0x12f] sm:$0x2] %vm19_vm0, %v113_v28  }
  0x95   :  { %1039 = vst [vmem:[%s1626_s1 + $0x3] sm:$0x1] %v550_v29 }
  0x96   :  { %1071 = vst [vmem:[%s1626_s1 + $0x23] sm:$0x1] %v774_v30  ;;  %v556_v31 = vld [vmem:[#allocation0 + $0x20] sm:$0x3]  ;;  %v121_v33 = vpop.permute.xlu0 %120  }
  0x97   :  { %v780_v32 = vld [vmem:[#allocation0 + $0x120] sm:$0x3]  ;;  %v129_v34 = vpop.permute.xlu1 %128   ;;  %v557_v35 = vpack.c.bf16 %v1226_v10, %v556_v31  ;;  %124 = vst.msk [vmem:[#allocation0 + $0x31] sm:$0x1] %vm19_vm0, %v121_v33   ;;  %126 = vst.msk [vmem:[#allocation0 + $0x130] sm:$0x2] %vm19_vm0, %v121_v33  }
  0x98   :  { %v781_v36 = vpack.c.bf16 %v1226_v10, %v780_v32  ;;  %132 = vst.msk [vmem:[#allocation0 + $0x38] sm:$0x1] %vm19_vm0, %v129_v34   ;;  %134 = vst.msk [vmem:[#allocation0 + $0x137] sm:$0x2] %vm19_vm0, %v129_v34  }
  0x99   :  { %1040 = vst [vmem:[%s1626_s1 + $0x4] sm:$0x1] %v557_v35 }
  0x9a   :  { %1072 = vst [vmem:[%s1626_s1 + $0x24] sm:$0x1] %v781_v36  ;;  %v787_v37 = vld [vmem:[#allocation0 + $0x128] sm:$0x3]  ;;  %v137_v39 = vpop.permute.xlu0 %136  }
  0x9b   :  { %v563_v38 = vld [vmem:[#allocation0 + $0x28] sm:$0x3]  ;;  %v145_v40 = vpop.permute.xlu1 %144   ;;  %v788_v41 = vpack.c.bf16 %v1226_v10, %v787_v37  ;;  %140 = vst.msk [vmem:[#allocation0 + $0x39] sm:$0x1] %vm19_vm0, %v137_v39   ;;  %142 = vst.msk [vmem:[#allocation0 + $0x138] sm:$0x2] %vm19_vm0, %v137_v39  }
  0x9c   :  { %v564_v42 = vpack.c.bf16 %v1226_v10, %v563_v38  ;;  %148 = vst.msk [vmem:[#allocation0 + $0x40] sm:$0x1] %vm19_vm0, %v145_v40   ;;  %150 = vst.msk [vmem:[#allocation0 + $0x13f] sm:$0x2] %vm19_vm0, %v145_v40  }
  0x9d   :  { %1073 = vst [vmem:[%s1626_s1 + $0x25] sm:$0x1] %v788_v41 }
  0x9e   :  { %1041 = vst [vmem:[%s1626_s1 + $0x5] sm:$0x1] %v564_v42  ;;  %v570_v43 = vld [vmem:[#allocation0 + $0x30] sm:$0x3]  ;;  %v153_v45 = vpop.permute.xlu0 %152  }
  0x9f   :  { %v794_v44 = vld [vmem:[#allocation0 + $0x130] sm:$0x3]  ;;  %v161_v46 = vpop.permute.xlu1 %160   ;;  %v571_v47 = vpack.c.bf16 %v1226_v10, %v570_v43  ;;  %156 = vst.msk [vmem:[#allocation0 + $0x41] sm:$0x1] %vm19_vm0, %v153_v45   ;;  %158 = vst.msk [vmem:[#allocation0 + $0x140] sm:$0x2] %vm19_vm0, %v153_v45  }
  0xa0   :  { %v795_v48 = vpack.c.bf16 %v1226_v10, %v794_v44  ;;  %164 = vst.msk [vmem:[#allocation0 + $0x48] sm:$0x1] %vm19_vm0, %v161_v46   ;;  %166 = vst.msk [vmem:[#allocation0 + $0x147] sm:$0x2] %vm19_vm0, %v161_v46  }
  0xa1   :  { %1042 = vst [vmem:[%s1626_s1 + $0x6] sm:$0x1] %v571_v47 }
  0xa2   :  { %1074 = vst [vmem:[%s1626_s1 + $0x26] sm:$0x1] %v795_v48  ;;  %v577_v49 = vld [vmem:[#allocation0 + $0x38] sm:$0x3]  ;;  %v169_v51 = vpop.permute.xlu0 %168  }
  0xa3   :  { %v801_v50 = vld [vmem:[#allocation0 + $0x138] sm:$0x3]  ;;  %v177_v52 = vpop.permute.xlu1 %176   ;;  %v578_v53 = vpack.c.bf16 %v1226_v10, %v577_v49  ;;  %172 = vst.msk [vmem:[#allocation0 + $0x49] sm:$0x1] %vm19_vm0, %v169_v51   ;;  %174 = vst.msk [vmem:[#allocation0 + $0x148] sm:$0x2] %vm19_vm0, %v169_v51  }
  0xa4   :  { %v802_v54 = vpack.c.bf16 %v1226_v10, %v801_v50  ;;  %180 = vst.msk [vmem:[#allocation0 + $0x50] sm:$0x1] %vm19_vm0, %v177_v52   ;;  %182 = vst.msk [vmem:[#allocation0 + $0x14f] sm:$0x2] %vm19_vm0, %v177_v52  }
  0xa5   :  { %1043 = vst [vmem:[%s1626_s1 + $0x7] sm:$0x1] %v578_v53 }
  0xa6   :  { %1075 = vst [vmem:[%s1626_s1 + $0x27] sm:$0x1] %v802_v54  ;;  %v584_v55 = vld [vmem:[#allocation0 + $0x40] sm:$0x3]  ;;  %v185_v57 = vpop.permute.xlu0 %184  }
  0xa7   :  { %v808_v56 = vld [vmem:[#allocation0 + $0x140] sm:$0x3]  ;;  %v193_v58 = vpop.permute.xlu1 %192   ;;  %v585_v59 = vpack.c.bf16 %v1226_v10, %v584_v55  ;;  %188 = vst.msk [vmem:[#allocation0 + $0x51] sm:$0x1] %vm19_vm0, %v185_v57   ;;  %190 = vst.msk [vmem:[#allocation0 + $0x150] sm:$0x2] %vm19_vm0, %v185_v57  }
  0xa8   :  { %v809_v60 = vpack.c.bf16 %v1226_v10, %v808_v56  ;;  %196 = vst.msk [vmem:[#allocation0 + $0x58] sm:$0x1] %vm19_vm0, %v193_v58   ;;  %198 = vst.msk [vmem:[#allocation0 + $0x157] sm:$0x2] %vm19_vm0, %v193_v58  }
  0xa9   :  { %1044 = vst [vmem:[%s1626_s1 + $0x8] sm:$0x1] %v585_v59 }
  0xaa   :  { %1076 = vst [vmem:[%s1626_s1 + $0x28] sm:$0x1] %v809_v60  ;;  %v591_v61 = vld [vmem:[#allocation0 + $0x48] sm:$0x3]  ;;  %v201_v63 = vpop.permute.xlu0 %200  }
  0xab   :  { %v815_v62 = vld [vmem:[#allocation0 + $0x148] sm:$0x3]  ;;  %v209_v0 = vpop.permute.xlu1 %208   ;;  %v592_v1 = vpack.c.bf16 %v1226_v10, %v591_v61  ;;  %204 = vst.msk [vmem:[#allocation0 + $0x59] sm:$0x1] %vm19_vm0, %v201_v63   ;;  %206 = vst.msk [vmem:[#allocation0 + $0x158] sm:$0x2] %vm19_vm0, %v201_v63  }
  0xac   :  { %v816_v2 = vpack.c.bf16 %v1226_v10, %v815_v62  ;;  %212 = vst.msk [vmem:[#allocation0 + $0x60] sm:$0x1] %vm19_vm0, %v209_v0   ;;  %214 = vst.msk [vmem:[#allocation0 + $0x15f] sm:$0x2] %vm19_vm0, %v209_v0  }
  0xad   :  { %1045 = vst [vmem:[%s1626_s1 + $0x9] sm:$0x1] %v592_v1 }
  0xae   :  { %1077 = vst [vmem:[%s1626_s1 + $0x29] sm:$0x1] %v816_v2  ;;  %v598_v3 = vld [vmem:[#allocation0 + $0x50] sm:$0x3]  ;;  %v217_v5 = vpop.permute.xlu0 %216  }
  0xaf   :  { %v822_v4 = vld [vmem:[#allocation0 + $0x150] sm:$0x3]  ;;  %v225_v6 = vpop.permute.xlu1 %224   ;;  %v599_v7 = vpack.c.bf16 %v1226_v10, %v598_v3  ;;  %220 = vst.msk [vmem:[#allocation0 + $0x61] sm:$0x1] %vm19_vm0, %v217_v5   ;;  %222 = vst.msk [vmem:[#allocation0 + $0x160] sm:$0x2] %vm19_vm0, %v217_v5  }
  0xb0   :  { %v823_v8 = vpack.c.bf16 %v1226_v10, %v822_v4  ;;  %228 = vst.msk [vmem:[#allocation0 + $0x68] sm:$0x1] %vm19_vm0, %v225_v6   ;;  %230 = vst.msk [vmem:[#allocation0 + $0x167] sm:$0x2] %vm19_vm0, %v225_v6  }
  0xb1   :  { %1046 = vst [vmem:[%s1626_s1 + $0xa] sm:$0x1] %v599_v7 }
  0xb2   :  { %1078 = vst [vmem:[%s1626_s1 + $0x2a] sm:$0x1] %v823_v8  ;;  %v605_v9 = vld [vmem:[#allocation0 + $0x58] sm:$0x3]  ;;  %v233_v12 = vpop.permute.xlu0 %232  }
  0xb3   :  { %v829_v11 = vld [vmem:[#allocation0 + $0x158] sm:$0x3]  ;;  %v241_v13 = vpop.permute.xlu1 %240   ;;  %v606_v14 = vpack.c.bf16 %v1226_v10, %v605_v9  ;;  %236 = vst.msk [vmem:[#allocation0 + $0x69] sm:$0x1] %vm19_vm0, %v233_v12   ;;  %238 = vst.msk [vmem:[#allocation0 + $0x168] sm:$0x2] %vm19_vm0, %v233_v12  }
  0xb4   :  { %v830_v15 = vpack.c.bf16 %v1226_v10, %v829_v11  ;;  %244 = vst.msk [vmem:[#allocation0 + $0x70] sm:$0x1] %vm19_vm0, %v241_v13   ;;  %246 = vst.msk [vmem:[#allocation0 + $0x16f] sm:$0x2] %vm19_vm0, %v241_v13  }
  0xb5   :  { %1047 = vst [vmem:[%s1626_s1 + $0xb] sm:$0x1] %v606_v14 }
  0xb6   :  { %1079 = vst [vmem:[%s1626_s1 + $0x2b] sm:$0x1] %v830_v15  ;;  %v612_v16 = vld [vmem:[#allocation0 + $0x60] sm:$0x3]  ;;  %v249_v18 = vpop.permute.xlu0 %248  }
  0xb7   :  { %v836_v17 = vld [vmem:[#allocation0 + $0x160] sm:$0x3]  ;;  %v257_v19 = vpop.permute.xlu1 %256   ;;  %v613_v20 = vpack.c.bf16 %v1226_v10, %v612_v16  ;;  %252 = vst.msk [vmem:[#allocation0 + $0x71] sm:$0x1] %vm19_vm0, %v249_v18   ;;  %254 = vst.msk [vmem:[#allocation0 + $0x170] sm:$0x2] %vm19_vm0, %v249_v18  }
  0xb8   :  { %v837_v21 = vpack.c.bf16 %v1226_v10, %v836_v17  ;;  %260 = vst.msk [vmem:[#allocation0 + $0x78] sm:$0x1] %vm19_vm0, %v257_v19   ;;  %262 = vst.msk [vmem:[#allocation0 + $0x177] sm:$0x2] %vm19_vm0, %v257_v19  }
  0xb9   :  { %1048 = vst [vmem:[%s1626_s1 + $0xc] sm:$0x1] %v613_v20 }
  0xba   :  { %1080 = vst [vmem:[%s1626_s1 + $0x2c] sm:$0x1] %v837_v21  ;;  %v619_v22 = vld [vmem:[#allocation0 + $0x68] sm:$0x3]  ;;  %v265_v24 = vpop.permute.xlu0 %264  }
  0xbb   :  { %v843_v23 = vld [vmem:[#allocation0 + $0x168] sm:$0x3]  ;;  %v273_v25 = vpop.permute.xlu1 %272   ;;  %v620_v26 = vpack.c.bf16 %v1226_v10, %v619_v22  ;;  %268 = vst.msk [vmem:[#allocation0 + $0x79] sm:$0x1] %vm19_vm0, %v265_v24   ;;  %270 = vst.msk [vmem:[#allocation0 + $0x178] sm:$0x2] %vm19_vm0, %v265_v24  }
  0xbc   :  { %v844_v27 = vpack.c.bf16 %v1226_v10, %v843_v23  ;;  %276 = vst.msk [vmem:[#allocation0 + $0x80] sm:$0x1] %vm19_vm0, %v273_v25   ;;  %278 = vst.msk [vmem:[#allocation0 + $0x17f] sm:$0x2] %vm19_vm0, %v273_v25  }
  0xbd   :  { %1049 = vst [vmem:[%s1626_s1 + $0xd] sm:$0x1] %v620_v26 }
  0xbe   :  { %1081 = vst [vmem:[%s1626_s1 + $0x2d] sm:$0x1] %v844_v27  ;;  %v850_v28 = vld [vmem:[#allocation0 + $0x170] sm:$0x3]  ;;  %v281_v30 = vpop.permute.xlu0 %280  }
  0xbf   :  { %v626_v29 = vld [vmem:[#allocation0 + $0x70] sm:$0x3]  ;;  %v289_v31 = vpop.permute.xlu1 %288   ;;  %v851_v32 = vpack.c.bf16 %v1226_v10, %v850_v28  ;;  %284 = vst.msk [vmem:[#allocation0 + $0x81] sm:$0x1] %vm19_vm0, %v281_v30   ;;  %286 = vst.msk [vmem:[#allocation0 + $0x180] sm:$0x2] %vm19_vm0, %v281_v30  }
  0xc0   :  { %v627_v33 = vpack.c.bf16 %v1226_v10, %v626_v29  ;;  %292 = vst.msk [vmem:[#allocation0 + $0x88] sm:$0x1] %vm19_vm0, %v289_v31   ;;  %294 = vst.msk [vmem:[#allocation0 + $0x187] sm:$0x2] %vm19_vm0, %v289_v31  }
  0xc1   :  { %1082 = vst [vmem:[%s1626_s1 + $0x2e] sm:$0x1] %v851_v32 }
  0xc2   :  { %1050 = vst [vmem:[%s1626_s1 + $0xe] sm:$0x1] %v627_v33  ;;  %v633_v34 = vld [vmem:[#allocation0 + $0x78] sm:$0x3]  ;;  %v297_v36 = vpop.permute.xlu0 %296  }
  0xc3   :  { %v857_v35 = vld [vmem:[#allocation0 + $0x178] sm:$0x3]  ;;  %v305_v37 = vpop.permute.xlu1 %304   ;;  %v634_v38 = vpack.c.bf16 %v1226_v10, %v633_v34  ;;  %300 = vst.msk [vmem:[#allocation0 + $0x89] sm:$0x1] %vm19_vm0, %v297_v36   ;;  %302 = vst.msk [vmem:[#allocation0 + $0x188] sm:$0x2] %vm19_vm0, %v297_v36  }
  0xc4   :  { %v858_v39 = vpack.c.bf16 %v1226_v10, %v857_v35  ;;  %308 = vst.msk [vmem:[#allocation0 + $0x90] sm:$0x1] %vm19_vm0, %v305_v37   ;;  %310 = vst.msk [vmem:[#allocation0 + $0x18f] sm:$0x2] %vm19_vm0, %v305_v37  }
  0xc5   :  { %1051 = vst [vmem:[%s1626_s1 + $0xf] sm:$0x1] %v634_v38 }
  0xc6   :  { %1083 = vst [vmem:[%s1626_s1 + $0x2f] sm:$0x1] %v858_v39  ;;  %v640_v40 = vld [vmem:[#allocation0 + $0x80] sm:$0x3]  ;;  %v313_v42 = vpop.permute.xlu0 %312  }
  0xc7   :  { %v864_v41 = vld [vmem:[#allocation0 + $0x180] sm:$0x3]  ;;  %v321_v43 = vpop.permute.xlu1 %320   ;;  %v641_v44 = vpack.c.bf16 %v1226_v10, %v640_v40  ;;  %316 = vst.msk [vmem:[#allocation0 + $0x91] sm:$0x1] %vm19_vm0, %v313_v42   ;;  %318 = vst.msk [vmem:[#allocation0 + $0x190] sm:$0x2] %vm19_vm0, %v313_v42  }
  0xc8   :  { %v865_v45 = vpack.c.bf16 %v1226_v10, %v864_v41  ;;  %324 = vst.msk [vmem:[#allocation0 + $0x98] sm:$0x1] %vm19_vm0, %v321_v43   ;;  %326 = vst.msk [vmem:[#allocation0 + $0x197] sm:$0x2] %vm19_vm0, %v321_v43  }
  0xc9   :  { %1052 = vst [vmem:[%s1626_s1 + $0x10] sm:$0x1] %v641_v44 }
  0xca   :  { %1084 = vst [vmem:[%s1626_s1 + $0x30] sm:$0x1] %v865_v45  ;;  %v647_v46 = vld [vmem:[#allocation0 + $0x88] sm:$0x3]  ;;  %v329_v48 = vpop.permute.xlu0 %328  }
  0xcb   :  { %v871_v47 = vld [vmem:[#allocation0 + $0x188] sm:$0x3]  ;;  %v337_v49 = vpop.permute.xlu1 %336   ;;  %v648_v50 = vpack.c.bf16 %v1226_v10, %v647_v46  ;;  %332 = vst.msk [vmem:[#allocation0 + $0x99] sm:$0x1] %vm19_vm0, %v329_v48   ;;  %334 = vst.msk [vmem:[#allocation0 + $0x198] sm:$0x2] %vm19_vm0, %v329_v48  }
  0xcc   :  { %v872_v51 = vpack.c.bf16 %v1226_v10, %v871_v47  ;;  %340 = vst.msk [vmem:[#allocation0 + $0xa0] sm:$0x1] %vm19_vm0, %v337_v49   ;;  %342 = vst.msk [vmem:[#allocation0 + $0x19f] sm:$0x2] %vm19_vm0, %v337_v49  }
  0xcd   :  { %1053 = vst [vmem:[%s1626_s1 + $0x11] sm:$0x1] %v648_v50 }
  0xce   :  { %1085 = vst [vmem:[%s1626_s1 + $0x31] sm:$0x1] %v872_v51  ;;  %v654_v52 = vld [vmem:[#allocation0 + $0x90] sm:$0x3]  ;;  %v345_v54 = vpop.permute.xlu0 %344  }
  0xcf   :  { %v878_v53 = vld [vmem:[#allocation0 + $0x190] sm:$0x3]  ;;  %v353_v55 = vpop.permute.xlu1 %352   ;;  %v655_v56 = vpack.c.bf16 %v1226_v10, %v654_v52  ;;  %348 = vst.msk [vmem:[#allocation0 + $0xa1] sm:$0x1] %vm19_vm0, %v345_v54   ;;  %350 = vst.msk [vmem:[#allocation0 + $0x1a0] sm:$0x2] %vm19_vm0, %v345_v54  }
  0xd0   :  { %v879_v57 = vpack.c.bf16 %v1226_v10, %v878_v53  ;;  %356 = vst.msk [vmem:[#allocation0 + $0xa8] sm:$0x1] %vm19_vm0, %v353_v55   ;;  %358 = vst.msk [vmem:[#allocation0 + $0x1a7] sm:$0x2] %vm19_vm0, %v353_v55  }
  0xd1   :  { %1054 = vst [vmem:[%s1626_s1 + $0x12] sm:$0x1] %v655_v56 }
  0xd2   :  { %1086 = vst [vmem:[%s1626_s1 + $0x32] sm:$0x1] %v879_v57  ;;  %v661_v58 = vld [vmem:[#allocation0 + $0x98] sm:$0x3]  ;;  %v361_v60 = vpop.permute.xlu0 %360  }
  0xd3   :  { %v885_v59 = vld [vmem:[#allocation0 + $0x198] sm:$0x3]  ;;  %v369_v61 = vpop.permute.xlu1 %368   ;;  %v662_v62 = vpack.c.bf16 %v1226_v10, %v661_v58  ;;  %364 = vst.msk [vmem:[#allocation0 + $0xa9] sm:$0x1] %vm19_vm0, %v361_v60   ;;  %366 = vst.msk [vmem:[#allocation0 + $0x1a8] sm:$0x2] %vm19_vm0, %v361_v60  }
  0xd4   :  { %v886_v63 = vpack.c.bf16 %v1226_v10, %v885_v59  ;;  %372 = vst.msk [vmem:[#allocation0 + $0xb0] sm:$0x1] %vm19_vm0, %v369_v61   ;;  %374 = vst.msk [vmem:[#allocation0 + $0x1af] sm:$0x2] %vm19_vm0, %v369_v61  }
  0xd5   :  { %1055 = vst [vmem:[%s1626_s1 + $0x13] sm:$0x1] %v662_v62 }
  0xd6   :  { %1087 = vst [vmem:[%s1626_s1 + $0x33] sm:$0x1] %v886_v63  ;;  %v892_v0 = vld [vmem:[#allocation0 + $0x1a0] sm:$0x3]  ;;  %v377_v2 = vpop.permute.xlu0 %376  }
  0xd7   :  { %v668_v1 = vld [vmem:[#allocation0 + $0xa0] sm:$0x3]  ;;  %v385_v3 = vpop.permute.xlu1 %384   ;;  %v893_v4 = vpack.c.bf16 %v1226_v10, %v892_v0  ;;  %380 = vst.msk [vmem:[#allocation0 + $0xb1] sm:$0x1] %vm19_vm0, %v377_v2   ;;  %382 = vst.msk [vmem:[#allocation0 + $0x1b0] sm:$0x2] %vm19_vm0, %v377_v2  }
  0xd8   :  { %v669_v5 = vpack.c.bf16 %v1226_v10, %v668_v1  ;;  %388 = vst.msk [vmem:[#allocation0 + $0xb8] sm:$0x1] %vm19_vm0, %v385_v3   ;;  %390 = vst.msk [vmem:[#allocation0 + $0x1b7] sm:$0x2] %vm19_vm0, %v385_v3  }
  0xd9   :  { %1088 = vst [vmem:[%s1626_s1 + $0x34] sm:$0x1] %v893_v4 }
  0xda   :  { %1056 = vst [vmem:[%s1626_s1 + $0x14] sm:$0x1] %v669_v5  ;;  %v675_v6 = vld [vmem:[#allocation0 + $0xa8] sm:$0x3]  ;;  %v393_v8 = vpop.permute.xlu0 %392  }
  0xdb   :  { %v899_v7 = vld [vmem:[#allocation0 + $0x1a8] sm:$0x3]  ;;  %v401_v9 = vpop.permute.xlu1 %400   ;;  %v676_v11 = vpack.c.bf16 %v1226_v10, %v675_v6  ;;  %396 = vst.msk [vmem:[#allocation0 + $0xb9] sm:$0x1] %vm19_vm0, %v393_v8   ;;  %398 = vst.msk [vmem:[#allocation0 + $0x1b8] sm:$0x2] %vm19_vm0, %v393_v8  }
  0xdc   :  { %v900_v12 = vpack.c.bf16 %v1226_v10, %v899_v7  ;;  %404 = vst.msk [vmem:[#allocation0 + $0xc0] sm:$0x1] %vm19_vm0, %v401_v9   ;;  %406 = vst.msk [vmem:[#allocation0 + $0x1bf] sm:$0x2] %vm19_vm0, %v401_v9  }
  0xdd   :  { %1057 = vst [vmem:[%s1626_s1 + $0x15] sm:$0x1] %v676_v11 }
  0xde   :  { %1089 = vst [vmem:[%s1626_s1 + $0x35] sm:$0x1] %v900_v12  ;;  %v682_v13 = vld [vmem:[#allocation0 + $0xb0] sm:$0x3]  ;;  %v409_v15 = vpop.permute.xlu0 %408  }
  0xdf   :  { %v906_v14 = vld [vmem:[#allocation0 + $0x1b0] sm:$0x3]  ;;  %v417_v16 = vpop.permute.xlu1 %416   ;;  %v683_v17 = vpack.c.bf16 %v1226_v10, %v682_v13  ;;  %412 = vst.msk [vmem:[#allocation0 + $0xc1] sm:$0x1] %vm19_vm0, %v409_v15   ;;  %414 = vst.msk [vmem:[#allocation0 + $0x1c0] sm:$0x2] %vm19_vm0, %v409_v15  }
  0xe0   :  { %v907_v18 = vpack.c.bf16 %v1226_v10, %v906_v14  ;;  %420 = vst.msk [vmem:[#allocation0 + $0xc8] sm:$0x1] %vm19_vm0, %v417_v16   ;;  %422 = vst.msk [vmem:[#allocation0 + $0x1c7] sm:$0x2] %vm19_vm0, %v417_v16  }
  0xe1   :  { %1058 = vst [vmem:[%s1626_s1 + $0x16] sm:$0x1] %v683_v17 }
  0xe2   :  { %1090 = vst [vmem:[%s1626_s1 + $0x36] sm:$0x1] %v907_v18  ;;  %v689_v19 = vld [vmem:[#allocation0 + $0xb8] sm:$0x3]  ;;  %v425_v21 = vpop.permute.xlu0 %424  }
  0xe3   :  { %v913_v20 = vld [vmem:[#allocation0 + $0x1b8] sm:$0x3]  ;;  %v433_v22 = vpop.permute.xlu1 %432   ;;  %v690_v23 = vpack.c.bf16 %v1226_v10, %v689_v19  ;;  %428 = vst.msk [vmem:[#allocation0 + $0xc9] sm:$0x1] %vm19_vm0, %v425_v21   ;;  %430 = vst.msk [vmem:[#allocation0 + $0x1c8] sm:$0x2] %vm19_vm0, %v425_v21  }
  0xe4   :  { %v914_v24 = vpack.c.bf16 %v1226_v10, %v913_v20  ;;  %436 = vst.msk [vmem:[#allocation0 + $0xd0] sm:$0x1] %vm19_vm0, %v433_v22   ;;  %438 = vst.msk [vmem:[#allocation0 + $0x1cf] sm:$0x2] %vm19_vm0, %v433_v22  }
  0xe5   :  { %1059 = vst [vmem:[%s1626_s1 + $0x17] sm:$0x1] %v690_v23 }
  0xe6   :  { %1091 = vst [vmem:[%s1626_s1 + $0x37] sm:$0x1] %v914_v24  ;;  %v696_v25 = vld [vmem:[#allocation0 + $0xc0] sm:$0x3]  ;;  %v441_v27 = vpop.permute.xlu0 %440  }
  0xe7   :  { %v920_v26 = vld [vmem:[#allocation0 + $0x1c0] sm:$0x3]  ;;  %v449_v28 = vpop.permute.xlu1 %448   ;;  %v697_v29 = vpack.c.bf16 %v1226_v10, %v696_v25  ;;  %444 = vst.msk [vmem:[#allocation0 + $0xd1] sm:$0x1] %vm19_vm0, %v441_v27   ;;  %446 = vst.msk [vmem:[#allocation0 + $0x1d0] sm:$0x2] %vm19_vm0, %v441_v27  }
  0xe8   :  { %v921_v30 = vpack.c.bf16 %v1226_v10, %v920_v26  ;;  %452 = vst.msk [vmem:[#allocation0 + $0xd8] sm:$0x1] %vm19_vm0, %v449_v28   ;;  %454 = vst.msk [vmem:[#allocation0 + $0x1d7] sm:$0x2] %vm19_vm0, %v449_v28  }
  0xe9   :  { %1060 = vst [vmem:[%s1626_s1 + $0x18] sm:$0x1] %v697_v29 }
  0xea   :  { %1092 = vst [vmem:[%s1626_s1 + $0x38] sm:$0x1] %v921_v30  ;;  %v703_v31 = vld [vmem:[#allocation0 + $0xc8] sm:$0x3]  ;;  %v457_v33 = vpop.permute.xlu0 %456  }
  0xeb   :  { %v927_v32 = vld [vmem:[#allocation0 + $0x1c8] sm:$0x3]  ;;  %v465_v34 = vpop.permute.xlu1 %464   ;;  %v704_v35 = vpack.c.bf16 %v1226_v10, %v703_v31  ;;  %460 = vst.msk [vmem:[#allocation0 + $0xd9] sm:$0x1] %vm19_vm0, %v457_v33   ;;  %462 = vst.msk [vmem:[#allocation0 + $0x1d8] sm:$0x2] %vm19_vm0, %v457_v33  }
  0xec   :  { %v928_v36 = vpack.c.bf16 %v1226_v10, %v927_v32  ;;  %468 = vst.msk [vmem:[#allocation0 + $0xe0] sm:$0x1] %vm19_vm0, %v465_v34   ;;  %470 = vst.msk [vmem:[#allocation0 + $0x1df] sm:$0x2] %vm19_vm0, %v465_v34  }
  0xed   :  { %1061 = vst [vmem:[%s1626_s1 + $0x19] sm:$0x1] %v704_v35 }
  0xee   :  { %1093 = vst [vmem:[%s1626_s1 + $0x39] sm:$0x1] %v928_v36  ;;  %v710_v37 = vld [vmem:[#allocation0 + $0xd0] sm:$0x3]  ;;  %v473_v39 = vpop.permute.xlu0 %472  }
  0xef   :  { %v934_v38 = vld [vmem:[#allocation0 + $0x1d0] sm:$0x3]  ;;  %v481_v40 = vpop.permute.xlu1 %480   ;;  %v711_v41 = vpack.c.bf16 %v1226_v10, %v710_v37  ;;  %476 = vst.msk [vmem:[#allocation0 + $0xe1] sm:$0x1] %vm19_vm0, %v473_v39   ;;  %478 = vst.msk [vmem:[#allocation0 + $0x1e0] sm:$0x2] %vm19_vm0, %v473_v39  }
  0xf0   :  { %v935_v42 = vpack.c.bf16 %v1226_v10, %v934_v38  ;;  %484 = vst.msk [vmem:[#allocation0 + $0xe8] sm:$0x1] %vm19_vm0, %v481_v40   ;;  %486 = vst.msk [vmem:[#allocation0 + $0x1e7] sm:$0x2] %vm19_vm0, %v481_v40  }
  0xf1   :  { %1062 = vst [vmem:[%s1626_s1 + $0x1a] sm:$0x1] %v711_v41 }
  0xf2   :  { %1094 = vst [vmem:[%s1626_s1 + $0x3a] sm:$0x1] %v935_v42  ;;  %v717_v43 = vld [vmem:[#allocation0 + $0xd8] sm:$0x3]  ;;  %v489_v45 = vpop.permute.xlu0 %488  }
  0xf3   :  { %v941_v44 = vld [vmem:[#allocation0 + $0x1d8] sm:$0x3]  ;;  %v497_v46 = vpop.permute.xlu1 %496   ;;  %v718_v47 = vpack.c.bf16 %v1226_v10, %v717_v43  ;;  %492 = vst.msk [vmem:[#allocation0 + $0xe9] sm:$0x1] %vm19_vm0, %v489_v45   ;;  %494 = vst.msk [vmem:[#allocation0 + $0x1e8] sm:$0x2] %vm19_vm0, %v489_v45  }
  0xf4   :  { %v942_v48 = vpack.c.bf16 %v1226_v10, %v941_v44  ;;  %500 = vst.msk [vmem:[#allocation0 + $0xf0] sm:$0x1] %vm19_vm0, %v497_v46   ;;  %502 = vst.msk [vmem:[#allocation0 + $0x1ef] sm:$0x2] %vm19_vm0, %v497_v46  }
  0xf5   :  { %1063 = vst [vmem:[%s1626_s1 + $0x1b] sm:$0x1] %v718_v47 }
  0xf6   :  { %1095 = vst [vmem:[%s1626_s1 + $0x3b] sm:$0x1] %v942_v48  ;;  %v724_v49 = vld [vmem:[#allocation0 + $0xe0] sm:$0x3]  ;;  %v505_v51 = vpop.permute.xlu0 %504  }
  0xf7   :  { %v948_v50 = vld [vmem:[#allocation0 + $0x1e0] sm:$0x3]  ;;  %v513_v52 = vpop.permute.xlu1 %512   ;;  %v725_v53 = vpack.c.bf16 %v1226_v10, %v724_v49  ;;  %508 = vst.msk [vmem:[#allocation0 + $0xf1] sm:$0x1] %vm19_vm0, %v505_v51   ;;  %510 = vst.msk [vmem:[#allocation0 + $0x1f0] sm:$0x2] %vm19_vm0, %v505_v51  }
  0xf8   :  { %v949_v54 = vpack.c.bf16 %v1226_v10, %v948_v50  ;;  %516 = vst.msk [vmem:[#allocation0 + $0xf8] sm:$0x1] %vm19_vm0, %v513_v52   ;;  %518 = vst.msk [vmem:[#allocation0 + $0x1f7] sm:$0x2] %vm19_vm0, %v513_v52  }
  0xf9   :  { %1064 = vst [vmem:[%s1626_s1 + $0x1c] sm:$0x1] %v725_v53 }
  0xfa   :  { %1096 = vst [vmem:[%s1626_s1 + $0x3c] sm:$0x1] %v949_v54  ;;  %v731_v55 = vld [vmem:[#allocation0 + $0xe8] sm:$0x3]  ;;  %v521_v57 = vpop.permute.xlu0 %520  }
  0xfb   :  { %v955_v56 = vld [vmem:[#allocation0 + $0x1e8] sm:$0x3]  ;;  %v732_v58 = vpack.c.bf16 %v1226_v10, %v731_v55  ;;  %524 = vst.msk [vmem:[#allocation0 + $0xf9] sm:$0x1] %vm19_vm0, %v521_v57   ;;  %526 = vst.msk [vmem:[#allocation0 + $0x1f8] sm:$0x2] %vm19_vm0, %v521_v57  }
  0xfc   :  { %v956_v59 = vpack.c.bf16 %v1226_v10, %v955_v56 }
  0xfd   :  { %1065 = vst [vmem:[%s1626_s1 + $0x1d] sm:$0x1] %v732_v58 }
  0xfe   :  { %1097 = vst [vmem:[%s1626_s1 + $0x3d] sm:$0x1] %v956_v59  ;;  %v738_v60 = vld [vmem:[#allocation0 + $0xf0] sm:$0x3] }
  0xff   :  { %v962_v61 = vld [vmem:[#allocation0 + $0x1f0] sm:$0x3]  ;;  %v739_v62 = vpack.c.bf16 %v1226_v10, %v738_v60 }
 0x100   :  { %v963_v63 = vpack.c.bf16 %v1226_v10, %v962_v61 }
 0x101   :  { %1066 = vst [vmem:[%s1626_s1 + $0x1e] sm:$0x1] %v739_v62 }
 0x102   :  { %1098 = vst [vmem:[%s1626_s1 + $0x3e] sm:$0x1] %v963_v63  ;;  %v745_v0 = vld [vmem:[#allocation0 + $0xf8] sm:$0x3] }
 0x103   :  { %v969_v1 = vld [vmem:[#allocation0 + $0x1f8] sm:$0x3]  ;;  %v746_v2 = vpack.c.bf16 %v1226_v10, %v745_v0 }
 0x104   :  { %v970_v10 = vpack.c.bf16 %v1226_v10, %v969_v1 }
 0x105   :  { %1067 = vst [vmem:[%s1626_s1 + $0x1f] sm:$0x1] %v746_v2 }
 0x106   :  { %1099 = vst [vmem:[%s1626_s1 + $0x3f] sm:$0x1] %v970_v10 }

// kernel: alexnet_forward.16
= control target key start
LH: loop header
LB: loop body
LE: loop exit
PB: predicated region body
PF: predicated region fallthrough
CT: control target
= control target key end

     0   :  { %vm14_vm0 = vcmask 1040384   ;;  %v67_v14 = vmov 1966171168   ;;  %v39_v16 = vlaneseq  ;;  %vm52_vm1 = vsmask.f32 256  ;;  %s93_s0 = inlined_call_operand.vmem [shape: bf16[9,256], index: 0, kind: input, shape index: {}]   ;;  %s94_s1 = inlined_call_operand.vmem [shape: bf16[1,256], index: 1, kind: output, shape index: {}]  }
   0x1   :  { %v8_v0 = vld [vmem:[%s93_s0] sm:$0xff]  ;;  %v9_v1 = vld [vmem:[%s93_s0 + $0x8] sm:$0x11]  ;;  %v37_v15 = vunpack.c.l.s4 %v67_v14  ;;  %vm54_vm2 = vcmask 1041409   ;;  %vm55_vm3 = vsmask.f32 1280  ;;  %vm53_vm4 = vmand %vm14_vm0, %vm52_vm1 }
   0x2   :  { %v10_v2 = vunpack.c.l.bf16 %v8_v0  ;;  %v11_v3 = vunpack.c.h.bf16 %v8_v0  ;;  %v12_v4 = vunpack.c.l.bf16 %v9_v1  ;;  %v13_v5 = vunpack.c.h.bf16 %v9_v1  ;;  %vm56_vm5 = vmand %vm54_vm2, %vm55_vm3  ;;  %v58_v30 = vld [vmem:[%s94_s1] sm:$0x3] }
   0x3   :  { %v38_v21 = vunpack.c.0.s8 %v37_v15  ;;  %v40_v22 = vshrl.u32 %v39_v16, 7  ;;  %vm57_vm6 = vmor %vm56_vm5, %vm53_vm4 }
   0x4   :  { %v15_v6 = vsel %vm14_vm0, %v12_v4, -inf  ;;  %v23_v7 = vsel %vm14_vm0, %v13_v5, -inf }
   0x5   :  { %v16_v8 = vmax.f32 %v10_v2, %v15_v6  ;;  %v24_v9 = vmax.f32 %v11_v3, %v23_v7  ;;  %v41_v27 = vsub.s32 %v38_v21, %v40_v22 }
   0x7   :  { %v17_v10 = vrot.slane %v16_v8, 4  ;;  %v25_v11 = vrot.slane %v24_v9, 4 }
   0x9   :  { %v18_v12 = vmax.f32 %v16_v8, %v17_v10  ;;  %v26_v13 = vmax.f32 %v24_v9, %v25_v11 }
   0xb   :  { %v19_v17 = vrot.slane %v18_v12, 2  ;;  %v27_v18 = vrot.slane %v26_v13, 2 }
   0xd   :  { %v20_v19 = vmax.f32 %v18_v12, %v19_v17  ;;  %v28_v20 = vmax.f32 %v26_v13, %v27_v18 }
   0xf   :  { %v21_v23 = vrot.slane %v20_v19, 1  ;;  %v29_v24 = vrot.slane %v28_v20, 1 }
  0x11   :  { %v22_v25 = vmax.f32 %v20_v19, %v21_v23  ;;  %v30_v26 = vmax.f32 %v28_v20, %v29_v24 }
  0x13   :  { %v65_v28 = vpack.c.bf16 %v30_v26, %v22_v25 }
  0x15   :  { %v42_v29 = vrot.slane %v65_v28, %v41_v27 }
  0x17   :  { %v49_v31 = vrot.slane %v42_v29, %v41_v27 }
  0x19   :  { %v59_v32 = vsel %vm57_vm6, %v49_v31, %v58_v30 }
  0x1a   :  { %60 = vst [vmem:[%s94_s1] sm:$0x3] %v59_v32 }

// kernel: alexnet_forward.17
= control target key start
LH: loop header
LB: loop body
LE: loop exit
PB: predicated region body
PF: predicated region fallthrough
CT: control target
= control target key end

     0   :  { %v514_v1 = vmov 0.0   ;;  %vm515_vm0 = vmmov 0   ;;  %s659_s0 = inlined_call_operand.vmem [shape: bf16[2,128], index: 0, kind: input, shape index: {}]   ;;  %s660_s1 = inlined_call_operand.vmem [shape: bf16[128,128], index: 1, kind: input, shape index: {}]   ;;  %s661_s2 = inlined_call_operand.vmem [shape: bf16[128,128], index: 2, kind: input, shape index: {}]   ;;  %s662_s3 = inlined_call_operand.vmem [shape: bf16[128,10], index: 3, kind: input, shape index: {}]   ;;  %s663_s4 = inlined_call_operand.hbm [shape: f32[2,10], index: 4, kind: output, shape index: {}]  }
   0x1   :  { %v466_v0 = vld [vmem:[%s660_s1] sm:$0xff]   ;;  %403 = vmatprep.subr.bf16.mxu0 %v514_v1  ;;  %423 = vmatprep.subr.bf16.mxu1 %v514_v1  ;;  %v467_v2 = vld [vmem:[%s660_s1 + $0x8] sm:$0xff]   ;;  %v468_v3 = vld [vmem:[%s660_s1 + $0x10] sm:$0xff]  }
   0x2   :  { %404 = vmatpush3.bf16.msra.mxu0 %v466_v0  ;;  %419 = vmatprep.mubr.msk.bf16.mxu0 %vm515_vm0, %v514_v1  ;;  %v474_v4 = vld [vmem:[%s661_s2] sm:$0xff]   ;;  %v469_v5 = vld [vmem:[%s660_s1 + $0x18] sm:$0xff]   ;;  %v475_v6 = vld [vmem:[%s661_s2 + $0x8] sm:$0xff]  }
   0x3   :  { %405 = vmatprep.subr.bf16.mxu0 %v514_v1  ;;  %439 = vmatprep.mubr.msk.bf16.mxu1 %vm515_vm0, %v514_v1  ;;  %v470_v7 = vld [vmem:[%s660_s1 + $0x20] sm:$0xff]   ;;  %v476_v8 = vld [vmem:[%s661_s2 + $0x10] sm:$0xff]   ;;  %v471_v9 = vld [vmem:[%s660_s1 + $0x28] sm:$0xff]  }
   0x4   :  { %424 = vmatpush3.bf16.msra.mxu1 %v474_v4  ;;  %v477_v10 = vld [vmem:[%s661_s2 + $0x18] sm:$0xff]  }
   0x5   :  { %425 = vmatprep.subr.bf16.mxu1 %v514_v1 }
   0x6   :  { %406 = vmatpush3.bf16.msra.mxu0 %v467_v2 }
   0x7   :  { %407 = vmatprep.subr.bf16.mxu0 %v514_v1 }
   0x8   :  { %426 = vmatpush3.bf16.msra.mxu1 %v475_v6 }
   0x9   :  { %427 = vmatprep.subr.bf16.mxu1 %v514_v1 }
   0xa   :  { %408 = vmatpush3.bf16.msra.mxu0 %v468_v3 }
   0xb   :  { %409 = vmatprep.subr.bf16.mxu0 %v514_v1 }
   0xc   :  { %428 = vmatpush3.bf16.msra.mxu1 %v476_v8 }
   0xd   :  { %429 = vmatprep.subr.bf16.mxu1 %v514_v1 }
   0xe   :  { %410 = vmatpush3.bf16.msra.mxu0 %v469_v5 }
   0xf   :  { %411 = vmatprep.subr.bf16.mxu0 %v514_v1 }
  0x12   :  { %412 = vmatpush3.bf16.msra.mxu0 %v470_v7 }
  0x13   :  { %413 = vmatprep.subr.bf16.mxu0 %v514_v1 }
  0x14   :  { %9 = vsyncpa [#allocation3], 0  ;;  %v472_v11 = vld [vmem:[%s660_s1 + $0x30] sm:$0xff]   ;;  %430 = vmatpush3.bf16.msra.mxu1 %v477_v10  ;;  %v478_v12 = vld [vmem:[%s661_s2 + $0x20] sm:$0xff]   ;;  %s516_s10 = smov [#allocation2]   ;;  %vm336_vm1 = vcmask 74752  }
  0x15   :  { %431 = vmatprep.subr.bf16.mxu1 %v514_v1  ;;  %v473_v13 = vld [vmem:[%s660_s1 + $0x38] sm:$0xff]   ;;  %v479_v14 = vld [vmem:[%s661_s2 + $0x28] sm:$0xff]   ;;  %v19_v15 = vld [vmem:[%s659_s0] sm:$0x1]  ;;  %s344_s11 = sshll.u32 %s516_s10, 4  ;;  %s345_s11 = int_to_ptr.vmem [resolvable:$true] %s344_s11 }
  0x16   :  { %414 = vmatpush3.bf16.msra.mxu0 %v471_v9  ;;  %v480_v16 = vld [vmem:[%s661_s2 + $0x30] sm:$0xff]   ;;  %v481_v17 = vld [vmem:[%s661_s2 + $0x38] sm:$0xff]   ;;  %v482_v18 = vld [vmem:[%s662_s3] sm:$0xff]   ;;  %s490_s12 = scalar_lea.vmem %s345_s11, 32  ;;  %p495_p1 = scmp.lt.s32.totalorder %s345_s11, %s345_s11 }
  0x17   :  { %415 = vmatprep.subr.bf16.mxu0 %v514_v1  ;;  %v483_v19 = vld [vmem:[%s662_s3 + $0x8] sm:$0xff]   ;;  %v484_v20 = vld [vmem:[%s662_s3 + $0x10] sm:$0xff]   ;;  %v485_v21 = vld [vmem:[%s662_s3 + $0x18] sm:$0xff]   ;;  %p491_p0 = scmp.ne.s32.totalorder %s345_s11, %s490_s12  ;;  %p496_p2 = scmp.lt.s32.totalorder %s490_s12, %s490_s12 }
  0x18   :  { %432 = vmatpush3.bf16.msra.mxu1 %v478_v12  ;;  %v486_v22 = vld [vmem:[%s662_s3 + $0x20] sm:$0xff]   ;;  %v487_v23 = vld [vmem:[%s662_s3 + $0x28] sm:$0xff]   ;;  %v488_v24 = vld [vmem:[%s662_s3 + $0x30] sm:$0xff]  }
  0x19   :  { %433 = vmatprep.subr.bf16.mxu1 %v514_v1  ;;  %v489_v31 = vld [vmem:[%s662_s3 + $0x38] sm:$0xff]   ;;  %p497_p3 = por %p496_p2, %p495_p1 }
  0x1a   :  { %416 = vmatpush3.bf16.msra.mxu0 %v472_v11 }
  0x1b   :  { %417 = vmatprep.subr.bf16.mxu0 %v514_v1  ;;  %p498_p4 = pnand %p497_p3, %p491_p0 }
  0x1c   :  { %434 = vmatpush3.bf16.msra.mxu1 %v479_v14 }
  0x1d   :  { %435 = vmatprep.subr.bf16.mxu1 %v514_v1 }
  0x1e   :  { %418 = vmatpush3.bf16.msra.mxu0 %v473_v13 }
  0x1f   :  { %443 = vmatprep.subr.bf16.mxu0 %v514_v1 }
  0x20   :  { %436 = vmatpush3.bf16.msra.mxu1 %v480_v16 }
  0x21   :  { %420 = vmatmul.mubr.bf16.vlgmr.msra.gmra.mrb[0].mxu0 %v19_v15  ;;  %437 = vmatprep.subr.bf16.mxu1 %v514_v1 }
  0x22   :  { %459 = vmatprep.mubr.msk.bf16.mxu0 %vm515_vm0, %v514_v1  ;;  %444 = vmatpush3.bf16.msra.mxu0 %v482_v18 }
  0x23   :  { %445 = vmatprep.subr.bf16.mxu0 %v514_v1 }
  0x24   :  { %438 = vmatpush3.bf16.msra.mxu1 %v481_v17 }
  0x26   :  { %446 = vmatpush3.bf16.msra.mxu0 %v483_v19 }
  0x27   :  { %447 = vmatprep.subr.bf16.mxu0 %v514_v1 }
  0x2a   :  { %448 = vmatpush3.bf16.msra.mxu0 %v484_v20 }
  0x2b   :  { %449 = vmatprep.subr.bf16.mxu0 %v514_v1 }
  0x2e   :  { %450 = vmatpush3.bf16.msra.mxu0 %v485_v21 }
  0x2f   :  { %451 = vmatprep.subr.bf16.mxu0 %v514_v1 }
  0x32   :  { %452 = vmatpush3.bf16.msra.mxu0 %v486_v22 }
  0x33   :  { %453 = vmatprep.subr.bf16.mxu0 %v514_v1 }
  0x36   :  { %454 = vmatpush3.bf16.msra.mxu0 %v487_v23 }
  0x37   :  { %455 = vmatprep.subr.bf16.mxu0 %v514_v1 }
  0x3a   :  { %456 = vmatpush3.bf16.msra.mxu0 %v488_v24 }
  0x3b   :  { %457 = vmatprep.subr.bf16.mxu0 %v514_v1 }
  0x3e   :  { %458 = vmatpush3.bf16.msra.mxu0 %v489_v31 }
  0xf4   :  { %v118_v25 = vpop.f32.mrb[0].mxu0 }
  0xf5   :  { %v124_v26 = vmax.f32 %v118_v25, 0.0  ;;  %v421_v27 = vpop.f32.mrb[1].mxu0 }
  0xf6   :  { %v121_v28 = vpop.f32.mrb[2].mxu0 }
  0xf7   :  { %v125_v29 = vpack.c.bf16 %v124_v26, %v124_v26  ;;  %v422_v30 = vpop.f32.mrb[3].mxu0 }
  0xf9   :  { %440 = vmatmul.mubr.bf16.vlgmr.msra.gmra.mrb[0].mxu1 %v125_v29 }
 0x1cc   :  { %v224_v32 = vpop.f32.mrb[0].mxu1 }
 0x1cd   :  { %v230_v33 = vmax.f32 %v224_v32, 0.0  ;;  %v441_v34 = vpop.f32.mrb[1].mxu1 }
 0x1ce   :  { %v227_v35 = vpop.f32.mrb[2].mxu1 }
 0x1cf   :  { %v231_v36 = vpack.c.bf16 %v230_v33, %v230_v33  ;;  %v442_v37 = vpop.f32.mrb[3].mxu1 }
 0x1d1   :  { %460 = vmatmul.mubr.bf16.vlgmr.msra.gmra.mrb[4].mxu0 %v231_v36 }
 0x2a4   :  { %v330_v38 = vpop.f32.mrb[4].mxu0 }
 0x2a5   :  { %337 = vst.msk [vmem:[#allocation2] sm:$0x3] %vm336_vm1, %v330_v38  ;;  %v461_v39 = vpop.f32.mrb[5].mxu0 }
 0x2a6   :  { %v333_v40 = vpop.f32.mrb[6].mxu0 }
 0x2a7   :  { %501 = shalt.err (!%p498_p4)
}
 0x2a8   :  { %s502_s14 = scalar_lea.hbm %s663_s4, 32 }
 0x2a9   :  { %p503_p5 = scmp.ne.s32.totalorder %s663_s4, %s502_s14  ;;  %p506_p6 = scmp.lt.u32.totalorder %s502_s14, %s663_s4 }
 0x2ab   :  { %p508_p7 = pnand %p506_p6, %p503_p5 }
 0x2ad   :  { %511 = shalt.err (!%p508_p7)
}
 0x2ae   :  { %347 = dma.vmem_to_hbm [thread:$0]  %s345_s11, 32, %s663_s4, [#allocation3]   ;;  %v462_v41 = vpop.f32.mrb[7].mxu0 }
 0x2af   :  { %512 = dma.done.wait [#allocation3], 32  }
 0x2b0   :  { %513 = vsyncadd [#allocation3], 4294967264 }
 0x2b1   :  { %351 = vsyncpa [#allocation3], 1 }

</bundles_post_ra>
